<compile_context>
chip_gen: v7x
topology: tpu7x:2x2x1
jax: 0.10.0
libtpu: 0.0.40
codegen_flags: <defaults>
</compile_context>

<pallas_src>
import math

import jax
import jax.numpy as jnp
from jax import lax
from jax.experimental import pallas as pl
from jax.experimental.pallas import tpu as pltpu

POOL_K = 75   # AvgPool2d kernel (width)
POOL_S = 15   # AvgPool2d stride (width)
BN_EPS = 1e-5


def _patch_embed_kernel(x_ref, wf_ref, bf_ref, pmat_ref, wpt_ref, bp_ref, out_ref):
    """One block of BB batch elements, processed as a single matmul chain.

    x_ref:    (64, XL)        batch block: electrodes (padded 62->64) x (BB*T, lane-padded)
    wf_ref:   (25, 40, 64)    fused conv1+conv2+BN weight, indexed [time-tap k, c_out, h]
    bf_ref:   (40, 1)         fused bias (conv biases + BN shift)
    pmat_ref: (N, BB*P)       block-diagonal average-pool matrix (1/75 in each window)
    wpt_ref:  (40, E)         1x1 projection weights, transposed to [c_in, emb]
    bp_ref:   (1, E)          projection bias
    out_ref:  (BB*P, E)       output tokens for this batch block
    """
    K1, C1, _ = wf_ref.shape
    N, _ = pmat_ref.shape

    # Fused conv1(1,25) + conv2(62,1) + BatchNorm as K1 shift-and-accumulate MXU matmuls
    # over the time taps.  No im2col temp; each slice is a static lane-shifted load.
    acc = jnp.zeros((C1, N), jnp.float32)
    for k in range(K1):                                           # static unroll
        acc = acc + jnp.dot(wf_ref[k], x_ref[:, k:k + N],
                            preferred_element_type=jnp.float32)   # (40, N)

    y = acc + bf_ref[...]                                         # one bias broadcast
    # ELU(alpha=1); exp only of the clamped-negative branch (no overflow).
    y = jnp.where(y > 0, y, jnp.exp(jnp.minimum(y, 0.0)) - 1.0)

    # AvgPool2d((1,75),(1,15)) for the whole block: one matmul against the block-diagonal
    # pooling matrix.  Lane-pad / cross-batch junk columns have zero pool weight.
    pooled = jnp.dot(y, pmat_ref[...], preferred_element_type=jnp.float32)   # (40, BB*P)

    # Dropout(0.5): identity in inference mode.
    # 1x1-conv projection + Rearrange 'b e h w -> b (h w) e' (h == 1): contract channel
    # dim directly (no explicit transpose), single store for the whole block.
    out = lax.dot_general(pooled, wpt_ref[...], (((0,), (0,)), ((), ())),
                          preferred_element_type=jnp.float32) + bp_ref[...]  # (BB*P, E)
    out_ref[...] = out.astype(out_ref.dtype)


def patch_embedding_forward(x, params, *, block_b=8):
    """x: (B, 1, 62, T) float32, NCHW like the PyTorch module. Returns (B, P, emb)."""
    B, C, H, W = x.shape
    assert C == 1 and H == 62, "PatchEmbedding expects (B, 1, 62, T) input"
    C1, K1 = 40, 25
    Hp = 64                                   # electrode axis padded 62 -> 64 (sublane aligned)
    W1 = W - K1 + 1
    assert W1 >= POOL_K, "time dimension too short for AvgPool2d((1,75))"
    P = (W1 - POOL_K) // POOL_S + 1
    E = params["wp"].shape[0]

    # ---- fold conv1 + conv2 + BatchNorm into one (25, 40, 64) weight + (40,) bias ----
    w1_ck = params["w1"][:, 0, 0, :]                      # (40, 25)      [c_in1, k]
    w2_cih = params["w2"][:, :, :, 0]                     # (40, 40, 62)  [c_out, c_in, h]
    wfold = jnp.einsum('cih,ik->ckh', w2_cih, w1_ck)      # (40, 25, 62)
    b_eff = params["b2"] + jnp.einsum('cih,i->c', w2_cih, params["b1"])
    scale = params["gamma"] / jnp.sqrt(params["var"] + BN_EPS)
    shift = params["beta"] - params["mean"] * scale
    wf = scale[:, None, None] * wfold                     # (40, 25, 62)
    wf = jnp.pad(wf, ((0, 0), (0, 0), (0, Hp - H)))       # zero-pad the two extra electrodes
    wf = wf.transpose(1, 0, 2).astype(jnp.float32)        # (25, 40, 64)  [k, c, h]
    bf = (scale * b_eff + shift).reshape(C1, 1).astype(jnp.float32)

    wpt = params["wp"][:, :, 0, 0].T.astype(jnp.float32)  # (40, E)
    bp = params["bp"].reshape(1, E).astype(jnp.float32)

    # ---- batch-block layout: (G, 64, BB*W) with lane padding to multiples of 128 ----
    BB = max(1, min(block_b, B))
    G = -(-B // BB)
    Bp = G * BB
    N = ((BB * W + 127) // 128) * 128                     # conv-output columns per block
    XL = ((N + K1 - 1 + 127) // 128) * 128                # x lane extent per block (>= N+24)

    x2 = x[:, 0]                                          # (B, 62, W)
    if Bp != B:
        x2 = jnp.pad(x2, ((0, Bp - B), (0, 0), (0, 0)))
    x2 = jnp.pad(x2, ((0, 0), (0, Hp - H), (0, 0)))       # (Bp, 64, W)
    xblk = (x2.reshape(G, BB, Hp, W)
              .transpose(0, 2, 1, 3)
              .reshape(G, Hp, BB * W))                    # batch concatenated along lanes
    xblk = jnp.pad(xblk, ((0, 0), (0, 0), (0, XL - BB * W))).astype(jnp.float32)

    # Block-diagonal average-pool matrix (N, BB*P):
    #   pmat[b*W + w, b*P + p] = 1/75 if window p covers w (w < W1), else 0.
    j = jnp.arange(N)[:, None]
    q = jnp.arange(BB * P)[None, :]
    bj, wj = j // W, j % W
    bq, pq = q // P, q % P
    pmat = jnp.where((j < BB * W) & (bj == bq)
                     & (wj >= pq * POOL_S) & (wj < pq * POOL_S + POOL_K),
                     1.0 / POOL_K, 0.0).astype(jnp.float32)

    out = pl.pallas_call(
        _patch_embed_kernel,
        out_shape=jax.ShapeDtypeStruct((G, BB * P, E), x.dtype),
        grid=(G,),
        in_specs=[
            pl.BlockSpec((None, Hp, XL), lambda i: (i, 0, 0)),     # x batch block
            pl.BlockSpec((K1, C1, Hp), lambda i: (0, 0, 0)),       # fused weight
            pl.BlockSpec((C1, 1), lambda i: (0, 0)),               # fused bias
            pl.BlockSpec((N, BB * P), lambda i: (0, 0)),           # pooling matrix
            pl.BlockSpec((C1, E), lambda i: (0, 0)),               # projection weight^T
            pl.BlockSpec((1, E), lambda i: (0, 0)),                # projection bias
        ],
        out_specs=pl.BlockSpec((None, BB * P, E), lambda i: (i, 0, 0)),
        compiler_params=pltpu.CompilerParams(
            dimension_semantics=("parallel",),
            vmem_limit_bytes=64 * 1024 * 1024,
        ),
    )(xblk, wf, bf, pmat, wpt, bp)
    return out.reshape(Bp, P, E)[:B]


def init_params(key, emb_size=40):
    ks = jax.random.split(key, 10)

    def unif(k, shape, bound):
        return jax.random.uniform(k, shape, jnp.float32, -bound, bound)

    return dict(
        w1=unif(ks[0], (40, 1, 1, 25), 1.0 / math.sqrt(25.0)),
        b1=unif(ks[1], (40,), 1.0 / math.sqrt(25.0)),
        w2=unif(ks[2], (40, 40, 62, 1), 1.0 / math.sqrt(40.0 * 62.0)),
        b2=unif(ks[3], (40,), 1.0 / math.sqrt(40.0 * 62.0)),
        gamma=jax.random.uniform(ks[4], (40,), jnp.float32, 0.5, 1.5),
        beta=0.1 * jax.random.normal(ks[5], (40,), jnp.float32),
        mean=0.1 * jax.random.normal(ks[6], (40,), jnp.float32),
        var=jax.random.uniform(ks[7], (40,), jnp.float32, 0.5, 1.5),
        wp=unif(ks[8], (emb_size, 40, 1, 1), 1.0 / math.sqrt(40.0)),
        bp=unif(ks[9], (emb_size,), 1.0 / math.sqrt(40.0)),
    )


def reference_forward(x, params):
    """Pure-JAX (XLA) reference with identical inference-mode semantics."""
    dn = ("NCHW", "OIHW", "NCHW")
    y = lax.conv_general_dilated(x, params["w1"], (1, 1), "VALID", dimension_numbers=dn)
    y = y + params["b1"].reshape(1, -1, 1, 1)
    y = lax.conv_general_dilated(y, params["w2"], (1, 1), "VALID", dimension_numbers=dn)
    y = y + params["b2"].reshape(1, -1, 1, 1)
    y = (y - params["mean"].reshape(1, -1, 1, 1)) * (
        params["gamma"].reshape(1, -1, 1, 1)
        / jnp.sqrt(params["var"].reshape(1, -1, 1, 1) + BN_EPS)
    ) + params["beta"].reshape(1, -1, 1, 1)
    y = jnp.where(y > 0, y, jnp.exp(jnp.minimum(y, 0.0)) - 1.0)
    Wd = y.shape[-1]
    P = (Wd - POOL_K) // POOL_S + 1
    y = jnp.stack([y[..., p * POOL_S:p * POOL_S + POOL_K].mean(axis=-1) for p in range(P)],
                  axis=-1)
    y = lax.conv_general_dilated(y, params["wp"], (1, 1), "VALID", dimension_numbers=dn)
    y = y + params["bp"].reshape(1, -1, 1, 1)
    B, E, Hh, Pw = y.shape
    return y.reshape(B, E, Hh * Pw).transpose(0, 2, 1)


if __name__ == "__main__":
    key = jax.random.PRNGKey(0)
    kx, kp = jax.random.split(key)

    # Smallest shapes consistent with the module: H must be 62 (conv (62,1)) and
    # T - 24 >= 75 for the avg-pool.  T=144 -> 4 tokens.  B=8 with block_b=4 keeps
    # the grid at 2 steps so the "parallel" batch axis can feed two TensorCores.
    B, H, T = 8, 62, 144
    x = jax.random.normal(kx, (B, 1, H, T), jnp.float32)
    params = init_params(kp, emb_size=40)

    out = patch_embedding_forward(x, params, block_b=4)
    out = jax.block_until_ready(out)

    ref = jax.block_until_ready(reference_forward(x, params))
    assert out.shape == ref.shape == (B, 4, 40), (out.shape, ref.shape)
    max_err = float(jnp.max(jnp.abs(out - ref)))
    if max_err > 1e-3:
        raise AssertionError(f"kernel vs reference mismatch: max abs err = {max_err}")

    print("KERNEL_OK")
</pallas_src>

<mosaic_0001>
module attributes {stable_mosaic.version = 11 : i64} {
  func.func @_patch_embed_kernel(%arg0: i32, %arg1: memref<1x64x768xf32, #tpu.memory_space<vmem>>, %arg2: memref<25x40x64xf32, #tpu.memory_space<vmem>>, %arg3: memref<40x1xf32, #tpu.memory_space<vmem>>, %arg4: memref<640x16xf32, #tpu.memory_space<vmem>>, %arg5: memref<40x40xf32, #tpu.memory_space<vmem>>, %arg6: memref<1x40xf32, #tpu.memory_space<vmem>>, %arg7: memref<1x16x40xf32, #tpu.memory_space<vmem>>) attributes {dimension_semantics = [#tpu.dimension_semantics<parallel>], iteration_bounds = array<i64: 2>, scalar_prefetch = 0 : i64, scratch_operands = 0 : i64, tpu.core_type = #tpu.core_type<tc>, window_params = [{transform_indices = @transform_0, window_bounds = array<i64: 1, 64, 768>}, {pipeline_mode = #tpu.pipeline_mode<synchronous>, transform_indices = @transform_1, window_bounds = array<i64: 25, 40, 64>}, {pipeline_mode = #tpu.pipeline_mode<synchronous>, transform_indices = @transform_2, window_bounds = array<i64: 40, 1>}, {pipeline_mode = #tpu.pipeline_mode<synchronous>, transform_indices = @transform_3, window_bounds = array<i64: 640, 16>}, {pipeline_mode = #tpu.pipeline_mode<synchronous>, transform_indices = @transform_4, window_bounds = array<i64: 40, 40>}, {pipeline_mode = #tpu.pipeline_mode<synchronous>, transform_indices = @transform_5, window_bounds = array<i64: 1, 40>}, {transform_indices = @transform_6, window_bounds = array<i64: 1, 16, 40>}]} {
    %cst = arith.constant 0.000000e+00 : f32
    %0 = vector.broadcast %cst : f32 to vector<40x640xf32>
    %c0 = arith.constant 0 : index
    %c0_0 = arith.constant 0 : index
    %c0_1 = arith.constant 0 : index
    %1 = vector.load %arg2[%c0, %c0_0, %c0_1] : memref<25x40x64xf32, #tpu.memory_space<vmem>>, vector<1x40x64xf32>
    %2 = vector.shape_cast %1 : vector<1x40x64xf32> to vector<40x64xf32>
    %c0_2 = arith.constant 0 : index
    %c0_3 = arith.constant 0 : index
    %c0_4 = arith.constant 0 : index
    %3 = vector.load %arg1[%c0_2, %c0_3, %c0_4] : memref<1x64x768xf32, #tpu.memory_space<vmem>>, vector<1x64x640xf32>
    %4 = vector.shape_cast %3 : vector<1x64x640xf32> to vector<64x640xf32>
    %cst_5 = arith.constant dense<0.000000e+00> : vector<40x640xf32>
    %5 = tpu.matmul %2, %4, %cst_5 {dimension_numbers = #tpu.dot_dimension_numbers<[1], [0], [0], [1], [0, 0, 1, 1], [], []>} : vector<40x64xf32>, vector<64x640xf32>, vector<40x640xf32> -> vector<40x640xf32>
    %6 = arith.addf %0, %5 : vector<40x640xf32>
    %c1 = arith.constant 1 : index
    %c0_6 = arith.constant 0 : index
    %c0_7 = arith.constant 0 : index
    %7 = vector.load %arg2[%c1, %c0_6, %c0_7] : memref<25x40x64xf32, #tpu.memory_space<vmem>>, vector<1x40x64xf32>
    %8 = vector.shape_cast %7 : vector<1x40x64xf32> to vector<40x64xf32>
    %c0_8 = arith.constant 0 : index
    %c0_9 = arith.constant 0 : index
    %c1_10 = arith.constant 1 : index
    %9 = vector.load %arg1[%c0_8, %c0_9, %c1_10] : memref<1x64x768xf32, #tpu.memory_space<vmem>>, vector<1x64x640xf32>
    %10 = vector.shape_cast %9 : vector<1x64x640xf32> to vector<64x640xf32>
    %cst_11 = arith.constant dense<0.000000e+00> : vector<40x640xf32>
    %11 = tpu.matmul %8, %10, %cst_11 {dimension_numbers = #tpu.dot_dimension_numbers<[1], [0], [0], [1], [0, 0, 1, 1], [], []>} : vector<40x64xf32>, vector<64x640xf32>, vector<40x640xf32> -> vector<40x640xf32>
    %12 = arith.addf %6, %11 : vector<40x640xf32>
    %c2 = arith.constant 2 : index
    %c0_12 = arith.constant 0 : index
    %c0_13 = arith.constant 0 : index
    %13 = vector.load %arg2[%c2, %c0_12, %c0_13] : memref<25x40x64xf32, #tpu.memory_space<vmem>>, vector<1x40x64xf32>
    %14 = vector.shape_cast %13 : vector<1x40x64xf32> to vector<40x64xf32>
    %c0_14 = arith.constant 0 : index
    %c0_15 = arith.constant 0 : index
    %c2_16 = arith.constant 2 : index
    %15 = vector.load %arg1[%c0_14, %c0_15, %c2_16] : memref<1x64x768xf32, #tpu.memory_space<vmem>>, vector<1x64x640xf32>
    %16 = vector.shape_cast %15 : vector<1x64x640xf32> to vector<64x640xf32>
    %cst_17 = arith.constant dense<0.000000e+00> : vector<40x640xf32>
    %17 = tpu.matmul %14, %16, %cst_17 {dimension_numbers = #tpu.dot_dimension_numbers<[1], [0], [0], [1], [0, 0, 1, 1], [], []>} : vector<40x64xf32>, vector<64x640xf32>, vector<40x640xf32> -> vector<40x640xf32>
    %18 = arith.addf %12, %17 : vector<40x640xf32>
    %c3 = arith.constant 3 : index
    %c0_18 = arith.constant 0 : index
    %c0_19 = arith.constant 0 : index
    %19 = vector.load %arg2[%c3, %c0_18, %c0_19] : memref<25x40x64xf32, #tpu.memory_space<vmem>>, vector<1x40x64xf32>
    %20 = vector.shape_cast %19 : vector<1x40x64xf32> to vector<40x64xf32>
    %c0_20 = arith.constant 0 : index
    %c0_21 = arith.constant 0 : index
    %c3_22 = arith.constant 3 : index
    %21 = vector.load %arg1[%c0_20, %c0_21, %c3_22] : memref<1x64x768xf32, #tpu.memory_space<vmem>>, vector<1x64x640xf32>
    %22 = vector.shape_cast %21 : vector<1x64x640xf32> to vector<64x640xf32>
    %cst_23 = arith.constant dense<0.000000e+00> : vector<40x640xf32>
    %23 = tpu.matmul %20, %22, %cst_23 {dimension_numbers = #tpu.dot_dimension_numbers<[1], [0], [0], [1], [0, 0, 1, 1], [], []>} : vector<40x64xf32>, vector<64x640xf32>, vector<40x640xf32> -> vector<40x640xf32>
    %24 = arith.addf %18, %23 : vector<40x640xf32>
    %c4 = arith.constant 4 : index
    %c0_24 = arith.constant 0 : index
    %c0_25 = arith.constant 0 : index
    %25 = vector.load %arg2[%c4, %c0_24, %c0_25] : memref<25x40x64xf32, #tpu.memory_space<vmem>>, vector<1x40x64xf32>
    %26 = vector.shape_cast %25 : vector<1x40x64xf32> to vector<40x64xf32>
    %c0_26 = arith.constant 0 : index
    %c0_27 = arith.constant 0 : index
    %c4_28 = arith.constant 4 : index
    %27 = vector.load %arg1[%c0_26, %c0_27, %c4_28] : memref<1x64x768xf32, #tpu.memory_space<vmem>>, vector<1x64x640xf32>
    %28 = vector.shape_cast %27 : vector<1x64x640xf32> to vector<64x640xf32>
    %cst_29 = arith.constant dense<0.000000e+00> : vector<40x640xf32>
    %29 = tpu.matmul %26, %28, %cst_29 {dimension_numbers = #tpu.dot_dimension_numbers<[1], [0], [0], [1], [0, 0, 1, 1], [], []>} : vector<40x64xf32>, vector<64x640xf32>, vector<40x640xf32> -> vector<40x640xf32>
    %30 = arith.addf %24, %29 : vector<40x640xf32>
    %c5 = arith.constant 5 : index
    %c0_30 = arith.constant 0 : index
    %c0_31 = arith.constant 0 : index
    %31 = vector.load %arg2[%c5, %c0_30, %c0_31] : memref<25x40x64xf32, #tpu.memory_space<vmem>>, vector<1x40x64xf32>
    %32 = vector.shape_cast %31 : vector<1x40x64xf32> to vector<40x64xf32>
    %c0_32 = arith.constant 0 : index
    %c0_33 = arith.constant 0 : index
    %c5_34 = arith.constant 5 : index
    %33 = vector.load %arg1[%c0_32, %c0_33, %c5_34] : memref<1x64x768xf32, #tpu.memory_space<vmem>>, vector<1x64x640xf32>
    %34 = vector.shape_cast %33 : vector<1x64x640xf32> to vector<64x640xf32>
    %cst_35 = arith.constant dense<0.000000e+00> : vector<40x640xf32>
    %35 = tpu.matmul %32, %34, %cst_35 {dimension_numbers = #tpu.dot_dimension_numbers<[1], [0], [0], [1], [0, 0, 1, 1], [], []>} : vector<40x64xf32>, vector<64x640xf32>, vector<40x640xf32> -> vector<40x640xf32>
    %36 = arith.addf %30, %35 : vector<40x640xf32>
    %c6 = arith.constant 6 : index
    %c0_36 = arith.constant 0 : index
    %c0_37 = arith.constant 0 : index
    %37 = vector.load %arg2[%c6, %c0_36, %c0_37] : memref<25x40x64xf32, #tpu.memory_space<vmem>>, vector<1x40x64xf32>
    %38 = vector.shape_cast %37 : vector<1x40x64xf32> to vector<40x64xf32>
    %c0_38 = arith.constant 0 : index
    %c0_39 = arith.constant 0 : index
    %c6_40 = arith.constant 6 : index
    %39 = vector.load %arg1[%c0_38, %c0_39, %c6_40] : memref<1x64x768xf32, #tpu.memory_space<vmem>>, vector<1x64x640xf32>
    %40 = vector.shape_cast %39 : vector<1x64x640xf32> to vector<64x640xf32>
    %cst_41 = arith.constant dense<0.000000e+00> : vector<40x640xf32>
    %41 = tpu.matmul %38, %40, %cst_41 {dimension_numbers = #tpu.dot_dimension_numbers<[1], [0], [0], [1], [0, 0, 1, 1], [], []>} : vector<40x64xf32>, vector<64x640xf32>, vector<40x640xf32> -> vector<40x640xf32>
    %42 = arith.addf %36, %41 : vector<40x640xf32>
    %c7 = arith.constant 7 : index
    %c0_42 = arith.constant 0 : index
    %c0_43 = arith.constant 0 : index
    %43 = vector.load %arg2[%c7, %c0_42, %c0_43] : memref<25x40x64xf32, #tpu.memory_space<vmem>>, vector<1x40x64xf32>
    %44 = vector.shape_cast %43 : vector<1x40x64xf32> to vector<40x64xf32>
    %c0_44 = arith.constant 0 : index
    %c0_45 = arith.constant 0 : index
    %c7_46 = arith.constant 7 : index
    %45 = vector.load %arg1[%c0_44, %c0_45, %c7_46] : memref<1x64x768xf32, #tpu.memory_space<vmem>>, vector<1x64x640xf32>
    %46 = vector.shape_cast %45 : vector<1x64x640xf32> to vector<64x640xf32>
    %cst_47 = arith.constant dense<0.000000e+00> : vector<40x640xf32>
    %47 = tpu.matmul %44, %46, %cst_47 {dimension_numbers = #tpu.dot_dimension_numbers<[1], [0], [0], [1], [0, 0, 1, 1], [], []>} : vector<40x64xf32>, vector<64x640xf32>, vector<40x640xf32> -> vector<40x640xf32>
    %48 = arith.addf %42, %47 : vector<40x640xf32>
    %c8 = arith.constant 8 : index
    %c0_48 = arith.constant 0 : index
    %c0_49 = arith.constant 0 : index
    %49 = vector.load %arg2[%c8, %c0_48, %c0_49] : memref<25x40x64xf32, #tpu.memory_space<vmem>>, vector<1x40x64xf32>
    %50 = vector.shape_cast %49 : vector<1x40x64xf32> to vector<40x64xf32>
    %c0_50 = arith.constant 0 : index
    %c0_51 = arith.constant 0 : index
    %c8_52 = arith.constant 8 : index
    %51 = vector.load %arg1[%c0_50, %c0_51, %c8_52] : memref<1x64x768xf32, #tpu.memory_space<vmem>>, vector<1x64x640xf32>
    %52 = vector.shape_cast %51 : vector<1x64x640xf32> to vector<64x640xf32>
    %cst_53 = arith.constant dense<0.000000e+00> : vector<40x640xf32>
    %53 = tpu.matmul %50, %52, %cst_53 {dimension_numbers = #tpu.dot_dimension_numbers<[1], [0], [0], [1], [0, 0, 1, 1], [], []>} : vector<40x64xf32>, vector<64x640xf32>, vector<40x640xf32> -> vector<40x640xf32>
    %54 = arith.addf %48, %53 : vector<40x640xf32>
    %c9 = arith.constant 9 : index
    %c0_54 = arith.constant 0 : index
    %c0_55 = arith.constant 0 : index
    %55 = vector.load %arg2[%c9, %c0_54, %c0_55] : memref<25x40x64xf32, #tpu.memory_space<vmem>>, vector<1x40x64xf32>
    %56 = vector.shape_cast %55 : vector<1x40x64xf32> to vector<40x64xf32>
    %c0_56 = arith.constant 0 : index
    %c0_57 = arith.constant 0 : index
    %c9_58 = arith.constant 9 : index
    %57 = vector.load %arg1[%c0_56, %c0_57, %c9_58] : memref<1x64x768xf32, #tpu.memory_space<vmem>>, vector<1x64x640xf32>
    %58 = vector.shape_cast %57 : vector<1x64x640xf32> to vector<64x640xf32>
    %cst_59 = arith.constant dense<0.000000e+00> : vector<40x640xf32>
    %59 = tpu.matmul %56, %58, %cst_59 {dimension_numbers = #tpu.dot_dimension_numbers<[1], [0], [0], [1], [0, 0, 1, 1], [], []>} : vector<40x64xf32>, vector<64x640xf32>, vector<40x640xf32> -> vector<40x640xf32>
    %60 = arith.addf %54, %59 : vector<40x640xf32>
    %c10 = arith.constant 10 : index
    %c0_60 = arith.constant 0 : index
    %c0_61 = arith.constant 0 : index
    %61 = vector.load %arg2[%c10, %c0_60, %c0_61] : memref<25x40x64xf32, #tpu.memory_space<vmem>>, vector<1x40x64xf32>
    %62 = vector.shape_cast %61 : vector<1x40x64xf32> to vector<40x64xf32>
    %c0_62 = arith.constant 0 : index
    %c0_63 = arith.constant 0 : index
    %c10_64 = arith.constant 10 : index
    %63 = vector.load %arg1[%c0_62, %c0_63, %c10_64] : memref<1x64x768xf32, #tpu.memory_space<vmem>>, vector<1x64x640xf32>
    %64 = vector.shape_cast %63 : vector<1x64x640xf32> to vector<64x640xf32>
    %cst_65 = arith.constant dense<0.000000e+00> : vector<40x640xf32>
    %65 = tpu.matmul %62, %64, %cst_65 {dimension_numbers = #tpu.dot_dimension_numbers<[1], [0], [0], [1], [0, 0, 1, 1], [], []>} : vector<40x64xf32>, vector<64x640xf32>, vector<40x640xf32> -> vector<40x640xf32>
    %66 = arith.addf %60, %65 : vector<40x640xf32>
    %c11 = arith.constant 11 : index
    %c0_66 = arith.constant 0 : index
    %c0_67 = arith.constant 0 : index
    %67 = vector.load %arg2[%c11, %c0_66, %c0_67] : memref<25x40x64xf32, #tpu.memory_space<vmem>>, vector<1x40x64xf32>
    %68 = vector.shape_cast %67 : vector<1x40x64xf32> to vector<40x64xf32>
    %c0_68 = arith.constant 0 : index
    %c0_69 = arith.constant 0 : index
    %c11_70 = arith.constant 11 : index
    %69 = vector.load %arg1[%c0_68, %c0_69, %c11_70] : memref<1x64x768xf32, #tpu.memory_space<vmem>>, vector<1x64x640xf32>
    %70 = vector.shape_cast %69 : vector<1x64x640xf32> to vector<64x640xf32>
    %cst_71 = arith.constant dense<0.000000e+00> : vector<40x640xf32>
    %71 = tpu.matmul %68, %70, %cst_71 {dimension_numbers = #tpu.dot_dimension_numbers<[1], [0], [0], [1], [0, 0, 1, 1], [], []>} : vector<40x64xf32>, vector<64x640xf32>, vector<40x640xf32> -> vector<40x640xf32>
    %72 = arith.addf %66, %71 : vector<40x640xf32>
    %c12 = arith.constant 12 : index
    %c0_72 = arith.constant 0 : index
    %c0_73 = arith.constant 0 : index
    %73 = vector.load %arg2[%c12, %c0_72, %c0_73] : memref<25x40x64xf32, #tpu.memory_space<vmem>>, vector<1x40x64xf32>
    %74 = vector.shape_cast %73 : vector<1x40x64xf32> to vector<40x64xf32>
    %c0_74 = arith.constant 0 : index
    %c0_75 = arith.constant 0 : index
    %c12_76 = arith.constant 12 : index
    %75 = vector.load %arg1[%c0_74, %c0_75, %c12_76] : memref<1x64x768xf32, #tpu.memory_space<vmem>>, vector<1x64x640xf32>
    %76 = vector.shape_cast %75 : vector<1x64x640xf32> to vector<64x640xf32>
    %cst_77 = arith.constant dense<0.000000e+00> : vector<40x640xf32>
    %77 = tpu.matmul %74, %76, %cst_77 {dimension_numbers = #tpu.dot_dimension_numbers<[1], [0], [0], [1], [0, 0, 1, 1], [], []>} : vector<40x64xf32>, vector<64x640xf32>, vector<40x640xf32> -> vector<40x640xf32>
    %78 = arith.addf %72, %77 : vector<40x640xf32>
    %c13 = arith.constant 13 : index
    %c0_78 = arith.constant 0 : index
    %c0_79 = arith.constant 0 : index
    %79 = vector.load %arg2[%c13, %c0_78, %c0_79] : memref<25x40x64xf32, #tpu.memory_space<vmem>>, vector<1x40x64xf32>
    %80 = vector.shape_cast %79 : vector<1x40x64xf32> to vector<40x64xf32>
    %c0_80 = arith.constant 0 : index
    %c0_81 = arith.constant 0 : index
    %c13_82 = arith.constant 13 : index
    %81 = vector.load %arg1[%c0_80, %c0_81, %c13_82] : memref<1x64x768xf32, #tpu.memory_space<vmem>>, vector<1x64x640xf32>
    %82 = vector.shape_cast %81 : vector<1x64x640xf32> to vector<64x640xf32>
    %cst_83 = arith.constant dense<0.000000e+00> : vector<40x640xf32>
    %83 = tpu.matmul %80, %82, %cst_83 {dimension_numbers = #tpu.dot_dimension_numbers<[1], [0], [0], [1], [0, 0, 1, 1], [], []>} : vector<40x64xf32>, vector<64x640xf32>, vector<40x640xf32> -> vector<40x640xf32>
    %84 = arith.addf %78, %83 : vector<40x640xf32>
    %c14 = arith.constant 14 : index
    %c0_84 = arith.constant 0 : index
    %c0_85 = arith.constant 0 : index
    %85 = vector.load %arg2[%c14, %c0_84, %c0_85] : memref<25x40x64xf32, #tpu.memory_space<vmem>>, vector<1x40x64xf32>
    %86 = vector.shape_cast %85 : vector<1x40x64xf32> to vector<40x64xf32>
    %c0_86 = arith.constant 0 : index
    %c0_87 = arith.constant 0 : index
    %c14_88 = arith.constant 14 : index
    %87 = vector.load %arg1[%c0_86, %c0_87, %c14_88] : memref<1x64x768xf32, #tpu.memory_space<vmem>>, vector<1x64x640xf32>
    %88 = vector.shape_cast %87 : vector<1x64x640xf32> to vector<64x640xf32>
    %cst_89 = arith.constant dense<0.000000e+00> : vector<40x640xf32>
    %89 = tpu.matmul %86, %88, %cst_89 {dimension_numbers = #tpu.dot_dimension_numbers<[1], [0], [0], [1], [0, 0, 1, 1], [], []>} : vector<40x64xf32>, vector<64x640xf32>, vector<40x640xf32> -> vector<40x640xf32>
    %90 = arith.addf %84, %89 : vector<40x640xf32>
    %c15 = arith.constant 15 : index
    %c0_90 = arith.constant 0 : index
    %c0_91 = arith.constant 0 : index
    %91 = vector.load %arg2[%c15, %c0_90, %c0_91] : memref<25x40x64xf32, #tpu.memory_space<vmem>>, vector<1x40x64xf32>
    %92 = vector.shape_cast %91 : vector<1x40x64xf32> to vector<40x64xf32>
    %c0_92 = arith.constant 0 : index
    %c0_93 = arith.constant 0 : index
    %c15_94 = arith.constant 15 : index
    %93 = vector.load %arg1[%c0_92, %c0_93, %c15_94] : memref<1x64x768xf32, #tpu.memory_space<vmem>>, vector<1x64x640xf32>
    %94 = vector.shape_cast %93 : vector<1x64x640xf32> to vector<64x640xf32>
    %cst_95 = arith.constant dense<0.000000e+00> : vector<40x640xf32>
    %95 = tpu.matmul %92, %94, %cst_95 {dimension_numbers = #tpu.dot_dimension_numbers<[1], [0], [0], [1], [0, 0, 1, 1], [], []>} : vector<40x64xf32>, vector<64x640xf32>, vector<40x640xf32> -> vector<40x640xf32>
    %96 = arith.addf %90, %95 : vector<40x640xf32>
    %c16 = arith.constant 16 : index
    %c0_96 = arith.constant 0 : index
    %c0_97 = arith.constant 0 : index
    %97 = vector.load %arg2[%c16, %c0_96, %c0_97] : memref<25x40x64xf32, #tpu.memory_space<vmem>>, vector<1x40x64xf32>
    %98 = vector.shape_cast %97 : vector<1x40x64xf32> to vector<40x64xf32>
    %c0_98 = arith.constant 0 : index
    %c0_99 = arith.constant 0 : index
    %c16_100 = arith.constant 16 : index
    %99 = vector.load %arg1[%c0_98, %c0_99, %c16_100] : memref<1x64x768xf32, #tpu.memory_space<vmem>>, vector<1x64x640xf32>
    %100 = vector.shape_cast %99 : vector<1x64x640xf32> to vector<64x640xf32>
    %cst_101 = arith.constant dense<0.000000e+00> : vector<40x640xf32>
    %101 = tpu.matmul %98, %100, %cst_101 {dimension_numbers = #tpu.dot_dimension_numbers<[1], [0], [0], [1], [0, 0, 1, 1], [], []>} : vector<40x64xf32>, vector<64x640xf32>, vector<40x640xf32> -> vector<40x640xf32>
    %102 = arith.addf %96, %101 : vector<40x640xf32>
    %c17 = arith.constant 17 : index
    %c0_102 = arith.constant 0 : index
    %c0_103 = arith.constant 0 : index
    %103 = vector.load %arg2[%c17, %c0_102, %c0_103] : memref<25x40x64xf32, #tpu.memory_space<vmem>>, vector<1x40x64xf32>
    %104 = vector.shape_cast %103 : vector<1x40x64xf32> to vector<40x64xf32>
    %c0_104 = arith.constant 0 : index
    %c0_105 = arith.constant 0 : index
    %c17_106 = arith.constant 17 : index
    %105 = vector.load %arg1[%c0_104, %c0_105, %c17_106] : memref<1x64x768xf32, #tpu.memory_space<vmem>>, vector<1x64x640xf32>
    %106 = vector.shape_cast %105 : vector<1x64x640xf32> to vector<64x640xf32>
    %cst_107 = arith.constant dense<0.000000e+00> : vector<40x640xf32>
    %107 = tpu.matmul %104, %106, %cst_107 {dimension_numbers = #tpu.dot_dimension_numbers<[1], [0], [0], [1], [0, 0, 1, 1], [], []>} : vector<40x64xf32>, vector<64x640xf32>, vector<40x640xf32> -> vector<40x640xf32>
    %108 = arith.addf %102, %107 : vector<40x640xf32>
    %c18 = arith.constant 18 : index
    %c0_108 = arith.constant 0 : index
    %c0_109 = arith.constant 0 : index
    %109 = vector.load %arg2[%c18, %c0_108, %c0_109] : memref<25x40x64xf32, #tpu.memory_space<vmem>>, vector<1x40x64xf32>
    %110 = vector.shape_cast %109 : vector<1x40x64xf32> to vector<40x64xf32>
    %c0_110 = arith.constant 0 : index
    %c0_111 = arith.constant 0 : index
    %c18_112 = arith.constant 18 : index
    %111 = vector.load %arg1[%c0_110, %c0_111, %c18_112] : memref<1x64x768xf32, #tpu.memory_space<vmem>>, vector<1x64x640xf32>
    %112 = vector.shape_cast %111 : vector<1x64x640xf32> to vector<64x640xf32>
    %cst_113 = arith.constant dense<0.000000e+00> : vector<40x640xf32>
    %113 = tpu.matmul %110, %112, %cst_113 {dimension_numbers = #tpu.dot_dimension_numbers<[1], [0], [0], [1], [0, 0, 1, 1], [], []>} : vector<40x64xf32>, vector<64x640xf32>, vector<40x640xf32> -> vector<40x640xf32>
    %114 = arith.addf %108, %113 : vector<40x640xf32>
    %c19 = arith.constant 19 : index
    %c0_114 = arith.constant 0 : index
    %c0_115 = arith.constant 0 : index
    %115 = vector.load %arg2[%c19, %c0_114, %c0_115] : memref<25x40x64xf32, #tpu.memory_space<vmem>>, vector<1x40x64xf32>
    %116 = vector.shape_cast %115 : vector<1x40x64xf32> to vector<40x64xf32>
    %c0_116 = arith.constant 0 : index
    %c0_117 = arith.constant 0 : index
    %c19_118 = arith.constant 19 : index
    %117 = vector.load %arg1[%c0_116, %c0_117, %c19_118] : memref<1x64x768xf32, #tpu.memory_space<vmem>>, vector<1x64x640xf32>
    %118 = vector.shape_cast %117 : vector<1x64x640xf32> to vector<64x640xf32>
    %cst_119 = arith.constant dense<0.000000e+00> : vector<40x640xf32>
    %119 = tpu.matmul %116, %118, %cst_119 {dimension_numbers = #tpu.dot_dimension_numbers<[1], [0], [0], [1], [0, 0, 1, 1], [], []>} : vector<40x64xf32>, vector<64x640xf32>, vector<40x640xf32> -> vector<40x640xf32>
    %120 = arith.addf %114, %119 : vector<40x640xf32>
    %c20 = arith.constant 20 : index
    %c0_120 = arith.constant 0 : index
    %c0_121 = arith.constant 0 : index
    %121 = vector.load %arg2[%c20, %c0_120, %c0_121] : memref<25x40x64xf32, #tpu.memory_space<vmem>>, vector<1x40x64xf32>
    %122 = vector.shape_cast %121 : vector<1x40x64xf32> to vector<40x64xf32>
    %c0_122 = arith.constant 0 : index
    %c0_123 = arith.constant 0 : index
    %c20_124 = arith.constant 20 : index
    %123 = vector.load %arg1[%c0_122, %c0_123, %c20_124] : memref<1x64x768xf32, #tpu.memory_space<vmem>>, vector<1x64x640xf32>
    %124 = vector.shape_cast %123 : vector<1x64x640xf32> to vector<64x640xf32>
    %cst_125 = arith.constant dense<0.000000e+00> : vector<40x640xf32>
    %125 = tpu.matmul %122, %124, %cst_125 {dimension_numbers = #tpu.dot_dimension_numbers<[1], [0], [0], [1], [0, 0, 1, 1], [], []>} : vector<40x64xf32>, vector<64x640xf32>, vector<40x640xf32> -> vector<40x640xf32>
    %126 = arith.addf %120, %125 : vector<40x640xf32>
    %c21 = arith.constant 21 : index
    %c0_126 = arith.constant 0 : index
    %c0_127 = arith.constant 0 : index
    %127 = vector.load %arg2[%c21, %c0_126, %c0_127] : memref<25x40x64xf32, #tpu.memory_space<vmem>>, vector<1x40x64xf32>
    %128 = vector.shape_cast %127 : vector<1x40x64xf32> to vector<40x64xf32>
    %c0_128 = arith.constant 0 : index
    %c0_129 = arith.constant 0 : index
    %c21_130 = arith.constant 21 : index
    %129 = vector.load %arg1[%c0_128, %c0_129, %c21_130] : memref<1x64x768xf32, #tpu.memory_space<vmem>>, vector<1x64x640xf32>
    %130 = vector.shape_cast %129 : vector<1x64x640xf32> to vector<64x640xf32>
    %cst_131 = arith.constant dense<0.000000e+00> : vector<40x640xf32>
    %131 = tpu.matmul %128, %130, %cst_131 {dimension_numbers = #tpu.dot_dimension_numbers<[1], [0], [0], [1], [0, 0, 1, 1], [], []>} : vector<40x64xf32>, vector<64x640xf32>, vector<40x640xf32> -> vector<40x640xf32>
    %132 = arith.addf %126, %131 : vector<40x640xf32>
    %c22 = arith.constant 22 : index
    %c0_132 = arith.constant 0 : index
    %c0_133 = arith.constant 0 : index
    %133 = vector.load %arg2[%c22, %c0_132, %c0_133] : memref<25x40x64xf32, #tpu.memory_space<vmem>>, vector<1x40x64xf32>
    %134 = vector.shape_cast %133 : vector<1x40x64xf32> to vector<40x64xf32>
    %c0_134 = arith.constant 0 : index
    %c0_135 = arith.constant 0 : index
    %c22_136 = arith.constant 22 : index
    %135 = vector.load %arg1[%c0_134, %c0_135, %c22_136] : memref<1x64x768xf32, #tpu.memory_space<vmem>>, vector<1x64x640xf32>
    %136 = vector.shape_cast %135 : vector<1x64x640xf32> to vector<64x640xf32>
    %cst_137 = arith.constant dense<0.000000e+00> : vector<40x640xf32>
    %137 = tpu.matmul %134, %136, %cst_137 {dimension_numbers = #tpu.dot_dimension_numbers<[1], [0], [0], [1], [0, 0, 1, 1], [], []>} : vector<40x64xf32>, vector<64x640xf32>, vector<40x640xf32> -> vector<40x640xf32>
    %138 = arith.addf %132, %137 : vector<40x640xf32>
    %c23 = arith.constant 23 : index
    %c0_138 = arith.constant 0 : index
    %c0_139 = arith.constant 0 : index
    %139 = vector.load %arg2[%c23, %c0_138, %c0_139] : memref<25x40x64xf32, #tpu.memory_space<vmem>>, vector<1x40x64xf32>
    %140 = vector.shape_cast %139 : vector<1x40x64xf32> to vector<40x64xf32>
    %c0_140 = arith.constant 0 : index
    %c0_141 = arith.constant 0 : index
    %c23_142 = arith.constant 23 : index
    %141 = vector.load %arg1[%c0_140, %c0_141, %c23_142] : memref<1x64x768xf32, #tpu.memory_space<vmem>>, vector<1x64x640xf32>
    %142 = vector.shape_cast %141 : vector<1x64x640xf32> to vector<64x640xf32>
    %cst_143 = arith.constant dense<0.000000e+00> : vector<40x640xf32>
    %143 = tpu.matmul %140, %142, %cst_143 {dimension_numbers = #tpu.dot_dimension_numbers<[1], [0], [0], [1], [0, 0, 1, 1], [], []>} : vector<40x64xf32>, vector<64x640xf32>, vector<40x640xf32> -> vector<40x640xf32>
    %144 = arith.addf %138, %143 : vector<40x640xf32>
    %c24 = arith.constant 24 : index
    %c0_144 = arith.constant 0 : index
    %c0_145 = arith.constant 0 : index
    %145 = vector.load %arg2[%c24, %c0_144, %c0_145] : memref<25x40x64xf32, #tpu.memory_space<vmem>>, vector<1x40x64xf32>
    %146 = vector.shape_cast %145 : vector<1x40x64xf32> to vector<40x64xf32>
    %c0_146 = arith.constant 0 : index
    %c0_147 = arith.constant 0 : index
    %c24_148 = arith.constant 24 : index
    %147 = vector.load %arg1[%c0_146, %c0_147, %c24_148] : memref<1x64x768xf32, #tpu.memory_space<vmem>>, vector<1x64x640xf32>
    %148 = vector.shape_cast %147 : vector<1x64x640xf32> to vector<64x640xf32>
    %cst_149 = arith.constant dense<0.000000e+00> : vector<40x640xf32>
    %149 = tpu.matmul %146, %148, %cst_149 {dimension_numbers = #tpu.dot_dimension_numbers<[1], [0], [0], [1], [0, 0, 1, 1], [], []>} : vector<40x64xf32>, vector<64x640xf32>, vector<40x640xf32> -> vector<40x640xf32>
    %150 = arith.addf %144, %149 : vector<40x640xf32>
    %c0_150 = arith.constant 0 : index
    %c0_151 = arith.constant 0 : index
    %151 = vector.load %arg3[%c0_150, %c0_151] : memref<40x1xf32, #tpu.memory_space<vmem>>, vector<40x1xf32>
    %152 = vector.broadcast %151 : vector<40x1xf32> to vector<40x640xf32>
    %153 = arith.addf %150, %152 : vector<40x640xf32>
    %cst_152 = arith.constant 0.000000e+00 : f32
    %154 = vector.broadcast %cst_152 : f32 to vector<40x640xf32>
    %155 = arith.cmpf ogt, %153, %154 : vector<40x640xf32>
    %cst_153 = arith.constant 0.000000e+00 : f32
    %156 = vector.broadcast %cst_153 : f32 to vector<40x640xf32>
    %157 = arith.minimumf %153, %156 : vector<40x640xf32>
    %158 = math.exp %157 : vector<40x640xf32>
    %cst_154 = arith.constant 1.000000e+00 : f32
    %159 = vector.broadcast %cst_154 : f32 to vector<40x640xf32>
    %160 = arith.subf %158, %159 : vector<40x640xf32>
    %161 = arith.select %155, %153, %160 : vector<40x640xi1>, vector<40x640xf32>
    %c0_155 = arith.constant 0 : index
    %c0_156 = arith.constant 0 : index
    %162 = vector.load %arg4[%c0_155, %c0_156] : memref<640x16xf32, #tpu.memory_space<vmem>>, vector<640x16xf32>
    %cst_157 = arith.constant dense<0.000000e+00> : vector<40x16xf32>
    %163 = tpu.matmul %161, %162, %cst_157 {dimension_numbers = #tpu.dot_dimension_numbers<[1], [0], [0], [1], [0, 0, 1, 1], [], []>} : vector<40x640xf32>, vector<640x16xf32>, vector<40x16xf32> -> vector<40x16xf32>
    %c0_158 = arith.constant 0 : index
    %c0_159 = arith.constant 0 : index
    %164 = vector.load %arg5[%c0_158, %c0_159] : memref<40x40xf32, #tpu.memory_space<vmem>>, vector<40x40xf32>
    %cst_160 = arith.constant dense<0.000000e+00> : vector<16x40xf32>
    %165 = tpu.matmul %163, %164, %cst_160 {dimension_numbers = #tpu.dot_dimension_numbers<[0], [0], [1], [1], [0, 1, 1, 1], [], []>} : vector<40x16xf32>, vector<40x40xf32>, vector<16x40xf32> -> vector<16x40xf32>
    %c0_161 = arith.constant 0 : index
    %c0_162 = arith.constant 0 : index
    %166 = vector.load %arg6[%c0_161, %c0_162] : memref<1x40xf32, #tpu.memory_space<vmem>>, vector<1x40xf32>
    %167 = vector.broadcast %166 : vector<1x40xf32> to vector<16x40xf32>
    %168 = arith.addf %165, %167 : vector<16x40xf32>
    %c0_163 = arith.constant 0 : index
    %c0_164 = arith.constant 0 : index
    %c0_165 = arith.constant 0 : index
    %169 = vector.load %arg7[%c0_163, %c0_164, %c0_165] : memref<1x16x40xf32, #tpu.memory_space<vmem>>, vector<1x16x40xf32>
    %170 = vector.shape_cast %169 : vector<1x16x40xf32> to vector<16x40xf32>
    %171 = vector.shape_cast %168 : vector<16x40xf32> to vector<1x16x40xf32>
    tpu.vector_store %arg7[%c0_163, %c0_164, %c0_165], %171 {strides = array<i32>} : memref<1x16x40xf32, #tpu.memory_space<vmem>>, vector<1x16x40xf32>,
    return
  }
  func.func @transform_0(%arg0: i32) -> (i32, i32, i32) {
    %c0_i32 = arith.constant 0 : i32
    %c0_i32_0 = arith.constant 0 : i32
    %c0_i32_1 = arith.constant 0 : i32
    return %arg0, %c0_i32, %c0_i32_0 : i32, i32, i32
  }
  func.func @transform_1(%arg0: i32) -> (i32, i32, i32) {
    %c0_i32 = arith.constant 0 : i32
    %c0_i32_0 = arith.constant 0 : i32
    %c0_i32_1 = arith.constant 0 : i32
    %c0_i32_2 = arith.constant 0 : i32
    return %c0_i32, %c0_i32_0, %c0_i32_1 : i32, i32, i32
  }
  func.func @transform_2(%arg0: i32) -> (i32, i32) {
    %c0_i32 = arith.constant 0 : i32
    %c0_i32_0 = arith.constant 0 : i32
    %c0_i32_1 = arith.constant 0 : i32
    return %c0_i32, %c0_i32_0 : i32, i32
  }
  func.func @transform_3(%arg0: i32) -> (i32, i32) {
    %c0_i32 = arith.constant 0 : i32
    %c0_i32_0 = arith.constant 0 : i32
    %c0_i32_1 = arith.constant 0 : i32
    return %c0_i32, %c0_i32_0 : i32, i32
  }
  func.func @transform_4(%arg0: i32) -> (i32, i32) {
    %c0_i32 = arith.constant 0 : i32
    %c0_i32_0 = arith.constant 0 : i32
    %c0_i32_1 = arith.constant 0 : i32
    return %c0_i32, %c0_i32_0 : i32, i32
  }
  func.func @transform_5(%arg0: i32) -> (i32, i32) {
    %c0_i32 = arith.constant 0 : i32
    %c0_i32_0 = arith.constant 0 : i32
    %c0_i32_1 = arith.constant 0 : i32
    return %c0_i32, %c0_i32_0 : i32, i32
  }
  func.func @transform_6(%arg0: i32) -> (i32, i32, i32) {
    %c0_i32 = arith.constant 0 : i32
    %c0_i32_0 = arith.constant 0 : i32
    %c0_i32_1 = arith.constant 0 : i32
    return %arg0, %c0_i32, %c0_i32_0 : i32, i32, i32
  }
}

</mosaic_0001>

<bundles_post_ra>
// kernel: tpu_custom_call.1
= control target key start
LH: loop header
LB: loop body
LE: loop exit
PB: predicated region body
PF: predicated region fallthrough
CT: control target
= control target key end

     0   :  { %11 = vsyncpa [#allocation3], 0  ;;  %s28856_s0 = inlined_call_operand.hbm [shape: f32[2,64,768], index: 0, kind: input, shape index: {}]   ;;  %s28857_s1 = inlined_call_operand.hbm [shape: f32[25,40,64], index: 1, kind: input, shape index: {}]   ;;  %s28858_s2 = inlined_call_operand.hbm [shape: f32[40,1], index: 2, kind: input, shape index: {}]   ;;  %s28859_s3 = inlined_call_operand.hbm [shape: f32[640,16], index: 3, kind: input, shape index: {}]   ;;  %s28860_s4 = inlined_call_operand.hbm [shape: f32[40,40], index: 4, kind: input, shape index: {}]   ;;  %s28861_s5 = inlined_call_operand.hbm [shape: f32[1,40], index: 5, kind: input, shape index: {}]   ;;  %s28862_s6 = inlined_call_operand.hbm [shape: f32[2,16,40], index: 6, kind: output, shape index: {}]  }
   0x1   :  { %13 = vsyncpa [#allocation3 + $0x1], 0 }
   0x2   :  { %14 = vsyncpa [#allocation6], 0 }
   0x3   :  { %15 = vsyncpa [#allocation9], 0 }
   0x4   :  { %16 = vsyncpa [#allocation12], 0 }
   0x5   :  { %17 = vsyncpa [#allocation4], 0 }
   0x6   :  { %19 = vsyncpa [#allocation4 + $0x1], 0  ;;  %s20740_s21 = smov 0   ;;  %s20742_s22 = smov 0  }
   0x7   :  { %s20744_s23 = smov 0   ;;  %s20746_s24 = smov 0  }
   0x8 LB: > { %s20664_s25 = smov [#allocation5]   ;;  %s20761_s27 = sadd.s32 4294967295, %s20662_s24   ;;  %s20662_s24 = sphi %s20746_s24, %s29190_s24   ;;  %s20658_s23 = sphi %s20744_s23, %s29189_s23   ;;  %s20654_s22 = sphi %s20742_s22, %s29188_s22   ;;  %s20650_s21 = sphi %s20740_s21, %s29187_s21  }
   0x9   : > { %s199_s26 = sshll.u32 %s20664_s25, 4  ;;  %p13644_p0 = scmp.ge.s32.totalorder %s20662_s24, 1  ;;  %s20766_s26 = int_to_ptr.vmem [resolvable:$true] %s199_s26 }
   0xa   : > { %p28863_p1 = scmp.eq.s32.totalorder %s20761_s27, 0  ;;  %p187_p2 = scmp.lt.s32.totalorder %s20662_s24, 3 }
   0xb   : > { %s20665_s29 = smov [#allocation8]   ;;  %s20666_s8 = smov [#allocation7]  }
   0xc   : > { %p20768_p3 = pnand %p13644_p0, %p187_p2  ;;  %s225_s30 = sshll.u32 %s20665_s29, 4  ;;  %s20781_s30 = int_to_ptr.vmem [resolvable:$true] %s225_s30 }
   0xd   : > { %s212_s9 = sshll.u32 %s20666_s8, 4  ;;  %s20414_s12 = scalar_lea.hbm %s28857_s1, 16000  ;;  %s20783_s9 = int_to_ptr.vmem [resolvable:$true] %s212_s9 }
   0xe   : > { %s28994_s28 = scalar_select %p20768_p3, 1, 0 }
   0xf   : > { %p17053_p5 = pneg %p20768_p3  ;;  %p20415_p7 = scmp.ne.s32.totalorder %s28857_s1, %s20414_s12 }
  0x10   : > { %p20421_p11 = scmp.lt.u32.totalorder %s20414_s12, %s28857_s1 }
  0x11   : > { %p20777_p6 = pnand %p17053_p5, %p28863_p1 }
  0x13   : > { %p20793_p8 = pneg %p20777_p6 }
  0x15   : > { %p20417_p9 = pnand %p20793_p8, %p20415_p7 }
  0x17   : > { %p20418_p10 = pneg %p20417_p9 }
  0x19   : > { %p20423_p12 = pnand %p20421_p11, %p20418_p10 }
  0x1b   : > { %20426 = shalt.err (!%p20423_p12)
}
  0x1c   : > { %s20427_s18 = scalar_lea.vmem %s20766_s26, 16000  ;;  %p20435_p5 = scmp.lt.s32.totalorder %s20766_s26, %s20766_s26 }
  0x1d   : > { %p20428_p13 = scmp.ne.s32.totalorder %s20766_s26, %s20427_s18  ;;  %p20436_p4 = scmp.lt.s32.totalorder %s20427_s18, %s20427_s18 }
  0x1f   : > { %p20430_p0 = pnand %p20428_p13, %p20793_p8  ;;  %p20437_p7 = por %p20436_p4, %p20435_p5 }
  0x21   : > { %p20431_p2 = pneg %p20430_p0 }
  0x23   : > { %p20438_p9 = pnand %p20437_p7, %p20431_p2 }
  0x25   : > { %20441 = shalt.err (!%p20438_p9)
}
  0x26   : > { %s20667_s19 = smov 128   ;;  %s20668_s20 = smov 8  }
  0x27   : > { %17056 = dma.hbm_to_vmem [thread:$0]  (!%p20777_p6), %s28857_s1, 16000, %s20766_s26, [#allocation6], %s20667_s19, %s20667_s19, %s20668_s20  }
  0x28   : > { %s20442_s11 = scalar_lea.hbm %s28859_s3, 10240 }
  0x29   : > { %p20443_p4 = scmp.ne.s32.totalorder %s28859_s3, %s20442_s11  ;;  %p20449_p12 = scmp.lt.u32.totalorder %s20442_s11, %s28859_s3 }
  0x2b   : > { %p20445_p10 = pnand %p20443_p4, %p20793_p8 }
  0x2d   : > { %p20446_p11 = pneg %p20445_p10 }
  0x2f   : > { %p20451_p13 = pnand %p20449_p12, %p20446_p11 }
  0x31   : > { %20454 = shalt.err (!%p20451_p13)
}
  0x32   : > { %s20455_s26 = scalar_lea.vmem %s20781_s30, 10240  ;;  %p20463_p7 = scmp.lt.s32.totalorder %s20781_s30, %s20781_s30 }
  0x33   : > { %p20456_p0 = scmp.ne.s32.totalorder %s20781_s30, %s20455_s26  ;;  %p20464_p9 = scmp.lt.s32.totalorder %s20455_s26, %s20455_s26 }
  0x35   : > { %p20458_p2 = pnand %p20456_p0, %p20793_p8  ;;  %p20465_p4 = por %p20464_p9, %p20463_p7 }
  0x37   : > { %p20459_p5 = pneg %p20458_p2 }
  0x39   : > { %p20466_p10 = pnand %p20465_p4, %p20459_p5 }
  0x3b   : > { %20469 = shalt.err (!%p20466_p10)
}
  0x3c   : > { %17062 = dma.hbm_to_vmem [thread:$0]  (!%p20777_p6), %s28859_s3, 10240, %s20781_s30, [#allocation9], %s20667_s19, %s20667_s19, %s20668_s20  }
  0x3d   : > { %s20470_s8 = scalar_lea.hbm %s28858_s2, 640 }
  0x3e   : > { %p20471_p11 = scmp.ne.s32.totalorder %s28858_s2, %s20470_s8  ;;  %p20477_p0 = scmp.lt.u32.totalorder %s20470_s8, %s28858_s2 }
  0x40   : > { %p20473_p12 = pnand %p20471_p11, %p20793_p8 }
  0x42   : > { %p20474_p13 = pneg %p20473_p12 }
  0x44   : > { %p20479_p2 = pnand %p20477_p0, %p20474_p13 }
  0x46   : > { %20482 = shalt.err (!%p20479_p2)
}
  0x47   : > { %s20483_s30 = scalar_lea.vmem %s20783_s9, 640  ;;  %p20491_p4 = scmp.lt.s32.totalorder %s20783_s9, %s20783_s9 }
  0x48   : > { %p20484_p5 = scmp.ne.s32.totalorder %s20783_s9, %s20483_s30  ;;  %p20492_p10 = scmp.lt.s32.totalorder %s20483_s30, %s20483_s30 }
  0x4a   : > { %p20486_p7 = pnand %p20484_p5, %p20793_p8  ;;  %p20493_p11 = por %p20492_p10, %p20491_p4 }
  0x4c   : > { %p20487_p9 = pneg %p20486_p7 }
  0x4e   : > { %p20494_p12 = pnand %p20493_p11, %p20487_p9 }
  0x50   : > { %20497 = shalt.err (!%p20494_p12)
}
  0x51   : > { %17059 = dma.hbm_to_vmem [thread:$0]  (!%p20777_p6), %s28858_s2, 640, %s20783_s9, [#allocation6], %s20667_s19, %s20667_s19, %s20668_s20  }
  0x52   : > { %s20669_s26 = smov [#allocation10]   ;;  %s20670_s18 = smov [#allocation11]  }
  0x53   : > { %s238_s17 = sshll.u32 %s20669_s26, 4  ;;  %s252_s25 = sshll.u32 %s20670_s18, 4  ;;  %s239_s17 = int_to_ptr.vmem [resolvable:$true] %s238_s17  ;;  %s253_s25 = int_to_ptr.vmem [resolvable:$true] %s252_s25 }
  0x54   : > { %s20498_s10 = scalar_lea.hbm %s28860_s4, 640 }
  0x55   : > { %p20499_p13 = scmp.ne.s32.totalorder %s28860_s4, %s20498_s10  ;;  %p20505_p5 = scmp.lt.u32.totalorder %s20498_s10, %s28860_s4 }
  0x57   : > { %p20501_p0 = pnand %p20499_p13, %p20793_p8 }
  0x59   : > { %p20502_p2 = pneg %p20501_p0 }
  0x5b   : > { %p20507_p7 = pnand %p20505_p5, %p20502_p2 }
  0x5d   : > { %20510 = shalt.err (!%p20507_p7)
}
  0x5e   : > { %s20511_s9 = scalar_lea.vmem %s239_s17, 640  ;;  %p20519_p11 = scmp.lt.s32.totalorder %s239_s17, %s239_s17 }
  0x5f   : > { %p20512_p9 = scmp.ne.s32.totalorder %s239_s17, %s20511_s9  ;;  %p20520_p12 = scmp.lt.s32.totalorder %s20511_s9, %s20511_s9 }
  0x61   : > { %p20514_p4 = pnand %p20512_p9, %p20793_p8  ;;  %p20521_p1 = por %p20520_p12, %p20519_p11 }
  0x63   : > { %p20515_p10 = pneg %p20514_p4 }
  0x65   : > { %p20522_p3 = pnand %p20521_p1, %p20515_p10 }
  0x67   : > { %20525 = shalt.err (!%p20522_p3)
}
  0x68   : > { %17065 = dma.hbm_to_vmem [thread:$0]  (!%p20777_p6), %s28860_s4, 640, %s239_s17, [#allocation9], %s20667_s19, %s20667_s19, %s20668_s20  }
  0x69   : > { %s20526_s29 = scalar_lea.hbm %s28861_s5, 16 }
  0x6a   : > { %p20527_p1 = scmp.ne.s32.totalorder %s28861_s5, %s20526_s29  ;;  %p20533_p0 = scmp.lt.u32.totalorder %s20526_s29, %s28861_s5 }
  0x6c   : > { %p20529_p3 = pnand %p20527_p1, %p20793_p8 }
  0x6e   : > { %p20530_p13 = pneg %p20529_p3 }
  0x70   : > { %p20535_p2 = pnand %p20533_p0, %p20530_p13 }
  0x72   : > { %20538 = shalt.err (!%p20535_p2)
}
  0x73   : > { %s20539_s13 = scalar_lea.vmem %s253_s25, 16  ;;  %s20546_s19 = scalar_lea.vmem %s253_s25, 32 }
  0x74   : > { %p20540_p5 = scmp.ne.s32.totalorder %s253_s25, %s20539_s13  ;;  %p20547_p4 = scmp.lt.s32.totalorder %s253_s25, %s253_s25 }
  0x75   : > { %p20548_p10 = scmp.lt.s32.totalorder %s20546_s19, %s20539_s13 }
  0x76   : > { %p20542_p7 = pnand %p20540_p5, %p20793_p8 }
  0x77   : > { %p20549_p11 = por %p20548_p10, %p20547_p4 }
  0x78   : > { %p20543_p9 = pneg %p20542_p7 }
  0x7a   : > { %p20550_p12 = pnand %p20549_p11, %p20543_p9 }
  0x7c   : > { %20553 = shalt.err (!%p20550_p12)
}
  0x7d   : > { %17068 = dma.hbm_to_vmem [thread:$0]  (!%p20777_p6), %s28861_s5, 16, %s253_s25, [#allocation12]  }
  0x7e   : > { %s13643_s15 = sadd.s32 4294967294, %s20662_s24   ;;  %s20910_s7 = sadd.s32 1, %s20662_s24  }
  0x7f   : > { %s32_s30 = sadd.s32 1, %s20658_s23  ;;  %s29_s9 = ssub.s32 %s20662_s24, %s20910_s7 }
  0x80   : > { %p39_p8 = scmp.ne.s32.totalorder %s20658_s23, %s20654_s22  ;;  %p30_p1 = scmp.eq.s32.totalorder %s29_s9, 0 }
  0x81   : > { %p40_p3 = scmp.eq.s32.totalorder %s20662_s24, 0  ;;  %p45_p13 = scmp.ne.s32.totalorder %s20654_s22, %s20650_s21 }
  0x82   : > { %p174_p0 = scmp.eq.s32.totalorder %s20761_s27, 1  ;;  %p28997_p5 = scmp.eq.s32.totalorder %s20761_s27, 0 }
  0x83   : > { %s20922_s14 = scalar_select %p30_p1, %s20658_s23, %s32_s30  }
  0x84   : > { %p41_p2 = por %p40_p3, %p39_p8  ;;  %p20926_p7 = por %p28997_p5, %p45_p13 }
  0x85   : > { %p20930_p6 = por %p174_p0, %p39_p8  ;;  %p180_p9 = scmp.eq.s32.totalorder %s13643_s15, 1 }
  0x86   : > { %p17082_p4 = scmp.lt.s32.totalorder %s20662_s24, 2  ;;  %s263_s26 = sand.u32 1, %s20658_s23  }
  0x87   : > { %s28999_s25 = scalar_select %p20930_p6, 1, 0 }
  0x88   : > { %p20936_p10 = por %p180_p9, %p45_p13  ;;  %s17026_s29 = smul.u32 384, %s263_s26 }
  0x89   : > { %p20940_p11 = pnand %p17082_p4, %p41_p2  ;;  %s17027_s10 = smul.u32 6144, %s20662_s24 }
  0x8a   : > { %s29000_s18 = scalar_select %p20936_p10, 1, 0 }
  0x8b   : > { %s20948_s13 = scalar_lea.hbm %s28856_s0, %s17027_s10  ;;  %s267_s19 = scalar_lea.vmem [#allocation2], %s17026_s29 }
  0x8c   : > { %s274_s20 = sshll.u32 %s267_s19, 4  ;;  %s20952_s17 = scalar_lea.sflag [#allocation3], %s263_s26  ;;  %s20950_s20 = int_to_ptr.vmem [resolvable:$true] %s274_s20 }
  0x8d   : > { %s20554_s15 = scalar_lea.hbm %s20948_s13, 6144  ;;  %p20556_p8 = pneg %p20940_p11 }
  0x8e   : > { %p20555_p12 = scmp.ne.s32.totalorder %s20948_s13, %s20554_s15  ;;  %s20559_s10 = scalar_lea.hbm %s28856_s0, 12288 }
  0x8f   : > { %p20560_p13 = scmp.lt.u32.totalorder %s20948_s13, %s28856_s0  ;;  %p20561_p0 = scmp.lt.u32.totalorder %s20559_s10, %s20554_s15 }
  0x90   : > { %p20557_p1 = pnand %p20556_p8, %p20555_p12  ;;  %p20563_p5 = scmp.lt.u32.totalorder %s20554_s15, %s20948_s13 }
  0x91   : > { %p20562_p2 = por %p20561_p0, %p20560_p13 }
  0x92   : > { %p20558_p3 = pneg %p20557_p1 }
  0x93   : > { %p20564_p9 = por %p20563_p5, %p20562_p2 }
  0x95   : > { %p20565_p4 = pnand %p20564_p9, %p20558_p3 }
  0x97   : > { %20568 = shalt.err (!%p20565_p4)
}
  0x98   : > { %s20569_s26 = scalar_lea.vmem %s20950_s20, 6144  ;;  %s20671_s29 = smov [#allocation2]  }
  0x99   : > { %p20570_p12 = scmp.ne.s32.totalorder %s20950_s20, %s20569_s26  ;;  %s20574_s19 = sshll.u32 %s20671_s29, 4  ;;  %s20575_s19 = int_to_ptr.vmem [resolvable:$false] %s20574_s19 }
  0x9a   : > { %s20576_s30 = scalar_lea.vmem %s20575_s19, 12288  ;;  %p20577_p6 = scmp.lt.s32.totalorder %s20950_s20, %s20575_s19 }
  0x9b   : > { %p20572_p1 = pnand %p20570_p12, %p20556_p8  ;;  %p20578_p13 = scmp.lt.s32.totalorder %s20576_s30, %s20569_s26 }
  0x9d   : > { %p20573_p10 = pneg %p20572_p1  ;;  %p20579_p0 = por %p20578_p13, %p20577_p6 }
  0x9f   : > { %p20580_p2 = pnand %p20579_p0, %p20573_p10 }
  0xa1   : > { %20583 = shalt.err (!%p20580_p2)
}
  0xa2   : > { %s20672_s15 = smov 768   ;;  %s20673_s9 = smov 48  }
  0xa3   : > { %17072 = dma.hbm_to_vmem [thread:$0]  (!%p20940_p11), %s20948_s13, 6144, %s20950_s20, %s20952_s17, %s20672_s15, %s20672_s15, %s20673_s9  }
  0xa4   : > { %p29002_p8 = scmp.ne.s32.totalorder %s28994_s28, 0 }
  0xa6   : > { %286 = sbr.rel (%p29002_p8) target bundleno = 2293 (0x8f5), region = 44 }
  0xad   : > { %s20983_s10 = sand.u32 1, %s20654_s22  }
  0xae   : > { %s17028_s11 = smul.u32 384, %s20983_s10  ;;  %s289_s12 = scalar_lea.sflag [#allocation3], %s20983_s10 }
  0xb0   : > { %s20987_s26 = scalar_lea.vmem [#allocation2], %s17028_s11 }
  0xb1   : > { %20629 = dma.done.wait (%p20926_p7), %s289_s12, 6144  }
  0xb2   : > { %20631 = vsyncadd (%p20926_p7), %s289_s12, 4294961152  ;;  %p29003_p6 = scmp.eq.s32.totalorder %s20761_s27, 0 }
  0xb4   : > { %20633 = dma.done.wait (%p29003_p6), [#allocation6], 16640   ;;  %p29004_p10 = pmov %p29003_p6 }
  0xb5   : > { %p29005_p11 = pmov %p29003_p6 }
  0xb6   : > { %20635 = vsyncadd (%p29004_p10), [#allocation6], 4294950656 }
  0xb7   : > { %20637 = dma.done.wait (%p29005_p11), [#allocation9], 10880   ;;  %p29006_p3 = pmov %p29003_p6 }
  0xb9   : > { %20639 = vsyncadd (%p29006_p3), [#allocation9], 4294956416  ;;  %p29007_p5 = pmov %p29006_p3 }
  0xba   : > { %p29008_p9 = pmov %p29006_p3 }
  0xbb   : > { %20641 = dma.done.wait (%p29007_p5), [#allocation12], 16  }
  0xbc   : > { %20643 = vsyncadd (%p29008_p9), [#allocation12], 4294967280  ;;  %v396_v0 = vld [vmem:[%s20987_s26 + $0x20] sm:$0xff]  ;;  %v397_v1 = vld [vmem:[%s20987_s26 + $0x28] sm:$0xff]  ;;  %s20674_s28 = smov 127   ;;  %s20676_s16 = smov 126  }
  0xbd   : > { %v392_v2 = vld [vmem:[%s20987_s26] sm:$0xff]  ;;  %v21008_v3 = vpack.i.bf16 %v397_v1, %v396_v0  ;;  %v21011_v4 = vld [vmem:[%s20987_s26 + $0x8] sm:$0xff]  ;;  %v398_v5 = vld [vmem:[%s20987_s26 + $0x30] sm:$0xff]  ;;  %s20677_s8 = smov 125   ;;  %vm584_vm0 = vcmask 1039360   ;;  %s20678_s13 = smov 124  }
  0xbe   : > { %29010 = vst [vmem:[#allocation20_spill] sm:$0xff] %v21011_v4  ;;  %v21015_v6 = vld [vmem:[%s20987_s26 + $0x38] sm:$0xff]  ;;  %v21018_v7 = vpack.i.bf16 %v21011_v4, %v392_v2  ;;  %v21021_v8 = vld [vmem:[%s20987_s26 + $0x10] sm:$0xff]  ;;  %v21040_v14 = vld [vmem:[%s20987_s26 + $0x40] sm:$0xff]  ;;  %vm665_vm1 = vcmask 523264   ;;  %vm20680_vm2 = vmmov 0  }
  0xbf   : > { %29009 = vst [vmem:[#allocation19_spill] sm:$0xff] %v21008_v3  ;;  %29011 = vst [vmem:[#allocation21_spill] sm:$0xff] %v21015_v6  ;;  %v21024_v9 = vld [vmem:[%s20987_s26 + $0x18] sm:$0xff]  ;;  %17171 = vrot.lane.b32.xlu1 %v21008_v3, %s20674_s28  ;;  %v21029_v10 = vpack.i.bf16 %v21015_v6, %v398_v5  ;;  %v402_v12 = vld [vmem:[%s20987_s26 + $0x50] sm:$0xff]  ;;  %s20681_s20 = smov 123   ;;  %vm1358_vm3 = vcmask 1031168  }
  0xc0   : > { %17161 = vrot.lane.b32.xlu0 %v21018_v7, %s20674_s28  ;;  %v21035_v11 = vpack.i.bf16 %v21024_v9, %v21021_v8  ;;  %v403_v13 = vld [vmem:[%s20987_s26 + $0x58] sm:$0xff]  ;;  %v21043_v15 = vld [vmem:[%s20987_s26 + $0x48] sm:$0xff]  ;;  %v21056_v18 = vld [vmem:[%s20987_s26 + $0x70] sm:$0xff]  ;;  %vm1861_vm4 = vcmask 1022976   ;;  %s20682_s17 = smov 122   ;;  %vm2364_vm5 = vcmask 1014784  }
  0xc1   : > { %29012 = vst [vmem:[#allocation22_spill] sm:$0xff] %v21029_v10  ;;  %v21047_v16 = vpack.i.bf16 %v403_v13, %v402_v12  ;;  %v21053_v17 = vpack.i.bf16 %v21043_v15, %v21040_v14  ;;  %v21059_v19 = vld [vmem:[%s20987_s26 + $0x78] sm:$0xff]  ;;  %v404_v20 = vld [vmem:[%s20987_s26 + $0x60] sm:$0xff]  ;;  %v405_v21 = vld [vmem:[%s20987_s26 + $0x68] sm:$0xff]  ;;  %s20683_s29 = smov 121   ;;  %vm2867_vm6 = vcmask 1006592  }
  0xc2   : > { %v21067_v22 = vpack.i.bf16 %v21059_v19, %v21056_v18  ;;  %v21071_v23 = vpack.i.bf16 %v405_v21, %v404_v20  ;;  %v410_v24 = vld [vmem:[%s20987_s26 + $0x90] sm:$0xff]  ;;  %v411_v25 = vld [vmem:[%s20987_s26 + $0x98] sm:$0xff]  ;;  %v408_v26 = vld [vmem:[%s20987_s26 + $0x80] sm:$0xff]  ;;  %s20684_s19 = smov 120   ;;  %vm3370_vm7 = vcmask 998400   ;;  %s20685_s30 = smov 119  }
  0xc3   : > { %17176 = vrot.lane.b32.xlu1 %v21029_v10, %s20674_s28  ;;  %v409_v27 = vld [vmem:[%s20987_s26 + $0x88] sm:$0xff]  ;;  %v21079_v28 = vpack.i.bf16 %v411_v25, %v410_v24  ;;  %v414_v30 = vld [vmem:[%s20987_s26 + $0xb0] sm:$0xff]  ;;  %v415_v31 = vld [vmem:[%s20987_s26 + $0xb8] sm:$0xff]  ;;  %v28866_v24 = vmov 0.0   ;;  %vm3873_vm8 = vcmask 990208   ;;  %s20686_s15 = smov 118  }
  0xc4   : > { %17166 = vrot.lane.b32.xlu0 %v21035_v11, %s20674_s28  ;;  %29013 = vst [vmem:[#allocation23_spill] sm:$0xff] %v21067_v22  ;;  %29014 = vst [vmem:[#allocation24_spill] sm:$0xff] %v21071_v23  ;;  %v21083_v29 = vpack.i.bf16 %v409_v27, %v408_v26  ;;  %v21088_v32 = vld [vmem:[%s20987_s26 + $0xa0] sm:$0xff]  ;;  %v21091_v33 = vld [vmem:[%s20987_s26 + $0xa8] sm:$0xff]  ;;  %v21095_v34 = vpack.i.bf16 %v415_v31, %v414_v30  ;;  %745 = vmatprep.mubr.f32.mxu0 %v28866_v24  ;;  %vm4376_vm9 = vcmask 982016   ;;  %s20687_s9 = smov 117  }
  0xc5   : > { %29015 = vst [vmem:[#allocation25_spill] sm:$0xff] %v21079_v28  ;;  %v21101_v35 = vpack.i.bf16 %v21091_v33, %v21088_v32  ;;  %v21104_v36 = vld [vmem:[%s20987_s26 + $0xd0] sm:$0xff]  ;;  %v21107_v37 = vld [vmem:[%s20987_s26 + $0xd8] sm:$0xff]  ;;  %v416_v38 = vld [vmem:[%s20987_s26 + $0xc0] sm:$0xff]  ;;  %840 = vmatprep.mubr.f32.mxu1 %v28866_v24  ;;  %vm4879_vm10 = vcmask 973824   ;;  %s20688_s11 = smov 116  }
  0xc6   : > { %29016 = vst [vmem:[#allocation26_spill] sm:$0xff] %v21083_v29  ;;  %v417_v39 = vld [vmem:[%s20987_s26 + $0xc8] sm:$0xff]  ;;  %v21115_v40 = vpack.i.bf16 %v21107_v37, %v21104_v36  ;;  %v422_v42 = vld [vmem:[%s20987_s26 + $0xf0] sm:$0xff]  ;;  %v423_v43 = vld [vmem:[%s20987_s26 + $0xf8] sm:$0xff]  ;;  %vm5382_vm11 = vcmask 965632   ;;  %s20689_s12 = smov 115  }
  0xc7   : > { %17186 = vrot.lane.b32.xlu1 %v21047_v16, %s20674_s28  ;;  %v21119_v41 = vpack.i.bf16 %v417_v39, %v416_v38  ;;  %v420_v44 = vld [vmem:[%s20987_s26 + $0xe0] sm:$0xff]  ;;  %v421_v45 = vld [vmem:[%s20987_s26 + $0xe8] sm:$0xff]  ;;  %v21127_v46 = vpack.i.bf16 %v423_v43, %v422_v42  ;;  %v426_v48 = vld [vmem:[%s20987_s26 + $0x110] sm:$0xff]  ;;  %vm5885_vm12 = vcmask 957440   ;;  %vm6388_vm13 = vcmask 949248   ;;  %p29184_p4 = scmp.ne.s32.totalorder %s28999_s25, 0 }
  0xc8   : > { %17181 = vrot.lane.b32.xlu0 %v21053_v17, %s20674_s28  ;;  %v21131_v47 = vpack.i.bf16 %v421_v45, %v420_v44  ;;  %v427_v49 = vld [vmem:[%s20987_s26 + $0x118] sm:$0xff]  ;;  %v21136_v50 = vld [vmem:[%s20987_s26 + $0x100] sm:$0xff]  ;;  %v21139_v51 = vld [vmem:[%s20987_s26 + $0x108] sm:$0xff]  ;;  %vm6891_vm14 = vcmask 941056   ;;  %vm7394_vm15 = vcmask 932864  }
  0xc9   : > { %v21143_v52 = vpack.i.bf16 %v427_v49, %v426_v48  ;;  %v21149_v53 = vpack.i.bf16 %v21139_v51, %v21136_v50  ;;  %v21152_v54 = vld [vmem:[%s20987_s26 + $0x130] sm:$0xff]  ;;  %v21155_v55 = vld [vmem:[%s20987_s26 + $0x138] sm:$0xff]  ;;  %v428_v56 = vld [vmem:[%s20987_s26 + $0x120] sm:$0xff] }
  0xca   : > { %v429_v57 = vld [vmem:[%s20987_s26 + $0x128] sm:$0xff]  ;;  %v21163_v58 = vpack.i.bf16 %v21155_v55, %v21152_v54  ;;  %v434_v60 = vld [vmem:[%s20987_s26 + $0x150] sm:$0xff]  ;;  %v435_v61 = vld [vmem:[%s20987_s26 + $0x158] sm:$0xff] }
  0xcb   : > { %17196 = vrot.lane.b32.xlu1 %v21067_v22, %s20674_s28  ;;  %v21167_v59 = vpack.i.bf16 %v429_v57, %v428_v56  ;;  %v432_v62 = vld [vmem:[%s20987_s26 + $0x140] sm:$0xff]  ;;  %v433_v63 = vld [vmem:[%s20987_s26 + $0x148] sm:$0xff]  ;;  %v21175_v0 = vpack.i.bf16 %v435_v61, %v434_v60  ;;  %v438_v2 = vld [vmem:[%s20987_s26 + $0x170] sm:$0xff] }
  0xcc   : > { %17191 = vrot.lane.b32.xlu0 %v21071_v23, %s20674_s28  ;;  %v21179_v1 = vpack.i.bf16 %v433_v63, %v432_v62  ;;  %v439_v5 = vld [vmem:[%s20987_s26 + $0x178] sm:$0xff]  ;;  %v21184_v12 = vld [vmem:[%s20987_s26 + $0x160] sm:$0xff]  ;;  %v21187_v13 = vld [vmem:[%s20987_s26 + $0x168] sm:$0xff] }
  0xcd   : > { %29017 = vst [vmem:[#allocation27_spill] sm:$0xff] %v21175_v0  ;;  %v21191_v20 = vpack.i.bf16 %v439_v5, %v438_v2  ;;  %v21197_v21 = vpack.i.bf16 %v21187_v13, %v21184_v12 }
  0xce   : > { %29018 = vst [vmem:[#allocation28_spill] sm:$0xff] %v21179_v1 }
  0xcf   : > { %17206 = vrot.lane.b32.xlu1 %v21079_v28, %s20674_s28 }
  0xd0   : > { %17201 = vrot.lane.b32.xlu0 %v21083_v29, %s20674_s28 }
  0xd3   : > { %17216 = vrot.lane.b32.xlu1 %v21095_v34, %s20674_s28 }
  0xd4   : > { %17211 = vrot.lane.b32.xlu0 %v21101_v35, %s20674_s28 }
  0xd7   : > { %17226 = vrot.lane.b32.xlu1 %v21115_v40, %s20674_s28 }
  0xd8   : > { %17221 = vrot.lane.b32.xlu0 %v21119_v41, %s20674_s28 }
  0xdb   : > { %17236 = vrot.lane.b32.xlu1 %v21127_v46, %s20674_s28 }
  0xdc   : > { %17231 = vrot.lane.b32.xlu0 %v21131_v47, %s20674_s28 }
  0xdf   : > { %17246 = vrot.lane.b32.xlu1 %v21143_v52, %s20674_s28 }
  0xe0   : > { %17241 = vrot.lane.b32.xlu0 %v21149_v53, %s20674_s28 }
  0xe3   : > { %17256 = vrot.lane.b32.xlu1 %v21163_v58, %s20674_s28 }
  0xe4   : > { %17251 = vrot.lane.b32.xlu0 %v21167_v59, %s20674_s28 }
  0xe7   : > { %17266 = vrot.lane.b32.xlu1 %v21175_v0, %s20674_s28 }
  0xe8   : > { %17261 = vrot.lane.b32.xlu0 %v21179_v1, %s20674_s28 }
  0xeb   : > { %17276 = vrot.lane.b32.xlu1 %v21191_v20, %s20674_s28 }
  0xec   : > { %17271 = vrot.lane.b32.xlu0 %v21197_v21, %s20674_s28  ;;  %s20690_s28 = smov 114  }
  0xef   : > { %17286 = vrot.lane.b32.xlu1 %v21035_v11, %s20676_s16 }
  0xf0   : > { %17281 = vrot.lane.b32.xlu0 %v21018_v7, %s20676_s16 }
  0xf3   : > { %17296 = vrot.lane.b32.xlu1 %v21029_v10, %s20676_s16 }
  0xf4   : > { %17291 = vrot.lane.b32.xlu0 %v21008_v3, %s20676_s16 }
  0xf7   : > { %17306 = vrot.lane.b32.xlu1 %v21047_v16, %s20676_s16 }
  0xf8   : > { %17301 = vrot.lane.b32.xlu0 %v21053_v17, %s20676_s16 }
  0xfb   : > { %17316 = vrot.lane.b32.xlu1 %v21067_v22, %s20676_s16 }
  0xfc   : > { %17311 = vrot.lane.b32.xlu0 %v21071_v23, %s20676_s16 }
  0xff   : > { %17326 = vrot.lane.b32.xlu1 %v21079_v28, %s20676_s16 }
 0x100   : > { %17321 = vrot.lane.b32.xlu0 %v21083_v29, %s20676_s16 }
 0x103   : > { %17336 = vrot.lane.b32.xlu1 %v21095_v34, %s20676_s16 }
 0x104   : > { %17331 = vrot.lane.b32.xlu0 %v21101_v35, %s20676_s16 }
 0x107   : > { %17346 = vrot.lane.b32.xlu1 %v21115_v40, %s20676_s16 }
 0x108   : > { %17341 = vrot.lane.b32.xlu0 %v21119_v41, %s20676_s16 }
 0x10b   : > { %17356 = vrot.lane.b32.xlu1 %v21127_v46, %s20676_s16 }
 0x10c   : > { %17351 = vrot.lane.b32.xlu0 %v21131_v47, %s20676_s16 }
 0x10f   : > { %17366 = vrot.lane.b32.xlu1 %v21143_v52, %s20676_s16 }
 0x110   : > { %17361 = vrot.lane.b32.xlu0 %v21149_v53, %s20676_s16 }
 0x113   : > { %17376 = vrot.lane.b32.xlu1 %v21163_v58, %s20676_s16 }
 0x114   : > { %17371 = vrot.lane.b32.xlu0 %v21167_v59, %s20676_s16 }
 0x117   : > { %17386 = vrot.lane.b32.xlu1 %v21175_v0, %s20676_s16 }
 0x118   : > { %17381 = vrot.lane.b32.xlu0 %v21179_v1, %s20676_s16 }
 0x11b   : > { %17396 = vrot.lane.b32.xlu1 %v21191_v20, %s20676_s16 }
 0x11c   : > { %17391 = vrot.lane.b32.xlu0 %v21197_v21, %s20676_s16  ;;  %s20691_s16 = smov 113  }
 0x11f   : > { %17406 = vrot.lane.b32.xlu1 %v21035_v11, %s20677_s8 }
 0x120   : > { %17401 = vrot.lane.b32.xlu0 %v21018_v7, %s20677_s8 }
 0x123   : > { %17416 = vrot.lane.b32.xlu1 %v21029_v10, %s20677_s8 }
 0x124   : > { %17411 = vrot.lane.b32.xlu0 %v21008_v3, %s20677_s8 }
 0x127   : > { %17426 = vrot.lane.b32.xlu1 %v21047_v16, %s20677_s8 }
 0x128   : > { %17421 = vrot.lane.b32.xlu0 %v21053_v17, %s20677_s8 }
 0x12b   : > { %17436 = vrot.lane.b32.xlu1 %v21067_v22, %s20677_s8 }
 0x12c   : > { %17431 = vrot.lane.b32.xlu0 %v21071_v23, %s20677_s8 }
 0x12f   : > { %17446 = vrot.lane.b32.xlu1 %v21079_v28, %s20677_s8 }
 0x130   : > { %17441 = vrot.lane.b32.xlu0 %v21083_v29, %s20677_s8 }
 0x131   : > { %v21249_v25 = vpop.permute.xlu1 %17171 }
 0x132   : > { %v17162_v26 = vpop.permute.xlu0 %17161  ;;  %v28870_v56 = vunpack.i.l.bf16 %v21249_v25 }
 0x133   : > { %17456 = vrot.lane.b32.xlu1 %v21095_v34, %s20677_s8  ;;  %v17164_v44 = vunpack.i.h.bf16 %v17162_v26  ;;  %v17163_v45 = vunpack.i.l.bf16 %v17162_v26 }
 0x134   : > { %17451 = vrot.lane.b32.xlu0 %v21101_v35, %s20677_s8 }
 0x135   : > { %v17177_v27 = vpop.permute.xlu1 %17176  ;;  %v585_v6 = vsel %vm584_vm0, %v17163_v45, %v17164_v44 }
 0x136   : > { %v17167_v30 = vpop.permute.xlu0 %17166  ;;  %v17179_v31 = vunpack.i.h.bf16 %v17177_v27  ;;  %v17178_v38 = vunpack.i.l.bf16 %v17177_v27 }
 0x137   : > { %17466 = vrot.lane.b32.xlu1 %v21115_v40, %s20677_s8  ;;  %v17168_v39 = vunpack.i.l.bf16 %v17167_v30  ;;  %v17169_v42 = vunpack.i.h.bf16 %v17167_v30 }
 0x138   : > { %17461 = vrot.lane.b32.xlu0 %v21119_v41, %s20677_s8  ;;  %v590_v62 = vsel %vm584_vm0, %v17178_v38, %v17179_v31 }
 0x139   : > { %v21259_v43 = vpop.permute.xlu1 %17186  ;;  %v586_v61 = vsel %vm584_vm0, %v17164_v44, %v17168_v39  ;;  %v588_v5 = vsel %vm584_vm0, %v17169_v42, %v28870_v56  ;;  %v587_v38 = vsel %vm584_vm0, %v17168_v39, %v17169_v42 }
 0x13a   : > { %v28871_v48 = vunpack.i.l.bf16 %v21259_v43  ;;  %v17182_v49 = vpop.permute.xlu0 %17181 }
 0x13b   : > { %v17184_v57 = vunpack.i.h.bf16 %v17182_v49  ;;  %v17183_v60 = vunpack.i.l.bf16 %v17182_v49  ;;  %17476 = vrot.lane.b32.xlu1 %v21127_v46, %s20677_s8 }
 0x13c   : > { %17471 = vrot.lane.b32.xlu0 %v21131_v47, %s20677_s8 }
 0x13d   : > { %v17197_v63 = vpop.permute.xlu1 %17196  ;;  %v591_v2 = vsel %vm584_vm0, %v17179_v31, %v17183_v60  ;;  %v593_v26 = vsel %vm584_vm0, %v17184_v57, %v28871_v48  ;;  %v592_v27 = vsel %vm584_vm0, %v17183_v60, %v17184_v57  ;;  %v15352_v31 = vpack.c.bf16 %v590_v62, %v585_v6 }
 0x13e   : > { %v17192_v30 = vpop.permute.xlu0 %17191  ;;  %v15350_v49 = vpack.c.bf16 %v591_v2, %v586_v61  ;;  %v15366_v24 = vpack.c.bf16 %v593_v26, %v588_v5  ;;  %v15368_v4 = vpack.c.bf16 %v592_v27, %v587_v38  ;;  %v17198_v44 = vunpack.i.l.bf16 %v17197_v63 }
 0x13f   : > { %17486 = vrot.lane.b32.xlu1 %v21143_v52, %s20677_s8  ;;  %v17194_v39 = vunpack.i.h.bf16 %v17192_v30  ;;  %v17193_v61 = vunpack.i.l.bf16 %v17192_v30 }
 0x140   : > { %17481 = vrot.lane.b32.xlu0 %v21149_v53, %s20677_s8  ;;  %15351 = vmatprep.subr.bf16.mxu0 %v15350_v49 }
 0x141   : > { %15367 = vmatprep.subr.bf16.mxu1 %v15366_v24  ;;  %15353 = vmatpush1.bf16.msra.mxu0 %v15352_v31  ;;  %v17207_v56 = vpop.permute.xlu1 %17206  ;;  %v17199_v24 = vunpack.i.h.bf16 %v17197_v63 }
 0x142   : > { %15369 = vmatpush1.bf16.msra.mxu1 %v15368_v4  ;;  %v21283_v57 = vpop.permute.xlu0 %17201  ;;  %v17209_v42 = vunpack.i.h.bf16 %v17207_v56  ;;  %v17208_v45 = vunpack.i.l.bf16 %v17207_v56  ;;  %v596_v56 = vsel %vm584_vm0, %v17194_v39, %v17198_v44 }
 0x143   : > { %17496 = vrot.lane.b32.xlu1 %v21163_v58, %s20677_s8  ;;  %v28874_v6 = vunpack.i.l.bf16 %v21283_v57 }
 0x144   : > { %17491 = vrot.lane.b32.xlu0 %v21167_v59, %s20677_s8  ;;  %v600_v26 = vsel %vm584_vm0, %v17208_v45, %v17209_v42  ;;  %v597_v45 = vsel %vm584_vm0, %v17198_v44, %v17199_v24 }
 0x145   : > { %v21290_v60 = vpop.permute.xlu1 %17216  ;;  %v598_v63 = vsel %vm584_vm0, %v17199_v24, %v28874_v6 }
 0x146   : > { %v28875_v4 = vunpack.i.l.bf16 %v21290_v60  ;;  %v17212_v62 = vpop.permute.xlu0 %17211 }
 0x147   : > { %v17214_v2 = vunpack.i.h.bf16 %v17212_v62  ;;  %v17213_v5 = vunpack.i.l.bf16 %v17212_v62  ;;  %17506 = vrot.lane.b32.xlu1 %v21175_v0, %s20677_s8 }
 0x148   : > { %17501 = vrot.lane.b32.xlu0 %v21179_v1, %s20677_s8  ;;  %v595_v1 = vsel %vm584_vm0, %v17193_v61, %v17194_v39 }
 0x149   : > { %v17227_v27 = vpop.permute.xlu1 %17226  ;;  %v601_v49 = vsel %vm584_vm0, %v17209_v42, %v17213_v5  ;;  %v603_v30 = vsel %vm584_vm0, %v17214_v2, %v28875_v4  ;;  %v602_v38 = vsel %vm584_vm0, %v17213_v5, %v17214_v2  ;;  %v15356_v42 = vpack.c.bf16 %v600_v26, %v595_v1 }
 0x14a   : > { %v17222_v31 = vpop.permute.xlu0 %17221  ;;  %v15354_v62 = vpack.c.bf16 %v601_v49, %v596_v56  ;;  %v15370_v48 = vpack.c.bf16 %v603_v30, %v598_v63  ;;  %v15372_v0 = vpack.c.bf16 %v602_v38, %v597_v45  ;;  %v17228_v44 = vunpack.i.l.bf16 %v17227_v27 }
 0x14b   : > { %17516 = vrot.lane.b32.xlu1 %v21191_v20, %s20677_s8  ;;  %v17224_v39 = vunpack.i.h.bf16 %v17222_v31  ;;  %v17223_v56 = vunpack.i.l.bf16 %v17222_v31 }
 0x14c   : > { %17511 = vrot.lane.b32.xlu0 %v21197_v21, %s20677_s8  ;;  %15355 = vmatprep.subr.bf16.mxu0 %v15354_v62  ;;  %s20692_s8 = smov 112  }
 0x14d   : > { %15371 = vmatprep.subr.bf16.mxu1 %v15370_v48  ;;  %15357 = vmatpush1.bf16.msra.mxu0 %v15356_v42  ;;  %v17237_v6 = vpop.permute.xlu1 %17236  ;;  %v17229_v48 = vunpack.i.h.bf16 %v17227_v27 }
 0x14e   : > { %15373 = vmatpush1.bf16.msra.mxu1 %v15372_v0  ;;  %v21313_v2 = vpop.permute.xlu0 %17231  ;;  %v17239_v24 = vunpack.i.h.bf16 %v17237_v6  ;;  %v17238_v61 = vunpack.i.l.bf16 %v17237_v6  ;;  %v606_v6 = vsel %vm584_vm0, %v17224_v39, %v17228_v44 }
 0x14f   : > { %17526 = vrot.lane.b32.xlu1 %v21035_v11, %s20678_s13  ;;  %v28879_v1 = vunpack.i.l.bf16 %v21313_v2 }
 0x150   : > { %17521 = vrot.lane.b32.xlu0 %v21018_v7, %s20678_s13  ;;  %v610_v30 = vsel %vm584_vm0, %v17238_v61, %v17239_v24  ;;  %v607_v61 = vsel %vm584_vm0, %v17228_v44, %v17229_v48 }
 0x151   : > { %v21320_v5 = vpop.permute.xlu1 %17246  ;;  %v608_v27 = vsel %vm584_vm0, %v17229_v48, %v28879_v1 }
 0x152   : > { %v28880_v0 = vunpack.i.l.bf16 %v21320_v5  ;;  %v17242_v26 = vpop.permute.xlu0 %17241 }
 0x153   : > { %v17244_v49 = vunpack.i.h.bf16 %v17242_v26  ;;  %v17243_v63 = vunpack.i.l.bf16 %v17242_v26  ;;  %17536 = vrot.lane.b32.xlu1 %v21029_v10, %s20678_s13 }
 0x154   : > { %17531 = vrot.lane.b32.xlu0 %v21008_v3, %s20678_s13  ;;  %v605_v3 = vsel %vm584_vm0, %v17223_v56, %v17224_v39 }
 0x155   : > { %v17257_v38 = vpop.permute.xlu1 %17256  ;;  %v611_v62 = vsel %vm584_vm0, %v17239_v24, %v17243_v63  ;;  %v613_v31 = vsel %vm584_vm0, %v17244_v49, %v28880_v0  ;;  %v612_v45 = vsel %vm584_vm0, %v17243_v63, %v17244_v49  ;;  %v15360_v24 = vpack.c.bf16 %v610_v30, %v605_v3 }
 0x156   : > { %v17252_v42 = vpop.permute.xlu0 %17251  ;;  %v15358_v26 = vpack.c.bf16 %v611_v62, %v606_v6  ;;  %v15374_v4 = vpack.c.bf16 %v613_v31, %v608_v27  ;;  %v15376_v10 = vpack.c.bf16 %v612_v45, %v607_v61  ;;  %v17258_v39 = vunpack.i.l.bf16 %v17257_v38 }
 0x157   : > { %17546 = vrot.lane.b32.xlu1 %v21047_v16, %s20678_s13  ;;  %v17254_v44 = vunpack.i.h.bf16 %v17252_v42  ;;  %v17253_v6 = vunpack.i.l.bf16 %v17252_v42  ;;  %v17174_v31 = vunpack.i.h.bf16 %v21249_v25 }
 0x158   : > { %17541 = vrot.lane.b32.xlu0 %v21053_v17, %s20678_s13  ;;  %15359 = vmatprep.subr.bf16.mxu0 %v15358_v26 }
 0x159   : > { %15375 = vmatprep.subr.bf16.mxu1 %v15374_v4  ;;  %15361 = vmatpush1.bf16.msra.mxu0 %v15360_v24  ;;  %v17267_v1 = vpop.permute.xlu1 %17266  ;;  %v17259_v4 = vunpack.i.h.bf16 %v17257_v38  ;;  %v616_v45 = vsel %vm584_vm0, %v17254_v44, %v17258_v39 }
 0x15a   : > { %15377 = vmatpush1.bf16.msra.mxu1 %v15376_v10  ;;  %v21343_v49 = vpop.permute.xlu0 %17261  ;;  %v17269_v48 = vunpack.i.h.bf16 %v17267_v1  ;;  %v17268_v56 = vunpack.i.l.bf16 %v17267_v1  ;;  %v17189_v1 = vunpack.i.h.bf16 %v21259_v43 }
 0x15b   : > { %17556 = vrot.lane.b32.xlu1 %v21067_v22, %s20678_s13  ;;  %v28886_v3 = vunpack.i.l.bf16 %v21343_v49 }
 0x15c   : > { %17551 = vrot.lane.b32.xlu0 %v21071_v23, %s20678_s13  ;;  %v620_v38 = vsel %vm584_vm0, %v17268_v56, %v17269_v48  ;;  %v615_v56 = vsel %vm584_vm0, %v17253_v6, %v17254_v44  ;;  %v617_v23 = vsel %vm584_vm0, %v17258_v39, %v17259_v4  ;;  %v28889_v44 = vmov 0.0|0.0  }
 0x15d   : > { %v21350_v63 = vpop.permute.xlu1 %17276  ;;  %v618_v61 = vsel %vm584_vm0, %v17259_v4, %v28886_v3  ;;  %v15410_v3 = vpack.c.bf16 %v21043_v15, %v21024_v9  ;;  %v17204_v15 = vunpack.i.h.bf16 %v21283_v57  ;;  %v15412_v6 = vpack.c.bf16 %v21040_v14, %v21021_v8 }
 0x15e   : > { %v28887_v10 = vunpack.i.l.bf16 %v21350_v63  ;;  %v17272_v30 = vpop.permute.xlu0 %17271  ;;  %v29024_v14 = vunpack.i.l.bf16 %v21320_v5 }
 0x15f   : > { %v17274_v62 = vunpack.i.h.bf16 %v17272_v30  ;;  %v17273_v27 = vunpack.i.l.bf16 %v17272_v30  ;;  %17566 = vrot.lane.b32.xlu1 %v21079_v28, %s20678_s13 }
 0x160   : > { %17561 = vrot.lane.b32.xlu0 %v21083_v29, %s20678_s13 }
 0x161   : > { %v21361_v42 = vpop.permute.xlu1 %17286  ;;  %v621_v26 = vsel %vm584_vm0, %v17269_v48, %v17273_v27  ;;  %v623_v24 = vsel %vm584_vm0, %v17274_v62, %v28887_v10  ;;  %v622_v30 = vsel %vm584_vm0, %v17273_v27, %v17274_v62  ;;  %v15364_v48 = vpack.c.bf16 %v620_v38, %v615_v56 }
 0x162   : > { %v21371_v0 = vpop.permute.xlu0 %17281  ;;  %v15362_v29 = vpack.c.bf16 %v621_v26, %v616_v45  ;;  %v15378_v28 = vpack.c.bf16 %v623_v24, %v618_v61  ;;  %v15380_v22 = vpack.c.bf16 %v622_v30, %v617_v23  ;;  %v29019_v10 = vunpack.i.l.bf16 %v21259_v43 }
 0x163   : > { %17576 = vrot.lane.b32.xlu1 %v21095_v34, %s20678_s13  ;;  %v17219_v27 = vunpack.i.h.bf16 %v21290_v60  ;;  %v21387_v34 = vld [vmem:[#allocation5 + $0x28] sm:$0xff]  ;;  %v29020_v23 = vunpack.i.l.bf16 %v21249_v25  ;;  %v21409_v25 = vld [vmem:[#allocation5 + $0x30] sm:$0xff]  ;;  %v29025_v45 = vunpack.i.l.bf16 %v21313_v2  ;;  %v15418_v38 = vpack.c.bf16 %v21139_v51, %v21107_v37  ;;  %v21470_v51 = vld [vmem:[#allocation5 + $0x40] sm:$0xff] }
 0x164   : > { %v594_v62 = vsel %vm584_vm0, %v29019_v10, %v17189_v1  ;;  %17571 = vrot.lane.b32.xlu0 %v21101_v35, %s20678_s13  ;;  %15363 = vmatprep.subr.bf16.mxu0 %v15362_v29  ;;  %v29021_v29 = vunpack.i.l.bf16 %v21290_v60  ;;  %v17279_v1 = vunpack.i.h.bf16 %v21350_v63  ;;  %v15420_v26 = vpack.c.bf16 %v21136_v50, %v21104_v36 }
 0x165   : > { %15379 = vmatprep.subr.bf16.mxu1 %v15378_v28  ;;  %15365 = vmatpush1.bf16.msra.mxu0 %v15364_v48  ;;  %v21385_v39 = vpop.permute.xlu1 %17296  ;;  %v589_v9 = vsel %vm584_vm0, %v29020_v23, %v17174_v31  ;;  %v17234_v31 = vunpack.i.h.bf16 %v21313_v2  ;;  %v29027_v61 = vunpack.i.l.bf16 %v21343_v49  ;;  %v15422_v30 = vpack.c.bf16 %v21187_v13, %v21155_v55  ;;  %v21494_v55 = vld [vmem:[#allocation5 + $0x48] sm:$0xff]  ;;  %v346_v48 = vld [vmem:[%s20987_s26] sm:$0xff] }
 0x166   : > { %15381 = vmatpush1.bf16.msra.mxu1 %v15380_v22  ;;  %v21393_v43 = vpop.permute.xlu0 %17291  ;;  %15382 = vmatprep.subr.bf16.mxu0 %v28889_v44  ;;  %v15383_v28 = vpack.c.bf16 %v594_v62, %v589_v9  ;;  %v604_v35 = vsel %vm584_vm0, %v29021_v29, %v17219_v27  ;;  %v29028_v13 = vld [vmem:[#allocation20_spill] sm:$0xff]  ;;  %v351_v62 = vld [vmem:[%s20987_s26 + $0x30] sm:$0xff]  ;;  %v29030_v27 = vld [vmem:[#allocation27_spill] sm:$0xff] }
 0x167   : > { %17586 = vrot.lane.b32.xlu1 %v21115_v40, %s20678_s13  ;;  %15411 = vmatprep.subr.bf16.mxu1 %v15410_v3  ;;  %v29022_v40 = vunpack.i.l.bf16 %v21283_v57  ;;  %v17249_v3 = vunpack.i.h.bf16 %v21320_v5  ;;  %v15414_v57 = vpack.c.bf16 %v21091_v33, %v21059_v19  ;;  %v21441_v33 = vld [vmem:[#allocation5 + $0x38] sm:$0xff]  ;;  %v609_v5 = vsel %vm584_vm0, %v29025_v45, %v17234_v31  ;;  %v29031_v23 = vld [vmem:[#allocation28_spill] sm:$0xff] }
 0x168   : > { %17581 = vrot.lane.b32.xlu0 %v21119_v41, %s20678_s13  ;;  %13659 = vmatmul.mubr.msk.f32.vlgmr.msra.gmra.mrb[0].mxu0 %vm665_vm1, %v21387_v34  ;;  %v29023_v41 = vmov 0.0   ;;  %v15396_v29 = vpack.c.bf16 %v351_v62, %v346_v48  ;;  %v360_v31 = vld [vmem:[%s20987_s26 + $0x80] sm:$0xff] }
 0x169   : > { %13664 = vmatmul.mubr.msk.f32.vlgmr.msra.gmra.mrb[0].mxu1 %vm665_vm1, %v21387_v34  ;;  %15384 = vmatpush3.bf16.msra.mxu0 %v15383_v28  ;;  %v21407_v22 = vpop.permute.xlu1 %17306  ;;  %v599_v60 = vsel %vm584_vm0, %v29022_v40, %v17204_v15  ;;  %v350_v15 = vld [vmem:[%s20987_s26 + $0x20] sm:$0xff]  ;;  %v362_v28 = vld [vmem:[%s20987_s26 + $0x98] sm:$0xff] }
 0x16a   : > { %v21415_v4 = vpop.permute.xlu0 %17301  ;;  %751 = vmatprep.mubr.f32.mxu0 %v29023_v41  ;;  %846 = vmatprep.mubr.f32.mxu1 %v29023_v41  ;;  %v15386_v10 = vpack.c.bf16 %v604_v35, %v599_v60  ;;  %v21522_v35 = vld [vmem:[#allocation5] sm:$0xff] }
 0x16b   : > { %17596 = vrot.lane.b32.xlu1 %v21127_v46, %s20678_s13  ;;  %15385 = vmatprep.subr.bf16.mxu0 %v28889_v44  ;;  %v614_v46 = vsel %vm584_vm0, %v29024_v14, %v17249_v3  ;;  %v365_v14 = vld [vmem:[%s20987_s26 + $0xb0] sm:$0xff]  ;;  %v376_v62 = vld [vmem:[%s20987_s26 + $0x120] sm:$0xff] }
 0x16c   : > { %17591 = vrot.lane.b32.xlu0 %v21131_v47, %s20678_s13  ;;  %13660 = vmatmul.mubr.msk.f32.gmra.mrb[2].mxu0 %vm665_vm1, %v21409_v25  ;;  %v15416_v47 = vpack.c.bf16 %v21088_v32, %v21056_v18  ;;  %v17264_v18 = vunpack.i.h.bf16 %v21343_v49  ;;  %v15389_v32 = vpack.c.bf16 %v614_v46, %v609_v5  ;;  %v29029_v49 = vld [vmem:[#allocation21_spill] sm:$0xff] }
 0x16d   : > { %13665 = vmatmul.mubr.msk.f32.gmra.mrb[2].mxu1 %vm665_vm1, %v21409_v25  ;;  %15387 = vmatpush3.bf16.msra.mxu0 %v15386_v10  ;;  %v21433_v8 = vpop.permute.xlu1 %17316  ;;  %v15394_v56 = vpack.c.bf16 %v29029_v49, %v29028_v13  ;;  %v356_v10 = vld [vmem:[%s20987_s26 + $0x60] sm:$0xff]  ;;  %v367_v46 = vld [vmem:[%s20987_s26 + $0xc8] sm:$0xff]  ;;  %v17308_v13 = vunpack.i.l.bf16 %v21407_v22  ;;  %v17304_v49 = vunpack.i.h.bf16 %v21415_v4 }
 0x16e   : > { %15413 = vmatpush1.bf16.msra.mxu1 %v15412_v6  ;;  %v21438_v19 = vpop.permute.xlu0 %17311  ;;  %757 = vmatprep.mubr.f32.mxu0 %v29023_v41  ;;  %v619_v24 = vsel %vm584_vm0, %v29027_v61, %v17264_v18  ;;  %v371_v18 = vld [vmem:[%s20987_s26 + $0xf0] sm:$0xff]  ;;  %v382_v61 = vld [vmem:[%s20987_s26 + $0x158] sm:$0xff] }
 0x16f   : > { %852 = vmatprep.mubr.f32.mxu1 %v29023_v41  ;;  %15415 = vmatprep.subr.bf16.mxu1 %v15414_v57  ;;  %v361_v57 = vld [vmem:[%s20987_s26 + $0x90] sm:$0xff] }
 0x170   : > { %17606 = vrot.lane.b32.xlu1 %v21143_v52, %s20678_s13  ;;  %17601 = vrot.lane.b32.xlu0 %v21149_v53, %s20678_s13  ;;  %v29026_v53 = vunpack.i.l.bf16 %v21350_v63 }
 0x171   : > { %13661 = vmatmul.mubr.msk.f32.gmra.mrb[4].mxu0 %vm665_vm1, %v21441_v33  ;;  %13666 = vmatmul.mubr.msk.f32.gmra.mrb[4].mxu1 %vm665_vm1, %v21441_v33  ;;  %v21461_v2 = vpop.permute.xlu1 %17326 }
 0x172   : > { %15388 = vmatprep.subr.bf16.mxu0 %v28889_v44  ;;  %15417 = vmatpush1.bf16.msra.mxu1 %v15416_v47  ;;  %v21464_v52 = vpop.permute.xlu0 %17321  ;;  %v624_v37 = vsel %vm584_vm0, %v29026_v53, %v17279_v1  ;;  %v15400_v47 = vpack.c.bf16 %v361_v57, %v356_v10  ;;  %v15430_v1 = vpack.c.bf16 %v365_v14, %v360_v31  ;;  %v375_v53 = vld [vmem:[%s20987_s26 + $0x110] sm:$0xff]  ;;  %v17298_v10 = vunpack.i.l.bf16 %v21385_v39  ;;  %v21606_v14 = vld [vmem:[#allocation5 + $0x18] sm:$0xff] }
 0x173   : > { %15390 = vmatpush3.bf16.msra.mxu0 %v15389_v32  ;;  %763 = vmatprep.mubr.f32.mxu0 %v29023_v41  ;;  %v15392_v36 = vpack.c.bf16 %v624_v37, %v619_v24  ;;  %v370_v32 = vld [vmem:[%s20987_s26 + $0xe0] sm:$0xff]  ;;  %v17289_v31 = vunpack.i.h.bf16 %v21361_v42  ;;  %vm7897_vm0 = vcmask 924672  }
 0x174   : > { %858 = vmatprep.mubr.f32.mxu1 %v29023_v41  ;;  %15419 = vmatprep.subr.bf16.mxu1 %v15418_v38  ;;  %v366_v38 = vld [vmem:[%s20987_s26 + $0xc0] sm:$0xff] }
 0x175   : > { %17616 = vrot.lane.b32.xlu1 %v21163_v58, %s20678_s13  ;;  %17611 = vrot.lane.b32.xlu0 %v21167_v59, %s20678_s13  ;;  %v21482_v63 = vpop.permute.xlu1 %17336  ;;  %v15424_v58 = vpack.c.bf16 %v21184_v12, %v21152_v54  ;;  %v355_v54 = vld [vmem:[%s20987_s26 + $0x50] sm:$0xff]  ;;  %v357_v12 = vld [vmem:[%s20987_s26 + $0x68] sm:$0xff]  ;;  %v15404_v24 = vpack.c.bf16 %v371_v18, %v366_v38 }
 0x176   : > { %13662 = vmatmul.mubr.msk.f32.gmra.mrb[6].mxu0 %vm665_vm1, %v21470_v51  ;;  %13667 = vmatmul.mubr.msk.f32.gmra.mrb[6].mxu1 %vm665_vm1, %v21470_v51  ;;  %v21490_v50 = vpop.permute.xlu0 %17331  ;;  %v15427_v40 = vpack.c.bf16 %v355_v54, %v350_v15  ;;  %v15398_v6 = vpack.c.bf16 %v362_v28, %v357_v12  ;;  %v17284_v15 = vunpack.i.h.bf16 %v21371_v0  ;;  %v17299_v54 = vunpack.i.h.bf16 %v21385_v39  ;;  %v29033_v12 = vld [vmem:[#allocation19_spill] sm:$0xff]  ;;  %v385_v28 = vld [vmem:[%s20987_s26 + $0x170] sm:$0xff] }
 0x177   : > { %15391 = vmatprep.subr.bf16.mxu0 %v28889_v44  ;;  %15421 = vmatpush1.bf16.msra.mxu1 %v15420_v26  ;;  %v377_v26 = vld [vmem:[%s20987_s26 + $0x128] sm:$0xff] }
 0x178   : > { %15393 = vmatpush3.bf16.msra.mxu0 %v15392_v36  ;;  %769 = vmatprep.mubr.f32.mxu0 %v29023_v41  ;;  %v21575_v36 = vld [vmem:[#allocation5 + $0x10] sm:$0xff]  ;;  %v15406_v48 = vpack.c.bf16 %v382_v61, %v377_v26  ;;  %v17328_v26 = vunpack.i.l.bf16 %v21461_v2  ;;  %v17333_v61 = vunpack.i.l.bf16 %v21490_v50 }
 0x179   : > { %864 = vmatprep.mubr.f32.mxu1 %v29023_v41  ;;  %15423 = vmatprep.subr.bf16.mxu1 %v15422_v30  ;;  %v21499_v59 = vpop.permute.xlu1 %17346 }
 0x17a   : > { %17626 = vrot.lane.b32.xlu1 %v29030_v27, %s20678_s13  ;;  %17621 = vrot.lane.b32.xlu0 %v29031_v23, %s20678_s13  ;;  %v21509_v9 = vpop.permute.xlu0 %17341  ;;  %v381_v27 = vld [vmem:[%s20987_s26 + $0x150] sm:$0xff]  ;;  %v17288_v23 = vunpack.i.l.bf16 %v21361_v42  ;;  %v17283_v42 = vunpack.i.l.bf16 %v21371_v0  ;;  %v17318_v0 = vunpack.i.l.bf16 %v21433_v8 }
 0x17b   : > { %13663 = vmatmul.mubr.msk.f32.gmra.mrb[8].mxu0 %vm665_vm1, %v21494_v55  ;;  %13668 = vmatmul.mubr.msk.f32.gmra.mrb[8].mxu1 %vm665_vm1, %v21494_v55 }
 0x17c   : > { %15425 = vmatpush1.bf16.msra.mxu1 %v15424_v58  ;;  %14531 = vmatprep.mubr.msk.f32.mxu0 %vm20680_vm2, %v29023_v41  ;;  %v15433_v58 = vpack.c.bf16 %v375_v53, %v370_v32  ;;  %v1360_v39 = vsel %vm1358_vm3, %v17284_v15, %v17288_v23  ;;  %v17314_v32 = vunpack.i.h.bf16 %v21438_v19  ;;  %v17329_v53 = vunpack.i.h.bf16 %v21461_v2  ;;  %v20092_v2 = vld [vmem:[%s20987_s26 + $0xb0] sm:$0xff] }
 0x17d   : > { %15395 = vmatprep.subr.bf16.mxu0 %v15394_v56  ;;  %1135 = vmatprep.mubr.f32.mxu1 %v29023_v41  ;;  %v21524_v60 = vpop.permute.xlu1 %17356  ;;  %v29032_v56 = vld [vmem:[#allocation22_spill] sm:$0xff] }
 0x17e   : > { %15426 = vmatprep.subr.bf16.mxu1 %v28889_v44  ;;  %17636 = vrot.lane.b32.xlu1 %v21191_v20, %s20678_s13  ;;  %v21529_v3 = vpop.permute.xlu0 %17351  ;;  %v372_v20 = vld [vmem:[%s20987_s26 + $0xf8] sm:$0xff] }
 0x17f   : > { %17631 = vrot.lane.b32.xlu0 %v21197_v21, %s20678_s13  ;;  %14532 = vmatmul.mubr.msk.f32.vlgmr.msra.gmra.mrb[10].mxu0 %vm665_vm1, %v21387_v34  ;;  %v21548_v34 = vld [vmem:[#allocation5 + $0x8] sm:$0xff]  ;;  %v15402_v5 = vpack.c.bf16 %v372_v20, %v367_v46  ;;  %v1367_v20 = vsel %vm1358_vm3, %v17304_v49, %v17308_v13  ;;  %s20693_s13 = smov 111  }
 0x180   : > { %15397 = vmatpush1.bf16.msra.mxu0 %v15396_v29  ;;  %13679 = vmatmul.mubr.msk.f32.vlgmr.msra.gmra.mrb[0].mxu1 %vm665_vm1, %v21522_v35 }
 0x181   : > { %15428 = vmatpush3.bf16.msra.mxu1 %v15427_v40  ;;  %14534 = vmatprep.mubr.msk.f32.mxu0 %vm20680_vm2, %v29023_v41  ;;  %v21545_v21 = vpop.permute.xlu1 %17366  ;;  %v17293_v40 = vunpack.i.l.bf16 %v21393_v43 }
 0x182   : > { %15399 = vmatprep.subr.bf16.mxu0 %v15398_v6  ;;  %1141 = vmatprep.mubr.f32.mxu1 %v29023_v41  ;;  %v21550_v45 = vpop.permute.xlu0 %17361 }
 0x183   : > { %15429 = vmatprep.subr.bf16.mxu1 %v28889_v44  ;;  %17646 = vrot.lane.b32.xlu1 %v21035_v11, %s20681_s20 }
 0x184   : > { %17641 = vrot.lane.b32.xlu0 %v21018_v7, %s20681_s20  ;;  %14535 = vmatmul.mubr.msk.f32.gmra.mrb[12].mxu0 %vm665_vm1, %v21409_v25  ;;  %v17303_v25 = vunpack.i.l.bf16 %v21415_v4  ;;  %v380_v4 = vld [vmem:[%s20987_s26 + $0x140] sm:$0xff] }
 0x185   : > { %15401 = vmatpush1.bf16.msra.mxu0 %v15400_v47  ;;  %13680 = vmatmul.mubr.msk.f32.gmra.mrb[2].mxu1 %vm665_vm1, %v21548_v34  ;;  %v21565_v37 = vpop.permute.xlu1 %17376  ;;  %v15436_v46 = vpack.c.bf16 %v385_v28, %v380_v4  ;;  %v20094_v28 = vld [vmem:[%s20987_s26 + $0xa0] sm:$0xff] }
 0x186   : > { %15431 = vmatpush3.bf16.msra.mxu1 %v15430_v1  ;;  %14537 = vmatprep.mubr.msk.f32.mxu0 %vm20680_vm2, %v29023_v41  ;;  %v21571_v30 = vpop.permute.xlu0 %17371  ;;  %v1365_v57 = vsel %vm1358_vm3, %v17299_v54, %v17303_v25  ;;  %v21631_v18 = vsel %vm1358_vm3, %v17303_v25, %v17304_v49  ;;  %v17338_v25 = vunpack.i.l.bf16 %v21482_v63  ;;  %v21645_v49 = vld [vmem:[#allocation5 + $0x20] sm:$0xff] }
 0x187   : > { %15403 = vmatprep.subr.bf16.mxu0 %v15402_v5  ;;  %1147 = vmatprep.mubr.f32.mxu1 %v29023_v41  ;;  %v15438_v1 = vpack.c.bf16 %v1365_v57, %v1360_v39  ;;  %v1362_v5 = vsel %vm1358_vm3, %v17289_v31, %v17293_v40  ;;  %v17319_v57 = vunpack.i.h.bf16 %v21433_v8  ;;  %v1370_v8 = vsel %vm1358_vm3, %v17314_v32, %v17318_v0 }
 0x188   : > { %15432 = vmatprep.subr.bf16.mxu1 %v28889_v44  ;;  %17656 = vrot.lane.b32.xlu1 %v29032_v56, %s20681_s20 }
 0x189   : > { %17651 = vrot.lane.b32.xlu0 %v29033_v12, %s20681_s20  ;;  %14538 = vmatmul.mubr.msk.f32.gmra.mrb[14].mxu0 %vm665_vm1, %v21441_v33  ;;  %v21593_v29 = vpop.permute.xlu1 %17386  ;;  %v15408_v33 = vpack.c.bf16 %v381_v27, %v376_v62  ;;  %v20093_v62 = vld [vmem:[%s20987_s26 + $0xb8] sm:$0xff]  ;;  %v1359_v12 = vsel %vm1358_vm3, %v17283_v42, %v17284_v15  ;;  %v17313_v42 = vunpack.i.l.bf16 %v21438_v19 }
 0x18a   : > { %15405 = vmatpush1.bf16.msra.mxu0 %v15404_v24  ;;  %13681 = vmatmul.mubr.msk.f32.gmra.mrb[4].mxu1 %vm665_vm1, %v21575_v36  ;;  %v21598_v6 = vpop.permute.xlu0 %17381  ;;  %v28888_v24 = vunpack.i.l.bf16 %v21464_v52  ;;  %v21651_v27 = vpack.i.bf16 %v20093_v62, %v20092_v2  ;;  %v17364_v2 = vunpack.i.h.bf16 %v21550_v45  ;;  %v29036_v62 = vld [vmem:[#allocation25_spill] sm:$0xff] }
 0x18b   : > { %15434 = vmatpush3.bf16.msra.mxu1 %v15433_v58  ;;  %14540 = vmatprep.mubr.msk.f32.mxu0 %vm20680_vm2, %v29023_v41  ;;  %v17334_v58 = vunpack.i.h.bf16 %v21490_v50  ;;  %v29034_v50 = vld [vmem:[#allocation23_spill] sm:$0xff] }
 0x18c   : > { %15407 = vmatprep.subr.bf16.mxu0 %v15406_v48  ;;  %1153 = vmatprep.mubr.f32.mxu1 %v29023_v41  ;;  %v1372_v19 = vsel %vm1358_vm3, %v17319_v57, %v28888_v24 }
 0x18d   : > { %15435 = vmatprep.subr.bf16.mxu1 %v28889_v44  ;;  %17666 = vrot.lane.b32.xlu1 %v21047_v16, %s20681_s20  ;;  %v21615_v47 = vpop.permute.xlu1 %17396  ;;  %v21628_v16 = vsel %vm1358_vm3, %v17298_v10, %v17299_v54  ;;  %v1361_v54 = vsel %vm1358_vm3, %v17288_v23, %v17289_v31  ;;  %v20095_v10 = vld [vmem:[%s20987_s26 + $0xa8] sm:$0xff]  ;;  %v20096_v31 = vld [vmem:[%s20987_s26 + $0xd0] sm:$0xff] }
 0x18e   : > { %17661 = vrot.lane.b32.xlu0 %v21053_v17, %s20681_s20  ;;  %14541 = vmatmul.mubr.msk.f32.gmra.mrb[16].mxu0 %vm665_vm1, %v21470_v51  ;;  %v21625_v38 = vpop.permute.xlu0 %17391  ;;  %v15454_v51 = vpack.c.bf16 %v1367_v20, %v1362_v5  ;;  %v15440_v23 = vpack.c.bf16 %v21628_v16, %v1359_v12  ;;  %v15456_v15 = vpack.c.bf16 %v21631_v18, %v1361_v54  ;;  %v20097_v20 = vld [vmem:[%s20987_s26 + $0xd8] sm:$0xff]  ;;  %v17363_v16 = vunpack.i.l.bf16 %v21550_v45 }
 0x18f   : > { %15409 = vmatpush1.bf16.msra.mxu0 %v15408_v33  ;;  %13682 = vmatmul.mubr.msk.f32.gmra.mrb[6].mxu1 %vm665_vm1, %v21606_v14  ;;  %v21662_v33 = vpack.i.bf16 %v20095_v10, %v20094_v28  ;;  %v21673_v39 = vpack.i.bf16 %v20097_v20, %v20096_v31  ;;  %v21683_v5 = vsel %vm1358_vm3, %v17333_v61, %v17334_v58  ;;  %v17359_v12 = vunpack.i.h.bf16 %v21524_v60  ;;  %v29037_v10 = vld [vmem:[#allocation26_spill] sm:$0xff] }
 0x190   : > { %15437 = vmatpush3.bf16.msra.mxu1 %v15436_v46  ;;  %15439 = vmatprep.subr.bf16.mxu0 %v15438_v1  ;;  %v29035_v46 = vld [vmem:[#allocation24_spill] sm:$0xff]  ;;  %v1374_v1 = vsel %vm1358_vm3, %v17328_v26, %v17329_v53  ;;  %v1377_v18 = vsel %vm1358_vm3, %v17334_v58, %v17338_v25  ;;  %v17344_v26 = vunpack.i.h.bf16 %v21509_v9  ;;  %v17358_v28 = vunpack.i.l.bf16 %v21524_v60 }
 0x191   : > { %15455 = vmatprep.subr.bf16.mxu1 %v15454_v51  ;;  %14543 = vmatprep.mubr.msk.f32.mxu0 %vm20680_vm2, %v29023_v41  ;;  %v21647_v48 = vpop.permute.xlu1 %17406  ;;  %v28891_v58 = vunpack.i.l.bf16 %v21529_v3  ;;  %v1371_v45 = vsel %vm1358_vm3, %v17318_v0, %v17319_v57  ;;  %v1369_v31 = vsel %vm1358_vm3, %v17313_v42, %v17314_v32  ;;  %v15458_v20 = vpack.c.bf16 %v1377_v18, %v1372_v19 }
 0x192   : > { %1159 = vmatprep.mubr.f32.mxu1 %v29023_v41  ;;  %17676 = vrot.lane.b32.xlu1 %v29034_v50, %s20681_s20  ;;  %v21658_v4 = vpop.permute.xlu0 %17401  ;;  %v17349_v60 = vunpack.i.h.bf16 %v21499_v59  ;;  %v1385_v24 = vsel %vm1358_vm3, %v17359_v12, %v17363_v16  ;;  %v17393_v0 = vunpack.i.l.bf16 %v21625_v38  ;;  %v1384_v57 = vsel %vm1358_vm3, %v17358_v28, %v17359_v12  ;;  %v20098_v12 = vld [vmem:[%s20987_s26 + $0xc0] sm:$0xff]  ;;  %v20099_v28 = vld [vmem:[%s20987_s26 + $0xc8] sm:$0xff] }
 0x193   : > { %17671 = vrot.lane.b32.xlu0 %v29035_v46, %s20681_s20  ;;  %14544 = vmatmul.mubr.msk.f32.gmra.mrb[18].mxu0 %vm665_vm1, %v21494_v55  ;;  %v1375_v55 = vsel %vm1358_vm3, %v17329_v53, %v17333_v61  ;;  %v17348_v53 = vunpack.i.l.bf16 %v21499_v59  ;;  %v28892_v61 = vunpack.i.l.bf16 %v21545_v21  ;;  %v28900_v19 = vunpack.i.l.bf16 %v21598_v6 }
 0x194   : > { %13683 = vmatmul.mubr.msk.f32.gmra.mrb[8].mxu1 %vm665_vm1, %v21645_v49  ;;  %1040 = vmatprep.mubr.f32.mxu0 %v29023_v41  ;;  %v15442_v46 = vpack.c.bf16 %v1375_v55, %v1370_v8  ;;  %v1382_v42 = vsel %vm1358_vm3, %v17349_v60, %v28891_v58  ;;  %v17374_v8 = vunpack.i.h.bf16 %v21571_v30  ;;  %v17389_v55 = vunpack.i.h.bf16 %v21593_v29 }
 0x195   : > { %14562 = vmatprep.mubr.msk.f32.mxu1 %vm20680_vm2, %v29023_v41  ;;  %v21694_v51 = vpop.permute.xlu1 %17416  ;;  %v1380_v32 = vsel %vm1358_vm3, %v17344_v26, %v17348_v53  ;;  %v1387_v59 = vsel %vm1358_vm3, %v17364_v2, %v28892_v61 }
 0x196   : > { %17686 = vrot.lane.b32.xlu1 %v29036_v62, %s20681_s20  ;;  %v21702_v54 = vpop.permute.xlu0 %17411  ;;  %v17343_v62 = vunpack.i.l.bf16 %v21509_v9  ;;  %v15462_v18 = vpack.c.bf16 %v1387_v59, %v1382_v42  ;;  %v1381_v59 = vsel %vm1358_vm3, %v17348_v53, %v17349_v60  ;;  %v17379_v42 = vunpack.i.h.bf16 %v21565_v37 }
 0x197   : > { %17681 = vrot.lane.b32.xlu0 %v29037_v10, %s20681_s20  ;;  %13674 = vmatmul.mubr.msk.f32.vlgmr.msra.gmra.mrb[0].mxu0 %vm665_vm1, %v21522_v35  ;;  %v15444_v10 = vpack.c.bf16 %v1374_v1, %v1369_v31  ;;  %v17378_v1 = vunpack.i.l.bf16 %v21565_v37  ;;  %v20101_v31 = vld [vmem:[%s20987_s26 + $0xf8] sm:$0xff] }
 0x198   : > { %14563 = vmatmul.mubr.msk.f32.vlgmr.msra.gmra.mrb[10].mxu1 %vm665_vm1, %v21522_v35  ;;  %15441 = vmatpush1.bf16.msra.mxu0 %v15440_v23  ;;  %v15460_v35 = vpack.c.bf16 %v21683_v5, %v1371_v45  ;;  %v17398_v23 = vunpack.i.l.bf16 %v21615_v47  ;;  %v15446_v5 = vpack.c.bf16 %v1385_v24, %v1380_v32  ;;  %v20100_v45 = vld [vmem:[%s20987_s26 + $0xf0] sm:$0xff]  ;;  %v1379_v61 = vsel %vm1358_vm3, %v17343_v62, %v17344_v26 }
 0x199   : > { %15457 = vmatpush1.bf16.msra.mxu1 %v15456_v15  ;;  %15443 = vmatprep.subr.bf16.mxu0 %v15442_v46  ;;  %v21718_v44 = vpop.permute.xlu1 %17426  ;;  %v17394_v15 = vunpack.i.h.bf16 %v21625_v38  ;;  %v21751_v46 = vpack.i.bf16 %v20099_v28, %v20098_v12  ;;  %v1386_v24 = vsel %vm1358_vm3, %v17363_v16, %v17364_v2  ;;  %v17388_v32 = vunpack.i.l.bf16 %v21593_v29  ;;  %v20103_v12 = vld [vmem:[%s20987_s26 + $0xe8] sm:$0xff] }
 0x19a   : > { %15459 = vmatprep.subr.bf16.mxu1 %v15458_v20  ;;  %1046 = vmatprep.mubr.f32.mxu0 %v29023_v41  ;;  %v21727_v9 = vpop.permute.xlu0 %17421  ;;  %v21755_v20 = vpack.i.bf16 %v20101_v31, %v20100_v45  ;;  %v15448_v26 = vpack.c.bf16 %v1384_v57, %v1379_v61  ;;  %v17373_v16 = vunpack.i.l.bf16 %v21571_v30  ;;  %v1390_v37 = vsel %vm1358_vm3, %v17374_v8, %v17378_v1 }
 0x19b   : > { %14565 = vmatprep.mubr.msk.f32.mxu1 %vm20680_vm2, %v29023_v41  ;;  %17696 = vrot.lane.b32.xlu1 %v21651_v27, %s20681_s20  ;;  %v1397_v29 = vsel %vm1358_vm3, %v17394_v15, %v17398_v23  ;;  %v28896_v53 = vunpack.i.l.bf16 %v21718_v44  ;;  %v17424_v61 = vunpack.i.h.bf16 %v21727_v9  ;;  %v15464_v30 = vpack.c.bf16 %v1386_v24, %v1381_v59  ;;  %v20104_v24 = vld [vmem:[%s20987_s26 + $0x110] sm:$0xff] }
 0x19c   : > { %17691 = vrot.lane.b32.xlu0 %v21662_v33, %s20681_s20  ;;  %13675 = vmatmul.mubr.msk.f32.gmra.mrb[2].mxu0 %vm665_vm1, %v21548_v34  ;;  %v1392_v60 = vsel %vm1358_vm3, %v17379_v42, %v28900_v19  ;;  %v28895_v57 = vunpack.i.l.bf16 %v21702_v54  ;;  %v1396_v31 = vsel %vm1358_vm3, %v17393_v0, %v17394_v15  ;;  %v1391_v15 = vsel %vm1358_vm3, %v17378_v1, %v17379_v42  ;;  %v20106_v42 = vld [vmem:[%s20987_s26 + $0x100] sm:$0xff] }
 0x19d   : > { %14566 = vmatmul.mubr.msk.f32.gmra.mrb[12].mxu1 %vm665_vm1, %v21548_v34  ;;  %15445 = vmatpush1.bf16.msra.mxu0 %v15444_v10  ;;  %v21757_v58 = vpop.permute.xlu1 %17436  ;;  %v1395_v34 = vsel %vm1358_vm3, %v17389_v55, %v17393_v0  ;;  %v1870_v38 = vsel %vm1861_vm4, %v17424_v61, %v28896_v53  ;;  %v17309_v0 = vunpack.i.h.bf16 %v21407_v22  ;;  %v15468_v1 = vpack.c.bf16 %v1396_v31, %v1391_v15  ;;  %v20110_v22 = vld [vmem:[%s20987_s26 + $0x120] sm:$0xff] }
 0x19e   : > { %15461 = vmatpush1.bf16.msra.mxu1 %v15460_v35  ;;  %15447 = vmatprep.subr.bf16.mxu0 %v15446_v5  ;;  %v21765_v10 = vpop.permute.xlu0 %17431  ;;  %v15450_v2 = vpack.c.bf16 %v1395_v34, %v1390_v37  ;;  %v1394_v35 = vsel %vm1358_vm3, %v17388_v32, %v17389_v55  ;;  %v15466_v5 = vpack.c.bf16 %v1397_v29, %v1392_v60  ;;  %v20105_v32 = vld [vmem:[%s20987_s26 + $0x118] sm:$0xff]  ;;  %v17339_v31 = vunpack.i.h.bf16 %v21482_v63 }
 0x19f   : > { %15463 = vmatprep.subr.bf16.mxu1 %v15462_v18  ;;  %1052 = vmatprep.mubr.f32.mxu0 %v29023_v41  ;;  %v20102_v18 = vld [vmem:[%s20987_s26 + $0xe0] sm:$0xff]  ;;  %v1389_v55 = vsel %vm1358_vm3, %v17373_v16, %v17374_v8  ;;  %v21819_v34 = vpack.i.bf16 %v20105_v32, %v20104_v24  ;;  %v20113_v24 = vld [vmem:[%s20987_s26 + $0x158] sm:$0xff]  ;;  %v17369_v63 = vunpack.i.h.bf16 %v21545_v21 }
 0x1a0   : > { %14568 = vmatprep.mubr.msk.f32.mxu1 %vm20680_vm2, %v29023_v41  ;;  %17706 = vrot.lane.b32.xlu1 %v21673_v39, %s20681_s20  ;;  %v21796_v28 = vpack.i.bf16 %v20103_v12, %v20102_v18  ;;  %v15452_v8 = vpack.c.bf16 %v1394_v35, %v1389_v55  ;;  %v20108_v35 = vld [vmem:[%s20987_s26 + $0x130] sm:$0xff]  ;;  %v1368_v12 = vsel %vm1358_vm3, %v17308_v13, %v17309_v0  ;;  %v20111_v13 = vld [vmem:[%s20987_s26 + $0x128] sm:$0xff] }
 0x1a1   : > { %17701 = vrot.lane.b32.xlu0 %v21751_v46, %s20681_s20  ;;  %13676 = vmatmul.mubr.msk.f32.gmra.mrb[4].mxu0 %vm665_vm1, %v21575_v36  ;;  %v21788_v62 = vpop.permute.xlu1 %17446  ;;  %v21865_v0 = vpack.i.bf16 %v20111_v13, %v20110_v22  ;;  %v20114_v22 = vld [vmem:[%s20987_s26 + $0x140] sm:$0xff]  ;;  %v20115_v13 = vld [vmem:[%s20987_s26 + $0x148] sm:$0xff] }
 0x1a2   : > { %14569 = vmatmul.mubr.msk.f32.gmra.mrb[14].mxu1 %vm665_vm1, %v21575_v36  ;;  %15449 = vmatpush1.bf16.msra.mxu0 %v15448_v26  ;;  %v21798_v45 = vpop.permute.xlu0 %17441  ;;  %v17409_v36 = vunpack.i.h.bf16 %v21647_v48  ;;  %v20107_v26 = vld [vmem:[%s20987_s26 + $0x108] sm:$0xff] }
 0x1a3   : > { %15465 = vmatpush1.bf16.msra.mxu1 %v15464_v30  ;;  %15451 = vmatprep.subr.bf16.mxu0 %v15450_v2  ;;  %v21829_v29 = vpack.i.bf16 %v20107_v26, %v20106_v42  ;;  %v17294_v30 = vunpack.i.h.bf16 %v21393_v43  ;;  %v17423_v2 = vunpack.i.l.bf16 %v21727_v9  ;;  %v28899_v26 = vunpack.i.l.bf16 %v21647_v48 }
 0x1a4   : > { %15467 = vmatprep.subr.bf16.mxu1 %v15466_v5  ;;  %1058 = vmatprep.mubr.f32.mxu0 %v29023_v41  ;;  %v1865_v16 = vsel %vm1861_vm4, %v17409_v36, %v28895_v57  ;;  %v20109_v5 = vld [vmem:[%s20987_s26 + $0x138] sm:$0xff]  ;;  %v17324_v43 = vunpack.i.h.bf16 %v21464_v52 }
 0x1a5   : > { %14571 = vmatprep.mubr.msk.f32.mxu1 %vm20680_vm2, %v29023_v41  ;;  %17716 = vrot.lane.b32.xlu1 %v21755_v20, %s20681_s20  ;;  %v21821_v59 = vpop.permute.xlu1 %17456  ;;  %v15498_v60 = vpack.c.bf16 %v1870_v38, %v1865_v16  ;;  %v21845_v18 = vpack.i.bf16 %v20109_v5, %v20108_v35  ;;  %v1363_v42 = vsel %vm1358_vm3, %v17293_v40, %v17294_v30  ;;  %v28894_v35 = vunpack.i.l.bf16 %v21798_v45  ;;  %v21886_v5 = vld [vmem:[#allocation5 + $0x50] sm:$0xff] }
 0x1a6   : > { %17711 = vrot.lane.b32.xlu0 %v21796_v28, %s20681_s20  ;;  %13677 = vmatmul.mubr.msk.f32.gmra.mrb[6].mxu0 %vm665_vm1, %v21606_v14  ;;  %v21836_v37 = vpop.permute.xlu0 %17451  ;;  %v1869_v16 = vsel %vm1861_vm4, %v17423_v2, %v17424_v61  ;;  %v17439_v40 = vunpack.i.h.bf16 %v21757_v58  ;;  %v15471_v30 = vpack.c.bf16 %v1368_v12, %v1363_v42  ;;  %v21894_v61 = vpack.i.bf16 %v20115_v13, %v20114_v22  ;;  %v21925_v22 = vld [vmem:[#allocation5 + $0x58] sm:$0xff] }
 0x1a7   : > { %14572 = vmatmul.mubr.msk.f32.gmra.mrb[16].mxu1 %vm665_vm1, %v21606_v14  ;;  %15453 = vmatpush1.bf16.msra.mxu0 %v15452_v8  ;;  %v28893_v14 = vunpack.i.l.bf16 %v21821_v59  ;;  %v17454_v55 = vunpack.i.h.bf16 %v21836_v37  ;;  %v28898_v15 = vunpack.i.l.bf16 %v21836_v37  ;;  %v20112_v8 = vld [vmem:[%s20987_s26 + $0x150] sm:$0xff] }
 0x1a8   : > { %15469 = vmatpush1.bf16.msra.mxu1 %v15468_v1  ;;  %1064 = vmatprep.mubr.f32.mxu0 %v29023_v41  ;;  %v21870_v32 = vpack.i.bf16 %v20113_v24, %v20112_v8  ;;  %v29038_v8 = vmov 0.0|0.0   ;;  %v1875_v13 = vsel %vm1861_vm4, %v17439_v40, %v28894_v35  ;;  %v20116_v35 = vld [vmem:[%s20987_s26 + $0x170] sm:$0xff] }
 0x1a9   : > { %14574 = vmatprep.mubr.msk.f32.mxu1 %vm20680_vm2, %v29023_v41  ;;  %17726 = vrot.lane.b32.xlu1 %v21819_v34, %s20681_s20  ;;  %v21857_v38 = vpop.permute.xlu1 %17466  ;;  %v1880_v12 = vsel %vm1861_vm4, %v17454_v55, %v28893_v14  ;;  %v17354_v14 = vunpack.i.h.bf16 %v21529_v3 }
 0x1aa   : > { %17721 = vrot.lane.b32.xlu0 %v21829_v29, %s20681_s20  ;;  %13678 = vmatmul.mubr.msk.f32.gmra.mrb[8].mxu0 %vm665_vm1, %v21645_v49  ;;  %v21872_v1 = vpop.permute.xlu0 %17461 }
 0x1ab   : > { %14575 = vmatmul.mubr.msk.f32.gmra.mrb[18].mxu1 %vm665_vm1, %v21645_v49  ;;  %15499 = vmatprep.subr.bf16.mxu1 %v15498_v60  ;;  %v1378_v49 = vsel %vm1358_vm3, %v17338_v25, %v17339_v31  ;;  %v1864_v60 = vsel %vm1861_vm4, %v28899_v26, %v17409_v36  ;;  %v28897_v25 = vunpack.i.l.bf16 %v21757_v58  ;;  %v1879_v31 = vsel %vm1861_vm4, %v28898_v15, %v17454_v55 }
 0x1ac   : > { %1518 = vmatprep.mubr.f32.mxu0 %v29023_v41  ;;  %1613 = vmatprep.mubr.f32.mxu1 %v29023_v41  ;;  %v15500_v36 = vpack.c.bf16 %v1869_v16, %v1864_v60  ;;  %v29039_v16 = vunpack.i.l.bf16 %v21464_v52  ;;  %v17419_v15 = vunpack.i.h.bf16 %v21694_v51 }
 0x1ad   : > { %15470 = vmatprep.subr.bf16.mxu0 %v29038_v8  ;;  %17736 = vrot.lane.b32.xlu1 %v21845_v18, %s20681_s20  ;;  %v21910_v24 = vpop.permute.xlu1 %17476  ;;  %v1874_v55 = vsel %vm1861_vm4, %v28897_v25, %v17439_v40  ;;  %v29040_v40 = vunpack.i.l.bf16 %v21545_v21  ;;  %v17399_v25 = vunpack.i.h.bf16 %v21615_v47  ;;  %v21963_v21 = vld [vmem:[#allocation5 + $0x60] sm:$0xff]  ;;  %v21997_v47 = vld [vmem:[#allocation5 + $0x68] sm:$0xff] }
 0x1ae   : > { %17731 = vrot.lane.b32.xlu0 %v21865_v0, %s20681_s20  ;;  %13689 = vmatmul.mubr.msk.f32.vlgmr.msra.gmra.mrb[0].mxu0 %vm665_vm1, %v21886_v5  ;;  %v21921_v42 = vpop.permute.xlu0 %17471  ;;  %v1373_v60 = vsel %vm1358_vm3, %v29039_v16, %v17324_v43  ;;  %v20117_v43 = vld [vmem:[%s20987_s26 + $0x178] sm:$0xff]  ;;  %v15504_v57 = vpack.c.bf16 %v1879_v31, %v1874_v55 }
 0x1af   : > { %13694 = vmatmul.mubr.msk.f32.vlgmr.msra.gmra.mrb[0].mxu1 %vm665_vm1, %v21886_v5  ;;  %15472 = vmatpush3.bf16.msra.mxu0 %v15471_v30  ;;  %v15502_v30 = vpack.c.bf16 %v1880_v12, %v1875_v13  ;;  %v15474_v52 = vpack.c.bf16 %v1378_v49, %v1373_v60  ;;  %v21943_v16 = vpack.i.bf16 %v20117_v43, %v20116_v35  ;;  %v20118_v49 = vld [vmem:[%s20987_s26 + $0x160] sm:$0xff]  ;;  %v20119_v12 = vld [vmem:[%s20987_s26 + $0x168] sm:$0xff]  ;;  %v29041_v43 = vunpack.i.l.bf16 %v21529_v3 }
 0x1b0   : > { %15501 = vmatpush1.bf16.msra.mxu1 %v15500_v36  ;;  %1524 = vmatprep.mubr.f32.mxu0 %v29023_v41  ;;  %v1388_v36 = vsel %vm1358_vm3, %v29040_v40, %v17369_v63  ;;  %v21957_v13 = vpack.i.bf16 %v20119_v12, %v20118_v49  ;;  %v28901_v63 = vunpack.i.l.bf16 %v21921_v42  ;;  %v17384_v49 = vunpack.i.h.bf16 %v21598_v6 }
 0x1b1   : > { %15473 = vmatprep.subr.bf16.mxu0 %v29038_v8  ;;  %17746 = vrot.lane.b32.xlu1 %v21870_v32, %s20681_s20  ;;  %v21945_v53 = vpop.permute.xlu1 %17486  ;;  %v1383_v40 = vsel %vm1358_vm3, %v29041_v43, %v17354_v14  ;;  %v17469_v12 = vunpack.i.h.bf16 %v21857_v38  ;;  %v1398_v14 = vsel %vm1358_vm3, %v17398_v23, %v17399_v25  ;;  %v1868_v23 = vsel %vm1861_vm4, %v17419_v15, %v17423_v2 }
 0x1b2   : > { %17741 = vrot.lane.b32.xlu0 %v21894_v61, %s20681_s20  ;;  %13690 = vmatmul.mubr.msk.f32.gmra.mrb[2].mxu0 %vm665_vm1, %v21925_v22  ;;  %v28902_v35 = vunpack.i.l.bf16 %v21945_v53  ;;  %v21960_v31 = vpop.permute.xlu0 %17481  ;;  %v15477_v26 = vpack.c.bf16 %v1388_v36, %v1383_v40  ;;  %v29042_v43 = vunpack.i.l.bf16 %v21598_v6  ;;  %v17418_v2 = vunpack.i.l.bf16 %v21694_v51  ;;  %v20120_v51 = vld [vmem:[%s20987_s26 + $0x20] sm:$0xff] }
 0x1b3   : > { %15475 = vmatpush3.bf16.msra.mxu0 %v15474_v52  ;;  %1530 = vmatprep.mubr.f32.mxu0 %v29023_v41  ;;  %v17484_v60 = vunpack.i.h.bf16 %v21960_v31  ;;  %v17483_v55 = vunpack.i.l.bf16 %v21960_v31  ;;  %v17404_v52 = vunpack.i.h.bf16 %v21658_v4  ;;  %v1885_v25 = vsel %vm1861_vm4, %v17469_v12, %v28901_v63 }
 0x1b4   : > { %15476 = vmatprep.subr.bf16.mxu0 %v29038_v8  ;;  %15503 = vmatprep.subr.bf16.mxu1 %v15502_v30  ;;  %v28903_v30 = vunpack.i.l.bf16 %v21857_v38  ;;  %v1393_v40 = vsel %vm1358_vm3, %v29042_v43, %v17384_v49  ;;  %v29046_v31 = vunpack.i.l.bf16 %v21857_v38  ;;  %vm8400_vm3 = vcmask 916480  }
 0x1b5   : > { %17756 = vrot.lane.b32.xlu1 %v21943_v16, %s20681_s20  ;;  %15505 = vmatpush1.bf16.msra.mxu1 %v15504_v57  ;;  %v21978_v19 = vpop.permute.xlu1 %17496  ;;  %v1890_v3 = vsel %vm1861_vm4, %v17484_v60, %v28902_v35  ;;  %v1889_v57 = vsel %vm1861_vm4, %v17483_v55, %v17484_v60  ;;  %v15480_v6 = vpack.c.bf16 %v1398_v14, %v1393_v40  ;;  %v29043_v60 = vunpack.i.l.bf16 %v21647_v48  ;;  %v20121_v48 = vld [vmem:[%s20987_s26 + $0x28] sm:$0xff] }
 0x1b6   : > { %17751 = vrot.lane.b32.xlu0 %v21957_v13, %s20681_s20  ;;  %13691 = vmatmul.mubr.msk.f32.gmra.mrb[4].mxu0 %vm665_vm1, %v21963_v21  ;;  %v21994_v36 = vpop.permute.xlu0 %17491  ;;  %v15506_v9 = vpack.c.bf16 %v1890_v3, %v1885_v25  ;;  %v22031_v3 = vpack.i.bf16 %v20121_v48, %v20120_v51  ;;  %v17403_v25 = vunpack.i.l.bf16 %v21658_v4  ;;  %v1867_v40 = vsel %vm1861_vm4, %v17418_v2, %v17419_v15  ;;  %v20126_v2 = vld [vmem:[%s20987_s26 + $0x90] sm:$0xff]  ;;  %v20129_v35 = vld [vmem:[%s20987_s26 + $0x88] sm:$0xff]  ;;  %s20694_s20 = smov 110  }
 0x1b7   : > { %15478 = vmatpush3.bf16.msra.mxu0 %v15477_v26  ;;  %1536 = vmatprep.mubr.f32.mxu0 %v29023_v41  ;;  %v1884_v26 = vsel %vm1861_vm4, %v28903_v30, %v17469_v12  ;;  %v1863_v49 = vsel %vm1861_vm4, %v17404_v52, %v29043_v60  ;;  %v20122_v60 = vld [vmem:[%s20987_s26 + $0x50] sm:$0xff] }
 0x1b8   : > { %15479 = vmatprep.subr.bf16.mxu0 %v29038_v8  ;;  %1619 = vmatprep.mubr.f32.mxu1 %v29023_v41  ;;  %v15508_v12 = vpack.c.bf16 %v1889_v57, %v1884_v26  ;;  %v22037_v57 = vld [vmem:[#allocation5 + $0x70] sm:$0xff]  ;;  %v17449_v26 = vunpack.i.h.bf16 %v21788_v62 }
 0x1b9   : > { %17766 = vrot.lane.b32.xlu1 %v21035_v11, %s20682_s17  ;;  %13695 = vmatmul.mubr.msk.f32.gmra.mrb[2].mxu1 %vm665_vm1, %v21925_v22  ;;  %v22023_v43 = vpop.permute.xlu1 %17506  ;;  %v15482_v11 = vpack.c.bf16 %v1868_v23, %v1863_v49  ;;  %v17433_v23 = vunpack.i.l.bf16 %v21765_v10  ;;  %v20123_v49 = vld [vmem:[%s20987_s26 + $0x58] sm:$0xff] }
 0x1ba   : > { %17761 = vrot.lane.b32.xlu0 %v21018_v7, %s20682_s17  ;;  %13692 = vmatmul.mubr.msk.f32.gmra.mrb[6].mxu0 %vm665_vm1, %v21997_v47  ;;  %v22033_v14 = vpop.permute.xlu0 %17501  ;;  %v17434_v7 = vunpack.i.h.bf16 %v21765_v10  ;;  %v22048_v51 = vpack.i.bf16 %v20123_v49, %v20122_v60  ;;  %v20124_v10 = vld [vmem:[%s20987_s26 + $0x60] sm:$0xff]  ;;  %v1862_v60 = vsel %vm1861_vm4, %v17403_v25, %v17404_v52  ;;  %v29044_v49 = vunpack.i.l.bf16 %v21836_v37 }
 0x1bb   : > { %15481 = vmatpush3.bf16.msra.mxu0 %v15480_v6  ;;  %1542 = vmatprep.mubr.f32.mxu0 %v29023_v41  ;;  %v17448_v6 = vunpack.i.l.bf16 %v21788_v62  ;;  %v20125_v62 = vld [vmem:[%s20987_s26 + $0x68] sm:$0xff]  ;;  %v17503_v4 = vunpack.i.l.bf16 %v22033_v14  ;;  %v17464_v25 = vunpack.i.h.bf16 %v21872_v1 }
 0x1bc   : > { %15483 = vmatprep.subr.bf16.mxu0 %v15482_v11  ;;  %15507 = vmatprep.subr.bf16.mxu1 %v15506_v9  ;;  %v22058_v15 = vpack.i.bf16 %v20125_v62, %v20124_v10  ;;  %v20127_v11 = vld [vmem:[%s20987_s26 + $0x98] sm:$0xff]  ;;  %v1878_v63 = vsel %vm1861_vm4, %v17449_v26, %v29044_v49  ;;  %v20128_v62 = vld [vmem:[%s20987_s26 + $0x80] sm:$0xff]  ;;  %v17479_v49 = vunpack.i.h.bf16 %v21910_v24 }
 0x1bd   : > { %17776 = vrot.lane.b32.xlu1 %v29032_v56, %s20682_s17  ;;  %15509 = vmatpush1.bf16.msra.mxu1 %v15508_v12  ;;  %v22050_v48 = vpop.permute.xlu1 %17516  ;;  %v22063_v12 = vpack.i.bf16 %v20127_v11, %v20126_v2  ;;  %v22076_v30 = vpack.i.bf16 %v20129_v35, %v20128_v62  ;;  %v1872_v2 = vsel %vm1861_vm4, %v17433_v23, %v17434_v7  ;;  %v29045_v35 = vunpack.i.l.bf16 %v21757_v58 }
 0x1be   : > { %17771 = vrot.lane.b32.xlu0 %v22031_v3, %s20682_s17  ;;  %13693 = vmatmul.mubr.msk.f32.gmra.mrb[8].mxu0 %vm665_vm1, %v22037_v57  ;;  %v17518_v56 = vunpack.i.l.bf16 %v22050_v48  ;;  %v17512_v9 = vpop.permute.xlu0 %17511  ;;  %v15484_v11 = vpack.c.bf16 %v1867_v40, %v1862_v60  ;;  %v1877_v37 = vsel %vm1861_vm4, %v17448_v6, %v17449_v26  ;;  %v17478_v60 = vunpack.i.l.bf16 %v21910_v24 }
 0x1bf   : > { %14593 = vmatprep.mubr.msk.f32.mxu0 %vm20680_vm2, %v29023_v41  ;;  %1625 = vmatprep.mubr.f32.mxu1 %v29023_v41  ;;  %v17514_v10 = vunpack.i.h.bf16 %v17512_v9  ;;  %v17513_v52 = vunpack.i.l.bf16 %v17512_v9  ;;  %v1873_v23 = vsel %vm1861_vm4, %v17434_v7, %v29045_v35  ;;  %v17499_v9 = vunpack.i.h.bf16 %v21978_v19 }
 0x1c0   : > { %13696 = vmatmul.mubr.msk.f32.gmra.mrb[4].mxu1 %vm665_vm1, %v21963_v21  ;;  %v15486_v26 = vpack.c.bf16 %v1878_v63, %v1873_v23  ;;  %v17498_v7 = vunpack.i.l.bf16 %v21978_v19  ;;  %v17494_v62 = vunpack.i.h.bf16 %v21994_v36  ;;  %v17509_v24 = vunpack.i.h.bf16 %v22023_v43 }
 0x1c1   : > { %17786 = vrot.lane.b32.xlu1 %v22048_v51, %s20682_s17  ;;  %1631 = vmatprep.mubr.f32.mxu1 %v29023_v41  ;;  %v22091_v40 = vpop.permute.xlu1 %17526  ;;  %v1900_v58 = vsel %vm1861_vm4, %v17514_v10, %v17518_v56  ;;  %v15488_v63 = vpack.c.bf16 %v1877_v37, %v1872_v2  ;;  %v1899_v35 = vsel %vm1861_vm4, %v17513_v52, %v17514_v10  ;;  %v17508_v23 = vunpack.i.l.bf16 %v22023_v43 }
 0x1c2   : > { %17781 = vrot.lane.b32.xlu0 %v21053_v17, %s20682_s17  ;;  %14594 = vmatmul.mubr.msk.f32.vlgmr.msra.gmra.mrb[20].mxu0 %vm665_vm1, %v21886_v5  ;;  %v22099_v6 = vpop.permute.xlu0 %17521  ;;  %v1888_v17 = vsel %vm1861_vm4, %v17479_v49, %v17483_v55  ;;  %v17463_v5 = vunpack.i.l.bf16 %v21872_v1  ;;  %v1895_v19 = vsel %vm1861_vm4, %v17499_v9, %v17503_v4  ;;  %v1883_v55 = vsel %vm1861_vm4, %v17464_v25, %v29046_v31 }
 0x1c3   : > { %15485 = vmatpush1.bf16.msra.mxu0 %v15484_v11  ;;  %14596 = vmatprep.mubr.msk.f32.mxu0 %vm20680_vm2, %v29023_v41  ;;  %v1898_v1 = vsel %vm1861_vm4, %v17509_v24, %v17513_v52  ;;  %v15510_v2 = vpack.c.bf16 %v1900_v58, %v1895_v19  ;;  %v1887_v11 = vsel %vm1861_vm4, %v17478_v60, %v17479_v49  ;;  %v17429_v52 = vunpack.i.h.bf16 %v21718_v44 }
 0x1c4   : > { %15487 = vmatprep.subr.bf16.mxu0 %v15486_v26  ;;  %13697 = vmatmul.mubr.msk.f32.gmra.mrb[6].mxu1 %vm665_vm1, %v21997_v47  ;;  %v1894_v37 = vsel %vm1861_vm4, %v17498_v7, %v17499_v9  ;;  %v1893_v49 = vsel %vm1861_vm4, %v17494_v62, %v17498_v7  ;;  %v1882_v43 = vsel %vm1861_vm4, %v17463_v5, %v17464_v25  ;;  %v17493_v9 = vunpack.i.l.bf16 %v21994_v36 }
 0x1c5   : > { %17796 = vrot.lane.b32.xlu1 %v29034_v50, %s20682_s17  ;;  %1637 = vmatprep.mubr.f32.mxu1 %v29023_v41  ;;  %v22126_v10 = vpop.permute.xlu1 %17536  ;;  %v15490_v50 = vpack.c.bf16 %v1888_v17, %v1883_v55  ;;  %v15512_v60 = vpack.c.bf16 %v1899_v35, %v1894_v37  ;;  %v17414_v26 = vunpack.i.h.bf16 %v21702_v54  ;;  %v15492_v58 = vpack.c.bf16 %v1887_v11, %v1882_v43  ;;  %v22161_v35 = vld [vmem:[#allocation5 + $0x78] sm:$0xff] }
 0x1c6   : > { %17791 = vrot.lane.b32.xlu0 %v22058_v15, %s20682_s17  ;;  %14597 = vmatmul.mubr.msk.f32.gmra.mrb[22].mxu0 %vm665_vm1, %v21925_v22  ;;  %v22135_v38 = vpop.permute.xlu0 %17531  ;;  %v15494_v22 = vpack.c.bf16 %v1898_v1, %v1893_v49  ;;  %v1897_v7 = vsel %vm1861_vm4, %v17508_v23, %v17509_v24  ;;  %v29047_v25 = vunpack.i.l.bf16 %v21718_v44  ;;  %v1892_v24 = vsel %vm1861_vm4, %v17493_v9, %v17494_v62 }
 0x1c7   : > { %15489 = vmatpush1.bf16.msra.mxu0 %v15488_v63  ;;  %14599 = vmatprep.mubr.msk.f32.mxu0 %vm20680_vm2, %v29023_v41  ;;  %v17459_v63 = vunpack.i.h.bf16 %v21821_v59  ;;  %v29048_v19 = vunpack.i.l.bf16 %v21702_v54  ;;  %v17444_v31 = vunpack.i.h.bf16 %v21798_v45  ;;  %v15496_v44 = vpack.c.bf16 %v1897_v7, %v1892_v24 }
 0x1c8   : > { %15491 = vmatprep.subr.bf16.mxu0 %v15490_v50  ;;  %13698 = vmatmul.mubr.msk.f32.gmra.mrb[8].mxu1 %vm665_vm1, %v22037_v57  ;;  %v1871_v5 = vsel %vm1861_vm4, %v29047_v25, %v17429_v52  ;;  %v17528_v11 = vunpack.i.l.bf16 %v22091_v40  ;;  %v17524_v37 = vunpack.i.h.bf16 %v22099_v6  ;;  %v17539_v23 = vunpack.i.h.bf16 %v22126_v10 }
 0x1c9   : > { %17806 = vrot.lane.b32.xlu1 %v22063_v12, %s20682_s17  ;;  %15511 = vmatprep.subr.bf16.mxu1 %v15510_v2  ;;  %v22148_v17 = vpop.permute.xlu1 %17546  ;;  %v29049_v2 = vunpack.i.l.bf16 %v21821_v59  ;;  %v17489_v50 = vunpack.i.h.bf16 %v21945_v53  ;;  %v17538_v52 = vunpack.i.l.bf16 %v22126_v10  ;;  %v22193_v59 = vld [vmem:[#allocation5 + $0x80] sm:$0xff]  ;;  %v29050_v49 = vunpack.i.l.bf16 %v21798_v45 }
 0x1ca   : > { %17801 = vrot.lane.b32.xlu0 %v22076_v30, %s20682_s17  ;;  %14600 = vmatmul.mubr.msk.f32.gmra.mrb[24].mxu0 %vm665_vm1, %v21963_v21  ;;  %v22155_v36 = vpop.permute.xlu0 %17541  ;;  %v1866_v21 = vsel %vm1861_vm4, %v29048_v19, %v17414_v26  ;;  %v17474_v9 = vunpack.i.h.bf16 %v21921_v42  ;;  %v2366_v26 = vsel %vm2364_vm5, %v17524_v37, %v17528_v11  ;;  %v17519_v7 = vunpack.i.h.bf16 %v22050_v48 }
 0x1cb   : > { %15493 = vmatpush1.bf16.msra.mxu0 %v15492_v58  ;;  %15513 = vmatpush1.bf16.msra.mxu1 %v15512_v60  ;;  %v17543_v55 = vunpack.i.l.bf16 %v22155_v36  ;;  %v15515_v54 = vpack.c.bf16 %v1871_v5, %v1866_v21  ;;  %v1876_v60 = vsel %vm1861_vm4, %v29050_v49, %v17444_v31  ;;  %v29051_v58 = vunpack.i.l.bf16 %v21945_v53 }
 0x1cc   : > { %15495 = vmatprep.subr.bf16.mxu0 %v15494_v22  ;;  %2116 = vmatprep.mubr.f32.mxu1 %v29023_v41  ;;  %v17523_v22 = vunpack.i.l.bf16 %v22099_v6  ;;  %v2370_v25 = vsel %vm2364_vm5, %v17538_v52, %v17539_v23  ;;  %v22225_v6 = vld [vmem:[#allocation5 + $0x88] sm:$0xff]  ;;  %v17544_v24 = vunpack.i.h.bf16 %v22155_v36  ;;  %v17529_v49 = vunpack.i.h.bf16 %v22091_v40 }
 0x1cd   : > { %17816 = vrot.lane.b32.xlu1 %v21651_v27, %s20682_s17  ;;  %14602 = vmatprep.mubr.msk.f32.mxu0 %vm20680_vm2, %v29023_v41  ;;  %v22174_v1 = vpop.permute.xlu1 %17556  ;;  %v1881_v27 = vsel %vm1861_vm4, %v29049_v2, %v17459_v63  ;;  %v2371_v43 = vsel %vm2364_vm5, %v17539_v23, %v17543_v55  ;;  %v17548_v63 = vunpack.i.l.bf16 %v22148_v17  ;;  %v17533_v23 = vunpack.i.l.bf16 %v22135_v38 }
 0x1ce   : > { %17811 = vrot.lane.b32.xlu0 %v21662_v33, %s20682_s17  ;;  %13709 = vmatmul.mubr.msk.f32.vlgmr.msra.gmra.mrb[0].mxu1 %vm665_vm1, %v22161_v35  ;;  %v22180_v62 = vpop.permute.xlu0 %17551  ;;  %v15518_v45 = vpack.c.bf16 %v1881_v27, %v1876_v60  ;;  %v15526_v5 = vpack.c.bf16 %v2371_v43, %v2366_v26  ;;  %v17558_v53 = vunpack.i.l.bf16 %v22174_v1  ;;  %v2365_v27 = vsel %vm2364_vm5, %v17523_v22, %v17524_v37  ;;  %v22260_v60 = vld [vmem:[#allocation5 + $0x90] sm:$0xff] }
 0x1cf   : > { %15497 = vmatpush1.bf16.msra.mxu0 %v15496_v44  ;;  %15514 = vmatprep.subr.bf16.mxu1 %v29038_v8  ;;  %v17554_v19 = vunpack.i.h.bf16 %v22180_v62  ;;  %v17504_v44 = vunpack.i.h.bf16 %v22033_v14  ;;  %v17553_v52 = vunpack.i.l.bf16 %v22180_v62  ;;  %v15528_v37 = vpack.c.bf16 %v2370_v25, %v2365_v27  ;;  %v22294_v25 = vld [vmem:[#allocation5 + $0x98] sm:$0xff] }
 0x1d0   : > { %14603 = vmatmul.mubr.msk.f32.gmra.mrb[26].mxu0 %vm665_vm1, %v21997_v47  ;;  %15516 = vmatpush3.bf16.msra.mxu1 %v15515_v54  ;;  %v2373_v48 = vsel %vm2364_vm5, %v17544_v24, %v17548_v63 }
 0x1d1   : > { %17826 = vrot.lane.b32.xlu1 %v21673_v39, %s20682_s17  ;;  %2122 = vmatprep.mubr.f32.mxu1 %v29023_v41  ;;  %v17567_v10 = vpop.permute.xlu1 %17566  ;;  %v2376_v62 = vsel %vm2364_vm5, %v17554_v19, %v17558_v53 }
 0x1d2   : > { %17821 = vrot.lane.b32.xlu0 %v21751_v46, %s20682_s17  ;;  %14605 = vmatprep.mubr.msk.f32.mxu0 %vm20680_vm2, %v29023_v41  ;;  %v22209_v47 = vpop.permute.xlu0 %17561  ;;  %v1891_v46 = vsel %vm1861_vm4, %v29051_v58, %v17489_v50  ;;  %v17568_v54 = vunpack.i.l.bf16 %v17567_v10  ;;  %v2375_v58 = vsel %vm2364_vm5, %v17553_v52, %v17554_v19 }
 0x1d3   : > { %13710 = vmatmul.mubr.msk.f32.gmra.mrb[2].mxu1 %vm665_vm1, %v22193_v59  ;;  %15517 = vmatprep.subr.bf16.mxu1 %v29038_v8 }
 0x1d4   : > { %14606 = vmatmul.mubr.msk.f32.gmra.mrb[28].mxu0 %vm665_vm1, %v22037_v57  ;;  %15519 = vmatpush3.bf16.msra.mxu1 %v15518_v45  ;;  %v29052_v57 = vunpack.i.l.bf16 %v21921_v42 }
 0x1d5   : > { %17836 = vrot.lane.b32.xlu1 %v21755_v20, %s20682_s17  ;;  %2128 = vmatprep.mubr.f32.mxu1 %v29023_v41  ;;  %v22234_v21 = vpop.permute.xlu1 %17576  ;;  %v17569_v20 = vunpack.i.h.bf16 %v17567_v10 }
 0x1d6   : > { %v1886_v31 = vsel %vm1861_vm4, %v29052_v57, %v17474_v9  ;;  %17831 = vrot.lane.b32.xlu0 %v21796_v28, %s20682_s17  ;;  %2021 = vmatprep.mubr.f32.mxu0 %v29023_v41  ;;  %v22243_v2 = vpop.permute.xlu0 %17571  ;;  %v1901_v28 = vsel %vm1861_vm4, %v17518_v56, %v17519_v7  ;;  %v17578_v26 = vunpack.i.l.bf16 %v22234_v21  ;;  %v17563_v7 = vunpack.i.l.bf16 %v22209_v47 }
 0x1d7   : > { %13711 = vmatmul.mubr.msk.f32.gmra.mrb[4].mxu1 %vm665_vm1, %v22225_v6  ;;  %15520 = vmatprep.subr.bf16.mxu1 %v29038_v8  ;;  %v15521_v42 = vpack.c.bf16 %v1891_v46, %v1886_v31  ;;  %v17573_v50 = vunpack.i.l.bf16 %v22243_v2  ;;  %v2380_v10 = vsel %vm2364_vm5, %v17568_v54, %v17569_v20  ;;  %v17574_v14 = vunpack.i.h.bf16 %v22243_v2  ;;  %v20131_v54 = vld [vmem:[%s20987_s26 + $0x18] sm:$0xff] }
 0x1d8   : > { %15527 = vmatprep.subr.bf16.mxu0 %v15526_v5  ;;  %13704 = vmatmul.mubr.msk.f32.vlgmr.msra.gmra.mrb[0].mxu0 %vm665_vm1, %v22161_v35  ;;  %v15532_v5 = vpack.c.bf16 %v2380_v10, %v2375_v58  ;;  %v2372_v31 = vsel %vm2364_vm5, %v17543_v55, %v17544_v24  ;;  %v20130_v24 = vld [vmem:[%s20987_s26 + $0x10] sm:$0xff] }
 0x1d9   : > { %17846 = vrot.lane.b32.xlu1 %v21819_v34, %s20682_s17  ;;  %15522 = vmatpush3.bf16.msra.mxu1 %v15521_v42  ;;  %v22265_v56 = vpop.permute.xlu1 %17586  ;;  %v2381_v43 = vsel %vm2364_vm5, %v17569_v20, %v17573_v50  ;;  %v1896_v34 = vsel %vm1861_vm4, %v17503_v4, %v17504_v44  ;;  %v2368_v4 = vsel %vm2364_vm5, %v17529_v49, %v17533_v23  ;;  %v17559_v44 = vunpack.i.h.bf16 %v22174_v1 }
 0x1da   : > { %17841 = vrot.lane.b32.xlu0 %v21829_v29, %s20682_s17  ;;  %15529 = vmatpush1.bf16.msra.mxu0 %v15528_v37  ;;  %v22279_v9 = vpop.permute.xlu0 %17581  ;;  %v15530_v45 = vpack.c.bf16 %v2381_v43, %v2376_v62  ;;  %v15524_v22 = vpack.c.bf16 %v1901_v28, %v1896_v34  ;;  %v15542_v46 = vpack.c.bf16 %v2373_v48, %v2368_v4  ;;  %v17588_v36 = vunpack.i.l.bf16 %v22265_v56  ;;  %v20133_v48 = vld [vmem:[%s20987_s26 + $0x8] sm:$0xff] }
 0x1db   : > { %2134 = vmatprep.mubr.f32.mxu1 %v29023_v41  ;;  %15523 = vmatprep.subr.bf16.mxu1 %v29038_v8  ;;  %v2383_v20 = vsel %vm2364_vm5, %v17574_v14, %v17578_v26  ;;  %v17584_v55 = vunpack.i.h.bf16 %v22279_v9  ;;  %v22317_v27 = vpack.i.bf16 %v20131_v54, %v20130_v24  ;;  %v2378_v40 = vsel %vm2364_vm5, %v17559_v44, %v17563_v7 }
 0x1dc   : > { %13712 = vmatmul.mubr.msk.f32.gmra.mrb[6].mxu1 %vm665_vm1, %v22260_v60  ;;  %15531 = vmatprep.subr.bf16.mxu0 %v15530_v45  ;;  %v15546_v37 = vpack.c.bf16 %v2383_v20, %v2378_v40  ;;  %v17589_v34 = vunpack.i.h.bf16 %v22265_v56  ;;  %v2382_v4 = vsel %vm2364_vm5, %v17573_v50, %v17574_v14  ;;  %v17583_v58 = vunpack.i.l.bf16 %v22279_v9  ;;  %v20134_v20 = vld [vmem:[%s20987_s26 + $0x30] sm:$0xff] }
 0x1dd   : > { %17856 = vrot.lane.b32.xlu1 %v21845_v18, %s20682_s17  ;;  %15525 = vmatpush3.bf16.msra.mxu1 %v15524_v22  ;;  %v17597_v57 = vpop.permute.xlu1 %17596  ;;  %v2386_v56 = vsel %vm2364_vm5, %v17584_v55, %v17588_v36  ;;  %vm8903_vm4 = vcmask 908288  }
 0x1de   : > { %17851 = vrot.lane.b32.xlu0 %v21865_v0, %s20682_s17  ;;  %15543 = vmatprep.subr.bf16.mxu1 %v15542_v46  ;;  %v22298_v19 = vpop.permute.xlu0 %17591  ;;  %v2367_v0 = vsel %vm2364_vm5, %v17528_v11, %v17529_v49  ;;  %v17599_v11 = vunpack.i.h.bf16 %v17597_v57  ;;  %v17598_v42 = vunpack.i.l.bf16 %v17597_v57  ;;  %v20132_v49 = vld [vmem:[%s20987_s26] sm:$0xff] }
 0x1df   : > { %2140 = vmatprep.mubr.f32.mxu1 %v29023_v41  ;;  %15533 = vmatpush1.bf16.msra.mxu0 %v15532_v5  ;;  %v17593_v28 = vunpack.i.l.bf16 %v22298_v19  ;;  %v15544_v52 = vpack.c.bf16 %v2372_v31, %v2367_v0  ;;  %v22332_v62 = vpack.i.bf16 %v20133_v48, %v20132_v49  ;;  %v2387_v31 = vsel %vm2364_vm5, %v17588_v36, %v17589_v34  ;;  %v20135_v0 = vld [vmem:[%s20987_s26 + $0x38] sm:$0xff] }
 0x1e0   : > { %13713 = vmatmul.mubr.msk.f32.gmra.mrb[8].mxu1 %vm665_vm1, %v22294_v25  ;;  %2027 = vmatprep.mubr.f32.mxu0 %v29023_v41  ;;  %v2390_v46 = vsel %vm2364_vm5, %v17598_v42, %v17599_v11  ;;  %v22379_v24 = vpack.i.bf16 %v20135_v0, %v20134_v20  ;;  %v20137_v42 = vld [vmem:[%s20987_s26 + $0x48] sm:$0xff] }
 0x1e1   : > { %17866 = vrot.lane.b32.xlu1 %v21870_v32, %s20682_s17  ;;  %14624 = vmatprep.mubr.msk.f32.mxu1 %vm20680_vm2, %v29023_v41 }
 0x1e2   : > { %17861 = vrot.lane.b32.xlu0 %v21894_v61, %s20682_s17  ;;  %v22334_v32 = vpop.permute.xlu1 %17606  ;;  %v17602_v43 = vpop.permute.xlu0 %17601  ;;  %13705 = vmatmul.mubr.msk.f32.gmra.mrb[2].mxu0 %vm665_vm1, %v22193_v59  ;;  %v2377_v61 = vsel %vm2364_vm5, %v17558_v53, %v17559_v44  ;;  %v2388_v53 = vsel %vm2364_vm5, %v17589_v34, %v17593_v28  ;;  %v2385_v44 = vsel %vm2364_vm5, %v17583_v58, %v17584_v55 }
 0x1e3   : > { %v17608_v10 = vunpack.i.l.bf16 %v22334_v32  ;;  %v17604_v45 = vunpack.i.h.bf16 %v17602_v43  ;;  %v17603_v22 = vunpack.i.l.bf16 %v17602_v43  ;;  %2033 = vmatprep.mubr.f32.mxu0 %v29023_v41  ;;  %v15548_v9 = vpack.c.bf16 %v2382_v4, %v2377_v61  ;;  %v20138_v61 = vld [vmem:[%s20987_s26 + $0x70] sm:$0xff]  ;;  %v20139_v4 = vld [vmem:[%s20987_s26 + $0x78] sm:$0xff] }
 0x1e4   : > { %14625 = vmatmul.mubr.msk.f32.vlgmr.msra.gmra.mrb[20].mxu1 %vm665_vm1, %v22161_v35  ;;  %v15536_v54 = vpack.c.bf16 %v2390_v46, %v2385_v44  ;;  %v22417_v58 = vpack.i.bf16 %v20139_v4, %v20138_v61  ;;  %v17534_v46 = vunpack.i.h.bf16 %v22135_v38  ;;  %v17594_v4 = vunpack.i.h.bf16 %v22298_v19 }
 0x1e5   : > { %17876 = vrot.lane.b32.xlu1 %v21943_v16, %s20682_s17  ;;  %15545 = vmatpush1.bf16.msra.mxu1 %v15544_v52  ;;  %v2391_v1 = vsel %vm2364_vm5, %v17599_v11, %v17603_v22  ;;  %v2392_v35 = vsel %vm2364_vm5, %v17603_v22, %v17604_v45  ;;  %v2393_v50 = vsel %vm2364_vm5, %v17604_v45, %v17608_v10 }
 0x1e6   : > { %17871 = vrot.lane.b32.xlu0 %v21957_v13, %s20682_s17  ;;  %15547 = vmatprep.subr.bf16.mxu1 %v15546_v37  ;;  %v15534_v2 = vpack.c.bf16 %v2391_v1, %v2386_v56  ;;  %v15550_v57 = vpack.c.bf16 %v2393_v50, %v2388_v53  ;;  %v15552_v40 = vpack.c.bf16 %v2392_v35, %v2387_v31  ;;  %v17549_v35 = vunpack.i.h.bf16 %v22148_v17  ;;  %v20140_v17 = vld [vmem:[%s20987_s26 + $0xb0] sm:$0xff]  ;;  %s20695_s17 = smov 109  }
 0x1e7   : > { %v22364_v14 = vpop.permute.xlu1 %17616  ;;  %v22366_v5 = vpop.permute.xlu0 %17611  ;;  %13706 = vmatmul.mubr.msk.f32.gmra.mrb[4].mxu0 %vm665_vm1, %v22225_v6  ;;  %14627 = vmatprep.mubr.msk.f32.mxu1 %vm20680_vm2, %v29023_v41 }
 0x1e8   : > { %15535 = vmatprep.subr.bf16.mxu0 %v15534_v2  ;;  %2039 = vmatprep.mubr.f32.mxu0 %v29023_v41  ;;  %v17619_v11 = vunpack.i.h.bf16 %v22364_v14  ;;  %v17618_v37 = vunpack.i.l.bf16 %v22364_v14  ;;  %v17614_v49 = vunpack.i.h.bf16 %v22366_v5  ;;  %v17613_v22 = vunpack.i.l.bf16 %v22366_v5 }
 0x1e9   : > { %17886 = vrot.lane.b32.xlu1 %v22317_v27, %s20683_s29  ;;  %15549 = vmatpush1.bf16.msra.mxu1 %v15548_v9 }
 0x1ea   : > { %17881 = vrot.lane.b32.xlu0 %v22332_v62, %s20683_s29  ;;  %15551 = vmatprep.subr.bf16.mxu1 %v15550_v57  ;;  %v2397_v2 = vsel %vm2364_vm5, %v17618_v37, %v17619_v11  ;;  %v2396_v9 = vsel %vm2364_vm5, %v17614_v49, %v17618_v37  ;;  %v2395_v44 = vsel %vm2364_vm5, %v17613_v22, %v17614_v49  ;;  %v17564_v49 = vunpack.i.h.bf16 %v22209_v47 }
 0x1eb   : > { %15537 = vmatpush1.bf16.msra.mxu0 %v15536_v54  ;;  %14628 = vmatmul.mubr.msk.f32.gmra.mrb[22].mxu1 %vm665_vm1, %v22193_v59  ;;  %v20136_v59 = vld [vmem:[%s20987_s26 + $0x40] sm:$0xff]  ;;  %v2369_v37 = vsel %vm2364_vm5, %v17533_v23, %v17534_v46 }
 0x1ec   : > { %v17627_v36 = vpop.permute.xlu1 %17626  ;;  %v22385_v55 = vpop.permute.xlu0 %17621  ;;  %13707 = vmatmul.mubr.msk.f32.gmra.mrb[6].mxu0 %vm665_vm1, %v22260_v60  ;;  %14630 = vmatprep.mubr.msk.f32.mxu1 %vm20680_vm2, %v29023_v41  ;;  %v22398_v52 = vpack.i.bf16 %v20137_v42, %v20136_v59  ;;  %v17579_v59 = vunpack.i.h.bf16 %v22234_v21  ;;  %v22453_v42 = vld [vmem:[#allocation5 + $0xa0] sm:$0xff]  ;;  %v2379_v21 = vsel %vm2364_vm5, %v17563_v7, %v17564_v49 }
 0x1ed   : > { %17896 = vrot.lane.b32.xlu1 %v22379_v24, %s20683_s29  ;;  %15553 = vmatpush1.bf16.msra.mxu1 %v15552_v40  ;;  %v17629_v48 = vunpack.i.h.bf16 %v17627_v36  ;;  %v17628_v43 = vunpack.i.l.bf16 %v17627_v36  ;;  %v17623_v34 = vunpack.i.l.bf16 %v22385_v55 }
 0x1ee   : > { %17891 = vrot.lane.b32.xlu0 %v22031_v3, %s20683_s29  ;;  %2045 = vmatprep.mubr.f32.mxu0 %v29023_v41  ;;  %v2384_v22 = vsel %vm2364_vm5, %v17578_v26, %v17579_v59  ;;  %v20142_v26 = vld [vmem:[%s20987_s26 + $0xc0] sm:$0xff] }
 0x1ef   : > { %14631 = vmatmul.mubr.msk.f32.gmra.mrb[24].mxu1 %vm665_vm1, %v22225_v6  ;;  %v2400_v50 = vsel %vm2364_vm5, %v17628_v43, %v17629_v48  ;;  %v2398_v57 = vsel %vm2364_vm5, %v17619_v11, %v17623_v34  ;;  %v2374_v11 = vsel %vm2364_vm5, %v17548_v63, %v17549_v35  ;;  %v17609_v43 = vunpack.i.h.bf16 %v22334_v32  ;;  %v20144_v32 = vld [vmem:[%s20987_s26 + $0xf0] sm:$0xff] }
 0x1f0   : > { %v22406_v45 = vpop.permute.xlu1 %17636  ;;  %13708 = vmatmul.mubr.msk.f32.gmra.mrb[8].mxu0 %vm665_vm1, %v22294_v25  ;;  %14633 = vmatprep.mubr.msk.f32.mxu1 %vm20680_vm2, %v29023_v41  ;;  %v15540_v36 = vpack.c.bf16 %v2400_v50, %v2395_v44  ;;  %v15559_v23 = vpack.c.bf16 %v2374_v11, %v2369_v37  ;;  %v15562_v7 = vpack.c.bf16 %v2384_v22, %v2379_v21  ;;  %v20149_v21 = vld [vmem:[%s20987_s26 + $0x118] sm:$0xff] }
 0x1f1   : > { %17906 = vrot.lane.b32.xlu1 %v22048_v51, %s20683_s29  ;;  %v17638_v6 = vunpack.i.l.bf16 %v22406_v45  ;;  %v17632_v56 = vpop.permute.xlu0 %17631  ;;  %2524 = vmatprep.mubr.f32.mxu0 %v29023_v41 }
 0x1f2   : > { %17901 = vrot.lane.b32.xlu0 %v22398_v52, %s20683_s29  ;;  %v17634_v1 = vunpack.i.h.bf16 %v17632_v56  ;;  %v17633_v53 = vunpack.i.l.bf16 %v17632_v56  ;;  %v22483_v56 = vld [vmem:[#allocation5 + $0xa8] sm:$0xff] }
 0x1f3   : > { %14634 = vmatmul.mubr.msk.f32.gmra.mrb[26].mxu1 %vm665_vm1, %v22260_v60 }
 0x1f4   : > { %v2402_v14 = vsel %vm2364_vm5, %v17633_v53, %v17634_v1  ;;  %v2401_v5 = vsel %vm2364_vm5, %v17629_v48, %v17633_v53  ;;  %v2403_v31 = vsel %vm2364_vm5, %v17634_v1, %v17638_v6  ;;  %14636 = vmatprep.mubr.msk.f32.mxu1 %vm20680_vm2, %v29023_v41  ;;  %v20141_v48 = vld [vmem:[%s20987_s26 + $0xb8] sm:$0xff]  ;;  %v2394_v1 = vsel %vm2364_vm5, %v17608_v10, %v17609_v43 }
 0x1f5   : > { %17916 = vrot.lane.b32.xlu1 %v22417_v58, %s20683_s29  ;;  %v22443_v60 = vpop.permute.xlu1 %17646  ;;  %v15538_v20 = vpack.c.bf16 %v2401_v5, %v2396_v9  ;;  %v15554_v0 = vpack.c.bf16 %v2403_v31, %v2398_v57  ;;  %v15556_v54 = vpack.c.bf16 %v2402_v14, %v2397_v2  ;;  %v22463_v63 = vpack.i.bf16 %v20141_v48, %v20140_v17  ;;  %v20145_v10 = vld [vmem:[%s20987_s26 + $0xf8] sm:$0xff]  ;;  %v20146_v57 = vld [vmem:[%s20987_s26 + $0xe0] sm:$0xff]  ;;  %v20147_v31 = vld [vmem:[%s20987_s26 + $0xe8] sm:$0xff] }
 0x1f6   : > { %17911 = vrot.lane.b32.xlu0 %v22058_v15, %s20683_s29  ;;  %v22447_v40 = vpop.permute.xlu0 %17641  ;;  %v17639_v53 = vunpack.i.h.bf16 %v22406_v45  ;;  %v17649_v47 = vunpack.i.h.bf16 %v22443_v60  ;;  %v22509_v50 = vpack.i.bf16 %v20145_v10, %v20144_v32  ;;  %v17648_v9 = vunpack.i.l.bf16 %v22443_v60  ;;  %v22553_v48 = vld [vmem:[#allocation5 + $0xb8] sm:$0xff]  ;;  %v20151_v10 = vld [vmem:[%s20987_s26 + $0x128] sm:$0xff] }
 0x1f7   : > { %15539 = vmatprep.subr.bf16.mxu0 %v15538_v20  ;;  %15555 = vmatprep.subr.bf16.mxu1 %v15554_v0  ;;  %v22521_v44 = vpack.i.bf16 %v20147_v31, %v20146_v57  ;;  %v22524_v20 = vld [vmem:[#allocation5 + $0xb0] sm:$0xff]  ;;  %v17624_v0 = vunpack.i.h.bf16 %v22385_v55  ;;  %v17644_v11 = vunpack.i.h.bf16 %v22447_v40 }
 0x1f8   : > { %15541 = vmatpush1.bf16.msra.mxu0 %v15540_v36  ;;  %15557 = vmatpush1.bf16.msra.mxu1 %v15556_v54  ;;  %v2404_v54 = vsel %vm2364_vm5, %v17638_v6, %v17639_v53  ;;  %v2870_v36 = vsel %vm2867_vm6, %v17648_v9, %v17649_v47 }
 0x1f9   : > { %17926 = vrot.lane.b32.xlu1 %v22063_v12, %s20683_s29  ;;  %15558 = vmatprep.subr.bf16.mxu0 %v29038_v8  ;;  %v2869_v55 = vsel %vm2867_vm6, %v17644_v11, %v17648_v9 }
 0x1fa   : > { %17921 = vrot.lane.b32.xlu0 %v22076_v30, %s20683_s29  ;;  %v22469_v38 = vpop.permute.xlu1 %17656  ;;  %14637 = vmatmul.mubr.msk.f32.gmra.mrb[28].mxu1 %vm665_vm1, %v22294_v25  ;;  %v20143_v25 = vld [vmem:[%s20987_s26 + $0xc8] sm:$0xff] }
 0x1fb   : > { %v22476_v61 = vpop.permute.xlu0 %17651  ;;  %13719 = vmatmul.mubr.msk.f32.vlgmr.msra.gmra.mrb[0].mxu0 %vm665_vm1, %v22453_v42  ;;  %2619 = vmatprep.mubr.f32.mxu1 %v29023_v41  ;;  %v22492_v46 = vpack.i.bf16 %v20143_v25, %v20142_v26  ;;  %v17659_v59 = vunpack.i.h.bf16 %v22469_v38 }
 0x1fc   : > { %15560 = vmatpush3.bf16.msra.mxu0 %v15559_v23  ;;  %2530 = vmatprep.mubr.f32.mxu0 %v29023_v41  ;;  %v17653_v35 = vunpack.i.l.bf16 %v22476_v61  ;;  %v2399_v23 = vsel %vm2364_vm5, %v17623_v34, %v17624_v0  ;;  %v17658_v34 = vunpack.i.l.bf16 %v22469_v38  ;;  %v20150_v38 = vld [vmem:[%s20987_s26 + $0x120] sm:$0xff] }
 0x1fd   : > { %17936 = vrot.lane.b32.xlu1 %v22463_v63, %s20683_s29  ;;  %15561 = vmatprep.subr.bf16.mxu0 %v29038_v8  ;;  %v15568_v25 = vpack.c.bf16 %v2404_v54, %v2399_v23  ;;  %v20153_v54 = vld [vmem:[%s20987_s26 + $0x158] sm:$0xff] }
 0x1fe   : > { %17931 = vrot.lane.b32.xlu0 %v21662_v33, %s20683_s29  ;;  %13724 = vmatmul.mubr.msk.f32.vlgmr.msra.gmra.mrb[0].mxu1 %vm665_vm1, %v22453_v42  ;;  %v2389_v33 = vsel %vm2364_vm5, %v17593_v28, %v17594_v4  ;;  %v2871_v45 = vsel %vm2867_vm6, %v17649_v47, %v17653_v35  ;;  %v20148_v4 = vld [vmem:[%s20987_s26 + $0x110] sm:$0xff]  ;;  %v22575_v47 = vld [vmem:[#allocation5 + $0xc0] sm:$0xff]  ;;  %vm9406_vm5 = vcmask 900096  }
 0x1ff   : > { %v22505_v2 = vpop.permute.xlu1 %17666  ;;  %13720 = vmatmul.mubr.msk.f32.gmra.mrb[2].mxu0 %vm665_vm1, %v22483_v56  ;;  %2625 = vmatprep.mubr.f32.mxu1 %v29023_v41  ;;  %v15565_v60 = vpack.c.bf16 %v2394_v1, %v2389_v33  ;;  %v22565_v26 = vpack.i.bf16 %v20149_v21, %v20148_v4  ;;  %v22586_v33 = vpack.i.bf16 %v20151_v10, %v20150_v38 }
 0x200   : > { %v17668_v14 = vunpack.i.l.bf16 %v22505_v2  ;;  %v17662_v5 = vpop.permute.xlu0 %17661  ;;  %15563 = vmatpush3.bf16.msra.mxu0 %v15562_v7  ;;  %2536 = vmatprep.mubr.f32.mxu0 %v29023_v41  ;;  %v17643_v7 = vunpack.i.l.bf16 %v22447_v40  ;;  %v2873_v40 = vsel %vm2867_vm6, %v17658_v34, %v17659_v59 }
 0x201   : > { %17946 = vrot.lane.b32.xlu1 %v21673_v39, %s20683_s29  ;;  %v17664_v19 = vunpack.i.h.bf16 %v17662_v5  ;;  %v17663_v28 = vunpack.i.l.bf16 %v17662_v5  ;;  %15564 = vmatprep.subr.bf16.mxu0 %v29038_v8 }
 0x202   : > { %17941 = vrot.lane.b32.xlu0 %v22492_v46, %s20683_s29  ;;  %13725 = vmatmul.mubr.msk.f32.gmra.mrb[2].mxu1 %vm665_vm1, %v22483_v56  ;;  %v2868_v0 = vsel %vm2867_vm6, %v17643_v7, %v17644_v11 }
 0x203   : > { %v2875_v39 = vsel %vm2867_vm6, %v17663_v28, %v17664_v19  ;;  %13721 = vmatmul.mubr.msk.f32.gmra.mrb[4].mxu0 %vm665_vm1, %v22524_v20  ;;  %v2876_v6 = vsel %vm2867_vm6, %v17664_v19, %v17668_v14  ;;  %2631 = vmatprep.mubr.f32.mxu1 %v29023_v41  ;;  %v2874_v43 = vsel %vm2867_vm6, %v17659_v59, %v17663_v28 }
 0x204   : > { %v22550_v37 = vpop.permute.xlu1 %17676  ;;  %v15586_v49 = vpack.c.bf16 %v2876_v6, %v2871_v45  ;;  %15566 = vmatpush3.bf16.msra.mxu0 %v15565_v60  ;;  %v15588_v17 = vpack.c.bf16 %v2875_v39, %v2870_v36  ;;  %2542 = vmatprep.mubr.f32.mxu0 %v29023_v41  ;;  %v15570_v1 = vpack.c.bf16 %v2874_v43, %v2869_v55  ;;  %v20152_v60 = vld [vmem:[%s20987_s26 + $0x150] sm:$0xff]  ;;  %v20154_v45 = vld [vmem:[%s20987_s26 + $0x140] sm:$0xff]  ;;  %v20155_v6 = vld [vmem:[%s20987_s26 + $0x148] sm:$0xff] }
 0x205   : > { %17956 = vrot.lane.b32.xlu1 %v22509_v50, %s20683_s29  ;;  %v22561_v22 = vpop.permute.xlu0 %17671  ;;  %15567 = vmatprep.subr.bf16.mxu0 %v29038_v8  ;;  %v17679_v9 = vunpack.i.h.bf16 %v22550_v37  ;;  %v22607_v36 = vpack.i.bf16 %v20153_v54, %v20152_v60  ;;  %v22614_v11 = vpack.i.bf16 %v20155_v6, %v20154_v45 }
 0x206   : > { %17951 = vrot.lane.b32.xlu0 %v22521_v44, %s20683_s29  ;;  %15587 = vmatprep.subr.bf16.mxu1 %v15586_v49  ;;  %v17674_v5 = vunpack.i.h.bf16 %v22561_v22 }
 0x207   : > { %15589 = vmatpush1.bf16.msra.mxu1 %v15588_v17  ;;  %13722 = vmatmul.mubr.msk.f32.gmra.mrb[6].mxu0 %vm665_vm1, %v22553_v48 }
 0x208   : > { %v17687_v53 = vpop.permute.xlu1 %17686  ;;  %15569 = vmatpush3.bf16.msra.mxu0 %v15568_v25  ;;  %2548 = vmatprep.mubr.f32.mxu0 %v29023_v41 }
 0x209   : > { %17966 = vrot.lane.b32.xlu1 %v22565_v26, %s20683_s29  ;;  %v22580_v32 = vpop.permute.xlu0 %17681  ;;  %15571 = vmatprep.subr.bf16.mxu0 %v15570_v1  ;;  %v17689_v57 = vunpack.i.h.bf16 %v17687_v53  ;;  %v17688_v31 = vunpack.i.l.bf16 %v17687_v53 }
 0x20a   : > { %17961 = vrot.lane.b32.xlu0 %v21829_v29, %s20683_s29  ;;  %13726 = vmatmul.mubr.msk.f32.gmra.mrb[4].mxu1 %vm665_vm1, %v22524_v20  ;;  %v17678_v29 = vunpack.i.l.bf16 %v22550_v37  ;;  %v17683_v19 = vunpack.i.l.bf16 %v22580_v32  ;;  %v15572_v37 = vpack.c.bf16 %v2873_v40, %v2868_v0 }
 0x20b   : > { %13723 = vmatmul.mubr.msk.f32.gmra.mrb[8].mxu0 %vm665_vm1, %v22575_v47  ;;  %2637 = vmatprep.mubr.f32.mxu1 %v29023_v41  ;;  %v2883_v23 = vsel %vm2867_vm6, %v17688_v31, %v17689_v57 }
 0x20c   : > { %14655 = vmatprep.mubr.msk.f32.mxu0 %vm20680_vm2, %v29023_v41  ;;  %v2880_v43 = vsel %vm2867_vm6, %v17678_v29, %v17679_v9  ;;  %v2879_v4 = vsel %vm2867_vm6, %v17674_v5, %v17678_v29 }
 0x20d   : > { %17976 = vrot.lane.b32.xlu1 %v21845_v18, %s20683_s29  ;;  %v22603_v28 = vpop.permute.xlu1 %17696  ;;  %v17673_v18 = vunpack.i.l.bf16 %v22561_v22 }
 0x20e   : > { %17971 = vrot.lane.b32.xlu0 %v22586_v33, %s20683_s29  ;;  %v17698_v59 = vunpack.i.l.bf16 %v22603_v28  ;;  %v17692_v39 = vpop.permute.xlu0 %17691  ;;  %13727 = vmatmul.mubr.msk.f32.gmra.mrb[6].mxu1 %vm665_vm1, %v22553_v48 }
 0x20f   : > { %v17694_v49 = vunpack.i.h.bf16 %v17692_v39  ;;  %v17693_v17 = vunpack.i.l.bf16 %v17692_v39  ;;  %14656 = vmatmul.mubr.msk.f32.vlgmr.msra.gmra.mrb[30].mxu0 %vm665_vm1, %v22453_v42  ;;  %2643 = vmatprep.mubr.f32.mxu1 %v29023_v41  ;;  %v2881_v42 = vsel %vm2867_vm6, %v17679_v9, %v17683_v19  ;;  %v2878_v7 = vsel %vm2867_vm6, %v17673_v18, %v17674_v5 }
 0x210   : > { %15573 = vmatpush1.bf16.msra.mxu0 %v15572_v37  ;;  %14658 = vmatprep.mubr.msk.f32.mxu0 %vm20680_vm2, %v29023_v41  ;;  %v15576_v10 = vpack.c.bf16 %v2883_v23, %v2878_v7 }
 0x211   : > { %v2885_v21 = vsel %vm2867_vm6, %v17693_v17, %v17694_v49  ;;  %17986 = vrot.lane.b32.xlu1 %v22607_v36, %s20683_s29  ;;  %v2886_v22 = vsel %vm2867_vm6, %v17694_v49, %v17698_v59  ;;  %v2884_v25 = vsel %vm2867_vm6, %v17689_v57, %v17693_v17 }
 0x212   : > { %17981 = vrot.lane.b32.xlu0 %v22614_v11, %s20683_s29  ;;  %v17707_v55 = vpop.permute.xlu1 %17706  ;;  %v15590_v34 = vpack.c.bf16 %v2886_v22, %v2881_v42  ;;  %v15574_v1 = vpack.c.bf16 %v2884_v25, %v2879_v4  ;;  %v15592_v53 = vpack.c.bf16 %v2885_v21, %v2880_v43  ;;  %13728 = vmatmul.mubr.msk.f32.gmra.mrb[8].mxu1 %vm665_vm1, %v22575_v47 }
 0x213   : > { %v17702_v38 = vpop.permute.xlu0 %17701  ;;  %14659 = vmatmul.mubr.msk.f32.gmra.mrb[32].mxu0 %vm665_vm1, %v22483_v56  ;;  %3122 = vmatprep.mubr.f32.mxu1 %v29023_v41  ;;  %v17709_v31 = vunpack.i.h.bf16 %v17707_v55 }
 0x214   : > { %15591 = vmatprep.subr.bf16.mxu1 %v15590_v34  ;;  %15575 = vmatprep.subr.bf16.mxu0 %v15574_v1  ;;  %v17704_v56 = vunpack.i.h.bf16 %v17702_v38 }
 0x215   : > { %17996 = vrot.lane.b32.xlu1 %v21943_v16, %s20683_s29  ;;  %15593 = vmatpush1.bf16.msra.mxu1 %v15592_v53  ;;  %v17708_v16 = vunpack.i.l.bf16 %v17707_v55 }
 0x216   : > { %17991 = vrot.lane.b32.xlu0 %v21957_v13, %s20683_s29  ;;  %15577 = vmatpush1.bf16.msra.mxu0 %v15576_v10  ;;  %s20696_s29 = smov 108  }
 0x217   : > { %v17717_v40 = vpop.permute.xlu1 %17716  ;;  %14661 = vmatprep.mubr.msk.f32.mxu0 %vm20680_vm2, %v29023_v41  ;;  %v2889_v6 = vsel %vm2867_vm6, %v17704_v56, %v17708_v16  ;;  %v2890_v43 = vsel %vm2867_vm6, %v17708_v16, %v17709_v31 }
 0x218   : > { %v22651_v9 = vpop.permute.xlu0 %17711  ;;  %14662 = vmatmul.mubr.msk.f32.gmra.mrb[34].mxu0 %vm665_vm1, %v22524_v20  ;;  %v17719_v13 = vunpack.i.h.bf16 %v17717_v40  ;;  %v17718_v29 = vunpack.i.l.bf16 %v17717_v40  ;;  %v17703_v20 = vunpack.i.l.bf16 %v17702_v38 }
 0x219   : > { %18006 = vrot.lane.b32.xlu1 %v22317_v27, %s20684_s19  ;;  %14664 = vmatprep.mubr.msk.f32.mxu0 %vm20680_vm2, %v29023_v41  ;;  %v17713_v5 = vunpack.i.l.bf16 %v22651_v9 }
 0x21a   : > { %18001 = vrot.lane.b32.xlu0 %v22332_v62, %s20684_s19  ;;  %v2893_v45 = vsel %vm2867_vm6, %v17718_v29, %v17719_v13  ;;  %v2888_v23 = vsel %vm2867_vm6, %v17703_v20, %v17704_v56  ;;  %v17669_v29 = vunpack.i.h.bf16 %v22505_v2  ;;  %v20157_v20 = vld [vmem:[%s20987_s26 + $0xa8] sm:$0xff] }
 0x21b   : > { %v22662_v57 = vpop.permute.xlu1 %17726  ;;  %v2891_v49 = vsel %vm2867_vm6, %v17709_v31, %v17713_v5  ;;  %v15580_v42 = vpack.c.bf16 %v2893_v45, %v2888_v23 }
 0x21c   : > { %v17728_v0 = vunpack.i.l.bf16 %v22662_v57  ;;  %v17722_v60 = vpop.permute.xlu0 %17721  ;;  %14665 = vmatmul.mubr.msk.f32.gmra.mrb[36].mxu0 %vm665_vm1, %v22553_v48 }
 0x21d   : > { %v17724_v54 = vunpack.i.h.bf16 %v17722_v60  ;;  %v17723_v39 = vunpack.i.l.bf16 %v17722_v60  ;;  %18016 = vrot.lane.b32.xlu1 %v22379_v24, %s20684_s19  ;;  %14667 = vmatprep.mubr.msk.f32.mxu0 %vm20680_vm2, %v29023_v41 }
 0x21e   : > { %18011 = vrot.lane.b32.xlu0 %v22031_v3, %s20684_s19 }
 0x21f   : > { %v2895_v37 = vsel %vm2867_vm6, %v17723_v39, %v17724_v54  ;;  %v17737_v18 = vpop.permute.xlu1 %17736  ;;  %v2894_v48 = vsel %vm2867_vm6, %v17719_v13, %v17723_v39  ;;  %v2896_v17 = vsel %vm2867_vm6, %v17724_v54, %v17728_v0 }
 0x220   : > { %v17732_v3 = vpop.permute.xlu0 %17731  ;;  %v15578_v4 = vpack.c.bf16 %v2894_v48, %v2889_v6  ;;  %v15594_v21 = vpack.c.bf16 %v2896_v17, %v2891_v49  ;;  %14668 = vmatmul.mubr.msk.f32.gmra.mrb[38].mxu0 %vm665_vm1, %v22575_v47  ;;  %v15596_v22 = vpack.c.bf16 %v2895_v37, %v2890_v43  ;;  %v17738_v47 = vunpack.i.l.bf16 %v17737_v18 }
 0x221   : > { %18026 = vrot.lane.b32.xlu1 %v22048_v51, %s20684_s19  ;;  %3027 = vmatprep.mubr.f32.mxu0 %v29023_v41  ;;  %v17734_v34 = vunpack.i.h.bf16 %v17732_v3  ;;  %v17739_v38 = vunpack.i.h.bf16 %v17737_v18  ;;  %v17733_v10 = vunpack.i.l.bf16 %v17732_v3  ;;  %v17654_v43 = vunpack.i.h.bf16 %v22476_v61 }
 0x222   : > { %18021 = vrot.lane.b32.xlu0 %v22398_v52, %s20684_s19  ;;  %15579 = vmatprep.subr.bf16.mxu0 %v15578_v4  ;;  %v20158_v4 = vld [vmem:[%s20987_s26 + $0xd0] sm:$0xff] }
 0x223   : > { %15595 = vmatprep.subr.bf16.mxu1 %v15594_v21  ;;  %15581 = vmatpush1.bf16.msra.mxu0 %v15580_v42  ;;  %v17747_v25 = vpop.permute.xlu1 %17746  ;;  %v2899_v54 = vsel %vm2867_vm6, %v17734_v34, %v17738_v47  ;;  %v2900_v37 = vsel %vm2867_vm6, %v17738_v47, %v17739_v38  ;;  %v2898_v18 = vsel %vm2867_vm6, %v17733_v10, %v17734_v34  ;;  %v20159_v21 = vld [vmem:[%s20987_s26 + $0xd8] sm:$0xff] }
 0x224   : > { %15597 = vmatpush1.bf16.msra.mxu1 %v15596_v22  ;;  %v22692_v55 = vpop.permute.xlu0 %17741  ;;  %v17749_v51 = vunpack.i.h.bf16 %v17747_v25  ;;  %v17748_v1 = vunpack.i.l.bf16 %v17747_v25  ;;  %v22732_v42 = vpack.i.bf16 %v20159_v21, %v20158_v4  ;;  %v2877_v22 = vsel %vm2867_vm6, %v17668_v14, %v17669_v29  ;;  %v22770_v29 = vld [vmem:[#allocation5 + $0xd0] sm:$0xff] }
 0x225   : > { %18036 = vrot.lane.b32.xlu1 %v22417_v58, %s20684_s19  ;;  %v17743_v53 = vunpack.i.l.bf16 %v22692_v55  ;;  %v17699_v25 = vunpack.i.h.bf16 %v22603_v28  ;;  %v17744_v4 = vunpack.i.h.bf16 %v22692_v55 }
 0x226   : > { %18031 = vrot.lane.b32.xlu0 %v22058_v15, %s20684_s19  ;;  %v2903_v31 = vsel %vm2867_vm6, %v17748_v1, %v17749_v51  ;;  %v20156_v15 = vld [vmem:[%s20987_s26 + $0xa0] sm:$0xff]  ;;  %v2872_v1 = vsel %vm2867_vm6, %v17653_v35, %v17654_v43  ;;  %v17729_v35 = vunpack.i.h.bf16 %v22662_v57  ;;  %v22810_v43 = vld [vmem:[#allocation5 + $0xd8] sm:$0xff] }
 0x227   : > { %v22699_v7 = vpop.permute.xlu1 %17756  ;;  %v22710_v60 = vpack.i.bf16 %v20157_v20, %v20156_v15  ;;  %v2901_v6 = vsel %vm2867_vm6, %v17739_v38, %v17743_v53  ;;  %v15584_v23 = vpack.c.bf16 %v2903_v31, %v2898_v18  ;;  %v17684_v38 = vunpack.i.h.bf16 %v22580_v32 }
 0x228   : > { %v17758_v40 = vunpack.i.l.bf16 %v22699_v7  ;;  %v17752_v16 = vpop.permute.xlu0 %17751  ;;  %v15603_v10 = vpack.c.bf16 %v2877_v22, %v2872_v1  ;;  %v2887_v61 = vsel %vm2867_vm6, %v17698_v59, %v17699_v25  ;;  %v17714_v15 = vunpack.i.h.bf16 %v22651_v9  ;;  %v20162_v22 = vld [vmem:[%s20987_s26 + $0x130] sm:$0xff]  ;;  %v20163_v25 = vld [vmem:[%s20987_s26 + $0x138] sm:$0xff] }
 0x229   : > { %v17754_v56 = vunpack.i.h.bf16 %v17752_v16  ;;  %v17753_v13 = vunpack.i.l.bf16 %v17752_v16  ;;  %18046 = vrot.lane.b32.xlu1 %v22063_v12, %s20684_s19  ;;  %v2882_v31 = vsel %vm2867_vm6, %v17683_v19, %v17684_v38  ;;  %v2897_v19 = vsel %vm2867_vm6, %v17728_v0, %v17729_v35 }
 0x22a   : > { %18041 = vrot.lane.b32.xlu0 %v22076_v30, %s20684_s19 }
 0x22b   : > { %v2905_v39 = vsel %vm2867_vm6, %v17753_v13, %v17754_v56  ;;  %v22714_v45 = vpop.permute.xlu1 %17766  ;;  %v2904_v12 = vsel %vm2867_vm6, %v17749_v51, %v17753_v13  ;;  %v2906_v30 = vsel %vm2867_vm6, %v17754_v56, %v17758_v40  ;;  %v22742_v51 = vld [vmem:[#allocation5 + $0xc8] sm:$0xff] }
 0x22c   : > { %v22725_v48 = vpop.permute.xlu0 %17761  ;;  %v15582_v49 = vpack.c.bf16 %v2904_v12, %v2899_v54  ;;  %v15598_v17 = vpack.c.bf16 %v2906_v30, %v2901_v6  ;;  %v15600_v3 = vpack.c.bf16 %v2905_v39, %v2900_v37  ;;  %v17768_v16 = vunpack.i.l.bf16 %v22714_v45  ;;  %v20160_v12 = vld [vmem:[%s20987_s26 + $0x100] sm:$0xff]  ;;  %v20161_v6 = vld [vmem:[%s20987_s26 + $0x108] sm:$0xff] }
 0x22d   : > { %18056 = vrot.lane.b32.xlu1 %v22463_v63, %s20684_s19  ;;  %v17764_v56 = vunpack.i.h.bf16 %v22725_v48  ;;  %v17763_v28 = vunpack.i.l.bf16 %v22725_v48  ;;  %v15606_v39 = vpack.c.bf16 %v2887_v61, %v2882_v31  ;;  %v22785_v32 = vpack.i.bf16 %v20161_v6, %v20160_v12 }
 0x22e   : > { %18051 = vrot.lane.b32.xlu0 %v22710_v60, %s20684_s19  ;;  %15583 = vmatprep.subr.bf16.mxu0 %v15582_v49  ;;  %v17759_v30 = vunpack.i.h.bf16 %v22699_v7 }
 0x22f   : > { %15599 = vmatprep.subr.bf16.mxu1 %v15598_v17  ;;  %15585 = vmatpush1.bf16.msra.mxu0 %v15584_v23  ;;  %v17777_v47 = vpop.permute.xlu1 %17776  ;;  %v3372_v18 = vsel %vm3370_vm7, %v17764_v56, %v17768_v16  ;;  %v3371_v57 = vsel %vm3370_vm7, %v17763_v28, %v17764_v56 }
 0x230   : > { %15601 = vmatpush1.bf16.msra.mxu1 %v15600_v3  ;;  %v22740_v34 = vpop.permute.xlu0 %17771  ;;  %v17779_v2 = vunpack.i.h.bf16 %v17777_v47  ;;  %v17778_v14 = vunpack.i.l.bf16 %v17777_v47  ;;  %v2892_v3 = vsel %vm2867_vm6, %v17713_v5, %v17714_v15  ;;  %v22821_v47 = vpack.i.bf16 %v20163_v25, %v20162_v22  ;;  %v20167_v22 = vld [vmem:[%s20987_s26 + $0x168] sm:$0xff] }
 0x231   : > { %18066 = vrot.lane.b32.xlu1 %v22732_v42, %s20684_s19  ;;  %15602 = vmatprep.subr.bf16.mxu1 %v29038_v8  ;;  %v17773_v1 = vunpack.i.l.bf16 %v22740_v34  ;;  %v15609_v9 = vpack.c.bf16 %v2897_v19, %v2892_v3  ;;  %v2907_v5 = vsel %vm2867_vm6, %v17758_v40, %v17759_v30  ;;  %v2902_v40 = vsel %vm2867_vm6, %v17743_v53, %v17744_v4  ;;  %v22864_v19 = vld [vmem:[#allocation5 + $0xe8] sm:$0xff] }
 0x232   : > { %18061 = vrot.lane.b32.xlu0 %v22492_v46, %s20684_s19  ;;  %13734 = vmatmul.mubr.msk.f32.vlgmr.msra.gmra.mrb[0].mxu0 %vm665_vm1, %v22742_v51  ;;  %v3376_v54 = vsel %vm3370_vm7, %v17778_v14, %v17779_v2  ;;  %v15612_v56 = vpack.c.bf16 %v2907_v5, %v2902_v40  ;;  %vm9909_vm6 = vcmask 891904  }
 0x233   : > { %13739 = vmatmul.mubr.msk.f32.vlgmr.msra.gmra.mrb[0].mxu1 %vm665_vm1, %v22742_v51  ;;  %v22763_v13 = vpop.permute.xlu1 %17786  ;;  %3033 = vmatprep.mubr.f32.mxu0 %v29023_v41  ;;  %v15616_v21 = vpack.c.bf16 %v3376_v54, %v3371_v57  ;;  %v20165_v57 = vld [vmem:[%s20987_s26 + $0x178] sm:$0xff] }
 0x234   : > { %15604 = vmatpush3.bf16.msra.mxu1 %v15603_v10  ;;  %v22767_v59 = vpop.permute.xlu0 %17781  ;;  %3128 = vmatprep.mubr.f32.mxu1 %v29023_v41  ;;  %v17788_v0 = vunpack.i.l.bf16 %v22763_v13  ;;  %v22835_v10 = vld [vmem:[#allocation5 + $0xe0] sm:$0xff] }
 0x235   : > { %v17783_v20 = vunpack.i.l.bf16 %v22767_v59  ;;  %18076 = vrot.lane.b32.xlu1 %v22509_v50, %s20684_s19  ;;  %15605 = vmatprep.subr.bf16.mxu1 %v29038_v8  ;;  %v17784_v49 = vunpack.i.h.bf16 %v22767_v59 }
 0x236   : > { %18071 = vrot.lane.b32.xlu0 %v22521_v44, %s20684_s19  ;;  %13735 = vmatmul.mubr.msk.f32.gmra.mrb[2].mxu0 %vm665_vm1, %v22770_v29 }
 0x237   : > { %13740 = vmatmul.mubr.msk.f32.gmra.mrb[2].mxu1 %vm665_vm1, %v22770_v29  ;;  %v22795_v37 = vpop.permute.xlu1 %17796  ;;  %v3377_v48 = vsel %vm3370_vm7, %v17779_v2, %v17783_v20  ;;  %3039 = vmatprep.mubr.f32.mxu0 %v29023_v41  ;;  %v17769_v2 = vunpack.i.h.bf16 %v22714_v45  ;;  %v3379_v7 = vsel %vm3370_vm7, %v17784_v49, %v17788_v0 }
 0x238   : > { %15607 = vmatpush3.bf16.msra.mxu1 %v15606_v39  ;;  %v22807_v17 = vpop.permute.xlu0 %17791  ;;  %3134 = vmatprep.mubr.f32.mxu1 %v29023_v41  ;;  %v15614_v23 = vpack.c.bf16 %v3377_v48, %v3372_v18  ;;  %v17798_v55 = vunpack.i.l.bf16 %v22795_v37  ;;  %v20164_v48 = vld [vmem:[%s20987_s26 + $0x170] sm:$0xff]  ;;  %v17799_v3 = vunpack.i.h.bf16 %v22795_v37 }
 0x239   : > { %18086 = vrot.lane.b32.xlu1 %v22565_v26, %s20684_s19  ;;  %15608 = vmatprep.subr.bf16.mxu1 %v29038_v8  ;;  %v3374_v28 = vsel %vm3370_vm7, %v17769_v2, %v17773_v1  ;;  %v17794_v53 = vunpack.i.h.bf16 %v22807_v17  ;;  %v17793_v54 = vunpack.i.l.bf16 %v22807_v17  ;;  %v22870_v17 = vpack.i.bf16 %v20165_v57, %v20164_v48 }
 0x23a   : > { %18081 = vrot.lane.b32.xlu0 %v22785_v32, %s20684_s19  ;;  %15615 = vmatprep.subr.bf16.mxu0 %v15614_v23  ;;  %v15630_v15 = vpack.c.bf16 %v3379_v7, %v3374_v28  ;;  %v3378_v23 = vsel %vm3370_vm7, %v17783_v20, %v17784_v49  ;;  %v3373_v40 = vsel %vm3370_vm7, %v17768_v16, %v17769_v2 }
 0x23b   : > { %13741 = vmatmul.mubr.msk.f32.gmra.mrb[4].mxu1 %vm665_vm1, %v22810_v43  ;;  %15617 = vmatpush1.bf16.msra.mxu0 %v15616_v21  ;;  %v17807_v38 = vpop.permute.xlu1 %17806  ;;  %v20166_v21 = vld [vmem:[%s20987_s26 + $0x160] sm:$0xff]  ;;  %v3382_v20 = vsel %vm3370_vm7, %v17794_v53, %v17798_v55  ;;  %v3383_v2 = vsel %vm3370_vm7, %v17798_v55, %v17799_v3 }
 0x23c   : > { %15610 = vmatpush3.bf16.msra.mxu1 %v15609_v9  ;;  %v22832_v14 = vpop.permute.xlu0 %17801  ;;  %3140 = vmatprep.mubr.f32.mxu1 %v29023_v41  ;;  %v17809_v61 = vunpack.i.h.bf16 %v17807_v38  ;;  %v17808_v35 = vunpack.i.l.bf16 %v17807_v38  ;;  %v22881_v25 = vpack.i.bf16 %v20167_v22, %v20166_v21  ;;  %v3381_v9 = vsel %vm3370_vm7, %v17793_v54, %v17794_v53  ;;  %v20169_v54 = vld [vmem:[%s20987_s26 + $0x28] sm:$0xff]  ;;  %v20170_v22 = vld [vmem:[%s20987_s26 + $0x50] sm:$0xff] }
 0x23d   : > { %18096 = vrot.lane.b32.xlu1 %v22821_v47, %s20684_s19  ;;  %15611 = vmatprep.subr.bf16.mxu1 %v29038_v8  ;;  %v17803_v39 = vunpack.i.l.bf16 %v22832_v14 }
 0x23e   : > { %18091 = vrot.lane.b32.xlu0 %v22586_v33, %s20684_s19  ;;  %13736 = vmatmul.mubr.msk.f32.gmra.mrb[4].mxu0 %vm665_vm1, %v22810_v43  ;;  %v3386_v4 = vsel %vm3370_vm7, %v17808_v35, %v17809_v61 }
 0x23f   : > { %13742 = vmatmul.mubr.msk.f32.gmra.mrb[6].mxu1 %vm665_vm1, %v22835_v10  ;;  %v22857_v31 = vpop.permute.xlu1 %17816  ;;  %3045 = vmatprep.mubr.f32.mxu0 %v29023_v41  ;;  %v3384_v7 = vsel %vm3370_vm7, %v17799_v3, %v17803_v39 }
 0x240   : > { %15613 = vmatpush3.bf16.msra.mxu1 %v15612_v56  ;;  %v17818_v12 = vunpack.i.l.bf16 %v22857_v31  ;;  %v17812_v6 = vpop.permute.xlu0 %17811  ;;  %3146 = vmatprep.mubr.f32.mxu1 %v29023_v41  ;;  %v15632_v56 = vpack.c.bf16 %v3378_v23, %v3373_v40 }
 0x241   : > { %v17814_v30 = vunpack.i.h.bf16 %v17812_v6  ;;  %v17813_v18 = vunpack.i.l.bf16 %v17812_v6  ;;  %15631 = vmatprep.subr.bf16.mxu1 %v15630_v15  ;;  %18106 = vrot.lane.b32.xlu1 %v22607_v36, %s20684_s19  ;;  %v20168_v15 = vld [vmem:[%s20987_s26 + $0x20] sm:$0xff] }
 0x242   : > { %18101 = vrot.lane.b32.xlu0 %v22614_v11, %s20684_s19  ;;  %13737 = vmatmul.mubr.msk.f32.gmra.mrb[6].mxu0 %vm665_vm1, %v22835_v10 }
 0x243   : > { %13743 = vmatmul.mubr.msk.f32.gmra.mrb[8].mxu1 %vm665_vm1, %v22864_v19  ;;  %v22887_v59 = vpop.permute.xlu1 %17826  ;;  %v3387_v37 = vsel %vm3370_vm7, %v17809_v61, %v17813_v18  ;;  %v3389_v49 = vsel %vm3370_vm7, %v17814_v30, %v17818_v12  ;;  %3051 = vmatprep.mubr.f32.mxu0 %v29023_v41  ;;  %v15620_v61 = vpack.c.bf16 %v3386_v4, %v3381_v9 }
 0x244   : > { %v17822_v5 = vpop.permute.xlu0 %17821  ;;  %14686 = vmatprep.mubr.msk.f32.mxu1 %vm20680_vm2, %v29023_v41  ;;  %v15618_v38 = vpack.c.bf16 %v3387_v37, %v3382_v20  ;;  %v15634_v35 = vpack.c.bf16 %v3389_v49, %v3384_v7  ;;  %v3388_v28 = vsel %vm3370_vm7, %v17813_v18, %v17814_v30  ;;  %v17828_v53 = vunpack.i.l.bf16 %v22887_v59  ;;  %v20171_v20 = vld [vmem:[%s20987_s26 + $0x58] sm:$0xff] }
 0x245   : > { %18116 = vrot.lane.b32.xlu1 %v22870_v17, %s20684_s19  ;;  %v17824_v6 = vunpack.i.h.bf16 %v17822_v5  ;;  %v15636_v48 = vpack.c.bf16 %v3388_v28, %v3383_v2  ;;  %v17823_v23 = vunpack.i.l.bf16 %v17822_v5  ;;  %v20173_v2 = vld [vmem:[%s20987_s26 + $0x68] sm:$0xff] }
 0x246   : > { %18111 = vrot.lane.b32.xlu0 %v22881_v25, %s20684_s19  ;;  %15619 = vmatprep.subr.bf16.mxu0 %v15618_v38  ;;  %s20697_s19 = smov 107  }
 0x247   : > { %14687 = vmatmul.mubr.msk.f32.vlgmr.msra.gmra.mrb[30].mxu1 %vm665_vm1, %v22742_v51  ;;  %15621 = vmatpush1.bf16.msra.mxu0 %v15620_v61  ;;  %v17837_v45 = vpop.permute.xlu1 %17836  ;;  %v22921_v51 = vpack.i.bf16 %v20169_v54, %v20168_v15  ;;  %v3391_v40 = vsel %vm3370_vm7, %v17823_v23, %v17824_v6 }
 0x248   : > { %15633 = vmatpush1.bf16.msra.mxu1 %v15632_v56  ;;  %v22911_v16 = vpop.permute.xlu0 %17831  ;;  %14689 = vmatprep.mubr.msk.f32.mxu1 %vm20680_vm2, %v29023_v41  ;;  %v17839_v30 = vunpack.i.h.bf16 %v17837_v45  ;;  %v17838_v18 = vunpack.i.l.bf16 %v17837_v45 }
 0x249   : > { %15635 = vmatprep.subr.bf16.mxu1 %v15634_v35  ;;  %18126 = vrot.lane.b32.xlu1 %v22317_v27, %s20685_s30  ;;  %v17833_v55 = vunpack.i.l.bf16 %v22911_v16  ;;  %v17829_v27 = vunpack.i.h.bf16 %v22887_v59  ;;  %v3392_v59 = vsel %vm3370_vm7, %v17824_v6, %v17828_v53  ;;  %v20174_v6 = vld [vmem:[%s20987_s26 + $0x90] sm:$0xff] }
 0x24a   : > { %18121 = vrot.lane.b32.xlu0 %v22332_v62, %s20685_s30  ;;  %13738 = vmatmul.mubr.msk.f32.gmra.mrb[8].mxu0 %vm665_vm1, %v22864_v19  ;;  %v3396_v37 = vsel %vm3370_vm7, %v17838_v18, %v17839_v30 }
 0x24b   : > { %v22928_v57 = vpop.permute.xlu1 %17846  ;;  %14690 = vmatmul.mubr.msk.f32.gmra.mrb[32].mxu1 %vm665_vm1, %v22770_v29  ;;  %3530 = vmatprep.mubr.f32.mxu0 %v29023_v41  ;;  %v22941_v29 = vpack.i.bf16 %v20171_v20, %v20170_v22  ;;  %v3393_v7 = vsel %vm3370_vm7, %v17828_v53, %v17829_v27  ;;  %v15624_v28 = vpack.c.bf16 %v3396_v37, %v3391_v40 }
 0x24c   : > { %15637 = vmatpush1.bf16.msra.mxu1 %v15636_v48  ;;  %v17848_v62 = vunpack.i.l.bf16 %v22928_v57  ;;  %v17842_v3 = vpop.permute.xlu0 %17841  ;;  %14692 = vmatprep.mubr.msk.f32.mxu1 %vm20680_vm2, %v29023_v41  ;;  %v20176_v48 = vld [vmem:[%s20987_s26 + $0x80] sm:$0xff] }
 0x24d   : > { %v17844_v4 = vunpack.i.h.bf16 %v17842_v3  ;;  %v17843_v21 = vunpack.i.l.bf16 %v17842_v3  ;;  %18136 = vrot.lane.b32.xlu1 %v22379_v24, %s20685_s30  ;;  %v3394_v24 = vsel %vm3370_vm7, %v17829_v27, %v17833_v55 }
 0x24e   : > { %18131 = vrot.lane.b32.xlu0 %v22921_v51, %s20685_s30 }
 0x24f   : > { %v3398_v49 = vsel %vm3370_vm7, %v17843_v21, %v17844_v4  ;;  %v17857_v9 = vpop.permute.xlu1 %17856  ;;  %v3397_v5 = vsel %vm3370_vm7, %v17839_v30, %v17843_v21  ;;  %v3399_v38 = vsel %vm3370_vm7, %v17844_v4, %v17848_v62  ;;  %14693 = vmatmul.mubr.msk.f32.gmra.mrb[34].mxu1 %vm665_vm1, %v22810_v43  ;;  %v20172_v43 = vld [vmem:[%s20987_s26 + $0x60] sm:$0xff]  ;;  %v20175_v30 = vld [vmem:[%s20987_s26 + $0x98] sm:$0xff] }
 0x250   : > { %v17852_v61 = vpop.permute.xlu0 %17851  ;;  %v15622_v35 = vpack.c.bf16 %v3397_v5, %v3392_v59  ;;  %v15638_v56 = vpack.c.bf16 %v3399_v38, %v3394_v24  ;;  %14695 = vmatprep.mubr.msk.f32.mxu1 %vm20680_vm2, %v29023_v41  ;;  %v15640_v45 = vpack.c.bf16 %v3398_v49, %v3393_v7  ;;  %v22967_v53 = vpack.i.bf16 %v20173_v2, %v20172_v43 }
 0x251   : > { %18146 = vrot.lane.b32.xlu1 %v22941_v29, %s20685_s30  ;;  %v22975_v18 = vpack.i.bf16 %v20175_v30, %v20174_v6  ;;  %v17858_v23 = vunpack.i.l.bf16 %v17857_v9  ;;  %v17854_v3 = vunpack.i.h.bf16 %v17852_v61  ;;  %v17859_v20 = vunpack.i.h.bf16 %v17857_v9 }
 0x252   : > { %18141 = vrot.lane.b32.xlu0 %v22398_v52, %s20685_s30  ;;  %15623 = vmatprep.subr.bf16.mxu0 %v15622_v35  ;;  %v20177_v52 = vld [vmem:[%s20987_s26 + $0x88] sm:$0xff]  ;;  %v17853_v37 = vunpack.i.l.bf16 %v17852_v61  ;;  %v17774_v24 = vunpack.i.h.bf16 %v22740_v34  ;;  %v17789_v38 = vunpack.i.h.bf16 %v22763_v13  ;;  %v17804_v13 = vunpack.i.h.bf16 %v22832_v14 }
 0x253   : > { %15639 = vmatprep.subr.bf16.mxu1 %v15638_v56  ;;  %15625 = vmatpush1.bf16.msra.mxu0 %v15624_v28  ;;  %v17867_v15 = vpop.permute.xlu1 %17866  ;;  %v22979_v27 = vpack.i.bf16 %v20177_v52, %v20176_v48  ;;  %v3402_v9 = vsel %vm3370_vm7, %v17854_v3, %v17858_v23  ;;  %v3403_v28 = vsel %vm3370_vm7, %v17858_v23, %v17859_v20  ;;  %v17819_v52 = vunpack.i.h.bf16 %v22857_v31  ;;  %v23050_v31 = vld [vmem:[#allocation5 + $0xf8] sm:$0xff] }
 0x254   : > { %15641 = vmatpush1.bf16.msra.mxu1 %v15640_v45  ;;  %v22969_v54 = vpop.permute.xlu0 %17861  ;;  %v17869_v4 = vunpack.i.h.bf16 %v17867_v15  ;;  %v17868_v21 = vunpack.i.l.bf16 %v17867_v15  ;;  %v3401_v45 = vsel %vm3370_vm7, %v17853_v37, %v17854_v3  ;;  %v3380_v48 = vsel %vm3370_vm7, %v17788_v0, %v17789_v38  ;;  %v23026_v3 = vld [vmem:[#allocation5 + $0xf0] sm:$0xff] }
 0x255   : > { %18156 = vrot.lane.b32.xlu1 %v22417_v58, %s20685_s30  ;;  %14696 = vmatmul.mubr.msk.f32.gmra.mrb[36].mxu1 %vm665_vm1, %v22835_v10  ;;  %v17863_v58 = vunpack.i.l.bf16 %v22969_v54 }
 0x256   : > { %18151 = vrot.lane.b32.xlu0 %v22967_v53, %s20685_s30  ;;  %14698 = vmatprep.mubr.msk.f32.mxu1 %vm20680_vm2, %v29023_v41  ;;  %v3406_v7 = vsel %vm3370_vm7, %v17868_v21, %v17869_v4  ;;  %v3390_v21 = vsel %vm3370_vm7, %v17818_v12, %v17819_v52  ;;  %v3385_v12 = vsel %vm3370_vm7, %v17803_v39, %v17804_v13 }
 0x257   : > { %v22988_v22 = vpop.permute.xlu1 %17876  ;;  %v15628_v6 = vpack.c.bf16 %v3406_v7, %v3401_v45  ;;  %v15650_v14 = vpack.c.bf16 %v3390_v21, %v3385_v12  ;;  %v23131_v21 = vld [vmem:[#allocation5 + $0x110] sm:$0xff] }
 0x258   : > { %v17878_v59 = vunpack.i.l.bf16 %v22988_v22  ;;  %v17872_v49 = vpop.permute.xlu0 %17871  ;;  %v17879_v7 = vunpack.i.h.bf16 %v22988_v22 }
 0x259   : > { %v17874_v10 = vunpack.i.h.bf16 %v17872_v49  ;;  %v17873_v5 = vunpack.i.l.bf16 %v17872_v49  ;;  %18166 = vrot.lane.b32.xlu1 %v22975_v18, %s20685_s30  ;;  %14699 = vmatmul.mubr.msk.f32.gmra.mrb[38].mxu1 %vm665_vm1, %v22864_v19  ;;  %v3404_v19 = vsel %vm3370_vm7, %v17859_v20, %v17863_v58  ;;  %v17849_v20 = vunpack.i.h.bf16 %v22928_v57  ;;  %v23077_v57 = vld [vmem:[#allocation5 + $0x100] sm:$0xff] }
 0x25a   : > { %18161 = vrot.lane.b32.xlu0 %v22979_v27, %s20685_s30  ;;  %3625 = vmatprep.mubr.f32.mxu1 %v29023_v41  ;;  %v17834_v49 = vunpack.i.h.bf16 %v22911_v16 }
 0x25b   : > { %v3408_v40 = vsel %vm3370_vm7, %v17873_v5, %v17874_v10  ;;  %v23003_v61 = vpop.permute.xlu1 %17886  ;;  %v3407_v35 = vsel %vm3370_vm7, %v17869_v4, %v17873_v5  ;;  %v3409_v56 = vsel %vm3370_vm7, %v17874_v10, %v17878_v59  ;;  %v3400_v39 = vsel %vm3370_vm7, %v17848_v62, %v17849_v20 }
 0x25c   : > { %v23014_v43 = vpop.permute.xlu0 %17881  ;;  %v15626_v2 = vpack.c.bf16 %v3407_v35, %v3402_v9  ;;  %v15642_v15 = vpack.c.bf16 %v3409_v56, %v3404_v19  ;;  %v15644_v30 = vpack.c.bf16 %v3408_v40, %v3403_v28  ;;  %v17889_v34 = vunpack.i.h.bf16 %v23003_v61 }
 0x25d   : > { %18176 = vrot.lane.b32.xlu1 %v22463_v63, %s20685_s30  ;;  %v3375_v63 = vsel %vm3370_vm7, %v17773_v1, %v17774_v24  ;;  %v17864_v35 = vunpack.i.h.bf16 %v22969_v54  ;;  %v17884_v45 = vunpack.i.h.bf16 %v23014_v43 }
 0x25e   : > { %18171 = vrot.lane.b32.xlu0 %v22710_v60, %s20685_s30  ;;  %15627 = vmatprep.subr.bf16.mxu0 %v15626_v2  ;;  %v15647_v4 = vpack.c.bf16 %v3380_v48, %v3375_v63 }
 0x25f   : > { %15643 = vmatprep.subr.bf16.mxu1 %v15642_v15  ;;  %15629 = vmatpush1.bf16.msra.mxu0 %v15628_v6  ;;  %v23024_v23 = vpop.permute.xlu1 %17896  ;;  %v23106_v6 = vld [vmem:[#allocation5 + $0x108] sm:$0xff] }
 0x260   : > { %15645 = vmatpush1.bf16.msra.mxu1 %v15644_v30  ;;  %v23032_v0 = vpop.permute.xlu0 %17891  ;;  %15646 = vmatprep.subr.bf16.mxu0 %v29038_v8  ;;  %v17899_v2 = vunpack.i.h.bf16 %v23024_v23  ;;  %v3405_v30 = vsel %vm3370_vm7, %v17863_v58, %v17864_v35  ;;  %v17898_v63 = vunpack.i.l.bf16 %v23024_v23 }
 0x261   : > { %18186 = vrot.lane.b32.xlu1 %v22732_v42, %s20685_s30  ;;  %v17893_v1 = vunpack.i.l.bf16 %v23032_v0 }
 0x262   : > { %18181 = vrot.lane.b32.xlu0 %v22492_v46, %s20685_s30  ;;  %13749 = vmatmul.mubr.msk.f32.vlgmr.msra.gmra.mrb[0].mxu0 %vm665_vm1, %v23026_v3  ;;  %v17888_v46 = vunpack.i.l.bf16 %v23003_v61  ;;  %v3395_v61 = vsel %vm3370_vm7, %v17833_v55, %v17834_v49  ;;  %v3410_v55 = vsel %vm3370_vm7, %v17878_v59, %v17879_v7  ;;  %v17883_v59 = vunpack.i.l.bf16 %v23014_v43 }
 0x263   : > { %15648 = vmatpush3.bf16.msra.mxu0 %v15647_v4  ;;  %v23047_v37 = vpop.permute.xlu1 %17906  ;;  %3536 = vmatprep.mubr.f32.mxu0 %v29023_v41  ;;  %v3877_v62 = vsel %vm3873_vm8, %v17889_v34, %v17893_v1  ;;  %v15653_v16 = vpack.c.bf16 %v3400_v39, %v3395_v61  ;;  %v15656_v48 = vpack.c.bf16 %v3410_v55, %v3405_v30  ;;  %vm10412_vm7 = vcmask 883712  }
 0x264   : > { %v17908_v10 = vunpack.i.l.bf16 %v23047_v37  ;;  %v17902_v5 = vpop.permute.xlu0 %17901  ;;  %15649 = vmatprep.subr.bf16.mxu0 %v29038_v8  ;;  %13754 = vmatmul.mubr.msk.f32.vlgmr.msra.gmra.mrb[0].mxu1 %vm665_vm1, %v23026_v3  ;;  %v3876_v9 = vsel %vm3873_vm8, %v17888_v46, %v17889_v34  ;;  %v3875_v52 = vsel %vm3873_vm8, %v17884_v45, %v17888_v46  ;;  %v3874_v46 = vsel %vm3873_vm8, %v17883_v59, %v17884_v45 }
 0x265   : > { %v17904_v24 = vunpack.i.h.bf16 %v17902_v5  ;;  %v17903_v38 = vunpack.i.l.bf16 %v17902_v5  ;;  %18196 = vrot.lane.b32.xlu1 %v22509_v50, %s20685_s30  ;;  %3631 = vmatprep.mubr.f32.mxu1 %v29023_v41  ;;  %v3879_v5 = vsel %vm3873_vm8, %v17898_v63, %v17899_v2 }
 0x266   : > { %18191 = vrot.lane.b32.xlu0 %v22521_v44, %s20685_s30  ;;  %13750 = vmatmul.mubr.msk.f32.gmra.mrb[2].mxu0 %vm665_vm1, %v23050_v31  ;;  %v15660_v61 = vpack.c.bf16 %v3879_v5, %v3874_v46 }
 0x267   : > { %v3881_v40 = vsel %vm3873_vm8, %v17903_v38, %v17904_v24  ;;  %15651 = vmatpush3.bf16.msra.mxu0 %v15650_v14  ;;  %v23074_v50 = vpop.permute.xlu1 %17916  ;;  %3542 = vmatprep.mubr.f32.mxu0 %v29023_v41  ;;  %v3882_v44 = vsel %vm3873_vm8, %v17904_v24, %v17908_v10 }
 0x268   : > { %v23089_v19 = vpop.permute.xlu0 %17911  ;;  %15652 = vmatprep.subr.bf16.mxu0 %v29038_v8  ;;  %v15674_v56 = vpack.c.bf16 %v3882_v44, %v3877_v62  ;;  %v15676_v28 = vpack.c.bf16 %v3881_v40, %v3876_v9  ;;  %13755 = vmatmul.mubr.msk.f32.gmra.mrb[2].mxu1 %vm665_vm1, %v23050_v31  ;;  %v17918_v54 = vunpack.i.l.bf16 %v23074_v50  ;;  %v17919_v23 = vunpack.i.h.bf16 %v23074_v50 }
 0x269   : > { %18206 = vrot.lane.b32.xlu1 %v22565_v26, %s20685_s30  ;;  %3637 = vmatprep.mubr.f32.mxu1 %v29023_v41  ;;  %v3880_v26 = vsel %vm3873_vm8, %v17899_v2, %v17903_v38  ;;  %v17914_v58 = vunpack.i.h.bf16 %v23089_v19  ;;  %v17913_v40 = vunpack.i.l.bf16 %v23089_v19  ;;  %v20180_v2 = vld [vmem:[%s20987_s26] sm:$0xff] }
 0x26a   : > { %18201 = vrot.lane.b32.xlu0 %v22785_v32, %s20685_s30  ;;  %13751 = vmatmul.mubr.msk.f32.gmra.mrb[4].mxu0 %vm665_vm1, %v23077_v57  ;;  %v15658_v43 = vpack.c.bf16 %v3880_v26, %v3875_v52  ;;  %v3886_v9 = vsel %vm3873_vm8, %v17918_v54, %v17919_v23 }
 0x26b   : > { %15675 = vmatprep.subr.bf16.mxu1 %v15674_v56  ;;  %15654 = vmatpush3.bf16.msra.mxu0 %v15653_v16  ;;  %v17927_v15 = vpop.permute.xlu1 %17926  ;;  %v3885_v38 = vsel %vm3873_vm8, %v17914_v58, %v17918_v54  ;;  %v20178_v56 = vld [vmem:[%s20987_s26 + $0x10] sm:$0xff]  ;;  %v20181_v16 = vld [vmem:[%s20987_s26 + $0x8] sm:$0xff]  ;;  %v3884_v26 = vsel %vm3873_vm8, %v17913_v40, %v17914_v58 }
 0x26c   : > { %15677 = vmatpush1.bf16.msra.mxu1 %v15676_v28  ;;  %v23112_v22 = vpop.permute.xlu0 %17921  ;;  %3548 = vmatprep.mubr.f32.mxu0 %v29023_v41  ;;  %v17928_v24 = vunpack.i.l.bf16 %v17927_v15  ;;  %v20179_v28 = vld [vmem:[%s20987_s26 + $0x18] sm:$0xff]  ;;  %v23179_v55 = vpack.i.bf16 %v20181_v16, %v20180_v2 }
 0x26d   : > { %18216 = vrot.lane.b32.xlu1 %v22821_v47, %s20685_s30  ;;  %15655 = vmatprep.subr.bf16.mxu0 %v29038_v8  ;;  %v17923_v13 = vunpack.i.l.bf16 %v23112_v22  ;;  %v23169_v45 = vpack.i.bf16 %v20179_v28, %v20178_v56  ;;  %v20187_v2 = vld [vmem:[%s20987_s26 + $0x78] sm:$0xff] }
 0x26e   : > { %18211 = vrot.lane.b32.xlu0 %v22586_v33, %s20685_s30  ;;  %13752 = vmatmul.mubr.msk.f32.gmra.mrb[6].mxu0 %vm665_vm1, %v23106_v6  ;;  %v17929_v33 = vunpack.i.h.bf16 %v17927_v15 }
 0x26f   : > { %15657 = vmatpush3.bf16.msra.mxu0 %v15656_v48  ;;  %v23128_v4 = vpop.permute.xlu1 %17936  ;;  %3554 = vmatprep.mubr.f32.mxu0 %v29023_v41  ;;  %v3887_v39 = vsel %vm3873_vm8, %v17919_v23, %v17923_v13  ;;  %v20182_v48 = vld [vmem:[%s20987_s26 + $0x30] sm:$0xff] }
 0x270   : > { %v17938_v20 = vunpack.i.l.bf16 %v23128_v4  ;;  %v17932_v34 = vpop.permute.xlu0 %17931  ;;  %15659 = vmatprep.subr.bf16.mxu0 %v15658_v43  ;;  %13756 = vmatmul.mubr.msk.f32.gmra.mrb[4].mxu1 %vm665_vm1, %v23077_v57  ;;  %v3889_v19 = vsel %vm3873_vm8, %v17928_v24, %v17929_v33 }
 0x271   : > { %v17934_v12 = vunpack.i.h.bf16 %v17932_v34  ;;  %v17933_v49 = vunpack.i.l.bf16 %v17932_v34  ;;  %18226 = vrot.lane.b32.xlu1 %v22607_v36, %s20685_s30  ;;  %3643 = vmatprep.mubr.f32.mxu1 %v29023_v41  ;;  %v15664_v59 = vpack.c.bf16 %v3889_v19, %v3884_v26  ;;  %v20186_v19 = vld [vmem:[%s20987_s26 + $0x70] sm:$0xff] }
 0x272   : > { %18221 = vrot.lane.b32.xlu0 %v22614_v11, %s20685_s30  ;;  %13753 = vmatmul.mubr.msk.f32.gmra.mrb[8].mxu0 %vm665_vm1, %v23131_v21  ;;  %v23237_v16 = vpack.i.bf16 %v20187_v2, %v20186_v19  ;;  %v20190_v2 = vld [vmem:[%s20987_s26 + $0xc0] sm:$0xff] }
 0x273   : > { %v3891_v14 = vsel %vm3873_vm8, %v17933_v49, %v17934_v12  ;;  %v23148_v36 = vpop.permute.xlu1 %17946  ;;  %14717 = vmatprep.mubr.msk.f32.mxu0 %vm20680_vm2, %v29023_v41  ;;  %v3892_v11 = vsel %vm3873_vm8, %v17934_v12, %v17938_v20  ;;  %v3890_v7 = vsel %vm3873_vm8, %v17929_v33, %v17933_v49 }
 0x274   : > { %v23161_v50 = vpop.permute.xlu0 %17941  ;;  %v15678_v62 = vpack.c.bf16 %v3892_v11, %v3887_v39  ;;  %v15662_v44 = vpack.c.bf16 %v3890_v7, %v3885_v38  ;;  %13757 = vmatmul.mubr.msk.f32.gmra.mrb[6].mxu1 %vm665_vm1, %v23106_v6  ;;  %v15680_v35 = vpack.c.bf16 %v3891_v14, %v3886_v9  ;;  %v17948_v63 = vunpack.i.l.bf16 %v23148_v36  ;;  %v20184_v38 = vld [vmem:[%s20987_s26 + $0x40] sm:$0xff]  ;;  %v20185_v14 = vld [vmem:[%s20987_s26 + $0x48] sm:$0xff] }
 0x275   : > { %18236 = vrot.lane.b32.xlu1 %v22870_v17, %s20685_s30  ;;  %3649 = vmatprep.mubr.f32.mxu1 %v29023_v41  ;;  %v17944_v54 = vunpack.i.h.bf16 %v23161_v50  ;;  %v17949_v33 = vunpack.i.h.bf16 %v23148_v36  ;;  %v17943_v12 = vunpack.i.l.bf16 %v23161_v50  ;;  %v23216_v36 = vpack.i.bf16 %v20185_v14, %v20184_v38 }
 0x276   : > { %18231 = vrot.lane.b32.xlu0 %v22881_v25, %s20685_s30  ;;  %14718 = vmatmul.mubr.msk.f32.vlgmr.msra.gmra.mrb[40].mxu0 %vm665_vm1, %v23026_v3  ;;  %v20183_v3 = vld [vmem:[%s20987_s26 + $0x38] sm:$0xff]  ;;  %v17909_v14 = vunpack.i.h.bf16 %v23047_v37  ;;  %v17924_v37 = vunpack.i.h.bf16 %v23112_v22  ;;  %s20698_s30 = smov 106  }
 0x277   : > { %15661 = vmatpush1.bf16.msra.mxu0 %v15660_v61  ;;  %15679 = vmatprep.subr.bf16.mxu1 %v15678_v62  ;;  %v17957_v15 = vpop.permute.xlu1 %17956  ;;  %v23188_v52 = vpack.i.bf16 %v20183_v3, %v20182_v48  ;;  %v3895_v39 = vsel %vm3873_vm8, %v17944_v54, %v17948_v63  ;;  %v3896_v62 = vsel %vm3873_vm8, %v17948_v63, %v17949_v33 }
 0x278   : > { %15663 = vmatprep.subr.bf16.mxu0 %v15662_v44  ;;  %15681 = vmatpush1.bf16.msra.mxu1 %v15680_v35  ;;  %v23182_v30 = vpop.permute.xlu0 %17951  ;;  %v17959_v58 = vunpack.i.h.bf16 %v17957_v15  ;;  %v17958_v43 = vunpack.i.l.bf16 %v17957_v15 }
 0x279   : > { %18246 = vrot.lane.b32.xlu1 %v23169_v45, %s20686_s15  ;;  %14720 = vmatprep.mubr.msk.f32.mxu0 %vm20680_vm2, %v29023_v41  ;;  %v17953_v23 = vunpack.i.l.bf16 %v23182_v30 }
 0x27a   : > { %18241 = vrot.lane.b32.xlu0 %v23179_v55, %s20686_s15  ;;  %14721 = vmatmul.mubr.msk.f32.gmra.mrb[42].mxu0 %vm665_vm1, %v23050_v31  ;;  %v3899_v24 = vsel %vm3873_vm8, %v17958_v43, %v17959_v58 }
 0x27b   : > { %15665 = vmatpush1.bf16.msra.mxu0 %v15664_v59  ;;  %v23199_v34 = vpop.permute.xlu1 %17966  ;;  %13758 = vmatmul.mubr.msk.f32.gmra.mrb[8].mxu1 %vm665_vm1, %v23131_v21  ;;  %v3897_v40 = vsel %vm3873_vm8, %v17949_v33, %v17953_v23 }
 0x27c   : > { %v17968_v49 = vunpack.i.l.bf16 %v23199_v34  ;;  %v17962_v46 = vpop.permute.xlu0 %17961  ;;  %14723 = vmatprep.mubr.msk.f32.mxu0 %vm20680_vm2, %v29023_v41  ;;  %4128 = vmatprep.mubr.f32.mxu1 %v29023_v41 }
 0x27d   : > { %v17964_v31 = vunpack.i.h.bf16 %v17962_v46  ;;  %v17963_v5 = vunpack.i.l.bf16 %v17962_v46  ;;  %18256 = vrot.lane.b32.xlu1 %v23188_v52, %s20686_s15 }
 0x27e   : > { %18251 = vrot.lane.b32.xlu0 %v22921_v51, %s20686_s15  ;;  %14724 = vmatmul.mubr.msk.f32.gmra.mrb[44].mxu0 %vm665_vm1, %v23077_v57  ;;  %v3894_v57 = vsel %vm3873_vm8, %v17943_v12, %v17944_v54 }
 0x27f   : > { %v3901_v11 = vsel %vm3873_vm8, %v17963_v5, %v17964_v31  ;;  %v17977_v7 = vpop.permute.xlu1 %17976  ;;  %v3900_v9 = vsel %vm3873_vm8, %v17959_v58, %v17963_v5  ;;  %v3902_v50 = vsel %vm3873_vm8, %v17964_v31, %v17968_v49  ;;  %14726 = vmatprep.mubr.msk.f32.mxu0 %vm20680_vm2, %v29023_v41  ;;  %v15668_v56 = vpack.c.bf16 %v3899_v24, %v3894_v57  ;;  %v20188_v5 = vld [vmem:[%s20987_s26 + $0xb0] sm:$0xff]  ;;  %v20189_v24 = vld [vmem:[%s20987_s26 + $0xb8] sm:$0xff] }
 0x280   : > { %v17972_v44 = vpop.permute.xlu0 %17971  ;;  %v15666_v61 = vpack.c.bf16 %v3900_v9, %v3895_v39  ;;  %v15682_v35 = vpack.c.bf16 %v3902_v50, %v3897_v40  ;;  %v15684_v28 = vpack.c.bf16 %v3901_v11, %v3896_v62  ;;  %v17978_v59 = vunpack.i.l.bf16 %v17977_v7 }
 0x281   : > { %18266 = vrot.lane.b32.xlu1 %v22941_v29, %s20686_s15  ;;  %v17974_v48 = vunpack.i.h.bf16 %v17972_v44  ;;  %v17973_v43 = vunpack.i.l.bf16 %v17972_v44  ;;  %v23261_v38 = vpack.i.bf16 %v20189_v24, %v20188_v5 }
 0x282   : > { %18261 = vrot.lane.b32.xlu0 %v23216_v36, %s20686_s15  ;;  %15667 = vmatprep.subr.bf16.mxu0 %v15666_v61 }
 0x283   : > { %15683 = vmatprep.subr.bf16.mxu1 %v15682_v35  ;;  %15669 = vmatpush1.bf16.msra.mxu0 %v15668_v56  ;;  %v17987_v15 = vpop.permute.xlu1 %17986  ;;  %v3904_v57 = vsel %vm3873_vm8, %v17973_v43, %v17974_v48  ;;  %v17894_v56 = vunpack.i.h.bf16 %v23032_v0  ;;  %v20194_v0 = vld [vmem:[%s20987_s26 + $0xe0] sm:$0xff] }
 0x284   : > { %15685 = vmatpush1.bf16.msra.mxu1 %v15684_v28  ;;  %v23241_v26 = vpop.permute.xlu0 %17981  ;;  %14727 = vmatmul.mubr.msk.f32.gmra.mrb[46].mxu0 %vm665_vm1, %v23106_v6  ;;  %v17989_v3 = vunpack.i.h.bf16 %v17987_v15  ;;  %v17988_v63 = vunpack.i.l.bf16 %v17987_v15  ;;  %v17979_v6 = vunpack.i.h.bf16 %v17977_v7  ;;  %v20191_v15 = vld [vmem:[%s20987_s26 + $0xc8] sm:$0xff] }
 0x285   : > { %18276 = vrot.lane.b32.xlu1 %v23237_v16, %s20686_s15  ;;  %14729 = vmatprep.mubr.msk.f32.mxu0 %vm20680_vm2, %v29023_v41  ;;  %v17983_v54 = vunpack.i.l.bf16 %v23241_v26  ;;  %v3878_v43 = vsel %vm3873_vm8, %v17893_v1, %v17894_v56 }
 0x286   : > { %18271 = vrot.lane.b32.xlu0 %v22967_v53, %s20686_s15  ;;  %v3909_v39 = vsel %vm3873_vm8, %v17988_v63, %v17989_v3  ;;  %v3906_v62 = vsel %vm3873_vm8, %v17978_v59, %v17979_v6 }
 0x287   : > { %v23252_v58 = vpop.permute.xlu1 %17996  ;;  %v3907_v40 = vsel %vm3873_vm8, %v17979_v6, %v17983_v54  ;;  %v15672_v28 = vpack.c.bf16 %v3909_v39, %v3904_v57  ;;  %v23298_v6 = vld [vmem:[#allocation5 + $0x118] sm:$0xff]  ;;  %v17969_v39 = vunpack.i.h.bf16 %v23199_v34 }
 0x288   : > { %v17998_v33 = vunpack.i.l.bf16 %v23252_v58  ;;  %v17992_v12 = vpop.permute.xlu0 %17991  ;;  %14730 = vmatmul.mubr.msk.f32.gmra.mrb[48].mxu0 %vm665_vm1, %v23131_v21  ;;  %v3905_v21 = vsel %vm3873_vm8, %v17974_v48, %v17978_v59  ;;  %v23290_v59 = vpack.i.bf16 %v20191_v15, %v20190_v2  ;;  %v3883_v48 = vsel %vm3873_vm8, %v17908_v10, %v17909_v14  ;;  %v20192_v10 = vld [vmem:[%s20987_s26 + $0xf0] sm:$0xff]  ;;  %v20195_v14 = vld [vmem:[%s20987_s26 + $0xe8] sm:$0xff] }
 0x289   : > { %v17994_v46 = vunpack.i.h.bf16 %v17992_v12  ;;  %v17993_v31 = vunpack.i.l.bf16 %v17992_v12  ;;  %18286 = vrot.lane.b32.xlu1 %v22975_v18, %s20686_s15  ;;  %4033 = vmatprep.mubr.f32.mxu0 %v29023_v41  ;;  %v20193_v12 = vld [vmem:[%s20987_s26 + $0xf8] sm:$0xff]  ;;  %v15691_v24 = vpack.c.bf16 %v3883_v48, %v3878_v43  ;;  %v23315_v1 = vpack.i.bf16 %v20195_v14, %v20194_v0 }
 0x28a   : > { %18281 = vrot.lane.b32.xlu0 %v22979_v27, %s20686_s15 }
 0x28b   : > { %v3911_v11 = vsel %vm3873_vm8, %v17993_v31, %v17994_v46  ;;  %v23270_v7 = vpop.permute.xlu1 %18006  ;;  %v3910_v9 = vsel %vm3873_vm8, %v17989_v3, %v17993_v31  ;;  %v3912_v50 = vsel %vm3873_vm8, %v17994_v46, %v17998_v33  ;;  %v17939_v3 = vunpack.i.h.bf16 %v23128_v4 }
 0x28c   : > { %v23281_v44 = vpop.permute.xlu0 %18001  ;;  %v15670_v61 = vpack.c.bf16 %v3910_v9, %v3905_v21  ;;  %v15686_v35 = vpack.c.bf16 %v3912_v50, %v3907_v40  ;;  %v15688_v19 = vpack.c.bf16 %v3911_v11, %v3906_v62  ;;  %v23309_v46 = vpack.i.bf16 %v20193_v12, %v20192_v10  ;;  %v23334_v40 = vld [vmem:[#allocation5 + $0x120] sm:$0xff] }
 0x28d   : > { %18296 = vrot.lane.b32.xlu1 %v23261_v38, %s20686_s15  ;;  %v18008_v21 = vunpack.i.l.bf16 %v23270_v7  ;;  %v18004_v11 = vunpack.i.h.bf16 %v23281_v44  ;;  %v18003_v4 = vunpack.i.l.bf16 %v23281_v44  ;;  %v3888_v50 = vsel %vm3873_vm8, %v17923_v13, %v17924_v37  ;;  %v20196_v44 = vld [vmem:[%s20987_s26 + $0x110] sm:$0xff] }
 0x28e   : > { %18291 = vrot.lane.b32.xlu0 %v22710_v60, %s20686_s15  ;;  %15671 = vmatprep.subr.bf16.mxu0 %v15670_v61  ;;  %v17954_v62 = vunpack.i.h.bf16 %v23182_v30  ;;  %v20197_v61 = vld [vmem:[%s20987_s26 + $0x118] sm:$0xff]  ;;  %v3903_v13 = vsel %vm3873_vm8, %v17968_v49, %v17969_v39  ;;  %v17984_v10 = vunpack.i.h.bf16 %v23241_v26  ;;  %v20199_v30 = vld [vmem:[%s20987_s26 + $0x128] sm:$0xff]  ;;  %v23399_v39 = vld [vmem:[#allocation5 + $0x130] sm:$0xff] }
 0x28f   : > { %15687 = vmatprep.subr.bf16.mxu1 %v15686_v35  ;;  %15673 = vmatpush1.bf16.msra.mxu0 %v15672_v28  ;;  %v18017_v63 = vpop.permute.xlu1 %18016  ;;  %v23346_v35 = vpack.i.bf16 %v20197_v61, %v20196_v44  ;;  %v17999_v28 = vunpack.i.h.bf16 %v23252_v58  ;;  %v4378_v2 = vsel %vm4376_vm9, %v18004_v11, %v18008_v21  ;;  %v4377_v34 = vsel %vm4376_vm9, %v18003_v4, %v18004_v11  ;;  %v20200_v11 = vld [vmem:[%s20987_s26 + $0x150] sm:$0xff]  ;;  %v20201_v4 = vld [vmem:[%s20987_s26 + $0x158] sm:$0xff]  ;;  %v20203_v44 = vld [vmem:[%s20987_s26 + $0x148] sm:$0xff] }
 0x290   : > { %15689 = vmatpush1.bf16.msra.mxu1 %v15688_v19  ;;  %v23296_v60 = vpop.permute.xlu0 %18011  ;;  %v18019_v31 = vunpack.i.h.bf16 %v18017_v63  ;;  %v18018_v5 = vunpack.i.l.bf16 %v18017_v63  ;;  %v23374_v63 = vld [vmem:[#allocation5 + $0x128] sm:$0xff]  ;;  %v3898_v37 = vsel %vm3873_vm8, %v17953_v23, %v17954_v62  ;;  %v20202_v62 = vld [vmem:[%s20987_s26 + $0x140] sm:$0xff] }
 0x291   : > { %18306 = vrot.lane.b32.xlu1 %v22732_v42, %s20686_s15  ;;  %15690 = vmatprep.subr.bf16.mxu1 %v29038_v8  ;;  %v3893_v42 = vsel %vm3873_vm8, %v17938_v20, %v17939_v3  ;;  %v3913_v0 = vsel %vm3873_vm8, %v17998_v33, %v17999_v28  ;;  %v3908_v33 = vsel %vm3873_vm8, %v17983_v54, %v17984_v10  ;;  %v23436_v10 = vld [vmem:[#allocation5 + $0x138] sm:$0xff]  ;;  %vm10915_vm8 = vcmask 875520  }
 0x292   : > { %18301 = vrot.lane.b32.xlu0 %v23290_v59, %s20686_s15  ;;  %13764 = vmatmul.mubr.msk.f32.vlgmr.msra.gmra.mrb[0].mxu0 %vm665_vm1, %v23298_v6  ;;  %v4382_v56 = vsel %vm4376_vm9, %v18018_v5, %v18019_v31  ;;  %v15694_v22 = vpack.c.bf16 %v3893_v42, %v3888_v50  ;;  %v15697_v5 = vpack.c.bf16 %v3903_v13, %v3898_v37 }
 0x293   : > { %13769 = vmatmul.mubr.msk.f32.vlgmr.msra.gmra.mrb[0].mxu1 %vm665_vm1, %v23298_v6  ;;  %v23327_v9 = vpop.permute.xlu1 %18026  ;;  %4039 = vmatprep.mubr.f32.mxu0 %v29023_v41  ;;  %v15704_v12 = vpack.c.bf16 %v4382_v56, %v4377_v34  ;;  %v23412_v50 = vpack.i.bf16 %v20201_v4, %v20200_v11  ;;  %v23416_v61 = vpack.i.bf16 %v20203_v44, %v20202_v62 }
 0x294   : > { %15692 = vmatpush3.bf16.msra.mxu1 %v15691_v24  ;;  %v23331_v20 = vpop.permute.xlu0 %18021  ;;  %4134 = vmatprep.mubr.f32.mxu1 %v29023_v41  ;;  %v18028_v49 = vunpack.i.l.bf16 %v23327_v9  ;;  %v20198_v24 = vld [vmem:[%s20987_s26 + $0x120] sm:$0xff]  ;;  %v15700_v26 = vpack.c.bf16 %v3913_v0, %v3908_v33 }
 0x295   : > { %v18023_v57 = vunpack.i.l.bf16 %v23331_v20  ;;  %18316 = vrot.lane.b32.xlu1 %v23309_v46, %s20686_s15  ;;  %15693 = vmatprep.subr.bf16.mxu1 %v29038_v8  ;;  %v18024_v48 = vunpack.i.h.bf16 %v23331_v20  ;;  %v23388_v23 = vpack.i.bf16 %v20199_v30, %v20198_v24 }
 0x296   : > { %18311 = vrot.lane.b32.xlu0 %v23315_v1, %s20686_s15  ;;  %13765 = vmatmul.mubr.msk.f32.gmra.mrb[2].mxu0 %vm665_vm1, %v23334_v40 }
 0x297   : > { %13770 = vmatmul.mubr.msk.f32.gmra.mrb[2].mxu1 %vm665_vm1, %v23334_v40  ;;  %v23359_v19 = vpop.permute.xlu1 %18036  ;;  %v4383_v15 = vsel %vm4376_vm9, %v18019_v31, %v18023_v57  ;;  %4045 = vmatprep.mubr.f32.mxu0 %v29023_v41  ;;  %v18013_v31 = vunpack.i.l.bf16 %v23296_v60  ;;  %v4385_v58 = vsel %vm4376_vm9, %v18024_v48, %v18028_v49 }
 0x298   : > { %15695 = vmatpush3.bf16.msra.mxu1 %v15694_v22  ;;  %v23371_v3 = vpop.permute.xlu0 %18031  ;;  %4140 = vmatprep.mubr.f32.mxu1 %v29023_v41  ;;  %v15702_v43 = vpack.c.bf16 %v4383_v15, %v4378_v2  ;;  %v18038_v54 = vunpack.i.l.bf16 %v23359_v19  ;;  %v18039_v24 = vunpack.i.h.bf16 %v23359_v19 }
 0x299   : > { %18326 = vrot.lane.b32.xlu1 %v23346_v35, %s20686_s15  ;;  %15696 = vmatprep.subr.bf16.mxu1 %v29038_v8  ;;  %v18034_v13 = vunpack.i.h.bf16 %v23371_v3  ;;  %v18033_v15 = vunpack.i.l.bf16 %v23371_v3  ;;  %v4384_v3 = vsel %vm4376_vm9, %v18023_v57, %v18024_v48 }
 0x29a   : > { %18321 = vrot.lane.b32.xlu0 %v22785_v32, %s20686_s15  ;;  %15703 = vmatprep.subr.bf16.mxu0 %v15702_v43  ;;  %v18009_v32 = vunpack.i.h.bf16 %v23270_v7 }
 0x29b   : > { %13771 = vmatmul.mubr.msk.f32.gmra.mrb[4].mxu1 %vm665_vm1, %v23374_v63  ;;  %15705 = vmatpush1.bf16.msra.mxu0 %v15704_v12  ;;  %v18047_v14 = vpop.permute.xlu1 %18046  ;;  %v4387_v19 = vsel %vm4376_vm9, %v18033_v15, %v18034_v13 }
 0x29c   : > { %15698 = vmatpush3.bf16.msra.mxu1 %v15697_v5  ;;  %v23396_v42 = vpop.permute.xlu0 %18041  ;;  %4146 = vmatprep.mubr.f32.mxu1 %v29023_v41  ;;  %v18049_v56 = vunpack.i.h.bf16 %v18047_v14  ;;  %v18048_v22 = vunpack.i.l.bf16 %v18047_v14  ;;  %v4388_v14 = vsel %vm4376_vm9, %v18034_v13, %v18038_v54  ;;  %v4379_v11 = vsel %vm4376_vm9, %v18008_v21, %v18009_v32 }
 0x29d   : > { %18336 = vrot.lane.b32.xlu1 %v22821_v47, %s20686_s15  ;;  %15699 = vmatprep.subr.bf16.mxu1 %v29038_v8  ;;  %v4380_v47 = vsel %vm4376_vm9, %v18009_v32, %v18013_v31  ;;  %v18043_v34 = vunpack.i.l.bf16 %v23396_v42  ;;  %v15720_v44 = vpack.c.bf16 %v4384_v3, %v4379_v11 }
 0x29e   : > { %18331 = vrot.lane.b32.xlu0 %v23388_v23, %s20686_s15  ;;  %13766 = vmatmul.mubr.msk.f32.gmra.mrb[4].mxu0 %vm665_vm1, %v23374_v63  ;;  %v15718_v2 = vpack.c.bf16 %v4385_v58, %v4380_v47  ;;  %v4392_v30 = vsel %vm4376_vm9, %v18048_v22, %v18049_v56 }
 0x29f   : > { %13772 = vmatmul.mubr.msk.f32.gmra.mrb[6].mxu1 %vm665_vm1, %v23399_v39  ;;  %v23429_v28 = vpop.permute.xlu1 %18056  ;;  %4051 = vmatprep.mubr.f32.mxu0 %v29023_v41  ;;  %v4390_v33 = vsel %vm4376_vm9, %v18039_v24, %v18043_v34  ;;  %v15708_v4 = vpack.c.bf16 %v4392_v30, %v4387_v19 }
 0x2a0   : > { %15701 = vmatpush3.bf16.msra.mxu1 %v15700_v26  ;;  %v18058_v43 = vunpack.i.l.bf16 %v23429_v28  ;;  %v18052_v37 = vpop.permute.xlu0 %18051  ;;  %4152 = vmatprep.mubr.f32.mxu1 %v29023_v41 }
 0x2a1   : > { %v18054_v12 = vunpack.i.h.bf16 %v18052_v37  ;;  %v18053_v5 = vunpack.i.l.bf16 %v18052_v37  ;;  %15719 = vmatprep.subr.bf16.mxu1 %v15718_v2  ;;  %18346 = vrot.lane.b32.xlu1 %v23412_v50, %s20686_s15 }
 0x2a2   : > { %18341 = vrot.lane.b32.xlu0 %v23416_v61, %s20686_s15  ;;  %13767 = vmatmul.mubr.msk.f32.gmra.mrb[6].mxu0 %vm665_vm1, %v23399_v39 }
 0x2a3   : > { %13773 = vmatmul.mubr.msk.f32.gmra.mrb[8].mxu1 %vm665_vm1, %v23436_v10  ;;  %v18067_v0 = vpop.permute.xlu1 %18066  ;;  %v4393_v20 = vsel %vm4376_vm9, %v18049_v56, %v18053_v5  ;;  %v4395_v57 = vsel %vm4376_vm9, %v18054_v12, %v18058_v43  ;;  %4057 = vmatprep.mubr.f32.mxu0 %v29023_v41  ;;  %v4394_v56 = vsel %vm4376_vm9, %v18053_v5, %v18054_v12 }
 0x2a4   : > { %v18062_v48 = vpop.permute.xlu0 %18061  ;;  %14748 = vmatprep.mubr.msk.f32.mxu1 %vm20680_vm2, %v29023_v41  ;;  %v15706_v58 = vpack.c.bf16 %v4393_v20, %v4388_v14  ;;  %v15722_v62 = vpack.c.bf16 %v4395_v57, %v4390_v33  ;;  %v18068_v21 = vunpack.i.l.bf16 %v18067_v0 }
 0x2a5   : > { %18356 = vrot.lane.b32.xlu1 %v22870_v17, %s20686_s15  ;;  %v4389_v17 = vsel %vm4376_vm9, %v18038_v54, %v18039_v24  ;;  %v18069_v54 = vunpack.i.h.bf16 %v18067_v0  ;;  %v18063_v2 = vunpack.i.l.bf16 %v18062_v48 }
 0x2a6   : > { %18351 = vrot.lane.b32.xlu0 %v22881_v25, %s20686_s15  ;;  %15707 = vmatprep.subr.bf16.mxu0 %v15706_v58  ;;  %v18064_v25 = vunpack.i.h.bf16 %v18062_v48  ;;  %s20699_s15 = smov 105  }
 0x2a7   : > { %14749 = vmatmul.mubr.msk.f32.vlgmr.msra.gmra.mrb[40].mxu1 %vm665_vm1, %v23298_v6  ;;  %15709 = vmatpush1.bf16.msra.mxu0 %v15708_v4  ;;  %v18077_v22 = vpop.permute.xlu1 %18076  ;;  %v15724_v6 = vpack.c.bf16 %v4394_v56, %v4389_v17 }
 0x2a8   : > { %15721 = vmatpush1.bf16.msra.mxu1 %v15720_v44  ;;  %v23473_v7 = vpop.permute.xlu0 %18071  ;;  %14751 = vmatprep.mubr.msk.f32.mxu1 %vm20680_vm2, %v29023_v41  ;;  %v18079_v32 = vunpack.i.h.bf16 %v18077_v22  ;;  %v18078_v26 = vunpack.i.l.bf16 %v18077_v22  ;;  %v4397_v57 = vsel %vm4376_vm9, %v18063_v2, %v18064_v25  ;;  %v20205_v2 = vld [vmem:[%s20987_s26 + $0xa8] sm:$0xff] }
 0x2a9   : > { %15723 = vmatprep.subr.bf16.mxu1 %v15722_v62  ;;  %18366 = vrot.lane.b32.xlu1 %v23169_v45, %s20687_s9  ;;  %v18073_v47 = vunpack.i.l.bf16 %v23473_v7 }
 0x2aa   : > { %18361 = vrot.lane.b32.xlu0 %v23179_v55, %s20687_s9  ;;  %13768 = vmatmul.mubr.msk.f32.gmra.mrb[8].mxu0 %vm665_vm1, %v23436_v10  ;;  %v4402_v3 = vsel %vm4376_vm9, %v18078_v26, %v18079_v32 }
 0x2ab   : > { %v23485_v13 = vpop.permute.xlu1 %18086  ;;  %14752 = vmatmul.mubr.msk.f32.gmra.mrb[42].mxu1 %vm665_vm1, %v23334_v40  ;;  %4536 = vmatprep.mubr.f32.mxu0 %v29023_v41  ;;  %v4398_v40 = vsel %vm4376_vm9, %v18064_v25, %v18068_v21  ;;  %v4400_v14 = vsel %vm4376_vm9, %v18069_v54, %v18073_v47  ;;  %v15712_v33 = vpack.c.bf16 %v4402_v3, %v4397_v57 }
 0x2ac   : > { %15725 = vmatpush1.bf16.msra.mxu1 %v15724_v6  ;;  %v18088_v15 = vunpack.i.l.bf16 %v23485_v13  ;;  %v18082_v37 = vpop.permute.xlu0 %18081  ;;  %14754 = vmatprep.mubr.msk.f32.mxu1 %vm20680_vm2, %v29023_v41 }
 0x2ad   : > { %v18084_v12 = vunpack.i.h.bf16 %v18082_v37  ;;  %v18083_v5 = vunpack.i.l.bf16 %v18082_v37  ;;  %18376 = vrot.lane.b32.xlu1 %v23188_v52, %s20687_s9  ;;  %v18014_v37 = vunpack.i.h.bf16 %v23296_v60 }
 0x2ae   : > { %18371 = vrot.lane.b32.xlu0 %v22921_v51, %s20687_s9  ;;  %v4399_v51 = vsel %vm4376_vm9, %v18068_v21, %v18069_v54  ;;  %v20204_v54 = vld [vmem:[%s20987_s26 + $0xa0] sm:$0xff] }
 0x2af   : > { %v4404_v24 = vsel %vm4376_vm9, %v18083_v5, %v18084_v12  ;;  %v18097_v30 = vpop.permute.xlu1 %18096  ;;  %v4403_v0 = vsel %vm4376_vm9, %v18079_v32, %v18083_v5  ;;  %v4405_v20 = vsel %vm4376_vm9, %v18084_v12, %v18088_v15  ;;  %14755 = vmatmul.mubr.msk.f32.gmra.mrb[44].mxu1 %vm665_vm1, %v23374_v63  ;;  %v18029_v12 = vunpack.i.h.bf16 %v23327_v9 }
 0x2b0   : > { %v18092_v19 = vpop.permute.xlu0 %18091  ;;  %v15710_v48 = vpack.c.bf16 %v4403_v0, %v4398_v40  ;;  %v15726_v58 = vpack.c.bf16 %v4405_v20, %v4400_v14  ;;  %14757 = vmatprep.mubr.msk.f32.mxu1 %vm20680_vm2, %v29023_v41  ;;  %v15728_v11 = vpack.c.bf16 %v4404_v24, %v4399_v51  ;;  %v18099_v21 = vunpack.i.h.bf16 %v18097_v30 }
 0x2b1   : > { %18386 = vrot.lane.b32.xlu1 %v22941_v29, %s20687_s9  ;;  %v18098_v29 = vunpack.i.l.bf16 %v18097_v30  ;;  %v18094_v62 = vunpack.i.h.bf16 %v18092_v19  ;;  %v18093_v25 = vunpack.i.l.bf16 %v18092_v19  ;;  %v18044_v9 = vunpack.i.h.bf16 %v23396_v42 }
 0x2b2   : > { %18381 = vrot.lane.b32.xlu0 %v23216_v36, %s20687_s9  ;;  %15711 = vmatprep.subr.bf16.mxu0 %v15710_v48  ;;  %v20206_v48 = vld [vmem:[%s20987_s26 + $0xd0] sm:$0xff] }
 0x2b3   : > { %15727 = vmatprep.subr.bf16.mxu1 %v15726_v58  ;;  %15713 = vmatpush1.bf16.msra.mxu0 %v15712_v33  ;;  %v18107_v63 = vpop.permute.xlu1 %18106  ;;  %v4408_v3 = vsel %vm4376_vm9, %v18094_v62, %v18098_v29  ;;  %v4409_v30 = vsel %vm4376_vm9, %v18098_v29, %v18099_v21  ;;  %v4407_v0 = vsel %vm4376_vm9, %v18093_v25, %v18094_v62  ;;  %v20207_v58 = vld [vmem:[%s20987_s26 + $0xd8] sm:$0xff]  ;;  %v23574_v62 = vld [vmem:[#allocation5 + $0x140] sm:$0xff]  ;;  %v18089_v25 = vunpack.i.h.bf16 %v23485_v13 }
 0x2b4   : > { %15729 = vmatpush1.bf16.msra.mxu1 %v15728_v11  ;;  %v23517_v4 = vpop.permute.xlu0 %18101  ;;  %v18109_v44 = vunpack.i.h.bf16 %v18107_v63  ;;  %v18108_v56 = vunpack.i.l.bf16 %v18107_v63  ;;  %v23564_v33 = vpack.i.bf16 %v20207_v58, %v20206_v48  ;;  %v4386_v11 = vsel %vm4376_vm9, %v18028_v49, %v18029_v12 }
 0x2b5   : > { %18396 = vrot.lane.b32.xlu1 %v23237_v16, %s20687_s9  ;;  %14758 = vmatmul.mubr.msk.f32.gmra.mrb[46].mxu1 %vm665_vm1, %v23399_v39  ;;  %v18103_v22 = vunpack.i.l.bf16 %v23517_v4  ;;  %v18059_v63 = vunpack.i.h.bf16 %v23429_v28  ;;  %v23598_v28 = vld [vmem:[#allocation5 + $0x148] sm:$0xff] }
 0x2b6   : > { %18391 = vrot.lane.b32.xlu0 %v22967_v53, %s20687_s9  ;;  %14760 = vmatprep.mubr.msk.f32.mxu1 %vm20680_vm2, %v29023_v41  ;;  %v23535_v53 = vpack.i.bf16 %v20205_v2, %v20204_v54  ;;  %v4412_v5 = vsel %vm4376_vm9, %v18108_v56, %v18109_v44 }
 0x2b7   : > { %v23528_v17 = vpop.permute.xlu1 %18116  ;;  %v4410_v24 = vsel %vm4376_vm9, %v18099_v21, %v18103_v22  ;;  %v15716_v57 = vpack.c.bf16 %v4412_v5, %v4407_v0  ;;  %v4396_v21 = vsel %vm4376_vm9, %v18058_v43, %v18059_v63  ;;  %v4391_v43 = vsel %vm4376_vm9, %v18043_v34, %v18044_v9 }
 0x2b8   : > { %v18118_v39 = vunpack.i.l.bf16 %v23528_v17  ;;  %v18112_v32 = vpop.permute.xlu0 %18111  ;;  %v15738_v42 = vpack.c.bf16 %v4396_v21, %v4391_v43  ;;  %v4406_v34 = vsel %vm4376_vm9, %v18088_v15, %v18089_v25  ;;  %v18119_v5 = vunpack.i.h.bf16 %v23528_v17 }
 0x2b9   : > { %v18114_v26 = vunpack.i.h.bf16 %v18112_v32  ;;  %v18113_v6 = vunpack.i.l.bf16 %v18112_v32  ;;  %18406 = vrot.lane.b32.xlu1 %v22975_v18, %s20687_s9  ;;  %14761 = vmatmul.mubr.msk.f32.gmra.mrb[48].mxu1 %vm665_vm1, %v23436_v10 }
 0x2ba   : > { %18401 = vrot.lane.b32.xlu0 %v22979_v27, %s20687_s9  ;;  %4631 = vmatprep.mubr.f32.mxu1 %v29023_v41 }
 0x2bb   : > { %v4414_v18 = vsel %vm4376_vm9, %v18113_v6, %v18114_v26  ;;  %v23547_v40 = vpop.permute.xlu1 %18126  ;;  %v4413_v10 = vsel %vm4376_vm9, %v18109_v44, %v18113_v6  ;;  %v4415_v27 = vsel %vm4376_vm9, %v18114_v26, %v18118_v39  ;;  %v4381_v44 = vsel %vm4376_vm9, %v18013_v31, %v18014_v37 }
 0x2bc   : > { %v23558_v14 = vpop.permute.xlu0 %18121  ;;  %v15714_v20 = vpack.c.bf16 %v4413_v10, %v4408_v3  ;;  %v15730_v51 = vpack.c.bf16 %v4415_v27, %v4410_v24  ;;  %v15732_v19 = vpack.c.bf16 %v4414_v18, %v4409_v30  ;;  %v15735_v56 = vpack.c.bf16 %v4386_v11, %v4381_v44  ;;  %v23622_v18 = vld [vmem:[%s20987_s26 + $0x100] sm:$0xff]  ;;  %v23635_v24 = vld [vmem:[#allocation5 + $0x150] sm:$0xff]  ;;  %v23660_v11 = vld [vmem:[%s20987_s26 + $0x138] sm:$0xff] }
 0x2bd   : > { %18416 = vrot.lane.b32.xlu1 %v23261_v38, %s20687_s9  ;;  %v18129_v60 = vunpack.i.h.bf16 %v23547_v40  ;;  %v18074_v26 = vunpack.i.h.bf16 %v23473_v7  ;;  %v18128_v6 = vunpack.i.l.bf16 %v23547_v40  ;;  %v23625_v40 = vld [vmem:[%s20987_s26 + $0x108] sm:$0xff]  ;;  %v18124_v48 = vunpack.i.h.bf16 %v23558_v14 }
 0x2be   : > { %18411 = vrot.lane.b32.xlu0 %v23535_v53, %s20687_s9  ;;  %15715 = vmatprep.subr.bf16.mxu0 %v15714_v20  ;;  %v23629_v10 = vpack.i.bf16 %v23625_v40, %v23622_v18  ;;  %v18104_v20 = vunpack.i.h.bf16 %v23517_v4  ;;  %v4416_v44 = vsel %vm4376_vm9, %v18118_v39, %v18119_v5  ;;  %v18123_v25 = vunpack.i.l.bf16 %v23558_v14  ;;  %v20213_v5 = vld [vmem:[%s20987_s26 + $0x178] sm:$0xff] }
 0x2bf   : > { %15731 = vmatprep.subr.bf16.mxu1 %v15730_v51  ;;  %15717 = vmatpush1.bf16.msra.mxu0 %v15716_v57  ;;  %v23572_v29 = vpop.permute.xlu1 %18136  ;;  %v4882_v3 = vsel %vm4879_vm10, %v18128_v6, %v18129_v60  ;;  %v4401_v0 = vsel %vm4376_vm9, %v18073_v47, %v18074_v26  ;;  %v23657_v47 = vld [vmem:[%s20987_s26 + $0x130] sm:$0xff]  ;;  %v4881_v43 = vsel %vm4879_vm10, %v18124_v48, %v18128_v6 }
 0x2c0   : > { %15733 = vmatpush1.bf16.msra.mxu1 %v15732_v19  ;;  %v23580_v49 = vpop.permute.xlu0 %18131  ;;  %15734 = vmatprep.subr.bf16.mxu0 %v29038_v8  ;;  %v18139_v58 = vunpack.i.h.bf16 %v23572_v29  ;;  %v15741_v7 = vpack.c.bf16 %v4406_v34, %v4401_v0  ;;  %v23664_v63 = vpack.i.bf16 %v23660_v11, %v23657_v47  ;;  %v4411_v17 = vsel %vm4376_vm9, %v18103_v22, %v18104_v20  ;;  %v23706_v34 = vld [vmem:[%s20987_s26 + $0x170] sm:$0xff]  ;;  %v23721_v0 = vld [vmem:[%s20987_s26 + $0x168] sm:$0xff] }
 0x2c1   : > { %18426 = vrot.lane.b32.xlu1 %v23564_v33, %s20687_s9  ;;  %v28908_v31 = vunpack.i.l.bf16 %v23580_v49  ;;  %v18138_v4 = vunpack.i.l.bf16 %v23572_v29  ;;  %v23701_v29 = vld [vmem:[#allocation5 + $0x160] sm:$0xff]  ;;  %vm11418_vm9 = vcmask 867328  }
 0x2c2   : > { %18421 = vrot.lane.b32.xlu0 %v23290_v59, %s20687_s9  ;;  %13779 = vmatmul.mubr.msk.f32.vlgmr.msra.gmra.mrb[0].mxu0 %vm665_vm1, %v23574_v62 }
 0x2c3   : > { %15736 = vmatpush3.bf16.msra.mxu0 %v15735_v56  ;;  %v23595_v32 = vpop.permute.xlu1 %18146  ;;  %4542 = vmatprep.mubr.f32.mxu0 %v29023_v41  ;;  %v4883_v27 = vsel %vm4879_vm10, %v18129_v60, %v28908_v31  ;;  %v23676_v56 = vld [vmem:[#allocation5 + $0x158] sm:$0xff]  ;;  %v15744_v60 = vpack.c.bf16 %v4416_v44, %v4411_v17  ;;  %v18134_v31 = vunpack.i.h.bf16 %v23580_v49 }
 0x2c4   : > { %v18148_v54 = vunpack.i.l.bf16 %v23595_v32  ;;  %v18142_v2 = vpop.permute.xlu0 %18141  ;;  %15737 = vmatprep.subr.bf16.mxu0 %v29038_v8  ;;  %13784 = vmatmul.mubr.msk.f32.vlgmr.msra.gmra.mrb[0].mxu1 %vm665_vm1, %v23574_v62 }
 0x2c5   : > { %v18144_v37 = vunpack.i.h.bf16 %v18142_v2  ;;  %v18143_v12 = vunpack.i.l.bf16 %v18142_v2  ;;  %18436 = vrot.lane.b32.xlu1 %v23309_v46, %s20687_s9  ;;  %4637 = vmatprep.mubr.f32.mxu1 %v29023_v41 }
 0x2c6   : > { %18431 = vrot.lane.b32.xlu0 %v23315_v1, %s20687_s9  ;;  %13780 = vmatmul.mubr.msk.f32.gmra.mrb[2].mxu0 %vm665_vm1, %v23598_v28 }
 0x2c7   : > { %v4887_v13 = vsel %vm4879_vm10, %v18143_v12, %v18144_v37  ;;  %15739 = vmatpush3.bf16.msra.mxu0 %v15738_v42  ;;  %v23632_v15 = vpop.permute.xlu1 %18156  ;;  %4548 = vmatprep.mubr.f32.mxu0 %v29023_v41  ;;  %v4888_v30 = vsel %vm4879_vm10, %v18144_v37, %v18148_v54  ;;  %v4886_v21 = vsel %vm4879_vm10, %v18139_v58, %v18143_v12 }
 0x2c8   : > { %v23647_v51 = vpop.permute.xlu0 %18151  ;;  %15740 = vmatprep.subr.bf16.mxu0 %v29038_v8  ;;  %v15762_v57 = vpack.c.bf16 %v4888_v30, %v4883_v27  ;;  %v15764_v19 = vpack.c.bf16 %v4887_v13, %v4882_v3  ;;  %13785 = vmatmul.mubr.msk.f32.gmra.mrb[2].mxu1 %vm665_vm1, %v23598_v28  ;;  %v18158_v22 = vunpack.i.l.bf16 %v23632_v15  ;;  %v15746_v14 = vpack.c.bf16 %v4886_v21, %v4881_v43 }
 0x2c9   : > { %18446 = vrot.lane.b32.xlu1 %v23346_v35, %s20687_s9  ;;  %4643 = vmatprep.mubr.f32.mxu1 %v29023_v41  ;;  %v18154_v26 = vunpack.i.h.bf16 %v23647_v51  ;;  %v18159_v37 = vunpack.i.h.bf16 %v23632_v15  ;;  %v23710_v3 = vpack.i.bf16 %v20213_v5, %v23706_v34  ;;  %v23718_v15 = vld [vmem:[%s20987_s26 + $0x160] sm:$0xff] }
 0x2ca   : > { %18441 = vrot.lane.b32.xlu0 %v23629_v10, %s20687_s9  ;;  %13781 = vmatmul.mubr.msk.f32.gmra.mrb[4].mxu0 %vm665_vm1, %v23635_v24  ;;  %v23725_v20 = vpack.i.bf16 %v23721_v0, %v23718_v15 }
 0x2cb   : > { %15763 = vmatprep.subr.bf16.mxu1 %v15762_v57  ;;  %15742 = vmatpush3.bf16.msra.mxu0 %v15741_v7  ;;  %v23674_v9 = vpop.permute.xlu1 %18166  ;;  %v4880_v57 = vsel %vm4879_vm10, %v18123_v25, %v18124_v48  ;;  %v4891_v44 = vsel %vm4879_vm10, %v18154_v26, %v18158_v22  ;;  %v4892_v25 = vsel %vm4879_vm10, %v18158_v22, %v18159_v37 }
 0x2cc   : > { %15765 = vmatpush1.bf16.msra.mxu1 %v15764_v19  ;;  %v23682_v39 = vpop.permute.xlu0 %18161  ;;  %4554 = vmatprep.mubr.f32.mxu0 %v29023_v41  ;;  %v18169_v13 = vunpack.i.h.bf16 %v23674_v9  ;;  %v4885_v19 = vsel %vm4879_vm10, %v18138_v4, %v18139_v58  ;;  %v18168_v7 = vunpack.i.l.bf16 %v23674_v9 }
 0x2cd   : > { %18456 = vrot.lane.b32.xlu1 %v23664_v63, %s20687_s9  ;;  %15743 = vmatprep.subr.bf16.mxu0 %v29038_v8  ;;  %v28906_v2 = vunpack.i.l.bf16 %v23682_v39 }
 0x2ce   : > { %18451 = vrot.lane.b32.xlu0 %v23388_v23, %s20687_s9  ;;  %13782 = vmatmul.mubr.msk.f32.gmra.mrb[6].mxu0 %vm665_vm1, %v23676_v56 }
 0x2cf   : > { %15745 = vmatpush3.bf16.msra.mxu0 %v15744_v60  ;;  %v23698_v6 = vpop.permute.xlu1 %18176  ;;  %4560 = vmatprep.mubr.f32.mxu0 %v29023_v41  ;;  %v4893_v48 = vsel %vm4879_vm10, %v18159_v37, %v28906_v2  ;;  %v18153_v60 = vunpack.i.l.bf16 %v23647_v51 }
 0x2d0   : > { %v28907_v12 = vunpack.i.l.bf16 %v23698_v6  ;;  %v18172_v42 = vpop.permute.xlu0 %18171  ;;  %15747 = vmatprep.subr.bf16.mxu0 %v15746_v14  ;;  %13786 = vmatmul.mubr.msk.f32.gmra.mrb[4].mxu1 %vm665_vm1, %v23635_v24 }
 0x2d1   : > { %v18174_v27 = vunpack.i.h.bf16 %v18172_v42  ;;  %v18173_v30 = vunpack.i.l.bf16 %v18172_v42  ;;  %18466 = vrot.lane.b32.xlu1 %v23412_v50, %s20687_s9  ;;  %4649 = vmatprep.mubr.f32.mxu1 %v29023_v41  ;;  %v15748_v42 = vpack.c.bf16 %v4885_v19, %v4880_v57  ;;  %v4890_v22 = vsel %vm4879_vm10, %v18153_v60, %v18154_v26  ;;  %v20217_v57 = vld [vmem:[%s20987_s26 + $0x28] sm:$0xff]  ;;  %v20218_v60 = vld [vmem:[%s20987_s26 + $0x50] sm:$0xff] }
 0x2d2   : > { %18461 = vrot.lane.b32.xlu0 %v23416_v61, %s20687_s9  ;;  %13783 = vmatmul.mubr.msk.f32.gmra.mrb[8].mxu0 %vm665_vm1, %v23701_v29 }
 0x2d3   : > { %v4897_v21 = vsel %vm4879_vm10, %v18173_v30, %v18174_v27  ;;  %v23737_v17 = vpop.permute.xlu1 %18186  ;;  %14779 = vmatprep.mubr.msk.f32.mxu0 %vm20680_vm2, %v29023_v41  ;;  %v4898_v58 = vsel %vm4879_vm10, %v18174_v27, %v28907_v12  ;;  %v4896_v9 = vsel %vm4879_vm10, %v18169_v13, %v18173_v30  ;;  %v4895_v27 = vsel %vm4879_vm10, %v18168_v7, %v18169_v13  ;;  %v20216_v30 = vld [vmem:[%s20987_s26 + $0x20] sm:$0xff] }
 0x2d4   : > { %v18182_v43 = vpop.permute.xlu0 %18181  ;;  %v15766_v4 = vpack.c.bf16 %v4898_v58, %v4893_v48  ;;  %v15750_v14 = vpack.c.bf16 %v4896_v9, %v4891_v44  ;;  %13787 = vmatmul.mubr.msk.f32.gmra.mrb[6].mxu1 %vm665_vm1, %v23676_v56  ;;  %v15768_v5 = vpack.c.bf16 %v4897_v21, %v4892_v25  ;;  %v15752_v13 = vpack.c.bf16 %v4895_v27, %v4890_v22 }
 0x2d5   : > { %18476 = vrot.lane.b32.xlu1 %v23710_v3, %s20687_s9  ;;  %4655 = vmatprep.mubr.f32.mxu1 %v29023_v41  ;;  %v23767_v19 = vpack.i.bf16 %v20217_v57, %v20216_v30  ;;  %v18184_v7 = vunpack.i.h.bf16 %v18182_v43  ;;  %v18189_v48 = vunpack.i.h.bf16 %v23737_v17  ;;  %v18183_v58 = vunpack.i.l.bf16 %v18182_v43 }
 0x2d6   : > { %18471 = vrot.lane.b32.xlu0 %v23725_v20, %s20687_s9  ;;  %14780 = vmatmul.mubr.msk.f32.vlgmr.msra.gmra.mrb[50].mxu0 %vm665_vm1, %v23574_v62  ;;  %v18188_v62 = vunpack.i.l.bf16 %v23737_v17  ;;  %s20700_s9 = smov 104  }
 0x2d7   : > { %15749 = vmatpush1.bf16.msra.mxu0 %v15748_v42  ;;  %15767 = vmatprep.subr.bf16.mxu1 %v15766_v4  ;;  %v18197_v51 = vpop.permute.xlu1 %18196  ;;  %v20219_v4 = vld [vmem:[%s20987_s26 + $0x58] sm:$0xff]  ;;  %v4900_v22 = vsel %vm4879_vm10, %v18183_v58, %v18184_v7 }
 0x2d8   : > { %15751 = vmatprep.subr.bf16.mxu0 %v15750_v14  ;;  %15769 = vmatpush1.bf16.msra.mxu1 %v15768_v5  ;;  %v23761_v37 = vpop.permute.xlu0 %18191  ;;  %v18199_v26 = vunpack.i.h.bf16 %v18197_v51  ;;  %v18198_v44 = vunpack.i.l.bf16 %v18197_v51  ;;  %v23790_v14 = vpack.i.bf16 %v20219_v4, %v20218_v60  ;;  %v4901_v43 = vsel %vm4879_vm10, %v18184_v7, %v18188_v62  ;;  %v20224_v60 = vld [vmem:[%s20987_s26 + $0x80] sm:$0xff]  ;;  %v20225_v4 = vld [vmem:[%s20987_s26 + $0x88] sm:$0xff] }
 0x2d9   : > { %18486 = vrot.lane.b32.xlu1 %v23169_v45, %s20688_s11  ;;  %14782 = vmatprep.mubr.msk.f32.mxu0 %vm20680_vm2, %v29023_v41  ;;  %v28904_v45 = vunpack.i.l.bf16 %v23761_v37 }
 0x2da   : > { %18481 = vrot.lane.b32.xlu0 %v23179_v55, %s20688_s11  ;;  %14783 = vmatmul.mubr.msk.f32.gmra.mrb[52].mxu0 %vm665_vm1, %v23598_v28  ;;  %v4905_v17 = vsel %vm4879_vm10, %v18198_v44, %v18199_v26 }
 0x2db   : > { %15753 = vmatpush1.bf16.msra.mxu0 %v15752_v13  ;;  %v23777_v21 = vpop.permute.xlu1 %18206  ;;  %13788 = vmatmul.mubr.msk.f32.gmra.mrb[8].mxu1 %vm665_vm1, %v23701_v29  ;;  %v4903_v27 = vsel %vm4879_vm10, %v18189_v48, %v28904_v45 }
 0x2dc   : > { %v28905_v9 = vunpack.i.l.bf16 %v23777_v21  ;;  %v18202_v25 = vpop.permute.xlu0 %18201  ;;  %14785 = vmatprep.mubr.msk.f32.mxu0 %vm20680_vm2, %v29023_v41  ;;  %5134 = vmatprep.mubr.f32.mxu1 %v29023_v41 }
 0x2dd   : > { %v18204_v55 = vunpack.i.h.bf16 %v18202_v25  ;;  %v18203_v28 = vunpack.i.l.bf16 %v18202_v25  ;;  %18496 = vrot.lane.b32.xlu1 %v23188_v52, %s20688_s11  ;;  %v23815_v25 = vld [vmem:[%s20987_s26 + $0x60] sm:$0xff] }
 0x2de   : > { %18491 = vrot.lane.b32.xlu0 %v23767_v19, %s20688_s11  ;;  %14786 = vmatmul.mubr.msk.f32.gmra.mrb[54].mxu0 %vm665_vm1, %v23635_v24  ;;  %v4902_v24 = vsel %vm4879_vm10, %v18188_v62, %v18189_v48  ;;  %v23818_v62 = vld [vmem:[%s20987_s26 + $0x68] sm:$0xff] }
 0x2df   : > { %v4907_v42 = vsel %vm4879_vm10, %v18203_v28, %v18204_v55  ;;  %v18217_v5 = vpop.permute.xlu1 %18216  ;;  %v4906_v52 = vsel %vm4879_vm10, %v18199_v26, %v18203_v28  ;;  %v4908_v51 = vsel %vm4879_vm10, %v18204_v55, %v28905_v9  ;;  %14788 = vmatprep.mubr.msk.f32.mxu0 %vm20680_vm2, %v29023_v41  ;;  %v15756_v26 = vpack.c.bf16 %v4905_v17, %v4900_v22  ;;  %v23834_v55 = vld [vmem:[%s20987_s26 + $0x98] sm:$0xff] }
 0x2e0   : > { %v18212_v13 = vpop.permute.xlu0 %18211  ;;  %v15754_v30 = vpack.c.bf16 %v4906_v52, %v4901_v43  ;;  %v15770_v57 = vpack.c.bf16 %v4908_v51, %v4903_v27  ;;  %v15772_v44 = vpack.c.bf16 %v4907_v42, %v4902_v24  ;;  %v23822_v7 = vpack.i.bf16 %v23818_v62, %v23815_v25 }
 0x2e1   : > { %18506 = vrot.lane.b32.xlu1 %v23790_v14, %s20688_s11  ;;  %v23842_v17 = vpack.i.bf16 %v20225_v4, %v20224_v60  ;;  %v18218_v43 = vunpack.i.l.bf16 %v18217_v5  ;;  %v18219_v51 = vunpack.i.h.bf16 %v18217_v5  ;;  %v18213_v24 = vunpack.i.l.bf16 %v18212_v13 }
 0x2e2   : > { %18501 = vrot.lane.b32.xlu0 %v23216_v36, %s20688_s11  ;;  %15755 = vmatprep.subr.bf16.mxu0 %v15754_v30  ;;  %v23831_v36 = vld [vmem:[%s20987_s26 + $0x90] sm:$0xff] }
 0x2e3   : > { %15771 = vmatprep.subr.bf16.mxu1 %v15770_v57  ;;  %15757 = vmatpush1.bf16.msra.mxu0 %v15756_v26  ;;  %v18227_v48 = vpop.permute.xlu1 %18226  ;;  %v23838_v28 = vpack.i.bf16 %v23834_v55, %v23831_v36 }
 0x2e4   : > { %15773 = vmatpush1.bf16.msra.mxu1 %v15772_v44  ;;  %v23824_v58 = vpop.permute.xlu0 %18221  ;;  %14789 = vmatmul.mubr.msk.f32.gmra.mrb[56].mxu0 %vm665_vm1, %v23676_v56  ;;  %v18214_v56 = vunpack.i.h.bf16 %v18212_v13  ;;  %v18229_v42 = vunpack.i.h.bf16 %v18227_v48  ;;  %v18228_v52 = vunpack.i.l.bf16 %v18227_v48  ;;  %v18149_v44 = vunpack.i.h.bf16 %v23595_v32 }
 0x2e5   : > { %18516 = vrot.lane.b32.xlu1 %v23237_v16, %s20688_s11  ;;  %14791 = vmatprep.mubr.msk.f32.mxu0 %vm20680_vm2, %v29023_v41  ;;  %v18223_v16 = vunpack.i.l.bf16 %v23824_v58 }
 0x2e6   : > { %18511 = vrot.lane.b32.xlu0 %v23822_v7, %s20688_s11  ;;  %v4915_v48 = vsel %vm4879_vm10, %v18228_v52, %v18229_v42  ;;  %v4911_v5 = vsel %vm4879_vm10, %v18214_v56, %v18218_v43  ;;  %v4912_v52 = vsel %vm4879_vm10, %v18218_v43, %v18219_v51  ;;  %v4910_v45 = vsel %vm4879_vm10, %v18213_v24, %v18214_v56 }
 0x2e7   : > { %v23849_v27 = vpop.permute.xlu1 %18236  ;;  %v4913_v4 = vsel %vm4879_vm10, %v18219_v51, %v18223_v16  ;;  %v4889_v43 = vsel %vm4879_vm10, %v18148_v54, %v18149_v44  ;;  %v18179_v56 = vunpack.i.h.bf16 %v23698_v6  ;;  %v18209_v44 = vunpack.i.h.bf16 %v23777_v21 }
 0x2e8   : > { %v18238_v22 = vunpack.i.l.bf16 %v23849_v27  ;;  %v18232_v30 = vpop.permute.xlu0 %18231  ;;  %14792 = vmatmul.mubr.msk.f32.gmra.mrb[58].mxu0 %vm665_vm1, %v23701_v29 }
 0x2e9   : > { %v18234_v57 = vunpack.i.h.bf16 %v18232_v30  ;;  %v18233_v26 = vunpack.i.l.bf16 %v18232_v30  ;;  %18526 = vrot.lane.b32.xlu1 %v23838_v28, %s20688_s11  ;;  %5039 = vmatprep.mubr.f32.mxu0 %v29023_v41 }
 0x2ea   : > { %18521 = vrot.lane.b32.xlu0 %v23842_v17, %s20688_s11 }
 0x2eb   : > { %v4917_v13 = vsel %vm4879_vm10, %v18233_v26, %v18234_v57  ;;  %v23863_v60 = vpop.permute.xlu1 %18246  ;;  %v4916_v29 = vsel %vm4879_vm10, %v18229_v42, %v18233_v26  ;;  %v4918_v30 = vsel %vm4879_vm10, %v18234_v57, %v18238_v22  ;;  %v15760_v42 = vpack.c.bf16 %v4915_v48, %v4910_v45  ;;  %v23885_v57 = vld [vmem:[#allocation5 + $0x168] sm:$0xff] }
 0x2ec   : > { %v18242_v9 = vpop.permute.xlu0 %18241  ;;  %v15758_v2 = vpack.c.bf16 %v4916_v29, %v4911_v5  ;;  %v15774_v12 = vpack.c.bf16 %v4918_v30, %v4913_v4  ;;  %v15776_v26 = vpack.c.bf16 %v4917_v13, %v4912_v52  ;;  %v18248_v48 = vunpack.i.l.bf16 %v23863_v60 }
 0x2ed   : > { %18536 = vrot.lane.b32.xlu1 %v23261_v38, %s20688_s11  ;;  %v29053_v38 = vunpack.i.l.bf16 %v23580_v49  ;;  %v29054_v49 = vunpack.i.l.bf16 %v23698_v6  ;;  %v18244_v5 = vunpack.i.h.bf16 %v18242_v9  ;;  %v23911_v6 = vld [vmem:[#allocation5 + $0x170] sm:$0xff]  ;;  %v29055_v4 = vunpack.i.l.bf16 %v23682_v39 }
 0x2ee   : > { %18531 = vrot.lane.b32.xlu0 %v23535_v53, %s20688_s11  ;;  %15759 = vmatprep.subr.bf16.mxu0 %v15758_v2  ;;  %v18164_v2 = vunpack.i.h.bf16 %v23682_v39  ;;  %v18194_v52 = vunpack.i.h.bf16 %v23761_v37  ;;  %v29056_v39 = vunpack.i.l.bf16 %v23777_v21 }
 0x2ef   : > { %15775 = vmatprep.subr.bf16.mxu1 %v15774_v12  ;;  %15761 = vmatpush1.bf16.msra.mxu0 %v15760_v42  ;;  %v18257_v51 = vpop.permute.xlu1 %18256  ;;  %v4884_v45 = vsel %vm4879_vm10, %v29053_v38, %v18134_v31  ;;  %v4899_v31 = vsel %vm4879_vm10, %v29054_v49, %v18179_v56  ;;  %v18239_v56 = vunpack.i.h.bf16 %v23849_v27  ;;  %v29057_v49 = vunpack.i.l.bf16 %v23761_v37 }
 0x2f0   : > { %15777 = vmatpush1.bf16.msra.mxu1 %v15776_v26  ;;  %v23883_v24 = vpop.permute.xlu0 %18251  ;;  %v18259_v32 = vunpack.i.h.bf16 %v18257_v51  ;;  %v18258_v54 = vunpack.i.l.bf16 %v18257_v51  ;;  %v15779_v12 = vpack.c.bf16 %v4889_v43, %v4884_v45  ;;  %v4894_v30 = vsel %vm4879_vm10, %v29055_v4, %v18164_v2 }
 0x2f1   : > { %18546 = vrot.lane.b32.xlu1 %v23564_v33, %s20688_s11  ;;  %15778 = vmatprep.subr.bf16.mxu1 %v29038_v8  ;;  %v15782_v26 = vpack.c.bf16 %v4899_v31, %v4894_v30  ;;  %v4909_v43 = vsel %vm4879_vm10, %v29056_v39, %v18209_v44  ;;  %v5384_v51 = vsel %vm5382_vm11, %v18244_v5, %v18248_v48 }
 0x2f2   : > { %18541 = vrot.lane.b32.xlu0 %v23290_v59, %s20688_s11  ;;  %13794 = vmatmul.mubr.msk.f32.vlgmr.msra.gmra.mrb[0].mxu0 %vm665_vm1, %v23885_v57  ;;  %v18243_v59 = vunpack.i.l.bf16 %v18242_v9  ;;  %v5388_v9 = vsel %vm5382_vm11, %v18258_v54, %v18259_v32  ;;  %v23945_v54 = vld [vmem:[#allocation5 + $0x178] sm:$0xff]  ;;  %v4904_v31 = vsel %vm4879_vm10, %v29057_v49, %v18194_v52  ;;  %v4919_v37 = vsel %vm4879_vm10, %v18238_v22, %v18239_v56  ;;  %v23966_v52 = vld [vmem:[#allocation5 + $0x180] sm:$0xff] }
 0x2f3   : > { %13799 = vmatmul.mubr.msk.f32.vlgmr.msra.gmra.mrb[0].mxu1 %vm665_vm1, %v23885_v57  ;;  %v23905_v13 = vpop.permute.xlu1 %18266  ;;  %5045 = vmatprep.mubr.f32.mxu0 %v29023_v41 }
 0x2f4   : > { %15780 = vmatpush3.bf16.msra.mxu1 %v15779_v12  ;;  %v23908_v29 = vpop.permute.xlu0 %18261  ;;  %5140 = vmatprep.mubr.f32.mxu1 %v29023_v41  ;;  %v5383_v21 = vsel %vm5382_vm11, %v18243_v59, %v18244_v5  ;;  %v18268_v38 = vunpack.i.l.bf16 %v23905_v13  ;;  %v18253_v5 = vunpack.i.l.bf16 %v23883_v24  ;;  %v15785_v59 = vpack.c.bf16 %v4909_v43, %v4904_v31 }
 0x2f5   : > { %v18263_v42 = vunpack.i.l.bf16 %v23908_v29  ;;  %18556 = vrot.lane.b32.xlu1 %v23309_v46, %s20688_s11  ;;  %15781 = vmatprep.subr.bf16.mxu1 %v29038_v8  ;;  %v18264_v45 = vunpack.i.h.bf16 %v23908_v29  ;;  %v15792_v44 = vpack.c.bf16 %v5388_v9, %v5383_v21  ;;  %v23993_v21 = vld [vmem:[#allocation5 + $0x188] sm:$0xff] }
 0x2f6   : > { %18551 = vrot.lane.b32.xlu0 %v23315_v1, %s20688_s11  ;;  %13795 = vmatmul.mubr.msk.f32.gmra.mrb[2].mxu0 %vm665_vm1, %v23911_v6 }
 0x2f7   : > { %13800 = vmatmul.mubr.msk.f32.gmra.mrb[2].mxu1 %vm665_vm1, %v23911_v6  ;;  %v23932_v46 = vpop.permute.xlu1 %18276  ;;  %v5389_v1 = vsel %vm5382_vm11, %v18259_v32, %v18263_v42  ;;  %5051 = vmatprep.mubr.f32.mxu0 %v29023_v41  ;;  %v18224_v32 = vunpack.i.h.bf16 %v23824_v58 }
 0x2f8   : > { %15783 = vmatpush3.bf16.msra.mxu1 %v15782_v26  ;;  %v18272_v2 = vpop.permute.xlu0 %18271  ;;  %5146 = vmatprep.mubr.f32.mxu1 %v29023_v41  ;;  %v15790_v12 = vpack.c.bf16 %v5389_v1, %v5384_v51  ;;  %v18278_v58 = vunpack.i.l.bf16 %v23932_v46  ;;  %v18279_v31 = vunpack.i.h.bf16 %v23932_v46 }
 0x2f9   : > { %18566 = vrot.lane.b32.xlu1 %v23346_v35, %s20688_s11  ;;  %15784 = vmatprep.subr.bf16.mxu1 %v29038_v8  ;;  %v18249_v35 = vunpack.i.h.bf16 %v23863_v60  ;;  %v4914_v27 = vsel %vm4879_vm10, %v18223_v16, %v18224_v32  ;;  %v18274_v16 = vunpack.i.h.bf16 %v18272_v2  ;;  %v24040_v60 = vld [vmem:[%s20987_s26] sm:$0xff]  ;;  %vm11921_vm10 = vcmask 859136  }
 0x2fa   : > { %18561 = vrot.lane.b32.xlu0 %v23629_v10, %s20688_s11  ;;  %15791 = vmatprep.subr.bf16.mxu0 %v15790_v12  ;;  %v5391_v10 = vsel %vm5382_vm11, %v18264_v45, %v18268_v38  ;;  %v15788_v26 = vpack.c.bf16 %v4919_v37, %v4914_v27  ;;  %v24030_v27 = vld [vmem:[%s20987_s26 + $0x10] sm:$0xff] }
 0x2fb   : > { %13801 = vmatmul.mubr.msk.f32.gmra.mrb[4].mxu1 %vm665_vm1, %v23945_v54  ;;  %15793 = vmatpush1.bf16.msra.mxu0 %v15792_v44  ;;  %v18287_v4 = vpop.permute.xlu1 %18286  ;;  %v5386_v39 = vsel %vm5382_vm11, %v18249_v35, %v18253_v5  ;;  %v5394_v29 = vsel %vm5382_vm11, %v18274_v16, %v18278_v58  ;;  %v5385_v37 = vsel %vm5382_vm11, %v18248_v48, %v18249_v35  ;;  %v24043_v48 = vld [vmem:[%s20987_s26 + $0x8] sm:$0xff] }
 0x2fc   : > { %15786 = vmatpush3.bf16.msra.mxu1 %v15785_v59  ;;  %v23963_v30 = vpop.permute.xlu0 %18281  ;;  %5152 = vmatprep.mubr.f32.mxu1 %v29023_v41  ;;  %v18289_v22 = vunpack.i.h.bf16 %v18287_v4  ;;  %v18288_v9 = vunpack.i.l.bf16 %v18287_v4  ;;  %v15806_v43 = vpack.c.bf16 %v5391_v10, %v5386_v39 }
 0x2fd   : > { %18576 = vrot.lane.b32.xlu1 %v23664_v63, %s20688_s11  ;;  %15787 = vmatprep.subr.bf16.mxu1 %v29038_v8  ;;  %v18283_v56 = vunpack.i.l.bf16 %v23963_v30 }
 0x2fe   : > { %18571 = vrot.lane.b32.xlu0 %v23388_v23, %s20688_s11  ;;  %13796 = vmatmul.mubr.msk.f32.gmra.mrb[4].mxu0 %vm665_vm1, %v23945_v54  ;;  %v18273_v23 = vunpack.i.l.bf16 %v18272_v2  ;;  %v5390_v2 = vsel %vm5382_vm11, %v18263_v42, %v18264_v45  ;;  %v5398_v32 = vsel %vm5382_vm11, %v18288_v9, %v18289_v22 }
 0x2ff   : > { %13802 = vmatmul.mubr.msk.f32.gmra.mrb[6].mxu1 %vm665_vm1, %v23966_v52  ;;  %v23987_v63 = vpop.permute.xlu1 %18296  ;;  %5057 = vmatprep.mubr.f32.mxu0 %v29023_v41  ;;  %v5396_v59 = vsel %vm5382_vm11, %v18279_v31, %v18283_v56 }
 0x300   : > { %15789 = vmatpush3.bf16.msra.mxu1 %v15788_v26  ;;  %v18298_v51 = vunpack.i.l.bf16 %v23987_v63  ;;  %v18292_v1 = vpop.permute.xlu0 %18291  ;;  %5158 = vmatprep.mubr.f32.mxu1 %v29023_v41  ;;  %v15808_v26 = vpack.c.bf16 %v5390_v2, %v5385_v37  ;;  %v24085_v37 = vld [vmem:[%s20987_s26 + $0x40] sm:$0xff] }
 0x301   : > { %v18294_v12 = vunpack.i.h.bf16 %v18292_v1  ;;  %v18293_v49 = vunpack.i.l.bf16 %v18292_v1  ;;  %15807 = vmatprep.subr.bf16.mxu1 %v15806_v43  ;;  %18586 = vrot.lane.b32.xlu1 %v23412_v50, %s20688_s11  ;;  %v24061_v1 = vld [vmem:[%s20987_s26 + $0x38] sm:$0xff] }
 0x302   : > { %18581 = vrot.lane.b32.xlu0 %v23416_v61, %s20688_s11  ;;  %13797 = vmatmul.mubr.msk.f32.gmra.mrb[6].mxu0 %vm665_vm1, %v23966_v52  ;;  %v5393_v61 = vsel %vm5382_vm11, %v18273_v23, %v18274_v16  ;;  %v5395_v16 = vsel %vm5382_vm11, %v18278_v58, %v18279_v31  ;;  %v24058_v23 = vld [vmem:[%s20987_s26 + $0x30] sm:$0xff] }
 0x303   : > { %13803 = vmatmul.mubr.msk.f32.gmra.mrb[8].mxu1 %vm665_vm1, %v23993_v21  ;;  %v24008_v50 = vpop.permute.xlu1 %18306  ;;  %v5399_v42 = vsel %vm5382_vm11, %v18289_v22, %v18293_v49  ;;  %v5401_v46 = vsel %vm5382_vm11, %v18294_v12, %v18298_v51  ;;  %5063 = vmatprep.mubr.f32.mxu0 %v29023_v41  ;;  %v15796_v4 = vpack.c.bf16 %v5398_v32, %v5393_v61  ;;  %v24033_v22 = vld [vmem:[%s20987_s26 + $0x18] sm:$0xff] }
 0x304   : > { %v24017_v45 = vpop.permute.xlu0 %18301  ;;  %14810 = vmatprep.mubr.msk.f32.mxu1 %vm20680_vm2, %v29023_v41  ;;  %v15794_v44 = vpack.c.bf16 %v5399_v42, %v5394_v29  ;;  %v15810_v10 = vpack.c.bf16 %v5401_v46, %v5396_v59  ;;  %v18605_v9 = vpack.i.bf16 %v24033_v22, %v24030_v27  ;;  %v5400_v35 = vsel %vm5382_vm11, %v18293_v49, %v18294_v12 }
 0x305   : > { %18596 = vrot.lane.b32.xlu1 %v23710_v3, %s20688_s11  ;;  %v18600_v3 = vpack.i.bf16 %v24043_v48, %v24040_v60  ;;  %v18308_v43 = vunpack.i.l.bf16 %v24008_v50  ;;  %v18304_v12 = vunpack.i.h.bf16 %v24017_v45  ;;  %v15812_v58 = vpack.c.bf16 %v5400_v35, %v5395_v16 }
 0x306   : > { %18591 = vrot.lane.b32.xlu0 %v23725_v20, %s20688_s11  ;;  %15795 = vmatprep.subr.bf16.mxu0 %v15794_v44  ;;  %v18309_v29 = vunpack.i.h.bf16 %v24008_v50  ;;  %v18303_v61 = vunpack.i.l.bf16 %v24017_v45  ;;  %v24088_v50 = vld [vmem:[%s20987_s26 + $0x48] sm:$0xff] }
 0x307   : > { %14811 = vmatmul.mubr.msk.f32.vlgmr.msra.gmra.mrb[50].mxu1 %vm665_vm1, %v23885_v57  ;;  %15797 = vmatpush1.bf16.msra.mxu0 %v15796_v4  ;;  %v18317_v39 = vpop.permute.xlu1 %18316  ;;  %v18615_v57 = vpack.i.bf16 %v24061_v1, %v24058_v23  ;;  %v18620_v4 = vpack.i.bf16 %v24088_v50, %v24085_v37 }
 0x308   : > { %15809 = vmatpush1.bf16.msra.mxu1 %v15808_v26  ;;  %v24050_v20 = vpop.permute.xlu0 %18311  ;;  %14813 = vmatprep.mubr.msk.f32.mxu1 %vm20680_vm2, %v29023_v41  ;;  %v18319_v49 = vunpack.i.h.bf16 %v18317_v39  ;;  %v18318_v2 = vunpack.i.l.bf16 %v18317_v39  ;;  %v5405_v35 = vsel %vm5382_vm11, %v18308_v43, %v18309_v29 }
 0x309   : > { %15811 = vmatprep.subr.bf16.mxu1 %v15810_v10  ;;  %18606 = vrot.lane.b32.xlu1 %v18605_v9, %s20689_s12  ;;  %v18313_v31 = vunpack.i.l.bf16 %v24050_v20  ;;  %v5404_v10 = vsel %vm5382_vm11, %v18304_v12, %v18308_v43 }
 0x30a   : > { %18601 = vrot.lane.b32.xlu0 %v18600_v3, %s20689_s12  ;;  %13798 = vmatmul.mubr.msk.f32.gmra.mrb[8].mxu0 %vm665_vm1, %v23993_v21 }
 0x30b   : > { %14814 = vmatmul.mubr.msk.f32.gmra.mrb[52].mxu1 %vm665_vm1, %v23911_v6  ;;  %v24072_v32 = vpop.permute.xlu1 %18326  ;;  %5542 = vmatprep.mubr.f32.mxu0 %v29023_v41  ;;  %v5408_v6 = vsel %vm5382_vm11, %v18318_v2, %v18319_v49  ;;  %v24110_v2 = vld [vmem:[%s20987_s26 + $0x70] sm:$0xff] }
 0x30c   : > { %15813 = vmatpush1.bf16.msra.mxu1 %v15812_v58  ;;  %v18328_v42 = vunpack.i.l.bf16 %v24072_v32  ;;  %v18322_v46 = vpop.permute.xlu0 %18321  ;;  %14816 = vmatprep.mubr.msk.f32.mxu1 %vm20680_vm2, %v29023_v41  ;;  %v24113_v58 = vld [vmem:[%s20987_s26 + $0x78] sm:$0xff] }
 0x30d   : > { %v18324_v44 = vunpack.i.h.bf16 %v18322_v46  ;;  %v18323_v59 = vunpack.i.l.bf16 %v18322_v46  ;;  %18616 = vrot.lane.b32.xlu1 %v18615_v57, %s20689_s12  ;;  %v18635_v46 = vpack.i.bf16 %v24113_v58, %v24110_v2 }
 0x30e   : > { %18611 = vrot.lane.b32.xlu0 %v23767_v19, %s20689_s12  ;;  %v5406_v19 = vsel %vm5382_vm11, %v18309_v29, %v18313_v31 }
 0x30f   : > { %v5410_v45 = vsel %vm5382_vm11, %v18323_v59, %v18324_v44  ;;  %14817 = vmatmul.mubr.msk.f32.gmra.mrb[54].mxu1 %vm665_vm1, %v23945_v54  ;;  %v18337_v9 = vpop.permute.xlu1 %18336  ;;  %v5409_v26 = vsel %vm5382_vm11, %v18319_v49, %v18323_v59  ;;  %v5411_v3 = vsel %vm5382_vm11, %v18324_v44, %v18328_v42  ;;  %v5403_v54 = vsel %vm5382_vm11, %v18303_v61, %v18304_v12 }
 0x310   : > { %v18332_v39 = vpop.permute.xlu0 %18331  ;;  %14819 = vmatprep.mubr.msk.f32.mxu1 %vm20680_vm2, %v29023_v41  ;;  %v15798_v16 = vpack.c.bf16 %v5409_v26, %v5404_v10  ;;  %v15814_v57 = vpack.c.bf16 %v5411_v3, %v5406_v19  ;;  %v15816_v49 = vpack.c.bf16 %v5410_v45, %v5405_v35  ;;  %v15800_v43 = vpack.c.bf16 %v5408_v6, %v5403_v54  ;;  %v20237_v35 = vld [vmem:[%s20987_s26 + $0xb8] sm:$0xff] }
 0x311   : > { %18626 = vrot.lane.b32.xlu1 %v23790_v14, %s20689_s12  ;;  %v18338_v29 = vunpack.i.l.bf16 %v18337_v9  ;;  %v18334_v61 = vunpack.i.h.bf16 %v18332_v39  ;;  %v18333_v10 = vunpack.i.l.bf16 %v18332_v39 }
 0x312   : > { %18621 = vrot.lane.b32.xlu0 %v18620_v4, %s20689_s12  ;;  %15799 = vmatprep.subr.bf16.mxu0 %v15798_v16  ;;  %v18339_v4 = vunpack.i.h.bf16 %v18337_v9 }
 0x313   : > { %14820 = vmatmul.mubr.msk.f32.gmra.mrb[56].mxu1 %vm665_vm1, %v23966_v52  ;;  %15815 = vmatprep.subr.bf16.mxu1 %v15814_v57  ;;  %v18347_v12 = vpop.permute.xlu1 %18346  ;;  %v18269_v57 = vunpack.i.h.bf16 %v23905_v13  ;;  %v5414_v39 = vsel %vm5382_vm11, %v18334_v61, %v18338_v29  ;;  %v24178_v13 = vld [vmem:[#allocation5 + $0x190] sm:$0xff] }
 0x314   : > { %15801 = vmatpush1.bf16.msra.mxu0 %v15800_v43  ;;  %15817 = vmatpush1.bf16.msra.mxu1 %v15816_v49  ;;  %v24120_v14 = vpop.permute.xlu0 %18341  ;;  %v18349_v44 = vunpack.i.h.bf16 %v18347_v12  ;;  %v18348_v59 = vunpack.i.l.bf16 %v18347_v12  ;;  %v5413_v12 = vsel %vm5382_vm11, %v18333_v10, %v18334_v61  ;;  %v24172_v61 = vld [vmem:[%s20987_s26 + $0xc8] sm:$0xff] }
 0x315   : > { %14822 = vmatprep.mubr.msk.f32.mxu1 %vm20680_vm2, %v29023_v41  ;;  %18636 = vrot.lane.b32.xlu1 %v18635_v46, %s20689_s12  ;;  %v28909_v52 = vunpack.i.l.bf16 %v24120_v14 }
 0x316   : > { %18631 = vrot.lane.b32.xlu0 %v23822_v7, %s20689_s12  ;;  %v20236_v7 = vld [vmem:[%s20987_s26 + $0xb0] sm:$0xff]  ;;  %v5418_v9 = vsel %vm5382_vm11, %v18348_v59, %v18349_v44 }
 0x317   : > { %14823 = vmatmul.mubr.msk.f32.gmra.mrb[58].mxu1 %vm665_vm1, %v23993_v21  ;;  %v24130_v6 = vpop.permute.xlu1 %18356  ;;  %v24138_v16 = vpack.i.bf16 %v20237_v35, %v20236_v7  ;;  %v18254_v21 = vunpack.i.h.bf16 %v23883_v24  ;;  %v5416_v46 = vsel %vm5382_vm11, %v18339_v4, %v28909_v52  ;;  %v5392_v35 = vsel %vm5382_vm11, %v18268_v38, %v18269_v57 }
 0x318   : > { %v18358_v45 = vunpack.i.l.bf16 %v24130_v6  ;;  %v18352_v26 = vpop.permute.xlu0 %18351  ;;  %5637 = vmatprep.mubr.f32.mxu1 %v29023_v41  ;;  %v18299_v52 = vunpack.i.h.bf16 %v23987_v63  ;;  %v18284_v38 = vunpack.i.h.bf16 %v23963_v30 }
 0x319   : > { %v18354_v19 = vunpack.i.h.bf16 %v18352_v26  ;;  %v18353_v3 = vunpack.i.l.bf16 %v18352_v26  ;;  %18646 = vrot.lane.b32.xlu1 %v23838_v28, %s20689_s12 }
 0x31a   : > { %18641 = vrot.lane.b32.xlu0 %v23842_v17, %s20689_s12  ;;  %v5415_v17 = vsel %vm5382_vm11, %v18338_v29, %v18339_v4  ;;  %v24169_v29 = vld [vmem:[%s20987_s26 + $0xc0] sm:$0xff]  ;;  %v5402_v24 = vsel %vm5382_vm11, %v18298_v51, %v18299_v52  ;;  %v24214_v52 = vld [vmem:[#allocation5 + $0x198] sm:$0xff] }
 0x31b   : > { %v5420_v54 = vsel %vm5382_vm11, %v18353_v3, %v18354_v19  ;;  %v24147_v49 = vpop.permute.xlu1 %18366  ;;  %v5419_v28 = vsel %vm5382_vm11, %v18349_v44, %v18353_v3  ;;  %v5421_v43 = vsel %vm5382_vm11, %v18354_v19, %v18358_v45  ;;  %v15804_v44 = vpack.c.bf16 %v5418_v9, %v5413_v12  ;;  %v24190_v9 = vld [vmem:[%s20987_s26 + $0xf0] sm:$0xff] }
 0x31c   : > { %v24158_v59 = vpop.permute.xlu0 %18361  ;;  %v15802_v26 = vpack.c.bf16 %v5419_v28, %v5414_v39  ;;  %v15818_v7 = vpack.c.bf16 %v5421_v43, %v5416_v46  ;;  %v15820_v3 = vpack.c.bf16 %v5420_v54, %v5415_v17  ;;  %v18660_v4 = vpack.i.bf16 %v24172_v61, %v24169_v29  ;;  %v24206_v54 = vld [vmem:[%s20987_s26 + $0xe0] sm:$0xff] }
 0x31d   : > { %18656 = vrot.lane.b32.xlu1 %v24138_v16, %s20689_s12  ;;  %v18675_v39 = vpack.i.bf16 %v24190_v9, %v23622_v18  ;;  %v5397_v28 = vsel %vm5382_vm11, %v18283_v56, %v18284_v38  ;;  %v18314_v46 = vunpack.i.h.bf16 %v24050_v20  ;;  %v18368_v43 = vunpack.i.l.bf16 %v24147_v49  ;;  %v24245_v38 = vpop.f32.mrb[10].mxu0 }
 0x31e   : > { %18651 = vrot.lane.b32.xlu0 %v23535_v53, %s20689_s12  ;;  %15803 = vmatprep.subr.bf16.mxu0 %v15802_v26  ;;  %v5387_v53 = vsel %vm5382_vm11, %v18253_v5, %v18254_v21  ;;  %v18329_v5 = vunpack.i.h.bf16 %v24072_v32  ;;  %v18369_v21 = vunpack.i.h.bf16 %v24147_v49  ;;  %v15826_v30 = vpack.c.bf16 %v5402_v24, %v5397_v28  ;;  %v14533_v24 = vpop.f32.mrb[11].mxu0 }
 0x31f   : > { %15819 = vmatprep.subr.bf16.mxu1 %v15818_v7  ;;  %15805 = vmatpush1.bf16.msra.mxu0 %v15804_v44  ;;  %v24176_v10 = vpop.permute.xlu1 %18376  ;;  %v15823_v57 = vpack.c.bf16 %v5392_v35, %v5387_v53  ;;  %v20243_v44 = vld [vmem:[%s20987_s26 + $0x158] sm:$0xff]  ;;  %v18359_v35 = vunpack.i.h.bf16 %v24130_v6  ;;  %v20244_v53 = vld [vmem:[%s20987_s26 + $0x128] sm:$0xff]  ;;  %v29059_v24 = vunpack.i.l.bf16 %v24120_v14 }
 0x320   : > { %15821 = vmatpush1.bf16.msra.mxu1 %v15820_v3  ;;  %v24184_v19 = vpop.permute.xlu0 %18371  ;;  %15822 = vmatprep.subr.bf16.mxu0 %v29038_v8  ;;  %v24228_v56 = vpack.i.bf16 %v23718_v15, %v20243_v44  ;;  %v5412_v3 = vsel %vm5382_vm11, %v18328_v42, %v18329_v5  ;;  %v24243_v15 = vpack.i.bf16 %v23657_v47, %v20244_v53  ;;  %v18379_v20 = vunpack.i.h.bf16 %v24176_v10  ;;  %v24297_v6 = vld [vmem:[#allocation5 + $0x1a8] sm:$0xff] }
 0x321   : > { %18666 = vrot.lane.b32.xlu1 %v23564_v33, %s20689_s12  ;;  %v24203_v33 = vld [vmem:[%s20987_s26 + $0xf8] sm:$0xff]  ;;  %v28910_v63 = vunpack.i.l.bf16 %v24184_v19  ;;  %v5407_v5 = vsel %vm5382_vm11, %v18313_v31, %v18314_v46  ;;  %v24275_v46 = vld [vmem:[%s20987_s26 + $0x110] sm:$0xff]  ;;  %v5422_v53 = vsel %vm5382_vm11, %v18358_v45, %v18359_v35 }
 0x322   : > { %18661 = vrot.lane.b32.xlu0 %v18660_v4, %s20689_s12  ;;  %13809 = vmatmul.mubr.msk.f32.vlgmr.msra.gmra.mrb[0].mxu0 %vm665_vm1, %v24178_v13  ;;  %v18670_v18 = vpack.i.bf16 %v24203_v33, %v24206_v54  ;;  %v5888_v4 = vsel %vm5885_vm12, %v18368_v43, %v18369_v21  ;;  %v15829_v31 = vpack.c.bf16 %v5412_v3, %v5407_v5  ;;  %v20246_v3 = vld [vmem:[%s20987_s26 + $0x120] sm:$0xff] }
 0x323   : > { %15824 = vmatpush3.bf16.msra.mxu0 %v15823_v57  ;;  %v24211_v51 = vpop.permute.xlu1 %18386  ;;  %5548 = vmatprep.mubr.f32.mxu0 %v29023_v41  ;;  %v24251_v57 = vld [vmem:[#allocation5 + $0x1a0] sm:$0xff]  ;;  %v24279_v44 = vpack.i.bf16 %v24275_v46, %v23625_v40 }
 0x324   : > { %v28911_v17 = vunpack.i.l.bf16 %v24211_v51  ;;  %v18382_v12 = vpop.permute.xlu0 %18381  ;;  %15825 = vmatprep.subr.bf16.mxu0 %v29038_v8  ;;  %13814 = vmatmul.mubr.msk.f32.vlgmr.msra.gmra.mrb[0].mxu1 %vm665_vm1, %v24178_v13 }
 0x325   : > { %v18384_v26 = vunpack.i.h.bf16 %v18382_v12  ;;  %v18383_v7 = vunpack.i.l.bf16 %v18382_v12  ;;  %18676 = vrot.lane.b32.xlu1 %v18675_v39, %s20689_s12  ;;  %5643 = vmatprep.mubr.f32.mxu1 %v29023_v41  ;;  %v5889_v39 = vsel %vm5885_vm12, %v18369_v21, %v28910_v63  ;;  %v24268_v21 = vpop.f32.mrb[12].mxu0  ;;  %29058 = vst [vmem:[#allocation20_spill] sm:$0xff] %v24279_v44  ;;  %v24351_v63 = vpack.i.bf16 %v24030_v27, %v24043_v48 }
 0x326   : > { %18671 = vrot.lane.b32.xlu0 %v18670_v18, %s20689_s12  ;;  %13810 = vmatmul.mubr.msk.f32.gmra.mrb[2].mxu0 %vm665_vm1, %v24214_v52  ;;  %v18344_v18 = vunpack.i.h.bf16 %v24120_v14 }
 0x327   : > { %v5893_v32 = vsel %vm5885_vm12, %v18383_v7, %v18384_v26  ;;  %15827 = vmatpush3.bf16.msra.mxu0 %v15826_v30  ;;  %v24248_v42 = vpop.permute.xlu1 %18396  ;;  %5554 = vmatprep.mubr.f32.mxu0 %v29023_v41  ;;  %v5894_v47 = vsel %vm5885_vm12, %v18384_v26, %v28911_v17  ;;  %v18364_v26 = vunpack.i.h.bf16 %v24158_v59  ;;  %v5892_v45 = vsel %vm5885_vm12, %v18379_v20, %v18383_v7 }
 0x328   : > { %v24263_v28 = vpop.permute.xlu0 %18391  ;;  %15828 = vmatprep.subr.bf16.mxu0 %v29038_v8  ;;  %v15850_v12 = vpack.c.bf16 %v5894_v47, %v5889_v39  ;;  %v15852_v30 = vpack.c.bf16 %v5893_v32, %v5888_v4  ;;  %13815 = vmatmul.mubr.msk.f32.gmra.mrb[2].mxu1 %vm665_vm1, %v24214_v52  ;;  %v14536_v4 = vpop.f32.mrb[13].mxu0  ;;  %v20247_v32 = vld [vmem:[%s20987_s26 + $0x150] sm:$0xff]  ;;  %v5417_v5 = vsel %vm5382_vm11, %v29059_v24, %v18344_v18  ;;  %v24324_v18 = vld [vmem:[%s20987_s26 + $0x140] sm:$0xff]  ;;  %vm12424_vm11 = vcmask 850944  }
 0x329   : > { %18686 = vrot.lane.b32.xlu1 %v24228_v56, %s20689_s12  ;;  %5649 = vmatprep.mubr.f32.mxu1 %v29023_v41  ;;  %v24291_v39 = vpack.i.bf16 %v20247_v32, %v20246_v3  ;;  %v24293_v47 = vpop.f32.mrb[14].mxu0  ;;  %v18363_v3 = vunpack.i.l.bf16 %v24158_v59  ;;  %v15832_v14 = vpack.c.bf16 %v5422_v53, %v5417_v5  ;;  %v5887_v7 = vsel %vm5885_vm12, %v18364_v26, %v18368_v43  ;;  %v1232_v53 = vpop.f32.mrb[10].mxu1  ;;  %v24343_v5 = vld [vmem:[#allocation5 + $0x1b0] sm:$0xff] }
 0x32a   : > { %18681 = vrot.lane.b32.xlu0 %v24243_v15, %s20689_s12  ;;  %13811 = vmatmul.mubr.msk.f32.gmra.mrb[4].mxu0 %vm665_vm1, %v24251_v57  ;;  %v14539_v35 = vpop.f32.mrb[15].mxu0  ;;  %v18398_v32 = vunpack.i.l.bf16 %v24248_v42  ;;  %v15834_v49 = vpack.c.bf16 %v5892_v45, %v5887_v7  ;;  %v18399_v7 = vunpack.i.h.bf16 %v24248_v42 }
 0x32b   : > { %15851 = vmatprep.subr.bf16.mxu1 %v15850_v12  ;;  %15830 = vmatpush3.bf16.msra.mxu0 %v15829_v31  ;;  %v24295_v40 = vpop.permute.xlu1 %18406  ;;  %v24310_v12 = vpack.i.bf16 %v23706_v34, %v23721_v0  ;;  %v24312_v31 = vpop.f32.mrb[16].mxu0  ;;  %v24328_v34 = vpack.i.bf16 %v24324_v18, %v23660_v11  ;;  %v28912_v35 = vunpack.i.h.bf16 %v24263_v28  ;;  %v24357_v11 = vpack.i.bf16 %v24110_v2, %v23818_v62 }
 0x32c   : > { %15853 = vmatpush1.bf16.msra.mxu1 %v15852_v30  ;;  %v24305_v4 = vpop.permute.xlu0 %18401  ;;  %5560 = vmatprep.mubr.f32.mxu0 %v29023_v41  ;;  %v14542_v0 = vpop.f32.mrb[17].mxu0  ;;  %v18378_v30 = vunpack.i.l.bf16 %v24176_v10  ;;  %v18409_v27 = vunpack.i.h.bf16 %v24295_v40 }
 0x32d   : > { %29060 = vst [vmem:[#allocation21_spill] sm:$0xff] %v24310_v12  ;;  %18696 = vrot.lane.b32.xlu1 %v24279_v44, %s20689_s12  ;;  %15831 = vmatprep.subr.bf16.mxu0 %v29038_v8  ;;  %29061 = vst [vmem:[#allocation27_spill] sm:$0xff] %v24328_v34  ;;  %v24337_v43 = vpop.f32.mrb[18].mxu0  ;;  %v24347_v0 = vpack.i.bf16 %v24085_v37, %v24061_v1  ;;  %v1233_v1 = vadd.f32 %v1232_v53, %v24245_v38  ;;  %v14564_v37 = vpop.f32.mrb[11].mxu1  ;;  %v18408_v53 = vunpack.i.l.bf16 %v24295_v40 }
 0x32e   : > { %18691 = vrot.lane.b32.xlu0 %v24291_v39, %s20689_s12  ;;  %13812 = vmatmul.mubr.msk.f32.gmra.mrb[6].mxu0 %vm665_vm1, %v24297_v6  ;;  %v14545_v45 = vpop.f32.mrb[19].mxu0  ;;  %v1237_v62 = vpop.f32.mrb[12].mxu1  ;;  %v5891_v38 = vsel %vm5885_vm12, %v18378_v30, %v18379_v20  ;;  %v29062_v10 = vunpack.i.l.bf16 %v24305_v4 }
 0x32f   : > { %15833 = vmatpush3.bf16.msra.mxu0 %v15832_v14  ;;  %v24340_v24 = vpop.permute.xlu1 %18416  ;;  %5566 = vmatprep.mubr.f32.mxu0 %v29023_v41  ;;  %v1710_v2 = vpop.f32.mrb[20].mxu0 }
 0x330   : > { %v28916_v17 = vunpack.i.l.bf16 %v24340_v24  ;;  %v18412_v14 = vpop.permute.xlu0 %18411  ;;  %15835 = vmatprep.subr.bf16.mxu0 %v15834_v49  ;;  %13816 = vmatmul.mubr.msk.f32.gmra.mrb[4].mxu1 %vm665_vm1, %v24251_v57  ;;  %v5886_v49 = vsel %vm5885_vm12, %v18363_v3, %v18364_v26  ;;  %v14567_v37 = vpop.f32.mrb[13].mxu1  ;;  %v5899_v20 = vsel %vm5885_vm12, %v18399_v7, %v29062_v10 }
 0x331   : > { %v18414_v48 = vunpack.i.h.bf16 %v18412_v14  ;;  %v18413_v45 = vunpack.i.l.bf16 %v18412_v14  ;;  %18706 = vrot.lane.b32.xlu1 %v24310_v12, %s20689_s12  ;;  %5655 = vmatprep.mubr.f32.mxu1 %v29023_v41  ;;  %v5897_v14 = vsel %vm5885_vm12, %v28912_v35, %v18398_v32  ;;  %v14595_v59 = vpop.f32.mrb[21].mxu0  ;;  %v1242_v42 = vpop.f32.mrb[14].mxu1  ;;  %v5898_v37 = vsel %vm5885_vm12, %v18398_v32, %v18399_v7 }
 0x332   : > { %18701 = vrot.lane.b32.xlu0 %v24328_v34, %s20689_s12  ;;  %13813 = vmatmul.mubr.msk.f32.gmra.mrb[8].mxu0 %vm665_vm1, %v24343_v5  ;;  %v18393_v59 = vunpack.i.l.bf16 %v24263_v28  ;;  %v1715_v44 = vpop.f32.mrb[22].mxu0  ;;  %v1238_v32 = vadd.f32 %v1237_v62, %v24268_v21  ;;  %v14570_v7 = vpop.f32.mrb[15].mxu1  ;;  %v18735_v21 = vpack.i.bf16 %v23831_v36, %v23815_v25 }
 0x333   : > { %v5903_v26 = vsel %vm5885_vm12, %v18413_v45, %v18414_v48  ;;  %v24383_v3 = vpop.permute.xlu1 %18426  ;;  %14841 = vmatprep.mubr.msk.f32.mxu0 %vm20680_vm2, %v29023_v41  ;;  %v5904_v40 = vsel %vm5885_vm12, %v18414_v48, %v28916_v17  ;;  %v5902_v30 = vsel %vm5885_vm12, %v18409_v27, %v18413_v45  ;;  %v15836_v48 = vpack.c.bf16 %v5891_v38, %v5886_v49  ;;  %v14598_v45 = vpop.f32.mrb[23].mxu0 }
 0x334   : > { %v24396_v35 = vpop.permute.xlu0 %18421  ;;  %v15854_v34 = vpack.c.bf16 %v5904_v40, %v5899_v20  ;;  %v15838_v12 = vpack.c.bf16 %v5902_v30, %v5897_v14  ;;  %13817 = vmatmul.mubr.msk.f32.gmra.mrb[6].mxu1 %vm665_vm1, %v24297_v6  ;;  %v15856_v10 = vpack.c.bf16 %v5903_v26, %v5898_v37  ;;  %v5901_v17 = vsel %vm5885_vm12, %v18408_v53, %v18409_v27  ;;  %v1247_v40 = vpop.f32.mrb[16].mxu1  ;;  %v20250_v45 = vld [vmem:[%s20987_s26 + $0x100] sm:$0xff] }
 0x335   : > { %18716 = vrot.lane.b32.xlu1 %v24347_v0, %s20690_s28  ;;  %5661 = vmatprep.mubr.f32.mxu1 %v29023_v41  ;;  %v1738_v14 = vadd.f32 %v1710_v2, %v1233_v1  ;;  %v1243_v20 = vadd.f32 %v1242_v42, %v24293_v47  ;;  %v1720_v49 = vpop.f32.mrb[24].mxu0  ;;  %v24412_v62 = vadd.f32 %v1715_v44, %v1238_v32  ;;  %v14573_v27 = vpop.f32.mrb[17].mxu1  ;;  %v29063_v53 = vunpack.i.h.bf16 %v24263_v28  ;;  %v20249_v28 = vld [vmem:[%s20987_s26 + $0xa0] sm:$0xff] }
 0x336   : > { %18711 = vrot.lane.b32.xlu0 %v24351_v63, %s20690_s28  ;;  %14842 = vmatmul.mubr.msk.f32.vlgmr.msra.gmra.mrb[60].mxu0 %vm665_vm1, %v24178_v13  ;;  %v1248_v47 = vadd.f32 %v1247_v40, %v24312_v31  ;;  %v18428_v42 = vunpack.i.l.bf16 %v24383_v3  ;;  %v18424_v25 = vunpack.i.h.bf16 %v24396_v35  ;;  %v24430_v44 = vpack.i.bf16 %v20249_v28, %v23834_v55 }
 0x337   : > { %15837 = vmatpush1.bf16.msra.mxu0 %v15836_v48  ;;  %15855 = vmatprep.subr.bf16.mxu1 %v15854_v34  ;;  %v18437_v38 = vpop.permute.xlu1 %18436  ;;  %v5896_v26 = vsel %vm5885_vm12, %v18393_v59, %v29063_v53  ;;  %v24420_v1 = vadd.f32 %v1720_v49, %v1243_v20  ;;  %v14601_v34 = vpop.f32.mrb[25].mxu0  ;;  %v29064_v37 = vpack.i.bf16 %v24058_v23, %v24040_v60  ;;  %v18429_v60 = vunpack.i.h.bf16 %v24383_v3 }
 0x338   : > { %15839 = vmatprep.subr.bf16.mxu0 %v15838_v12  ;;  %15857 = vmatpush1.bf16.msra.mxu1 %v15856_v10  ;;  %v24417_v13 = vpop.permute.xlu0 %18431  ;;  %v15840_v36 = vpack.c.bf16 %v5901_v17, %v5896_v26  ;;  %v1252_v12 = vpop.f32.mrb[18].mxu1  ;;  %v18439_v2 = vunpack.i.h.bf16 %v18437_v38  ;;  %v18438_v30 = vunpack.i.l.bf16 %v18437_v38  ;;  %v18423_v49 = vunpack.i.l.bf16 %v24396_v35 }
 0x339   : > { %14844 = vmatprep.mubr.msk.f32.mxu0 %vm20680_vm2, %v29023_v41  ;;  %18726 = vrot.lane.b32.xlu1 %v24357_v11, %s20690_s28  ;;  %v1725_v31 = vpop.f32.mrb[26].mxu0  ;;  %v1253_v59 = vadd.f32 %v1252_v12, %v24337_v43  ;;  %v14576_v48 = vpop.f32.mrb[19].mxu1  ;;  %v18433_v10 = vunpack.i.l.bf16 %v24417_v13  ;;  %v24450_v43 = vpack.i.bf16 %v20250_v45, %v24203_v33  ;;  %v5907_v34 = vsel %vm5885_vm12, %v18424_v25, %v18428_v42 }
 0x33a   : > { %18721 = vrot.lane.b32.xlu0 %v29064_v37, %s20690_s28  ;;  %14845 = vmatmul.mubr.msk.f32.gmra.mrb[62].mxu0 %vm665_vm1, %v24214_v52  ;;  %v24439_v17 = vadd.f32 %v1725_v31, %v1248_v47  ;;  %v14604_v55 = vpop.f32.mrb[27].mxu0  ;;  %v2213_v40 = vpop.f32.mrb[20].mxu1  ;;  %v5911_v33 = vsel %vm5885_vm12, %v18438_v30, %v18439_v2  ;;  %v20251_v47 = vld [vmem:[%s20987_s26 + $0xd0] sm:$0xff]  ;;  %v5908_v30 = vsel %vm5885_vm12, %v18428_v42, %v18429_v60 }
 0x33b   : > { %15841 = vmatpush1.bf16.msra.mxu0 %v15840_v36  ;;  %v24442_v32 = vpop.permute.xlu1 %18446  ;;  %14847 = vmatprep.mubr.msk.f32.mxu0 %vm20680_vm2, %v29023_v41  ;;  %v1730_v7 = vpop.f32.mrb[28].mxu0  ;;  %v2241_v3 = vadd.f32 %v2213_v40, %v1738_v14  ;;  %v24466_v35 = vpack.i.bf16 %v20251_v47, %v24172_v61 }
 0x33c   : > { %v18448_v23 = vunpack.i.l.bf16 %v24442_v32  ;;  %v18442_v52 = vpop.permute.xlu0 %18441  ;;  %13818 = vmatmul.mubr.msk.f32.gmra.mrb[8].mxu1 %vm665_vm1, %v24343_v5  ;;  %v24454_v20 = vadd.f32 %v1730_v7, %v1253_v59  ;;  %v14607_v53 = vpop.f32.mrb[29].mxu0  ;;  %v5906_v7 = vsel %vm5885_vm12, %v18423_v49, %v18424_v25 }
 0x33d   : > { %v18444_v38 = vunpack.i.h.bf16 %v18442_v52  ;;  %v18443_v27 = vunpack.i.l.bf16 %v18442_v52  ;;  %18736 = vrot.lane.b32.xlu1 %v18735_v21, %s20690_s28  ;;  %6140 = vmatprep.mubr.f32.mxu1 %v29023_v41  ;;  %v14626_v26 = vpop.f32.mrb[21].mxu1  ;;  %v2716_v36 = vpop.f32.mrb[30].mxu0  ;;  %v18750_v52 = vpack.i.bf16 %v24190_v9, %v24169_v29  ;;  %v15844_v42 = vpack.c.bf16 %v5911_v33, %v5906_v7 }
 0x33e   : > { %18731 = vrot.lane.b32.xlu0 %v24430_v44, %s20690_s28  ;;  %14848 = vmatmul.mubr.msk.f32.gmra.mrb[64].mxu0 %vm665_vm1, %v24251_v57  ;;  %v2218_v21 = vpop.f32.mrb[22].mxu1  ;;  %v5909_v57 = vsel %vm5885_vm12, %v18429_v60, %v18433_v10  ;;  %v14657_v55 = vpop.f32.mrb[31].mxu0  ;;  %v2744_v60 = vadd.f32 %v2716_v36, %v2241_v3 }
 0x33f   : > { %v5913_v14 = vsel %vm5885_vm12, %v18443_v27, %v18444_v38  ;;  %v24470_v28 = vpop.permute.xlu1 %18456  ;;  %14850 = vmatprep.mubr.msk.f32.mxu0 %vm20680_vm2, %v29023_v41  ;;  %v5912_v12 = vsel %vm5885_vm12, %v18439_v2, %v18443_v27  ;;  %v5914_v61 = vsel %vm5885_vm12, %v18444_v38, %v18448_v23  ;;  %v14629_v31 = vpop.f32.mrb[23].mxu1  ;;  %v2246_v45 = vadd.f32 %v2218_v21, %v24412_v62 }
 0x340   : > { %v24482_v37 = vpop.permute.xlu0 %18451  ;;  %v15842_v59 = vpack.c.bf16 %v5912_v12, %v5907_v34  ;;  %v15858_v48 = vpack.c.bf16 %v5914_v61, %v5909_v57  ;;  %v15860_v2 = vpack.c.bf16 %v5913_v14, %v5908_v30  ;;  %v2223_v40 = vpop.f32.mrb[24].mxu1  ;;  %v18458_v33 = vunpack.i.l.bf16 %v24470_v28  ;;  %v24515_v61 = vld [vmem:[%s20987_s26 + $0x148] sm:$0xff]  ;;  %v24518_v31 = vld [vmem:[%s20987_s26 + $0x178] sm:$0xff] }
 0x341   : > { %18746 = vrot.lane.b32.xlu1 %v24450_v43, %s20690_s28  ;;  %v2721_v38 = vpop.f32.mrb[32].mxu0  ;;  %v2251_v25 = vadd.f32 %v2223_v40, %v24420_v1  ;;  %v14632_v49 = vpop.f32.mrb[25].mxu1  ;;  %v18454_v34 = vunpack.i.h.bf16 %v24482_v37  ;;  %v18775_v30 = vpack.i.bf16 %v24518_v31, %v24515_v61 }
 0x342   : > { %18741 = vrot.lane.b32.xlu0 %v24466_v35, %s20690_s28  ;;  %14851 = vmatmul.mubr.msk.f32.gmra.mrb[66].mxu0 %vm665_vm1, %v24297_v6  ;;  %v14660_v27 = vpop.f32.mrb[33].mxu0  ;;  %v24495_v29 = vadd.f32 %v2721_v38, %v2246_v45  ;;  %v2228_v9 = vpop.f32.mrb[26].mxu1  ;;  %v18389_v49 = vunpack.i.h.bf16 %v24211_v51 }
 0x343   : > { %15843 = vmatprep.subr.bf16.mxu0 %v15842_v59  ;;  %15859 = vmatprep.subr.bf16.mxu1 %v15858_v48  ;;  %v18467_v53 = vpop.permute.xlu1 %18466  ;;  %v2256_v26 = vadd.f32 %v2228_v9, %v24439_v17  ;;  %v2726_v47 = vpop.f32.mrb[34].mxu0  ;;  %v24523_v59 = vld [vmem:[%s20987_s26 + $0xe8] sm:$0xff]  ;;  %v24526_v48 = vld [vmem:[%s20987_s26 + $0x118] sm:$0xff] }
 0x344   : > { %15845 = vmatpush1.bf16.msra.mxu0 %v15844_v42  ;;  %15861 = vmatpush1.bf16.msra.mxu1 %v15860_v2  ;;  %v24497_v62 = vpop.permute.xlu0 %18461  ;;  %v24504_v6 = vadd.f32 %v2726_v47, %v2251_v25  ;;  %v14635_v1 = vpop.f32.mrb[27].mxu1  ;;  %v18469_v17 = vunpack.i.h.bf16 %v18467_v53  ;;  %v18468_v21 = vunpack.i.l.bf16 %v18467_v53  ;;  %v18459_v2 = vunpack.i.h.bf16 %v24470_v28 }
 0x345   : > { %14853 = vmatprep.mubr.msk.f32.mxu0 %vm20680_vm2, %v29023_v41  ;;  %18756 = vrot.lane.b32.xlu1 %v24243_v15, %s20690_s28  ;;  %v14663_v3 = vpop.f32.mrb[35].mxu0  ;;  %v2233_v36 = vpop.f32.mrb[28].mxu1  ;;  %v28917_v12 = vunpack.i.l.bf16 %v24497_v62  ;;  %v18374_v25 = vunpack.i.h.bf16 %v24184_v19 }
 0x346   : > { %18751 = vrot.lane.b32.xlu0 %v18750_v52, %s20690_s28  ;;  %14854 = vmatmul.mubr.msk.f32.gmra.mrb[68].mxu0 %vm665_vm1, %v24343_v5  ;;  %v2731_v14 = vpop.f32.mrb[36].mxu0  ;;  %v18770_v5 = vpack.i.bf16 %v24526_v48, %v24523_v59  ;;  %v2261_v55 = vadd.f32 %v2233_v36, %v24454_v20  ;;  %v14638_v7 = vpop.f32.mrb[29].mxu1  ;;  %v18453_v52 = vunpack.i.l.bf16 %v24482_v37  ;;  %v5921_v28 = vsel %vm5885_vm12, %v18468_v21, %v18469_v17 }
 0x347   : > { %v24512_v57 = vpop.permute.xlu1 %18476  ;;  %6045 = vmatprep.mubr.f32.mxu0 %v29023_v41  ;;  %v24535_v38 = vadd.f32 %v2731_v14, %v2256_v26  ;;  %v14666_v42 = vpop.f32.mrb[37].mxu0  ;;  %v5917_v37 = vsel %vm5885_vm12, %v18454_v34, %v18458_v33  ;;  %v5919_v21 = vsel %vm5885_vm12, %v18459_v2, %v28917_v12  ;;  %v24566_v12 = vld [vmem:[%s20987_s26 + $0x58] sm:$0xff] }
 0x348   : > { %v18478_v45 = vunpack.i.l.bf16 %v24512_v57  ;;  %v18472_v40 = vpop.permute.xlu0 %18471  ;;  %v2736_v20 = vpop.f32.mrb[38].mxu0 }
 0x349   : > { %v18474_v27 = vunpack.i.h.bf16 %v18472_v40  ;;  %v18473_v53 = vunpack.i.l.bf16 %v18472_v40  ;;  %18766 = vrot.lane.b32.xlu1 %v24291_v39, %s20690_s28  ;;  %v3219_v9 = vpop.f32.mrb[30].mxu1  ;;  %v24545_v26 = vadd.f32 %v2736_v20, %v2261_v55  ;;  %v14669_v1 = vpop.f32.mrb[39].mxu0  ;;  %v5916_v40 = vsel %vm5885_vm12, %v18453_v52, %v18454_v34 }
 0x34a   : > { %18761 = vrot.lane.b32.xlu0 %v24228_v56, %s20690_s28  ;;  %v3247_v47 = vadd.f32 %v3219_v9, %v2744_v60  ;;  %v14688_v3 = vpop.f32.mrb[31].mxu1  ;;  %v5918_v60 = vsel %vm5885_vm12, %v18458_v33, %v18459_v2 }
 0x34b   : > { %v5923_v36 = vsel %vm5885_vm12, %v18473_v53, %v18474_v27  ;;  %v24548_v14 = vpop.permute.xlu1 %18486  ;;  %v5922_v39 = vsel %vm5885_vm12, %v18469_v17, %v18473_v53  ;;  %v5924_v55 = vsel %vm5885_vm12, %v18474_v27, %v18478_v45  ;;  %v3224_v7 = vpop.f32.mrb[32].mxu1  ;;  %v15848_v53 = vpack.c.bf16 %v5921_v28, %v5916_v40  ;;  %v24563_v3 = vld [vmem:[%s20987_s26 + $0x50] sm:$0xff]  ;;  %v24579_v28 = vld [vmem:[%s20987_s26 + $0x28] sm:$0xff] }
 0x34c   : > { %v24559_v42 = vpop.permute.xlu0 %18481  ;;  %v15846_v20 = vpack.c.bf16 %v5922_v39, %v5917_v37  ;;  %v15862_v9 = vpack.c.bf16 %v5924_v55, %v5919_v21  ;;  %v3722_v17 = vpop.f32.mrb[40].mxu0  ;;  %v15864_v1 = vpack.c.bf16 %v5923_v36, %v5918_v60  ;;  %v18785_v33 = vpack.i.bf16 %v24566_v12, %v24563_v3 }
 0x34d   : > { %18776 = vrot.lane.b32.xlu1 %v18775_v30, %s20689_s12  ;;  %v3252_v34 = vadd.f32 %v3224_v7, %v24495_v29  ;;  %v14691_v2 = vpop.f32.mrb[33].mxu1  ;;  %v14719_v52 = vpop.f32.mrb[41].mxu0  ;;  %v29065_v27 = vunpack.i.l.bf16 %v24211_v51  ;;  %v24576_v30 = vld [vmem:[%s20987_s26 + $0x20] sm:$0xff]  ;;  %v24583_v39 = vadd.f32 %v3722_v17, %v3247_v47  ;;  %v18419_v55 = vunpack.i.h.bf16 %v24340_v24  ;;  %v24592_v47 = vld [vmem:[#allocation5 + $0x1b8] sm:$0xff] }
 0x34e   : > { %18771 = vrot.lane.b32.xlu0 %v18770_v5, %s20689_s12  ;;  %15847 = vmatprep.subr.bf16.mxu0 %v15846_v20  ;;  %v18780_v36 = vpack.i.bf16 %v24579_v28, %v24576_v30  ;;  %v3229_v21 = vpop.f32.mrb[34].mxu1  ;;  %v3727_v29 = vpop.f32.mrb[42].mxu0  ;;  %v29066_v7 = vunpack.i.l.bf16 %v24184_v19  ;;  %v24603_v19 = vld [vmem:[%s20987_s26 + $0x88] sm:$0xff] }
 0x34f   : > { %v5895_v37 = vsel %vm5885_vm12, %v29065_v27, %v18389_v49  ;;  %15863 = vmatprep.subr.bf16.mxu1 %v15862_v9  ;;  %15849 = vmatpush1.bf16.msra.mxu0 %v15848_v53  ;;  %v18497_v51 = vpop.permute.xlu1 %18496  ;;  %v3257_v5 = vadd.f32 %v3229_v21, %v24504_v6  ;;  %v14694_v49 = vpop.f32.mrb[35].mxu1  ;;  %v24594_v20 = vadd.f32 %v3727_v29, %v3252_v34  ;;  %v18404_v9 = vunpack.i.h.bf16 %v24305_v4  ;;  %v24600_v53 = vld [vmem:[%s20987_s26 + $0x80] sm:$0xff] }
 0x350   : > { %v5890_v60 = vsel %vm5885_vm12, %v29066_v7, %v18374_v25  ;;  %15865 = vmatpush1.bf16.msra.mxu1 %v15864_v1  ;;  %v24590_v40 = vpop.permute.xlu0 %18491  ;;  %v14722_v17 = vpop.f32.mrb[43].mxu0  ;;  %v18790_v25 = vpack.i.bf16 %v24603_v19, %v24600_v53  ;;  %v18499_v52 = vunpack.i.h.bf16 %v18497_v51  ;;  %v18498_v34 = vunpack.i.l.bf16 %v18497_v51 }
 0x351   : > { %18786 = vrot.lane.b32.xlu1 %v18785_v33, %s20690_s28  ;;  %15866 = vmatprep.subr.bf16.mxu1 %v29038_v8  ;;  %v15867_v6 = vpack.c.bf16 %v5895_v37, %v5890_v60  ;;  %v3234_v1 = vpop.f32.mrb[36].mxu1  ;;  %v3732_v2 = vpop.f32.mrb[44].mxu0  ;;  %v29067_v29 = vunpack.i.l.bf16 %v24340_v24  ;;  %v18449_v7 = vunpack.i.h.bf16 %v24442_v32  ;;  %v18488_v60 = vunpack.i.l.bf16 %v24548_v14 }
 0x352   : > { %18781 = vrot.lane.b32.xlu0 %v18780_v36, %s20690_s28  ;;  %13824 = vmatmul.mubr.msk.f32.vlgmr.msra.gmra.mrb[0].mxu0 %vm665_vm1, %v24592_v47  ;;  %v3262_v33 = vadd.f32 %v3234_v1, %v24535_v38  ;;  %v24611_v27 = vadd.f32 %v3732_v2, %v3257_v5  ;;  %v14697_v37 = vpop.f32.mrb[37].mxu1  ;;  %v14725_v21 = vpop.f32.mrb[45].mxu0  ;;  %v18484_v51 = vunpack.i.h.bf16 %v24559_v42  ;;  %v18483_v5 = vunpack.i.l.bf16 %v24559_v42 }
 0x353   : > { %v5905_v49 = vsel %vm5885_vm12, %v29067_v29, %v18419_v55  ;;  %13829 = vmatmul.mubr.msk.f32.vlgmr.msra.gmra.mrb[0].mxu1 %vm665_vm1, %v24592_v47  ;;  %v24621_v36 = vpop.permute.xlu1 %18506  ;;  %6051 = vmatprep.mubr.f32.mxu0 %v29023_v41  ;;  %v3239_v38 = vpop.f32.mrb[38].mxu1  ;;  %v24628_v55 = vld [vmem:[#allocation5 + $0x1c0] sm:$0xff]  ;;  %v29068_v2 = vunpack.i.l.bf16 %v24305_v4  ;;  %v18434_v21 = vunpack.i.h.bf16 %v24417_v13  ;;  %v18805_v42 = vpack.i.bf16 %v24523_v59, %v24206_v54 }
 0x354   : > { %15868 = vmatpush3.bf16.msra.mxu1 %v15867_v6  ;;  %v24625_v24 = vpop.permute.xlu0 %18501  ;;  %6146 = vmatprep.mubr.f32.mxu1 %v29023_v41  ;;  %v3267_v17 = vadd.f32 %v3239_v38, %v24545_v26  ;;  %v14700_v1 = vpop.f32.mrb[39].mxu1  ;;  %v6394_v6 = vsel %vm6388_vm13, %v18498_v34, %v18499_v52  ;;  %v18800_v4 = vpack.i.bf16 %v24088_v50, %v24033_v22 }
 0x355   : > { %v5900_v37 = vsel %vm5885_vm12, %v29068_v2, %v18404_v9  ;;  %v18503_v29 = vunpack.i.l.bf16 %v24625_v24  ;;  %18796 = vrot.lane.b32.xlu1 %v24138_v16, %s20690_s28  ;;  %15869 = vmatprep.subr.bf16.mxu1 %v29038_v8  ;;  %v5915_v16 = vsel %vm5885_vm12, %v18448_v23, %v18449_v7  ;;  %v18479_v9 = vunpack.i.h.bf16 %v24512_v57 }
 0x356   : > { %18791 = vrot.lane.b32.xlu0 %v18790_v25, %s20690_s28  ;;  %v15870_v26 = vpack.c.bf16 %v5905_v49, %v5900_v37  ;;  %13825 = vmatmul.mubr.msk.f32.gmra.mrb[2].mxu0 %vm665_vm1, %v24628_v55  ;;  %v6390_v59 = vsel %vm6388_vm13, %v18484_v51, %v18488_v60  ;;  %v6389_v32 = vsel %vm6388_vm13, %v18483_v5, %v18484_v51  ;;  %v18508_v23 = vunpack.i.l.bf16 %v24621_v36  ;;  %v24668_v49 = vld [vmem:[#allocation5 + $0x1c8] sm:$0xff] }
 0x357   : > { %13830 = vmatmul.mubr.msk.f32.gmra.mrb[2].mxu1 %vm665_vm1, %v24628_v55  ;;  %v24653_v54 = vpop.permute.xlu1 %18516  ;;  %v6395_v22 = vsel %vm6388_vm13, %v18499_v52, %v18503_v29  ;;  %6057 = vmatprep.mubr.f32.mxu0 %v29023_v41  ;;  %v3737_v50 = vpop.f32.mrb[46].mxu0  ;;  %v18504_v25 = vunpack.i.h.bf16 %v24625_v24  ;;  %v5910_v52 = vsel %vm5885_vm12, %v18433_v10, %v18434_v21  ;;  %v18464_v1 = vunpack.i.h.bf16 %v24497_v62  ;;  %v24677_v5 = vld [vmem:[%s20987_s26 + $0xa8] sm:$0xff] }
 0x358   : > { %15871 = vmatpush3.bf16.msra.mxu1 %v15870_v26  ;;  %v24665_v34 = vpop.permute.xlu0 %18511  ;;  %6152 = vmatprep.mubr.f32.mxu1 %v29023_v41  ;;  %v15878_v7 = vpack.c.bf16 %v6395_v22, %v6390_v59  ;;  %v14728_v38 = vpop.f32.mrb[47].mxu0  ;;  %v15880_v51 = vpack.c.bf16 %v6394_v6, %v6389_v32  ;;  %v18815_v2 = vpack.i.bf16 %v24677_v5, %v24113_v58  ;;  %v18493_v37 = vunpack.i.l.bf16 %v24590_v40 }
 0x359   : > { %18806 = vrot.lane.b32.xlu1 %v18805_v42, %s20690_s28  ;;  %15872 = vmatprep.subr.bf16.mxu1 %v29038_v8  ;;  %v15873_v13 = vpack.c.bf16 %v5915_v16, %v5910_v52  ;;  %v18810_v10 = vpack.i.bf16 %v24526_v48, %v24275_v46  ;;  %v24685_v21 = vadd.f32 %v3737_v50, %v3262_v33  ;;  %v18489_v26 = vunpack.i.h.bf16 %v24548_v14  ;;  %v24696_v46 = vld [vmem:[#allocation5 + $0x1d0] sm:$0xff] }
 0x35a   : > { %18801 = vrot.lane.b32.xlu0 %v18800_v4, %s20690_s28  ;;  %15879 = vmatprep.subr.bf16.mxu0 %v15878_v7  ;;  %v5925_v42 = vsel %vm5885_vm12, %v18478_v45, %v18479_v9  ;;  %v6397_v57 = vsel %vm6388_vm13, %v18504_v25, %v18508_v23  ;;  %v29069_v33 = vunpack.i.l.bf16 %v24497_v62  ;;  %v20263_v9 = vld [vmem:[%s20987_s26 + $0x170] sm:$0xff]  ;;  %v18820_v22 = vpack.i.bf16 %v24515_v61, %v24324_v18 }
 0x35b   : > { %13831 = vmatmul.mubr.msk.f32.gmra.mrb[4].mxu1 %vm665_vm1, %v24668_v49  ;;  %15881 = vmatpush1.bf16.msra.mxu0 %v15880_v51  ;;  %v18527_v58 = vpop.permute.xlu1 %18526  ;;  %v3742_v6 = vpop.f32.mrb[48].mxu0  ;;  %v18825_v59 = vpack.i.bf16 %v24518_v31, %v20263_v9  ;;  %v6392_v62 = vsel %vm6388_vm13, %v18489_v26, %v18493_v37  ;;  %v18518_v7 = vunpack.i.l.bf16 %v24653_v54  ;;  %v18514_v38 = vunpack.i.h.bf16 %v24665_v34 }
 0x35c   : > { %15874 = vmatpush3.bf16.msra.mxu1 %v15873_v13  ;;  %v24693_v4 = vpop.permute.xlu0 %18521  ;;  %6158 = vmatprep.mubr.f32.mxu1 %v29023_v41  ;;  %v24703_v48 = vadd.f32 %v3742_v6, %v3267_v17  ;;  %v14731_v45 = vpop.f32.mrb[49].mxu0  ;;  %v5920_v16 = vsel %vm5885_vm12, %v29069_v33, %v18464_v1  ;;  %v18529_v50 = vunpack.i.h.bf16 %v18527_v58  ;;  %v18528_v32 = vunpack.i.l.bf16 %v18527_v58  ;;  %v20265_v58 = vld [vmem:[%s20987_s26 + $0x168] sm:$0xff]  ;;  %v24747_v33 = vld [vmem:[%s20987_s26 + $0xd8] sm:$0xff] }
 0x35d   : > { %18816 = vrot.lane.b32.xlu1 %v18815_v2, %s20690_s28  ;;  %15875 = vmatprep.subr.bf16.mxu1 %v29038_v8  ;;  %v15876_v17 = vpack.c.bf16 %v5925_v42, %v5920_v16  ;;  %v15894_v61 = vpack.c.bf16 %v6397_v57, %v6392_v62  ;;  %v18513_v31 = vunpack.i.l.bf16 %v24665_v34  ;;  %v28920_v52 = vunpack.i.l.bf16 %v24693_v4  ;;  %v24731_v2 = vld [vmem:[#allocation5 + $0x1d8] sm:$0xff]  ;;  %v20267_v16 = vld [vmem:[%s20987_s26 + $0x108] sm:$0xff] }
 0x35e   : > { %18811 = vrot.lane.b32.xlu0 %v18810_v10, %s20690_s28  ;;  %13826 = vmatmul.mubr.msk.f32.gmra.mrb[4].mxu0 %vm665_vm1, %v24668_v49  ;;  %v20264_v42 = vld [vmem:[%s20987_s26 + $0x138] sm:$0xff]  ;;  %v6396_v6 = vsel %vm6388_vm13, %v18503_v29, %v18504_v25  ;;  %v18519_v57 = vunpack.i.h.bf16 %v24653_v54  ;;  %v6404_v45 = vsel %vm6388_vm13, %v18528_v32, %v18529_v50  ;;  %v18830_v9 = vpack.i.bf16 %v20267_v16, %v24747_v33 }
 0x35f   : > { %13832 = vmatmul.mubr.msk.f32.gmra.mrb[6].mxu1 %vm665_vm1, %v24696_v46  ;;  %v24724_v18 = vpop.permute.xlu1 %18536  ;;  %6063 = vmatprep.mubr.f32.mxu0 %v29023_v41  ;;  %v24736_v34 = vpack.i.bf16 %v20265_v58, %v20264_v42  ;;  %v6400_v29 = vsel %vm6388_vm13, %v18514_v38, %v18518_v7 }
 0x360   : > { %15877 = vmatpush3.bf16.msra.mxu1 %v15876_v17  ;;  %v18538_v1 = vunpack.i.l.bf16 %v24724_v18  ;;  %v18532_v51 = vpop.permute.xlu0 %18531  ;;  %6164 = vmatprep.mubr.f32.mxu1 %v29023_v41  ;;  %v6402_v17 = vsel %vm6388_vm13, %v18519_v57, %v28920_v52 }
 0x361   : > { %v18534_v13 = vunpack.i.h.bf16 %v18532_v51  ;;  %v18533_v10 = vunpack.i.l.bf16 %v18532_v51  ;;  %15895 = vmatprep.subr.bf16.mxu1 %v15894_v61  ;;  %18826 = vrot.lane.b32.xlu1 %v18825_v59, %s20690_s28  ;;  %v6399_v59 = vsel %vm6388_vm13, %v18513_v31, %v18514_v38 }
 0x362   : > { %18821 = vrot.lane.b32.xlu0 %v18820_v22, %s20690_s28  ;;  %13827 = vmatmul.mubr.msk.f32.gmra.mrb[6].mxu0 %vm665_vm1, %v24696_v46  ;;  %v15884_v62 = vpack.c.bf16 %v6404_v45, %v6399_v59 }
 0x363   : > { %13833 = vmatmul.mubr.msk.f32.gmra.mrb[8].mxu1 %vm665_vm1, %v24731_v2  ;;  %v24755_v24 = vpop.permute.xlu1 %18546  ;;  %v6405_v54 = vsel %vm6388_vm13, %v18529_v50, %v18533_v10  ;;  %v6407_v25 = vsel %vm6388_vm13, %v18534_v13, %v18538_v1  ;;  %6069 = vmatprep.mubr.f32.mxu0 %v29023_v41  ;;  %v6391_v50 = vsel %vm6388_vm13, %v18488_v60, %v18489_v26 }
 0x364   : > { %v24764_v22 = vpop.permute.xlu0 %18541  ;;  %14872 = vmatprep.mubr.msk.f32.mxu1 %vm20680_vm2, %v29023_v41  ;;  %v15882_v32 = vpack.c.bf16 %v6405_v54, %v6400_v29  ;;  %v15898_v61 = vpack.c.bf16 %v6407_v25, %v6402_v17  ;;  %v15896_v38 = vpack.c.bf16 %v6396_v6, %v6391_v50  ;;  %v6406_v31 = vsel %vm6388_vm13, %v18533_v10, %v18534_v13  ;;  %v20268_v13 = vld [vmem:[%s20987_s26] sm:$0xff]  ;;  %v20269_v10 = vld [vmem:[%s20987_s26 + $0x30] sm:$0xff] }
 0x365   : > { %18836 = vrot.lane.b32.xlu1 %v24736_v34, %s20690_s28  ;;  %v6401_v26 = vsel %vm6388_vm13, %v18518_v7, %v18519_v57  ;;  %v18548_v51 = vunpack.i.l.bf16 %v24755_v24  ;;  %v18544_v42 = vunpack.i.h.bf16 %v24764_v22  ;;  %v18549_v16 = vunpack.i.h.bf16 %v24755_v24 }
 0x366   : > { %18831 = vrot.lane.b32.xlu0 %v18830_v9, %s20690_s28  ;;  %15883 = vmatprep.subr.bf16.mxu0 %v15882_v32  ;;  %v15900_v7 = vpack.c.bf16 %v6406_v31, %v6401_v26  ;;  %v18543_v54 = vunpack.i.l.bf16 %v24764_v22  ;;  %v20271_v32 = vld [vmem:[%s20987_s26 + $0x90] sm:$0xff]  ;;  %s14067_s28 = sshll.u32 %s20761_s27, 8 }
 0x367   : > { %14873 = vmatmul.mubr.msk.f32.vlgmr.msra.gmra.mrb[60].mxu1 %vm665_vm1, %v24592_v47  ;;  %15885 = vmatpush1.bf16.msra.mxu0 %v15884_v62  ;;  %v18557_v14 = vpop.permute.xlu1 %18556  ;;  %v24790_v47 = vpack.i.bf16 %v20269_v10, %v20268_v13  ;;  %v6410_v50 = vsel %vm6388_vm13, %v18544_v42, %v18548_v51 }
 0x368   : > { %15897 = vmatpush1.bf16.msra.mxu1 %v15896_v38  ;;  %v24780_v60 = vpop.permute.xlu0 %18551  ;;  %14875 = vmatprep.mubr.msk.f32.mxu1 %vm20680_vm2, %v29023_v41  ;;  %v18559_v58 = vunpack.i.h.bf16 %v18557_v14  ;;  %v18558_v6 = vunpack.i.l.bf16 %v18557_v14  ;;  %v6411_v14 = vsel %vm6388_vm13, %v18548_v51, %v18549_v16  ;;  %v6409_v10 = vsel %vm6388_vm13, %v18543_v54, %v18544_v42 }
 0x369   : > { %15899 = vmatprep.subr.bf16.mxu1 %v15898_v61  ;;  %18846 = vrot.lane.b32.xlu1 %v24347_v0, %s20691_s16  ;;  %v28918_v57 = vunpack.i.l.bf16 %v24780_v60 }
 0x36a   : > { %18841 = vrot.lane.b32.xlu0 %v24351_v63, %s20691_s16  ;;  %13828 = vmatmul.mubr.msk.f32.gmra.mrb[8].mxu0 %vm665_vm1, %v24731_v2  ;;  %v6414_v24 = vsel %vm6388_vm13, %v18558_v6, %v18559_v58  ;;  %v24835_v6 = vld [vmem:[%s20987_s26 + $0x48] sm:$0xff] }
 0x36b   : > { %14876 = vmatmul.mubr.msk.f32.gmra.mrb[62].mxu1 %vm665_vm1, %v24628_v55  ;;  %v24800_v45 = vpop.permute.xlu1 %18566  ;;  %6548 = vmatprep.mubr.f32.mxu0 %v29023_v41  ;;  %v20270_v55 = vld [vmem:[%s20987_s26 + $0x60] sm:$0xff]  ;;  %v6412_v38 = vsel %vm6388_vm13, %v18549_v16, %v28918_v57  ;;  %v15888_v51 = vpack.c.bf16 %v6414_v24, %v6409_v10  ;;  %v24842_v16 = vld [vmem:[%s20987_s26 + $0x18] sm:$0xff] }
 0x36c   : > { %15901 = vmatpush1.bf16.msra.mxu1 %v15900_v7  ;;  %v28919_v9 = vunpack.i.l.bf16 %v24800_v45  ;;  %v18562_v29 = vpop.permute.xlu0 %18561  ;;  %14878 = vmatprep.mubr.msk.f32.mxu1 %vm20680_vm2, %v29023_v41  ;;  %v24812_v17 = vpack.i.bf16 %v20271_v32, %v20270_v55  ;;  %v18875_v7 = vpack.i.bf16 %v24563_v3, %v24835_v6 }
 0x36d   : > { %v18564_v25 = vunpack.i.h.bf16 %v18562_v29  ;;  %v18563_v59 = vunpack.i.l.bf16 %v18562_v29  ;;  %18856 = vrot.lane.b32.xlu1 %v24357_v11, %s20691_s16  ;;  %v18870_v29 = vpack.i.bf16 %v24576_v30, %v24842_v16 }
 0x36e   : > { %18851 = vrot.lane.b32.xlu0 %v24790_v47, %s20691_s16 }
 0x36f   : > { %v6416_v62 = vsel %vm6388_vm13, %v18563_v59, %v18564_v25  ;;  %14879 = vmatmul.mubr.msk.f32.gmra.mrb[64].mxu1 %vm665_vm1, %v24668_v49  ;;  %v18577_v22 = vpop.permute.xlu1 %18576  ;;  %v6415_v61 = vsel %vm6388_vm13, %v18559_v58, %v18563_v59  ;;  %v6417_v31 = vsel %vm6388_vm13, %v18564_v25, %v28919_v9 }
 0x370   : > { %v18572_v26 = vpop.permute.xlu0 %18571  ;;  %14881 = vmatprep.mubr.msk.f32.mxu1 %vm20680_vm2, %v29023_v41  ;;  %v15886_v13 = vpack.c.bf16 %v6415_v61, %v6410_v50  ;;  %v15902_v49 = vpack.c.bf16 %v6417_v31, %v6412_v38  ;;  %v15904_v58 = vpack.c.bf16 %v6416_v62, %v6411_v14  ;;  %v18578_v3 = vunpack.i.l.bf16 %v18577_v22  ;;  %v24864_v31 = vld [vmem:[%s20987_s26 + $0x78] sm:$0xff] }
 0x371   : > { %18866 = vrot.lane.b32.xlu1 %v24812_v17, %s20691_s16  ;;  %v18574_v25 = vunpack.i.h.bf16 %v18572_v26  ;;  %v18579_v32 = vunpack.i.h.bf16 %v18577_v22  ;;  %v18573_v24 = vunpack.i.l.bf16 %v18572_v26  ;;  %v18895_v14 = vpack.i.bf16 %v24600_v53, %v24864_v31 }
 0x372   : > { %18861 = vrot.lane.b32.xlu0 %v24430_v44, %s20691_s16  ;;  %15887 = vmatprep.subr.bf16.mxu0 %v15886_v13  ;;  %v20276_v13 = vld [vmem:[%s20987_s26 + $0xf0] sm:$0xff]  ;;  %v18494_v22 = vunpack.i.h.bf16 %v24590_v40  ;;  %v18509_v26 = vunpack.i.h.bf16 %v24621_v36  ;;  %v18569_v40 = vunpack.i.h.bf16 %v24800_v45 }
 0x373   : > { %14882 = vmatmul.mubr.msk.f32.gmra.mrb[66].mxu1 %vm665_vm1, %v24696_v46  ;;  %15903 = vmatprep.subr.bf16.mxu1 %v15902_v49  ;;  %v18587_v42 = vpop.permute.xlu1 %18586 }
 0x374   : > { %15889 = vmatpush1.bf16.msra.mxu0 %v15888_v51  ;;  %15905 = vmatpush1.bf16.msra.mxu1 %v15904_v58  ;;  %v24848_v54 = vpop.permute.xlu0 %18581  ;;  %v18589_v59 = vunpack.i.h.bf16 %v18587_v42  ;;  %v18588_v30 = vunpack.i.l.bf16 %v18587_v42  ;;  %v6420_v58 = vsel %vm6388_vm13, %v18574_v25, %v18578_v3 }
 0x375   : > { %14884 = vmatprep.mubr.msk.f32.mxu1 %vm20680_vm2, %v29023_v41  ;;  %18876 = vrot.lane.b32.xlu1 %v18875_v7, %s20691_s16  ;;  %v28921_v46 = vunpack.i.l.bf16 %v24848_v54 }
 0x376   : > { %18871 = vrot.lane.b32.xlu0 %v18870_v29, %s20691_s16  ;;  %v6424_v10 = vsel %vm6388_vm13, %v18588_v30, %v18589_v59 }
 0x377   : > { %14885 = vmatmul.mubr.msk.f32.gmra.mrb[68].mxu1 %vm665_vm1, %v24731_v2  ;;  %v24857_v55 = vpop.permute.xlu1 %18596  ;;  %v20275_v2 = vld [vmem:[%s20987_s26 + $0xc0] sm:$0xff]  ;;  %v6422_v42 = vsel %vm6388_vm13, %v18579_v32, %v28921_v46 }
 0x378   : > { %v18598_v50 = vunpack.i.l.bf16 %v24857_v55  ;;  %v18592_v62 = vpop.permute.xlu0 %18591  ;;  %6643 = vmatprep.mubr.f32.mxu1 %v29023_v41  ;;  %v24870_v49 = vpack.i.bf16 %v20276_v13, %v20275_v2  ;;  %v6421_v2 = vsel %vm6388_vm13, %v18578_v3, %v18579_v32  ;;  %v6419_v13 = vsel %vm6388_vm13, %v18573_v24, %v18574_v25  ;;  %v24903_v3 = vld [vmem:[%s20987_s26 + $0xb0] sm:$0xff] }
 0x379   : > { %v18594_v61 = vunpack.i.h.bf16 %v18592_v62  ;;  %v18593_v38 = vunpack.i.l.bf16 %v18592_v62  ;;  %18886 = vrot.lane.b32.xlu1 %v24450_v43, %s20691_s16  ;;  %v18900_v25 = vpack.i.bf16 %v24903_v3, %v24677_v5 }
 0x37a   : > { %18881 = vrot.lane.b32.xlu0 %v24466_v35, %s20691_s16  ;;  %v4225_v7 = vpop.f32.mrb[40].mxu1 }
 0x37b   : > { %v6426_v51 = vsel %vm6388_vm13, %v18593_v38, %v18594_v61  ;;  %v24879_v29 = vpop.permute.xlu1 %18606  ;;  %v6425_v53 = vsel %vm6388_vm13, %v18589_v59, %v18593_v38  ;;  %v6427_v30 = vsel %vm6388_vm13, %v18594_v61, %v18598_v50  ;;  %v14750_v62 = vpop.f32.mrb[41].mxu1  ;;  %v15892_v59 = vpack.c.bf16 %v6424_v10, %v6419_v13  ;;  %v20279_v10 = vld [vmem:[%s20987_s26 + $0x150] sm:$0xff] }
 0x37c   : > { %v24890_v57 = vpop.permute.xlu0 %18601  ;;  %v15890_v9 = vpack.c.bf16 %v6425_v53, %v6420_v58  ;;  %v15906_v52 = vpack.c.bf16 %v6427_v30, %v6422_v42  ;;  %v15908_v38 = vpack.c.bf16 %v6426_v51, %v6421_v2  ;;  %v24894_v46 = vadd.f32 %v4225_v7, %v24583_v39 }
 0x37d   : > { %18896 = vrot.lane.b32.xlu1 %v18895_v14, %s20691_s16  ;;  %v6398_v61 = vsel %vm6388_vm13, %v18508_v23, %v18509_v26  ;;  %v18539_v62 = vunpack.i.h.bf16 %v24724_v18  ;;  %v18524_v39 = vunpack.i.h.bf16 %v24693_v4  ;;  %v24910_v23 = vld [vmem:[#allocation5 + $0x1e0] sm:$0xff]  ;;  %v6393_v14 = vsel %vm6388_vm13, %v18493_v37, %v18494_v22 }
 0x37e   : > { %18891 = vrot.lane.b32.xlu0 %v24870_v49, %s20691_s16  ;;  %15891 = vmatprep.subr.bf16.mxu0 %v15890_v9  ;;  %v4230_v32 = vpop.f32.mrb[42].mxu1  ;;  %v20278_v26 = vld [vmem:[%s20987_s26 + $0x120] sm:$0xff]  ;;  %v18609_v37 = vunpack.i.h.bf16 %v24879_v29  ;;  %v18554_v42 = vunpack.i.h.bf16 %v24780_v60  ;;  %v18608_v30 = vunpack.i.l.bf16 %v24879_v29  ;;  %v29071_v29 = vunpack.i.l.bf16 %v24800_v45 }
 0x37f   : > { %15907 = vmatprep.subr.bf16.mxu1 %v15906_v52  ;;  %15893 = vmatpush1.bf16.msra.mxu0 %v15892_v59  ;;  %v24908_v36 = vpop.permute.xlu1 %18616  ;;  %v24913_v24 = vadd.f32 %v4230_v32, %v24594_v20  ;;  %v14753_v9 = vpop.f32.mrb[43].mxu1  ;;  %v15911_v52 = vpack.c.bf16 %v6398_v61, %v6393_v14  ;;  %v24925_v58 = vpack.i.bf16 %v20279_v10, %v20278_v26  ;;  %v24974_v14 = vld [vmem:[#allocation5 + $0x1f0] sm:$0xff]  ;;  %v29072_v26 = vunpack.i.l.bf16 %v24780_v60  ;;  %v29073_v60 = vld [vmem:[#allocation20_spill] sm:$0xff] }
 0x380   : > { %15909 = vmatpush1.bf16.msra.mxu1 %v15908_v38  ;;  %v24918_v5 = vpop.permute.xlu0 %18611  ;;  %15910 = vmatprep.subr.bf16.mxu0 %v29038_v8  ;;  %v6408_v20 = vsel %vm6388_vm13, %v18538_v1, %v18539_v62  ;;  %v24942_v1 = vld [vmem:[#allocation5 + $0x1e8] sm:$0xff]  ;;  %v6418_v62 = vsel %vm6388_vm13, %v29071_v29, %v18569_v40  ;;  %v6894_v32 = vsel %vm6891_vm14, %v18608_v30, %v18609_v37  ;;  %v18584_v10 = vunpack.i.h.bf16 %v24848_v54  ;;  %v25005_v29 = vld [vmem:[#allocation5 + $0x1f8] sm:$0xff] }
 0x381   : > { %18906 = vrot.lane.b32.xlu1 %v24243_v15, %s20691_s16  ;;  %v29070_v15 = vunpack.i.l.bf16 %v24693_v4  ;;  %v18613_v51 = vunpack.i.l.bf16 %v24918_v5 }
 0x382   : > { %18901 = vrot.lane.b32.xlu0 %v18900_v25, %s20691_s16  ;;  %13839 = vmatmul.mubr.msk.f32.vlgmr.msra.gmra.mrb[0].mxu0 %vm665_vm1, %v24910_v23  ;;  %v4235_v22 = vpop.f32.mrb[44].mxu1  ;;  %v18599_v25 = vunpack.i.h.bf16 %v24857_v55 }
 0x383   : > { %v6403_v7 = vsel %vm6388_vm13, %v29070_v15, %v18524_v39  ;;  %15912 = vmatpush3.bf16.msra.mxu0 %v15911_v52  ;;  %v24939_v18 = vpop.permute.xlu1 %18626  ;;  %6554 = vmatprep.mubr.f32.mxu0 %v29023_v41  ;;  %v14756_v53 = vpop.f32.mrb[45].mxu1  ;;  %v24951_v13 = vadd.f32 %v4235_v22, %v24611_v27  ;;  %v24966_v27 = vld [vmem:[%s20987_s26 + $0xe0] sm:$0xff]  ;;  %v18604_v15 = vunpack.i.h.bf16 %v24890_v57 }
 0x384   : > { %v18628_v2 = vunpack.i.l.bf16 %v24939_v18  ;;  %v18622_v4 = vpop.permute.xlu0 %18621  ;;  %15913 = vmatprep.subr.bf16.mxu0 %v29038_v8  ;;  %13844 = vmatmul.mubr.msk.f32.vlgmr.msra.gmra.mrb[0].mxu1 %vm665_vm1, %v24910_v23  ;;  %v15914_v61 = vpack.c.bf16 %v6408_v20, %v6403_v7  ;;  %v18920_v39 = vpack.i.bf16 %v24966_v27, %v24747_v33  ;;  %v6413_v33 = vsel %vm6388_vm13, %v29072_v26, %v18554_v42 }
 0x385   : > { %v18624_v59 = vunpack.i.h.bf16 %v18622_v4  ;;  %v18623_v38 = vunpack.i.l.bf16 %v18622_v4  ;;  %18916 = vrot.lane.b32.xlu1 %v24925_v58, %s20691_s16  ;;  %6649 = vmatprep.mubr.f32.mxu1 %v29023_v41  ;;  %v18619_v7 = vunpack.i.h.bf16 %v24908_v36  ;;  %v15917_v53 = vpack.c.bf16 %v6418_v62, %v6413_v33 }
 0x386   : > { %18911 = vrot.lane.b32.xlu0 %v24228_v56, %s20691_s16  ;;  %13840 = vmatmul.mubr.msk.f32.gmra.mrb[2].mxu0 %vm665_vm1, %v24942_v1  ;;  %v6895_v56 = vsel %vm6891_vm14, %v18609_v37, %v18613_v51  ;;  %v6428_v4 = vsel %vm6388_vm13, %v18598_v50, %v18599_v25 }
 0x387   : > { %v6899_v9 = vsel %vm6891_vm14, %v18623_v38, %v18624_v59  ;;  %15915 = vmatpush3.bf16.msra.mxu0 %v15914_v61  ;;  %v24971_v45 = vpop.permute.xlu1 %18636  ;;  %6560 = vmatprep.mubr.f32.mxu0 %v29023_v41  ;;  %v6900_v52 = vsel %vm6891_vm14, %v18624_v59, %v18628_v2  ;;  %v6898_v62 = vsel %vm6891_vm14, %v18619_v7, %v18623_v38 }
 0x388   : > { %v24986_v20 = vpop.permute.xlu0 %18631  ;;  %15916 = vmatprep.subr.bf16.mxu0 %v29038_v8  ;;  %v15938_v40 = vpack.c.bf16 %v6900_v52, %v6895_v56  ;;  %v15940_v22 = vpack.c.bf16 %v6899_v9, %v6894_v32  ;;  %13845 = vmatmul.mubr.msk.f32.gmra.mrb[2].mxu1 %vm665_vm1, %v24942_v1  ;;  %v4240_v37 = vpop.f32.mrb[46].mxu1  ;;  %v29074_v32 = vunpack.i.l.bf16 %v24848_v54  ;;  %v6893_v38 = vsel %vm6891_vm14, %v18604_v15, %v18608_v30 }
 0x389   : > { %18926 = vrot.lane.b32.xlu1 %v29073_v60, %s20691_s16  ;;  %6655 = vmatprep.mubr.f32.mxu1 %v29023_v41  ;;  %v14759_v42 = vpop.f32.mrb[47].mxu1  ;;  %v25003_v59 = vadd.f32 %v4240_v37, %v24685_v21  ;;  %v18603_v21 = vunpack.i.l.bf16 %v24890_v57  ;;  %v18618_v52 = vunpack.i.l.bf16 %v24908_v36  ;;  %v18638_v26 = vunpack.i.l.bf16 %v24971_v45  ;;  %v29076_v57 = vld [vmem:[#allocation27_spill] sm:$0xff] }
 0x38a   : > { %18921 = vrot.lane.b32.xlu0 %v18920_v39, %s20691_s16  ;;  %13841 = vmatmul.mubr.msk.f32.gmra.mrb[4].mxu0 %vm665_vm1, %v24974_v14  ;;  %v6423_v55 = vsel %vm6388_vm13, %v29074_v32, %v18584_v10  ;;  %v29075_v39 = vld [vmem:[#allocation21_spill] sm:$0xff]  ;;  %v18634_v33 = vunpack.i.h.bf16 %v24986_v20  ;;  %v15922_v10 = vpack.c.bf16 %v6898_v62, %v6893_v38  ;;  %v18639_v36 = vunpack.i.h.bf16 %v24971_v45 }
 0x38b   : > { %15939 = vmatprep.subr.bf16.mxu1 %v15938_v40  ;;  %15918 = vmatpush3.bf16.msra.mxu0 %v15917_v53  ;;  %v18647_v61 = vpop.permute.xlu1 %18646  ;;  %v15920_v9 = vpack.c.bf16 %v6428_v4, %v6423_v55  ;;  %v6892_v4 = vsel %vm6891_vm14, %v18603_v21, %v18604_v15  ;;  %v6897_v45 = vsel %vm6891_vm14, %v18618_v52, %v18619_v7 }
 0x38c   : > { %15941 = vmatpush1.bf16.msra.mxu1 %v15940_v22  ;;  %v25011_v50 = vpop.permute.xlu0 %18641  ;;  %6566 = vmatprep.mubr.f32.mxu0 %v29023_v41  ;;  %v4245_v25 = vpop.f32.mrb[48].mxu1  ;;  %v18649_v60 = vunpack.i.h.bf16 %v18647_v61  ;;  %v18648_v62 = vunpack.i.l.bf16 %v18647_v61  ;;  %v6903_v32 = vsel %vm6891_vm14, %v18634_v33, %v18638_v26  ;;  %v6904_v7 = vsel %vm6891_vm14, %v18638_v26, %v18639_v36 }
 0x38d   : > { %18936 = vrot.lane.b32.xlu1 %v29075_v39, %s20691_s16  ;;  %15919 = vmatprep.subr.bf16.mxu0 %v29038_v8  ;;  %v25020_v54 = vadd.f32 %v4245_v25, %v24703_v48  ;;  %v14762_v56 = vpop.f32.mrb[49].mxu1  ;;  %v18643_v40 = vunpack.i.l.bf16 %v25011_v50  ;;  %v25033_v48 = vld [vmem:[#allocation5 + $0x200] sm:$0xff]  ;;  %v18633_v61 = vunpack.i.l.bf16 %v24986_v20  ;;  %v15924_v38 = vpack.c.bf16 %v6897_v45, %v6892_v4 }
 0x38e   : > { %18931 = vrot.lane.b32.xlu0 %v29076_v57, %s20691_s16  ;;  %13842 = vmatmul.mubr.msk.f32.gmra.mrb[6].mxu0 %vm665_vm1, %v25005_v29  ;;  %v6907_v52 = vsel %vm6891_vm14, %v18648_v62, %v18649_v60 }
 0x38f   : > { %15921 = vmatpush3.bf16.msra.mxu0 %v15920_v9  ;;  %v25030_v30 = vpop.permute.xlu1 %18656  ;;  %6572 = vmatprep.mubr.f32.mxu0 %v29023_v41 }
 0x390   : > { %v18658_v22 = vunpack.i.l.bf16 %v25030_v30  ;;  %v18652_v37 = vpop.permute.xlu0 %18651  ;;  %15923 = vmatprep.subr.bf16.mxu0 %v15922_v10  ;;  %13846 = vmatmul.mubr.msk.f32.gmra.mrb[4].mxu1 %vm665_vm1, %v24974_v14 }
 0x391   : > { %v18654_v53 = vunpack.i.h.bf16 %v18652_v37  ;;  %v18653_v42 = vunpack.i.l.bf16 %v18652_v37  ;;  %18946 = vrot.lane.b32.xlu1 %v24347_v0, %s20692_s8  ;;  %6661 = vmatprep.mubr.f32.mxu1 %v29023_v41  ;;  %v6905_v0 = vsel %vm6891_vm14, %v18639_v36, %v18643_v40 }
 0x392   : > { %18941 = vrot.lane.b32.xlu0 %v24351_v63, %s20692_s8  ;;  %13843 = vmatmul.mubr.msk.f32.gmra.mrb[8].mxu0 %vm665_vm1, %v25033_v48 }
 0x393   : > { %v6909_v55 = vsel %vm6891_vm14, %v18653_v42, %v18654_v53  ;;  %v25050_v25 = vpop.permute.xlu1 %18666  ;;  %14903 = vmatprep.mubr.msk.f32.mxu0 %vm20680_vm2, %v29023_v41  ;;  %v6910_v63 = vsel %vm6891_vm14, %v18654_v53, %v18658_v22  ;;  %v6908_v15 = vsel %vm6891_vm14, %v18649_v60, %v18653_v42 }
 0x394   : > { %v18662_v21 = vpop.permute.xlu0 %18661  ;;  %v15942_v39 = vpack.c.bf16 %v6910_v63, %v6905_v0  ;;  %v15926_v9 = vpack.c.bf16 %v6908_v15, %v6903_v32  ;;  %13847 = vmatmul.mubr.msk.f32.gmra.mrb[6].mxu1 %vm665_vm1, %v25005_v29  ;;  %v15944_v56 = vpack.c.bf16 %v6909_v55, %v6904_v7  ;;  %v18668_v20 = vunpack.i.l.bf16 %v25050_v25 }
 0x395   : > { %18956 = vrot.lane.b32.xlu1 %v24357_v11, %s20692_s8  ;;  %6667 = vmatprep.mubr.f32.mxu1 %v29023_v41  ;;  %v18664_v57 = vunpack.i.h.bf16 %v18662_v21  ;;  %v18663_v10 = vunpack.i.l.bf16 %v18662_v21  ;;  %v6902_v11 = vsel %vm6891_vm14, %v18633_v61, %v18634_v33  ;;  %v18970_v33 = vpack.i.bf16 %v24566_v12, %v24579_v28 }
 0x396   : > { %18951 = vrot.lane.b32.xlu0 %v24790_v47, %s20692_s8  ;;  %14904 = vmatmul.mubr.msk.f32.vlgmr.msra.gmra.mrb[70].mxu0 %vm665_vm1, %v24910_v23  ;;  %v15928_v47 = vpack.c.bf16 %v6907_v52, %v6902_v11  ;;  %v18669_v12 = vunpack.i.h.bf16 %v25050_v25 }
 0x397   : > { %15925 = vmatpush1.bf16.msra.mxu0 %v15924_v38  ;;  %15943 = vmatprep.subr.bf16.mxu1 %v15942_v39  ;;  %v18677_v26 = vpop.permute.xlu1 %18676  ;;  %v6912_v23 = vsel %vm6891_vm14, %v18663_v10, %v18664_v57  ;;  %v6913_v45 = vsel %vm6891_vm14, %v18664_v57, %v18668_v20  ;;  %v20281_v38 = vld [vmem:[%s20987_s26 + $0x130] sm:$0xff] }
 0x398   : > { %15927 = vmatprep.subr.bf16.mxu0 %v15926_v9  ;;  %15945 = vmatpush1.bf16.msra.mxu1 %v15944_v56  ;;  %v18679_v36 = vunpack.i.h.bf16 %v18677_v26  ;;  %v18678_v37 = vunpack.i.l.bf16 %v18677_v26  ;;  %v25075_v60 = vpop.permute.xlu0 %18671  ;;  %v6914_v52 = vsel %vm6891_vm14, %v18668_v20, %v18669_v12  ;;  %v25120_v26 = vld [vmem:[%s20987_s26 + $0xb8] sm:$0xff] }
 0x399   : > { %v18674_v53 = vunpack.i.h.bf16 %v25075_v60  ;;  %14906 = vmatprep.mubr.msk.f32.mxu0 %vm20680_vm2, %v29023_v41  ;;  %18966 = vrot.lane.b32.xlu1 %v24812_v17, %s20692_s8  ;;  %v18673_v15 = vunpack.i.l.bf16 %v25075_v60  ;;  %v18990_v11 = vpack.i.bf16 %v25120_v26, %v24603_v19  ;;  %v20302_v60 = vld [vmem:[%s20987_s26 + $0x38] sm:$0xff] }
 0x39a   : > { %18961 = vrot.lane.b32.xlu0 %v24430_v44, %s20692_s8  ;;  %14907 = vmatmul.mubr.msk.f32.gmra.mrb[72].mxu0 %vm665_vm1, %v24942_v1 }
 0x39b   : > { %v6917_v42 = vsel %vm6891_vm14, %v18679_v36, %v18674_v53  ;;  %15929 = vmatpush1.bf16.msra.mxu0 %v15928_v47  ;;  %v18687_v4 = vpop.permute.xlu1 %18686  ;;  %14909 = vmatprep.mubr.msk.f32.mxu0 %vm20680_vm2, %v29023_v41  ;;  %v6918_v62 = vsel %vm6891_vm14, %v18674_v53, %v18678_v37  ;;  %v6915_v20 = vsel %vm6891_vm14, %v18669_v12, %v18673_v15  ;;  %v18629_v12 = vunpack.i.h.bf16 %v24939_v18 }
 0x39c   : > { %v18689_v32 = vunpack.i.h.bf16 %v18687_v4  ;;  %v18688_v55 = vunpack.i.l.bf16 %v18687_v4  ;;  %v18682_v44 = vpop.permute.xlu0 %18681  ;;  %v15930_v0 = vpack.c.bf16 %v6918_v62, %v6913_v45  ;;  %v15932_v63 = vpack.c.bf16 %v6917_v42, %v6912_v23  ;;  %13848 = vmatmul.mubr.msk.f32.gmra.mrb[8].mxu1 %vm665_vm1, %v25033_v48 }
 0x39d   : > { %v18684_v28 = vunpack.i.h.bf16 %v18682_v44  ;;  %v18683_v1 = vunpack.i.l.bf16 %v18682_v44  ;;  %18976 = vrot.lane.b32.xlu1 %v24466_v35, %s20692_s8  ;;  %7146 = vmatprep.mubr.f32.mxu1 %v29023_v41  ;;  %v20285_v44 = vld [vmem:[%s20987_s26 + $0x160] sm:$0xff] }
 0x39e   : > { %18971 = vrot.lane.b32.xlu0 %v18970_v33, %s20691_s16  ;;  %14910 = vmatmul.mubr.msk.f32.gmra.mrb[74].mxu0 %vm665_vm1, %v24974_v14  ;;  %v6928_v7 = vsel %vm6891_vm14, %v18688_v55, %v18689_v32  ;;  %v20282_v14 = vld [vmem:[%s20987_s26 + $0x128] sm:$0xff] }
 0x39f   : > { %15931 = vmatprep.subr.bf16.mxu0 %v15930_v0  ;;  %v25105_v25 = vpop.permute.xlu1 %18696  ;;  %14912 = vmatprep.mubr.msk.f32.mxu0 %vm20680_vm2, %v29023_v41  ;;  %v6923_v35 = vsel %vm6891_vm14, %v18683_v1, %v18684_v28  ;;  %v25114_v56 = vpack.i.bf16 %v20281_v38, %v20282_v14 }
 0x3a0   : > { %15933 = vmatpush1.bf16.msra.mxu0 %v15932_v63  ;;  %v18699_v61 = vunpack.i.h.bf16 %v25105_v25  ;;  %v18698_v21 = vunpack.i.l.bf16 %v25105_v25  ;;  %v18692_v39 = vpop.permute.xlu0 %18691  ;;  %v15934_v9 = vpack.c.bf16 %v6928_v7, %v6923_v35 }
 0x3a1   : > { %v18694_v57 = vunpack.i.h.bf16 %v18692_v39  ;;  %v18693_v10 = vunpack.i.l.bf16 %v18692_v39  ;;  %18986 = vrot.lane.b32.xlu1 %v24870_v49, %s20692_s8 }
 0x3a2   : > { %v6919_v36 = vsel %vm6891_vm14, %v18678_v37, %v18698_v21  ;;  %18981 = vrot.lane.b32.xlu0 %v24450_v43, %s20692_s8  ;;  %14913 = vmatmul.mubr.msk.f32.gmra.mrb[76].mxu0 %vm665_vm1, %v25005_v29  ;;  %v6920_v49 = vsel %vm6891_vm14, %v18698_v21, %v18699_v61 }
 0x3a3   : > { %v6927_v53 = vsel %vm6891_vm14, %v18694_v57, %v18688_v55  ;;  %v6922_v19 = vsel %vm6891_vm14, %v18693_v10, %v18683_v1  ;;  %15935 = vmatprep.subr.bf16.mxu0 %v15934_v9  ;;  %v25137_v37 = vpop.permute.xlu1 %18706  ;;  %14915 = vmatprep.mubr.msk.f32.mxu0 %vm20680_vm2, %v29023_v41  ;;  %v15946_v43 = vpack.c.bf16 %v6920_v49, %v6915_v20  ;;  %v20284_v55 = vld [vmem:[%s20987_s26 + $0x158] sm:$0xff]  ;;  %v18614_v9 = vunpack.i.h.bf16 %v24918_v5  ;;  %v25189_v20 = vld [vmem:[%s20987_s26 + $0xe8] sm:$0xff] }
 0x3a4   : > { %v18709_v29 = vunpack.i.h.bf16 %v25137_v37  ;;  %v18708_v47 = vunpack.i.l.bf16 %v25137_v37  ;;  %v25143_v23 = vpop.permute.xlu0 %18701  ;;  %v15936_v33 = vpack.c.bf16 %v6927_v53, %v6922_v19  ;;  %v15948_v42 = vpack.c.bf16 %v6919_v36, %v6914_v52  ;;  %v25178_v52 = vld [vmem:[%s20987_s26 + $0x148] sm:$0xff]  ;;  %v25181_v57 = vld [vmem:[%s20987_s26 + $0x178] sm:$0xff] }
 0x3a5   : > { %v18704_v4 = vunpack.i.h.bf16 %v25143_v23  ;;  %v18703_v45 = vunpack.i.l.bf16 %v25143_v23  ;;  %18996 = vrot.lane.b32.xlu1 %v25114_v56, %s20692_s8  ;;  %15947 = vmatprep.subr.bf16.mxu1 %v15946_v43  ;;  %v25155_v0 = vpack.i.bf16 %v20285_v44, %v20284_v55  ;;  %v19015_v10 = vpack.i.bf16 %v25181_v57, %v25178_v52  ;;  %v25192_v49 = vld [vmem:[%s20987_s26 + $0x118] sm:$0xff]  ;;  %v25199_v19 = vld [vmem:[#allocation5 + $0x208] sm:$0xff]  ;;  %v25216_v55 = vld [vmem:[%s20987_s26 + $0x50] sm:$0xff] }
 0x3a6   : > { %v6929_v62 = vsel %vm6891_vm14, %v18689_v32, %v18708_v47  ;;  %18991 = vrot.lane.b32.xlu0 %v18990_v11, %s20691_s16  ;;  %14916 = vmatmul.mubr.msk.f32.gmra.mrb[78].mxu0 %vm665_vm1, %v25033_v48  ;;  %v6930_v63 = vsel %vm6891_vm14, %v18708_v47, %v18709_v29  ;;  %v18659_v36 = vunpack.i.h.bf16 %v25030_v30  ;;  %v25219_v44 = vld [vmem:[%s20987_s26 + $0x58] sm:$0xff]  ;;  %v20304_v23 = vld [vmem:[%s20987_s26 + $0x8] sm:$0xff] }
 0x3a7   : > { %v6924_v1 = vsel %vm6891_vm14, %v18684_v28, %v18703_v45  ;;  %15937 = vmatpush1.bf16.msra.mxu0 %v15936_v33  ;;  %15949 = vmatpush1.bf16.msra.mxu1 %v15948_v42  ;;  %v25162_v32 = vpop.permute.xlu1 %18716  ;;  %v6925_v48 = vsel %vm6891_vm14, %v18703_v45, %v18704_v4  ;;  %v6901_v33 = vsel %vm6891_vm14, %v18628_v2, %v18629_v12  ;;  %v25224_v2 = vld [vmem:[%s20987_s26 + $0x20] sm:$0xff] }
 0x3a8   : > { %v18719_v7 = vunpack.i.h.bf16 %v25162_v32  ;;  %v18718_v35 = vunpack.i.l.bf16 %v25162_v32  ;;  %v25169_v21 = vpop.permute.xlu0 %18711  ;;  %v15950_v28 = vpack.c.bf16 %v6930_v63, %v6925_v48  ;;  %v15952_v39 = vpack.c.bf16 %v6929_v62, %v6924_v1  ;;  %7051 = vmatprep.mubr.f32.mxu0 %v29023_v41  ;;  %v25227_v63 = vld [vmem:[%s20987_s26 + $0x28] sm:$0xff]  ;;  %v25232_v1 = vld [vmem:[#allocation5 + $0x210] sm:$0xff] }
 0x3a9   : > { %v28922_v38 = vunpack.i.h.bf16 %v25169_v21  ;;  %v18713_v14 = vunpack.i.l.bf16 %v25169_v21  ;;  %19006 = vrot.lane.b32.xlu1 %v24925_v58, %s20692_s8  ;;  %v4728_v11 = vpop.f32.mrb[50].mxu0  ;;  %v19010_v58 = vpack.i.bf16 %v25192_v49, %v25189_v20  ;;  %v19025_v18 = vpack.i.bf16 %v25219_v44, %v25216_v55 }
 0x3aa   : > { %19001 = vrot.lane.b32.xlu0 %v25155_v0, %s20692_s8  ;;  %15951 = vmatprep.subr.bf16.mxu1 %v15950_v28  ;;  %v7401_v53 = vsel %vm7394_vm15, %v18718_v35, %v18719_v7  ;;  %v25202_v43 = vadd.f32 %v4728_v11, %v24894_v46  ;;  %v14781_v47 = vpop.f32.mrb[51].mxu0  ;;  %v19020_v12 = vpack.i.bf16 %v25227_v63, %v25224_v2  ;;  %v18644_v28 = vunpack.i.h.bf16 %v25011_v50 }
 0x3ab   : > { %15953 = vmatpush1.bf16.msra.mxu1 %v15952_v39  ;;  %v25207_v42 = vpop.permute.xlu1 %18726  ;;  %v7396_v45 = vsel %vm7394_vm15, %v18713_v14, %v28922_v38  ;;  %13854 = vmatmul.mubr.msk.f32.vlgmr.msra.gmra.mrb[0].mxu0 %vm665_vm1, %v25199_v19  ;;  %v6896_v48 = vsel %vm6891_vm14, %v18613_v51, %v18614_v9  ;;  %v6911_v47 = vsel %vm6891_vm14, %v18658_v22, %v18659_v36 }
 0x3ac   : > { %v18722_v62 = vpop.permute.xlu0 %18721  ;;  %15954 = vmatprep.subr.bf16.mxu1 %v29038_v8  ;;  %v15966_v46 = vpack.c.bf16 %v7401_v53, %v7396_v45  ;;  %7057 = vmatprep.mubr.f32.mxu0 %v29023_v41  ;;  %v15955_v45 = vpack.c.bf16 %v6901_v33, %v6896_v48  ;;  %v28929_v51 = vunpack.i.h.bf16 %v25207_v42  ;;  %v18728_v9 = vunpack.i.l.bf16 %v25207_v42 }
 0x3ad   : > { %v18724_v39 = vunpack.i.h.bf16 %v18722_v62  ;;  %v18723_v11 = vunpack.i.l.bf16 %v18722_v62  ;;  %19016 = vrot.lane.b32.xlu1 %v19015_v10, %s20691_s16  ;;  %v4733_v53 = vpop.f32.mrb[52].mxu0  ;;  %v6906_v33 = vsel %vm6891_vm14, %v18643_v40, %v18644_v28 }
 0x3ae   : > { %19011 = vrot.lane.b32.xlu0 %v19010_v58, %s20691_s16  ;;  %15967 = vmatprep.subr.bf16.mxu0 %v15966_v46  ;;  %v25244_v38 = vadd.f32 %v4733_v53, %v24913_v24  ;;  %v14784_v5 = vpop.f32.mrb[53].mxu0  ;;  %v15958_v40 = vpack.c.bf16 %v6911_v47, %v6906_v33  ;;  %v19040_v33 = vpack.i.bf16 %v24835_v6, %v24842_v16 }
 0x3af   : > { %v7400_v62 = vsel %vm7394_vm15, %v18724_v39, %v18718_v35  ;;  %v7395_v10 = vsel %vm7394_vm15, %v18723_v11, %v18713_v14  ;;  %13859 = vmatmul.mubr.msk.f32.vlgmr.msra.gmra.mrb[0].mxu1 %vm665_vm1, %v25199_v19  ;;  %v18737_v30 = vpop.permute.xlu1 %18736  ;;  %13855 = vmatmul.mubr.msk.f32.gmra.mrb[2].mxu0 %vm665_vm1, %v25232_v1  ;;  %v19035_v35 = vpack.i.bf16 %v25120_v26, %v24903_v3  ;;  %v25259_v14 = vld [vmem:[#allocation5 + $0x218] sm:$0xff]  ;;  %v25269_v39 = vld [vmem:[%s20987_s26 + $0x80] sm:$0xff]  ;;  %v25272_v11 = vld [vmem:[%s20987_s26 + $0x88] sm:$0xff] }
 0x3b0   : > { %15956 = vmatpush3.bf16.msra.mxu1 %v15955_v45  ;;  %v18739_v24 = vunpack.i.h.bf16 %v18737_v30  ;;  %v18738_v22 = vunpack.i.l.bf16 %v18737_v30  ;;  %v25254_v36 = vpop.permute.xlu0 %18731  ;;  %v15968_v58 = vpack.c.bf16 %v7400_v62, %v7395_v10  ;;  %7063 = vmatprep.mubr.f32.mxu0 %v29023_v41  ;;  %v19030_v3 = vpack.i.bf16 %v25272_v11, %v25269_v39 }
 0x3b1   : > { %v28925_v46 = vunpack.i.h.bf16 %v25254_v36  ;;  %v18733_v48 = vunpack.i.l.bf16 %v25254_v36  ;;  %19026 = vrot.lane.b32.xlu1 %v19025_v18, %s20692_s8  ;;  %15957 = vmatprep.subr.bf16.mxu1 %v29038_v8  ;;  %v4738_v26 = vpop.f32.mrb[54].mxu0  ;;  %v7406_v5 = vsel %vm7394_vm15, %v18728_v9, %v28929_v51 }
 0x3b2   : > { %v7405_v50 = vsel %vm7394_vm15, %v18738_v22, %v18728_v9  ;;  %19021 = vrot.lane.b32.xlu0 %v19020_v12, %s20692_s8  ;;  %15969 = vmatpush1.bf16.msra.mxu0 %v15968_v58  ;;  %v25279_v28 = vadd.f32 %v4738_v26, %v24951_v13  ;;  %v14787_v18 = vpop.f32.mrb[55].mxu0  ;;  %v19045_v22 = vpack.i.bf16 %v25189_v20, %v24966_v27  ;;  %v25305_v58 = vld [vmem:[#allocation5 + $0x220] sm:$0xff] }
 0x3b3   : > { %v7410_v53 = vsel %vm7394_vm15, %v18739_v24, %v18733_v48  ;;  %v25282_v45 = vpop.permute.xlu1 %18746  ;;  %v7411_v62 = vsel %vm7394_vm15, %v18733_v48, %v28925_v46  ;;  %7152 = vmatprep.mubr.f32.mxu1 %v29023_v41  ;;  %13856 = vmatmul.mubr.msk.f32.gmra.mrb[4].mxu0 %vm665_vm1, %v25259_v14 }
 0x3b4   : > { %15959 = vmatpush3.bf16.msra.mxu1 %v15958_v40  ;;  %v28924_v13 = vunpack.i.h.bf16 %v25282_v45  ;;  %v18748_v12 = vunpack.i.l.bf16 %v25282_v45  ;;  %v25295_v47 = vpop.permute.xlu0 %18741  ;;  %v15970_v10 = vpack.c.bf16 %v7411_v62, %v7406_v5  ;;  %v15972_v30 = vpack.c.bf16 %v7410_v53, %v7405_v50  ;;  %7069 = vmatprep.mubr.f32.mxu0 %v29023_v41  ;;  %v25327_v5 = vld [vmem:[%s20987_s26 + $0xa8] sm:$0xff] }
 0x3b5   : > { %v28923_v9 = vunpack.i.h.bf16 %v25295_v47  ;;  %v18743_v24 = vunpack.i.l.bf16 %v25295_v47  ;;  %19036 = vrot.lane.b32.xlu1 %v19035_v35, %s20692_s8  ;;  %13860 = vmatmul.mubr.msk.f32.gmra.mrb[2].mxu1 %vm665_vm1, %v25232_v1  ;;  %v19055_v62 = vpack.i.bf16 %v25327_v5, %v24864_v31 }
 0x3b6   : > { %19031 = vrot.lane.b32.xlu0 %v19030_v3, %s20692_s8  ;;  %15971 = vmatprep.subr.bf16.mxu0 %v15970_v10  ;;  %v7421_v48 = vsel %vm7394_vm15, %v18748_v12, %v28924_v13  ;;  %v25333_v10 = vld [vmem:[#allocation5 + $0x228] sm:$0xff] }
 0x3b7   : > { %15973 = vmatpush1.bf16.msra.mxu0 %v15972_v30  ;;  %v25313_v35 = vpop.permute.xlu1 %18756  ;;  %v7416_v27 = vsel %vm7394_vm15, %v18743_v24, %v28923_v9  ;;  %7158 = vmatprep.mubr.f32.mxu1 %v29023_v41  ;;  %v4743_v20 = vpop.f32.mrb[56].mxu0  ;;  %v25358_v9 = vld [vmem:[%s20987_s26 + $0x170] sm:$0xff] }
 0x3b8   : > { %v18752_v3 = vpop.permute.xlu0 %18751  ;;  %v15974_v26 = vpack.c.bf16 %v7421_v48, %v7416_v27  ;;  %13857 = vmatmul.mubr.msk.f32.gmra.mrb[6].mxu0 %vm665_vm1, %v25305_v58  ;;  %15960 = vmatprep.subr.bf16.mxu1 %v29038_v8  ;;  %v25323_v50 = vadd.f32 %v4743_v20, %v25003_v59  ;;  %v14790_v40 = vpop.f32.mrb[57].mxu0  ;;  %v25337_v59 = vld [vmem:[%s20987_s26 + $0x110] sm:$0xff]  ;;  %v18758_v48 = vunpack.i.l.bf16 %v25313_v35 }
 0x3b9   : > { %v18754_v18 = vunpack.i.h.bf16 %v18752_v3  ;;  %v18753_v53 = vunpack.i.l.bf16 %v18752_v3  ;;  %19046 = vrot.lane.b32.xlu1 %v19045_v22, %s20692_s8  ;;  %13861 = vmatmul.mubr.msk.f32.gmra.mrb[4].mxu1 %vm665_vm1, %v25259_v14  ;;  %v19050_v30 = vpack.i.bf16 %v25192_v49, %v25337_v59  ;;  %v28927_v22 = vunpack.i.h.bf16 %v25313_v35 }
 0x3ba   : > { %19041 = vrot.lane.b32.xlu0 %v19040_v33, %s20692_s8  ;;  %15975 = vmatprep.subr.bf16.mxu0 %v15974_v26 }
 0x3bb   : > { %v7420_v27 = vsel %vm7394_vm15, %v18754_v18, %v18748_v12  ;;  %v7415_v31 = vsel %vm7394_vm15, %v18753_v53, %v18743_v24  ;;  %v18767_v20 = vpop.permute.xlu1 %18766  ;;  %7075 = vmatprep.mubr.f32.mxu0 %v29023_v41  ;;  %7164 = vmatprep.mubr.f32.mxu1 %v29023_v41  ;;  %v4748_v33 = vpop.f32.mrb[58].mxu0 }
 0x3bc   : > { %v18769_v3 = vunpack.i.h.bf16 %v18767_v20  ;;  %v18768_v26 = vunpack.i.l.bf16 %v18767_v20  ;;  %v25347_v40 = vpop.permute.xlu0 %18761  ;;  %v15976_v49 = vpack.c.bf16 %v7420_v27, %v7415_v31  ;;  %13858 = vmatmul.mubr.msk.f32.gmra.mrb[8].mxu0 %vm665_vm1, %v25333_v10  ;;  %v25352_v12 = vadd.f32 %v4748_v33, %v25020_v54  ;;  %v14793_v18 = vpop.f32.mrb[59].mxu0  ;;  %v25367_v54 = vld [vmem:[%s20987_s26 + $0x140] sm:$0xff] }
 0x3bd   : > { %v28926_v24 = vunpack.i.h.bf16 %v25347_v40  ;;  %v18763_v53 = vunpack.i.l.bf16 %v25347_v40  ;;  %19056 = vrot.lane.b32.xlu1 %v19055_v62, %s20692_s8  ;;  %v19065_v20 = vpack.i.bf16 %v25181_v57, %v25358_v9  ;;  %13862 = vmatmul.mubr.msk.f32.gmra.mrb[6].mxu1 %vm665_vm1, %v25305_v58  ;;  %v19060_v31 = vpack.i.bf16 %v25178_v52, %v25367_v54 }
 0x3be   : > { %v7425_v27 = vsel %vm7394_vm15, %v18768_v26, %v18758_v48  ;;  %19051 = vrot.lane.b32.xlu0 %v19050_v30, %s20692_s8  ;;  %15977 = vmatpush1.bf16.msra.mxu0 %v15976_v49  ;;  %v7426_v57 = vsel %vm7394_vm15, %v18758_v48, %v28927_v22  ;;  %v25385_v48 = vld [vmem:[%s20987_s26 + $0xd8] sm:$0xff] }
 0x3bf   : > { %v7430_v62 = vsel %vm7394_vm15, %v18769_v3, %v18763_v53  ;;  %v18777_v33 = vpop.permute.xlu1 %18776  ;;  %v7431_v26 = vsel %vm7394_vm15, %v18763_v53, %v28926_v24  ;;  %7170 = vmatprep.mubr.f32.mxu1 %v29023_v41  ;;  %7554 = vmatprep.mubr.f32.mxu0 %v29023_v41  ;;  %v25388_v53 = vld [vmem:[%s20987_s26 + $0x108] sm:$0xff] }
 0x3c0   : > { %v18772_v30 = vpop.permute.xlu0 %18771  ;;  %v15978_v49 = vpack.c.bf16 %v7431_v26, %v7426_v57  ;;  %v15980_v52 = vpack.c.bf16 %v7430_v62, %v7425_v27  ;;  %v18779_v18 = vunpack.i.h.bf16 %v18777_v33  ;;  %v18778_v3 = vunpack.i.l.bf16 %v18777_v33 }
 0x3c1   : > { %v18774_v13 = vunpack.i.h.bf16 %v18772_v30  ;;  %v18773_v46 = vunpack.i.l.bf16 %v18772_v30  ;;  %19066 = vrot.lane.b32.xlu1 %v19065_v20, %s20692_s8  ;;  %13863 = vmatmul.mubr.msk.f32.gmra.mrb[8].mxu1 %vm665_vm1, %v25333_v10  ;;  %v25392_v27 = vpack.i.bf16 %v25388_v53, %v25385_v48 }
 0x3c2   : > { %19061 = vrot.lane.b32.xlu0 %v19060_v31, %s20692_s8  ;;  %15979 = vmatprep.subr.bf16.mxu0 %v15978_v49  ;;  %v6931_v30 = vsel %vm6891_vm14, %v18709_v29, %v18779_v18 }
 0x3c3   : > { %v6921_v20 = vsel %vm6891_vm14, %v18699_v61, %v18774_v13  ;;  %v6916_v62 = vsel %vm6891_vm14, %v18673_v15, %v18773_v46  ;;  %15981 = vmatpush1.bf16.msra.mxu0 %v15980_v52  ;;  %v25400_v31 = vpop.permute.xlu1 %18786  ;;  %14934 = vmatprep.mubr.msk.f32.mxu1 %vm20680_vm2, %v29023_v41  ;;  %v25408_v61 = vld [vmem:[#allocation5 + $0x230] sm:$0xff]  ;;  %v20303_v15 = vld [vmem:[%s20987_s26 + $0x40] sm:$0xff]  ;;  %v6926_v13 = vsel %vm6891_vm14, %v18704_v4, %v18778_v3 }
 0x3c4   : > { %v18789_v33 = vunpack.i.h.bf16 %v25400_v31  ;;  %v28930_v57 = vunpack.i.l.bf16 %v25400_v31  ;;  %v25406_v26 = vpop.permute.xlu0 %18781  ;;  %v15961_v25 = vpack.c.bf16 %v6921_v20, %v6916_v62  ;;  %15998 = vmatprep.subr.bf16.mxu0 %v29038_v8  ;;  %v25413_v46 = vpack.i.bf16 %v20303_v15, %v20302_v60  ;;  %v20305_v4 = vld [vmem:[%s20987_s26 + $0x10] sm:$0xff]  ;;  %v25449_v15 = vld [vmem:[#allocation5 + $0x238] sm:$0xff] }
 0x3c5   : > { %v18784_v49 = vunpack.i.h.bf16 %v25406_v26  ;;  %v18783_v52 = vunpack.i.l.bf16 %v25406_v26  ;;  %19076 = vrot.lane.b32.xlu1 %v24736_v34, %s20692_s8  ;;  %v25432_v37 = vpack.i.bf16 %v20305_v4, %v20304_v23  ;;  %v20307_v23 = vld [vmem:[%s20987_s26 + $0x68] sm:$0xff] }
 0x3c6   : > { %v7404_v20 = vsel %vm7394_vm15, %v28930_v57, %v18789_v33  ;;  %19071 = vrot.lane.b32.xlu0 %v25392_v27, %s20692_s8  ;;  %15962 = vmatpush3.bf16.msra.mxu1 %v15961_v25  ;;  %v15964_v33 = vpack.c.bf16 %v6931_v30, %v6926_v13  ;;  %v20308_v30 = vld [vmem:[%s20987_s26] sm:$0xff] }
 0x3c7   : > { %v7399_v29 = vsel %vm7394_vm15, %v18783_v52, %v18784_v49  ;;  %v25435_v18 = vpop.permute.xlu1 %18796  ;;  %15963 = vmatprep.subr.bf16.mxu1 %v29038_v8  ;;  %13869 = vmatmul.mubr.msk.f32.vlgmr.msra.gmra.mrb[0].mxu0 %vm665_vm1, %v25408_v61  ;;  %v20306_v49 = vld [vmem:[%s20987_s26 + $0x70] sm:$0xff] }
 0x3c8   : > { %v18799_v34 = vunpack.i.h.bf16 %v25435_v18  ;;  %v28928_v3 = vunpack.i.l.bf16 %v25435_v18  ;;  %v25442_v62 = vpop.permute.xlu0 %18791  ;;  %v15999_v26 = vpack.c.bf16 %v7404_v20, %v7399_v29  ;;  %7560 = vmatprep.mubr.f32.mxu0 %v29023_v41  ;;  %v25453_v4 = vpack.i.bf16 %v20306_v49, %v20307_v23  ;;  %v20309_v20 = vld [vmem:[%s20987_s26 + $0x30] sm:$0xff] }
 0x3c9   : > { %v18794_v25 = vunpack.i.h.bf16 %v25442_v62  ;;  %v18793_v60 = vunpack.i.l.bf16 %v25442_v62  ;;  %19086 = vrot.lane.b32.xlu1 %v25413_v46, %s20693_s13  ;;  %v25462_v29 = vpack.i.bf16 %v20309_v20, %v20308_v30 }
 0x3ca   : > { %v7414_v13 = vsel %vm7394_vm15, %v28928_v3, %v18799_v34  ;;  %19081 = vrot.lane.b32.xlu0 %v25432_v37, %s20693_s13  ;;  %15965 = vmatpush3.bf16.msra.mxu1 %v15964_v33  ;;  %v29077_v3 = vunpack.i.h.bf16 %v25169_v21 }
 0x3cb   : > { %v7409_v62 = vsel %vm7394_vm15, %v18793_v60, %v18794_v25  ;;  %16000 = vmatpush3.bf16.msra.mxu0 %v15999_v26  ;;  %v25465_v24 = vpop.permute.xlu1 %18806  ;;  %v25476_v26 = vld [vmem:[#allocation5 + $0x240] sm:$0xff]  ;;  %v20310_v25 = vld [vmem:[%s20987_s26 + $0x98] sm:$0xff] }
 0x3cc   : > { %v18802_v49 = vpop.permute.xlu0 %18801  ;;  %13870 = vmatmul.mubr.msk.f32.gmra.mrb[2].mxu0 %vm665_vm1, %v25449_v15  ;;  %16001 = vmatprep.subr.bf16.mxu0 %v29038_v8  ;;  %v16002_v34 = vpack.c.bf16 %v7414_v13, %v7409_v62  ;;  %v18809_v33 = vunpack.i.h.bf16 %v25465_v24  ;;  %v20311_v13 = vld [vmem:[%s20987_s26 + $0xa0] sm:$0xff]  ;;  %v29079_v21 = vunpack.i.l.bf16 %v25465_v24 }
 0x3cd   : > { %v18804_v30 = vunpack.i.h.bf16 %v18802_v49  ;;  %v18803_v20 = vunpack.i.l.bf16 %v18802_v49  ;;  %14935 = vmatmul.mubr.msk.f32.vlgmr.msra.gmra.mrb[70].mxu1 %vm665_vm1, %v25199_v19  ;;  %19096 = vrot.lane.b32.xlu1 %v25453_v4, %s20693_s13  ;;  %v25484_v62 = vpack.i.bf16 %v20311_v13, %v20310_v25  ;;  %v19115_v49 = vpack.i.bf16 %v25216_v55, %v24835_v6 }
 0x3ce   : > { %19091 = vrot.lane.b32.xlu0 %v25462_v29, %s20693_s13  ;;  %14937 = vmatprep.mubr.msk.f32.mxu1 %vm20680_vm2, %v29023_v41  ;;  %v19110_v19 = vpack.i.bf16 %v25224_v2, %v24842_v16  ;;  %v29078_v16 = vunpack.i.l.bf16 %v25400_v31  ;;  %v7419_v55 = vsel %vm7394_vm15, %v29079_v21, %v18809_v33  ;;  %v20312_v21 = vld [vmem:[%s20987_s26 + $0xf8] sm:$0xff] }
 0x3cf   : > { %v7402_v22 = vsel %vm7394_vm15, %v18719_v7, %v18804_v30  ;;  %v7397_v51 = vsel %vm7394_vm15, %v29077_v3, %v18803_v20  ;;  %16003 = vmatpush3.bf16.msra.mxu0 %v16002_v34  ;;  %v18817_v23 = vpop.permute.xlu1 %18816  ;;  %7566 = vmatprep.mubr.f32.mxu0 %v29023_v41  ;;  %v7398_v25 = vsel %vm7394_vm15, %v18803_v20, %v18783_v52  ;;  %v25515_v3 = vld [vmem:[#allocation5 + $0x248] sm:$0xff]  ;;  %v29081_v34 = vunpack.i.h.bf16 %v25254_v36 }
 0x3d0   : > { %v18819_v13 = vunpack.i.h.bf16 %v18817_v23  ;;  %v18818_v57 = vunpack.i.l.bf16 %v18817_v23  ;;  %v25498_v6 = vpop.permute.xlu0 %18811  ;;  %13871 = vmatmul.mubr.msk.f32.gmra.mrb[4].mxu0 %vm665_vm1, %v25476_v26  ;;  %v7403_v32 = vsel %vm7394_vm15, %v18804_v30, %v29078_v16  ;;  %v15984_v7 = vpack.c.bf16 %v7402_v22, %v7397_v51  ;;  %16004 = vmatprep.subr.bf16.mxu0 %v29038_v8 }
 0x3d1   : > { %v18814_v2 = vunpack.i.h.bf16 %v25498_v6  ;;  %v18813_v52 = vunpack.i.l.bf16 %v25498_v6  ;;  %14938 = vmatmul.mubr.msk.f32.gmra.mrb[72].mxu1 %vm665_vm1, %v25232_v1  ;;  %19106 = vrot.lane.b32.xlu1 %v24812_v17, %s20693_s13  ;;  %v15982_v31 = vpack.c.bf16 %v7403_v32, %v7398_v25  ;;  %v29080_v51 = vunpack.i.h.bf16 %v25207_v42 }
 0x3d2   : > { %v7412_v33 = vsel %vm7394_vm15, %v29081_v34, %v18819_v13  ;;  %19101 = vrot.lane.b32.xlu0 %v25484_v62, %s20693_s13  ;;  %14940 = vmatprep.mubr.msk.f32.mxu1 %vm20680_vm2, %v29023_v41  ;;  %v7408_v1 = vsel %vm7394_vm15, %v18818_v57, %v18793_v60  ;;  %v29082_v36 = vunpack.i.l.bf16 %v25435_v18 }
 0x3d3   : > { %v7407_v22 = vsel %vm7394_vm15, %v29080_v51, %v18818_v57  ;;  %v7424_v17 = vsel %vm7394_vm15, %v18813_v52, %v18814_v2  ;;  %15983 = vmatprep.subr.bf16.mxu1 %v15982_v31  ;;  %v25531_v42 = vpop.permute.xlu1 %18826  ;;  %7572 = vmatprep.mubr.f32.mxu0 %v29023_v41  ;;  %v20315_v51 = vld [vmem:[%s20987_s26 + $0xc8] sm:$0xff] }
 0x3d4   : > { %v7413_v23 = vsel %vm7394_vm15, %v18819_v13, %v29082_v36  ;;  %v15988_v30 = vpack.c.bf16 %v7412_v33, %v7407_v22  ;;  %15985 = vmatpush1.bf16.msra.mxu1 %v15984_v7  ;;  %v18829_v20 = vunpack.i.h.bf16 %v25531_v42  ;;  %v18828_v57 = vunpack.i.l.bf16 %v25531_v42  ;;  %v18822_v60 = vpop.permute.xlu0 %18821  ;;  %13872 = vmatmul.mubr.msk.f32.gmra.mrb[6].mxu0 %vm665_vm1, %v25515_v3  ;;  %v25548_v7 = vld [vmem:[#allocation5 + $0x250] sm:$0xff]  ;;  %v25567_v36 = vld [vmem:[%s20987_s26 + $0x78] sm:$0xff] }
 0x3d5   : > { %v15986_v25 = vpack.c.bf16 %v7413_v23, %v7408_v1  ;;  %v16005_v16 = vpack.c.bf16 %v7424_v17, %v7419_v55  ;;  %v18824_v32 = vunpack.i.h.bf16 %v18822_v60  ;;  %v18823_v18 = vunpack.i.l.bf16 %v18822_v60  ;;  %14941 = vmatmul.mubr.msk.f32.gmra.mrb[74].mxu1 %vm665_vm1, %v25259_v14  ;;  %19116 = vrot.lane.b32.xlu1 %v19115_v49, %s20693_s13  ;;  %v20313_v55 = vld [vmem:[%s20987_s26 + $0x100] sm:$0xff]  ;;  %v20314_v49 = vld [vmem:[%s20987_s26 + $0xd0] sm:$0xff] }
 0x3d6   : > { %v7434_v13 = vsel %vm7394_vm15, %v18828_v57, %v18829_v20  ;;  %19111 = vrot.lane.b32.xlu0 %v19110_v19, %s20693_s13  ;;  %v25552_v2 = vpack.i.bf16 %v20313_v55, %v20312_v21  ;;  %14943 = vmatprep.mubr.msk.f32.mxu1 %vm20680_vm2, %v29023_v41  ;;  %v25559_v19 = vpack.i.bf16 %v20314_v49, %v20315_v51  ;;  %v20318_v20 = vld [vmem:[%s20987_s26 + $0xf0] sm:$0xff]  ;;  %v29085_v55 = vunpack.i.h.bf16 %v25282_v45 }
 0x3d7   : > { %15987 = vmatprep.subr.bf16.mxu1 %v15986_v25  ;;  %v7429_v31 = vsel %vm7394_vm15, %v18823_v18, %v18824_v32  ;;  %16006 = vmatpush3.bf16.msra.mxu0 %v16005_v16  ;;  %v18837_v14 = vpop.permute.xlu1 %18836  ;;  %v19135_v23 = vpack.i.bf16 %v25269_v39, %v25567_v36  ;;  %v29083_v16 = vunpack.i.h.bf16 %v25313_v35  ;;  %v25585_v21 = vld [vmem:[%s20987_s26 + $0xb0] sm:$0xff] }
 0x3d8   : > { %15989 = vmatpush1.bf16.msra.mxu1 %v15988_v30  ;;  %v18838_v22 = vunpack.i.l.bf16 %v18837_v14  ;;  %v18832_v34 = vpop.permute.xlu0 %18831  ;;  %7578 = vmatprep.mubr.f32.mxu0 %v29023_v41  ;;  %v16008_v33 = vpack.c.bf16 %v7434_v13, %v7429_v31  ;;  %v20317_v30 = vld [vmem:[%s20987_s26 + $0xc0] sm:$0xff]  ;;  %v18839_v25 = vunpack.i.h.bf16 %v18837_v14  ;;  %v25589_v39 = vpack.i.bf16 %v25585_v21, %v25327_v5 }
 0x3d9   : > { %v18834_v1 = vunpack.i.h.bf16 %v18832_v34  ;;  %v18833_v17 = vunpack.i.l.bf16 %v18832_v34  ;;  %14944 = vmatmul.mubr.msk.f32.gmra.mrb[76].mxu1 %vm665_vm1, %v25305_v58  ;;  %13873 = vmatmul.mubr.msk.f32.gmra.mrb[8].mxu0 %vm665_vm1, %v25548_v7  ;;  %v25573_v60 = vpack.i.bf16 %v20318_v20, %v20317_v30  ;;  %v29086_v31 = vunpack.i.h.bf16 %v25295_v47 }
 0x3da   : > { %v25578_v32 = vsel %vm7394_vm15, %v29083_v16, %v18838_v22  ;;  %v5231_v13 = vpop.f32.mrb[50].mxu1  ;;  %16007 = vmatprep.subr.bf16.mxu0 %v29038_v8  ;;  %19126 = vrot.lane.b32.xlu1 %v25552_v2, %s20693_s13  ;;  %v7428_v58 = vsel %vm7394_vm15, %v18838_v22, %v18823_v18  ;;  %29084 = vst [vmem:[#allocation28_spill] sm:$0xff] %v25589_v39 }
 0x3db   : > { %v7422_v35 = vsel %vm7394_vm15, %v29085_v55, %v18834_v1  ;;  %v7417_v14 = vsel %vm7394_vm15, %v29086_v31, %v18833_v17  ;;  %v25598_v49 = vadd.f32 %v5231_v13, %v25202_v43  ;;  %19121 = vrot.lane.b32.xlu0 %v25559_v19, %s20693_s13  ;;  %16009 = vmatpush3.bf16.msra.mxu0 %v16008_v33  ;;  %v25602_v18 = vpop.permute.xlu1 %18846  ;;  %v14812_v51 = vpop.f32.mrb[51].mxu1  ;;  %v29087_v43 = vunpack.i.l.bf16 %v25465_v24 }
 0x3dc   : > { %v18849_v5 = vunpack.i.h.bf16 %v25602_v18  ;;  %v18848_v45 = vunpack.i.l.bf16 %v25602_v18  ;;  %v25606_v22 = vpop.permute.xlu0 %18841  ;;  %14946 = vmatprep.mubr.msk.f32.mxu1 %vm20680_vm2, %v29023_v41  ;;  %14965 = vmatprep.mubr.msk.f32.mxu0 %vm20680_vm2, %v29023_v41  ;;  %v7423_v34 = vsel %vm7394_vm15, %v18834_v1, %v18813_v52  ;;  %v15992_v16 = vpack.c.bf16 %v7422_v35, %v7417_v14  ;;  %v20320_v51 = vld [vmem:[%s20987_s26 + $0x120] sm:$0xff] }
 0x3dd   : > { %v7418_v47 = vsel %vm7394_vm15, %v18833_v17, %v29087_v43  ;;  %v18844_v33 = vunpack.i.h.bf16 %v25606_v22  ;;  %v18843_v30 = vunpack.i.l.bf16 %v25606_v22  ;;  %14947 = vmatmul.mubr.msk.f32.gmra.mrb[78].mxu1 %vm665_vm1, %v25333_v10  ;;  %v29088_v13 = vunpack.i.h.bf16 %v25347_v40  ;;  %v20321_v43 = vld [vmem:[%s20987_s26 + $0x150] sm:$0xff] }
 0x3de   : > { %v15990_v20 = vpack.c.bf16 %v7423_v34, %v7418_v47  ;;  %v5236_v24 = vpop.f32.mrb[52].mxu1  ;;  %14966 = vmatmul.mubr.msk.f32.vlgmr.msra.gmra.mrb[80].mxu0 %vm665_vm1, %v25408_v61  ;;  %19136 = vrot.lane.b32.xlu1 %v19135_v23, %s20693_s13  ;;  %v7433_v6 = vsel %vm7394_vm15, %v18839_v25, %v18828_v57  ;;  %v7904_v10 = vsel %vm7897_vm0, %v18848_v45, %v18849_v5 }
 0x3df   : > { %v7432_v55 = vsel %vm7394_vm15, %v29088_v13, %v18839_v25  ;;  %v25635_v52 = vadd.f32 %v5236_v24, %v25244_v38  ;;  %19131 = vrot.lane.b32.xlu0 %v25573_v60, %s20693_s13  ;;  %v25639_v40 = vpop.permute.xlu1 %18856  ;;  %v14815_v1 = vpop.f32.mrb[53].mxu1  ;;  %v15994_v17 = vpack.c.bf16 %v7433_v6, %v7428_v58  ;;  %v7899_v42 = vsel %vm7897_vm0, %v18843_v30, %v18844_v33 }
 0x3e0   : > { %15991 = vmatprep.subr.bf16.mxu1 %v15990_v20  ;;  %v18852_v57 = vpop.permute.xlu0 %18851  ;;  %14968 = vmatprep.mubr.msk.f32.mxu0 %vm20680_vm2, %v29023_v41  ;;  %v16010_v38 = vpack.c.bf16 %v7904_v10, %v7899_v42  ;;  %v18859_v35 = vunpack.i.h.bf16 %v25639_v40  ;;  %v18858_v58 = vunpack.i.l.bf16 %v25639_v40  ;;  %v15996_v14 = vpack.c.bf16 %v7432_v55, %v25578_v32 }
 0x3e1   : > { %15993 = vmatpush1.bf16.msra.mxu1 %v15992_v16  ;;  %v18854_v23 = vunpack.i.h.bf16 %v18852_v57  ;;  %v18853_v25 = vunpack.i.l.bf16 %v18852_v57  ;;  %7649 = vmatprep.mubr.f32.mxu1 %v29023_v41  ;;  %v25656_v47 = vpack.i.bf16 %v20321_v43, %v20320_v51  ;;  %v25673_v6 = vpack.i.bf16 %v25337_v59, %v25388_v53 }
 0x3e2   : > { %15995 = vmatprep.subr.bf16.mxu1 %v15994_v17  ;;  %v5241_v31 = vpop.f32.mrb[54].mxu1  ;;  %14969 = vmatmul.mubr.msk.f32.gmra.mrb[82].mxu0 %vm665_vm1, %v25449_v15  ;;  %v25681_v17 = vld [vmem:[%s20987_s26 + $0xe0] sm:$0xff]  ;;  %v7909_v53 = vsel %vm7897_vm0, %v18858_v58, %v18859_v35 }
 0x3e3   : > { %19146 = vrot.lane.b32.xlu1 %v25114_v56, %s20693_s13  ;;  %29089 = vst [vmem:[#allocation22_spill] sm:$0xff] %v25656_v47  ;;  %v7903_v34 = vsel %vm7897_vm0, %v18854_v23, %v18848_v45  ;;  %v7898_v20 = vsel %vm7897_vm0, %v18853_v25, %v18843_v30  ;;  %v25661_v16 = vadd.f32 %v5241_v31, %v25279_v28  ;;  %v18867_v13 = vpop.permute.xlu1 %18866  ;;  %v14818_v56 = vpop.f32.mrb[55].mxu1  ;;  %29090 = vst [vmem:[#allocation19_spill] sm:$0xff] %v25673_v6 }
 0x3e4   : > { %19141 = vrot.lane.b32.xlu0 %v25589_v39, %s20693_s13  ;;  %16011 = vmatprep.subr.bf16.mxu0 %v16010_v38  ;;  %v18869_v32 = vunpack.i.h.bf16 %v18867_v13  ;;  %v18868_v55 = vunpack.i.l.bf16 %v18867_v13  ;;  %v25665_v24 = vpop.permute.xlu0 %18861  ;;  %v16012_v45 = vpack.c.bf16 %v7903_v34, %v7898_v20  ;;  %v25685_v42 = vpack.i.bf16 %v25681_v17, %v25385_v48  ;;  %v25712_v34 = vld [vmem:[%s20987_s26 + $0x168] sm:$0xff] }
 0x3e5   : > { %15997 = vmatpush1.bf16.msra.mxu1 %v15996_v14  ;;  %14971 = vmatprep.mubr.msk.f32.mxu0 %vm20680_vm2, %v29023_v41  ;;  %v18864_v30 = vunpack.i.h.bf16 %v25665_v24  ;;  %v18863_v28 = vunpack.i.l.bf16 %v25665_v24  ;;  %v25716_v20 = vpack.i.bf16 %v25358_v9, %v25712_v34 }
 0x3e6   : > { %v7908_v10 = vsel %vm7897_vm0, %v18868_v55, %v18858_v58  ;;  %v5246_v1 = vpop.f32.mrb[56].mxu1  ;;  %14972 = vmatmul.mubr.msk.f32.gmra.mrb[84].mxu0 %vm665_vm1, %v25476_v26  ;;  %29091 = vst [vmem:[#allocation23_spill] sm:$0xff] %v25685_v42 }
 0x3e7   : > { %19156 = vrot.lane.b32.xlu1 %v25656_v47, %s20693_s13  ;;  %v7913_v57 = vsel %vm7897_vm0, %v18869_v32, %v18863_v28  ;;  %v25692_v38 = vadd.f32 %v5246_v1, %v25323_v50  ;;  %16013 = vmatpush1.bf16.msra.mxu0 %v16012_v45  ;;  %v25696_v23 = vpop.permute.xlu1 %18876  ;;  %v14821_v25 = vpop.f32.mrb[57].mxu1  ;;  %v7914_v48 = vsel %vm7897_vm0, %v18863_v28, %v18864_v30 }
 0x3e8   : > { %19151 = vrot.lane.b32.xlu0 %v25155_v0, %s20693_s13  ;;  %v28940_v31 = vunpack.i.h.bf16 %v25696_v23  ;;  %v18878_v58 = vunpack.i.l.bf16 %v25696_v23  ;;  %v25703_v14 = vpop.permute.xlu0 %18871  ;;  %14974 = vmatprep.mubr.msk.f32.mxu0 %vm20680_vm2, %v29023_v41  ;;  %v16014_v50 = vpack.c.bf16 %v7914_v48, %v7909_v53  ;;  %v16016_v0 = vpack.c.bf16 %v7913_v57, %v7908_v10  ;;  %29092 = vst [vmem:[#allocation24_spill] sm:$0xff] %v25716_v20 }
 0x3e9   : > { %13874 = vmatmul.mubr.msk.f32.vlgmr.msra.gmra.mrb[0].mxu1 %vm665_vm1, %v25408_v61  ;;  %v28939_v51 = vunpack.i.h.bf16 %v25703_v14  ;;  %v18873_v43 = vunpack.i.l.bf16 %v25703_v14  ;;  %v25727_v61 = vld [vmem:[%s20987_s26 + $0x138] sm:$0xff] }
 0x3ea   : > { %7655 = vmatprep.mubr.f32.mxu1 %v29023_v41  ;;  %v7905_v13 = vsel %vm7897_vm0, %v18849_v5, %v18878_v58  ;;  %v5251_v56 = vpop.f32.mrb[58].mxu1  ;;  %14975 = vmatmul.mubr.msk.f32.gmra.mrb[86].mxu0 %vm665_vm1, %v25515_v3  ;;  %v25731_v32 = vpack.i.bf16 %v25367_v54, %v25727_v61  ;;  %v7906_v55 = vsel %vm7897_vm0, %v18878_v58, %v28940_v31 }
 0x3eb   : > { %19166 = vrot.lane.b32.xlu1 %v25673_v6, %s20693_s13  ;;  %v7900_v18 = vsel %vm7897_vm0, %v18844_v33, %v18873_v43  ;;  %v25740_v5 = vadd.f32 %v5251_v56, %v25352_v12  ;;  %16015 = vmatprep.subr.bf16.mxu0 %v16014_v50  ;;  %v25744_v45 = vpop.permute.xlu1 %18886  ;;  %v7901_v28 = vsel %vm7897_vm0, %v18873_v43, %v28939_v51  ;;  %v14824_v10 = vpop.f32.mrb[59].mxu1 }
 0x3ec   : > { %29093 = vst [vmem:[#allocation25_spill] sm:$0xff] %v25731_v32  ;;  %19161 = vrot.lane.b32.xlu0 %v25685_v42, %s20693_s13  ;;  %16017 = vmatpush1.bf16.msra.mxu0 %v16016_v0  ;;  %v18889_v1 = vunpack.i.h.bf16 %v25744_v45  ;;  %v18888_v22 = vunpack.i.l.bf16 %v25744_v45  ;;  %v25751_v33 = vpop.permute.xlu0 %18881  ;;  %v16026_v12 = vpack.c.bf16 %v7906_v55, %v7901_v28  ;;  %v16028_v53 = vpack.c.bf16 %v7905_v13, %v7900_v18  ;;  %v25962_v42 = vld [vmem:[%s20987_s26 + $0x58] sm:$0xff] }
 0x3ed   : > { %14977 = vmatprep.mubr.msk.f32.mxu0 %vm20680_vm2, %v29023_v41  ;;  %v18884_v57 = vunpack.i.h.bf16 %v25751_v33  ;;  %v18883_v25 = vunpack.i.l.bf16 %v25751_v33  ;;  %13875 = vmatmul.mubr.msk.f32.gmra.mrb[2].mxu1 %vm665_vm1, %v25449_v15  ;;  %29099 = vst [vmem:[#allocation30_spill] sm:$0xff] %v25962_v42 }
 0x3ee   : > { %14978 = vmatmul.mubr.msk.f32.gmra.mrb[88].mxu0 %vm665_vm1, %v25548_v7  ;;  %v7924_v48 = vsel %vm7897_vm0, %v18888_v22, %v18889_v1  ;;  %16027 = vmatprep.subr.bf16.mxu1 %v16026_v12 }
 0x3ef   : > { %19176 = vrot.lane.b32.xlu1 %v25716_v20, %s20693_s13  ;;  %v25768_v58 = vpop.permute.xlu1 %18896  ;;  %v7919_v15 = vsel %vm7897_vm0, %v18883_v25, %v18884_v57  ;;  %16029 = vmatpush1.bf16.msra.mxu1 %v16028_v53 }
 0x3f0   : > { %19171 = vrot.lane.b32.xlu0 %v25731_v32, %s20693_s13  ;;  %v18892_v50 = vpop.permute.xlu0 %18891  ;;  %v16018_v0 = vpack.c.bf16 %v7924_v48, %v7919_v15  ;;  %7661 = vmatprep.mubr.f32.mxu1 %v29023_v41  ;;  %v28938_v56 = vunpack.i.h.bf16 %v25768_v58  ;;  %v18898_v55 = vunpack.i.l.bf16 %v25768_v58  ;;  %v20326_v15 = vld [vmem:[%s20987_s26 + $0x90] sm:$0xff] }
 0x3f1   : > { %v18894_v43 = vunpack.i.h.bf16 %v18892_v50  ;;  %v18893_v13 = vunpack.i.l.bf16 %v18892_v50  ;;  %13876 = vmatmul.mubr.msk.f32.gmra.mrb[4].mxu1 %vm665_vm1, %v25476_v26  ;;  %8057 = vmatprep.mubr.f32.mxu0 %v29023_v41 }
 0x3f2   : > { %16019 = vmatprep.subr.bf16.mxu0 %v16018_v0  ;;  %7667 = vmatprep.mubr.f32.mxu1 %v29023_v41  ;;  %v7911_v0 = vsel %vm7897_vm0, %v18898_v55, %v28938_v56 }
 0x3f3   : > { %19186 = vrot.lane.b32.xlu1 %v25413_v46, %s20694_s20  ;;  %v7923_v18 = vsel %vm7897_vm0, %v18894_v43, %v18888_v22  ;;  %v7918_v28 = vsel %vm7897_vm0, %v18893_v13, %v18883_v25  ;;  %v25785_v26 = vpop.permute.xlu1 %18906  ;;  %v7910_v22 = vsel %vm7897_vm0, %v18859_v35, %v18898_v55  ;;  %v20325_v25 = vld [vmem:[%s20987_s26 + $0x60] sm:$0xff] }
 0x3f4   : > { %19181 = vrot.lane.b32.xlu0 %v25432_v37, %s20694_s20  ;;  %v25788_v10 = vpop.permute.xlu0 %18901  ;;  %v16020_v12 = vpack.c.bf16 %v7923_v18, %v7918_v28  ;;  %v25801_v50 = vpack.i.bf16 %v20326_v15, %v20325_v25  ;;  %v18909_v43 = vunpack.i.h.bf16 %v25785_v26 }
 0x3f5   : > { %v28937_v53 = vunpack.i.h.bf16 %v25788_v10  ;;  %v18903_v48 = vunpack.i.l.bf16 %v25788_v10  ;;  %13877 = vmatmul.mubr.msk.f32.gmra.mrb[6].mxu1 %vm665_vm1, %v25515_v3  ;;  %v18908_v3 = vunpack.i.l.bf16 %v25785_v26 }
 0x3f6   : > { %16021 = vmatpush1.bf16.msra.mxu0 %v16020_v12  ;;  %7673 = vmatprep.mubr.f32.mxu1 %v29023_v41 }
 0x3f7   : > { %19196 = vrot.lane.b32.xlu1 %v25453_v4, %s20694_s20  ;;  %v7915_v40 = vsel %vm7897_vm0, %v18864_v30, %v18903_v48  ;;  %v18917_v35 = vpop.permute.xlu1 %18916  ;;  %v7916_v13 = vsel %vm7897_vm0, %v18903_v48, %v28937_v53  ;;  %v19210_v30 = vpack.i.bf16 %v25219_v44, %v25227_v63  ;;  %v25937_v53 = vld [vmem:[%s20987_s26 + $0x118] sm:$0xff] }
 0x3f8   : > { %19191 = vrot.lane.b32.xlu0 %v25462_v29, %s20694_s20  ;;  %v18919_v18 = vunpack.i.h.bf16 %v18917_v35  ;;  %v18918_v55 = vunpack.i.l.bf16 %v18917_v35  ;;  %v18912_v28 = vpop.permute.xlu0 %18911  ;;  %v16030_v12 = vpack.c.bf16 %v7916_v13, %v7911_v0  ;;  %v16032_v25 = vpack.c.bf16 %v7915_v40, %v7910_v22 }
 0x3f9   : > { %v18914_v26 = vunpack.i.h.bf16 %v18912_v28  ;;  %v18913_v15 = vunpack.i.l.bf16 %v18912_v28  ;;  %13878 = vmatmul.mubr.msk.f32.gmra.mrb[8].mxu1 %vm665_vm1, %v25548_v7  ;;  %v7929_v0 = vsel %vm7897_vm0, %v18908_v3, %v18909_v43 }
 0x3fa   : > { %v7928_v24 = vsel %vm7897_vm0, %v18918_v55, %v18908_v3  ;;  %16031 = vmatprep.subr.bf16.mxu1 %v16030_v12  ;;  %8152 = vmatprep.mubr.f32.mxu1 %v29023_v41 }
 0x3fb   : > { %19206 = vrot.lane.b32.xlu1 %v25801_v50, %s20694_s20  ;;  %v7933_v48 = vsel %vm7897_vm0, %v18919_v18, %v18913_v15  ;;  %16033 = vmatpush1.bf16.msra.mxu1 %v16032_v25  ;;  %v25827_v22 = vpop.permute.xlu1 %18926  ;;  %v7934_v7 = vsel %vm7897_vm0, %v18913_v15, %v18914_v26 }
 0x3fc   : > { %19201 = vrot.lane.b32.xlu0 %v25484_v62, %s20694_s20  ;;  %v28936_v40 = vunpack.i.h.bf16 %v25827_v22  ;;  %v18928_v35 = vunpack.i.l.bf16 %v25827_v22  ;;  %v25833_v13 = vpop.permute.xlu0 %18921  ;;  %v16022_v55 = vpack.c.bf16 %v7934_v7, %v7929_v0  ;;  %v16024_v44 = vpack.c.bf16 %v7933_v48, %v7928_v24  ;;  %v25861_v0 = vld [vmem:[#allocation5 + $0x258] sm:$0xff] }
 0x3fd   : > { %v28933_v63 = vunpack.i.h.bf16 %v25833_v13  ;;  %v18923_v18 = vunpack.i.l.bf16 %v25833_v13 }
 0x3fe   : > { %v7925_v3 = vsel %vm7897_vm0, %v18889_v1, %v18928_v35  ;;  %16023 = vmatprep.subr.bf16.mxu0 %v16022_v55  ;;  %v7926_v28 = vsel %vm7897_vm0, %v18928_v35, %v28936_v40  ;;  %v20327_v35 = vld [vmem:[%s20987_s26 + $0x130] sm:$0xff]  ;;  %v20328_v55 = vld [vmem:[%s20987_s26 + $0x128] sm:$0xff] }
 0x3ff   : > { %19216 = vrot.lane.b32.xlu1 %v25559_v19, %s20694_s20  ;;  %v7920_v12 = vsel %vm7897_vm0, %v18884_v57, %v18923_v18  ;;  %16025 = vmatpush1.bf16.msra.mxu0 %v16024_v44  ;;  %v25850_v45 = vpop.permute.xlu1 %18936  ;;  %v7921_v1 = vsel %vm7897_vm0, %v18923_v18, %v28933_v63  ;;  %v25868_v44 = vpack.i.bf16 %v20327_v35, %v20328_v55  ;;  %v25934_v40 = vld [vmem:[%s20987_s26 + $0xe8] sm:$0xff] }
 0x400   : > { %19211 = vrot.lane.b32.xlu0 %v19210_v30, %s20693_s13  ;;  %v28931_v25 = vunpack.i.h.bf16 %v25850_v45  ;;  %v18938_v15 = vunpack.i.l.bf16 %v25850_v45  ;;  %v25857_v24 = vpop.permute.xlu0 %18931  ;;  %v16034_v33 = vpack.c.bf16 %v7926_v28, %v7921_v1  ;;  %v16036_v57 = vpack.c.bf16 %v7925_v3, %v7920_v12 }
 0x401   : > { %v28932_v48 = vunpack.i.h.bf16 %v25857_v24  ;;  %v18933_v30 = vunpack.i.l.bf16 %v25857_v24  ;;  %29094 = vst [vmem:[#allocation26_spill] sm:$0xff] %v25868_v44 }
 0x402   : > { %v7935_v7 = vsel %vm7897_vm0, %v18914_v26, %v18938_v15  ;;  %16035 = vmatprep.subr.bf16.mxu1 %v16034_v33  ;;  %v7936_v18 = vsel %vm7897_vm0, %v18938_v15, %v28931_v25  ;;  %v25879_v26 = vld [vmem:[%s20987_s26 + $0xb8] sm:$0xff]  ;;  %13884 = vmatmul.mubr.msk.f32.vlgmr.msra.gmra.mrb[0].mxu0 %vm665_vm1, %v25861_v0 }
 0x403   : > { %19226 = vrot.lane.b32.xlu1 %v25573_v60, %s20694_s20  ;;  %v7930_v3 = vsel %vm7897_vm0, %v18909_v43, %v18933_v30  ;;  %16037 = vmatpush1.bf16.msra.mxu1 %v16036_v57  ;;  %v25876_v28 = vpop.permute.xlu1 %18946  ;;  %29095 = vst [vmem:[#allocation20_spill] sm:$0xff] %v25879_v26  ;;  %v19230_v12 = vpack.i.bf16 %v25879_v26, %v25272_v11 }
 0x404   : > { %19221 = vrot.lane.b32.xlu0 %v25552_v2, %s20694_s20  ;;  %v7931_v1 = vsel %vm7897_vm0, %v18933_v30, %v28932_v48  ;;  %v28934_v15 = vunpack.i.h.bf16 %v25876_v28  ;;  %v18948_v43 = vunpack.i.l.bf16 %v25876_v28  ;;  %v25888_v33 = vpop.permute.xlu0 %18941  ;;  %v16040_v35 = vpack.c.bf16 %v7935_v7, %v7930_v3  ;;  %8063 = vmatprep.mubr.f32.mxu0 %v29023_v41  ;;  %v25895_v30 = vld [vmem:[#allocation5 + $0x260] sm:$0xff]  ;;  %v20330_v3 = vld [vmem:[%s20987_s26 + $0x158] sm:$0xff] }
 0x405   : > { %v16038_v57 = vpack.c.bf16 %v7936_v18, %v7931_v1  ;;  %v28935_v11 = vunpack.i.h.bf16 %v25888_v33  ;;  %v18943_v55 = vunpack.i.l.bf16 %v25888_v33  ;;  %v20331_v1 = vld [vmem:[%s20987_s26 + $0x160] sm:$0xff] }
 0x406   : > { %v8407_v18 = vsel %vm8400_vm3, %v18948_v43, %v28934_v15  ;;  %v25907_v25 = vpack.i.bf16 %v20331_v1, %v20330_v3  ;;  %13885 = vmatmul.mubr.msk.f32.gmra.mrb[2].mxu0 %vm665_vm1, %v25895_v30  ;;  %v25916_v3 = vld [vmem:[#allocation5 + $0x268] sm:$0xff] }
 0x407   : > { %19236 = vrot.lane.b32.xlu1 %v25868_v44, %s20694_s20  ;;  %16039 = vmatprep.subr.bf16.mxu1 %v16038_v57  ;;  %v25903_v7 = vpop.permute.xlu1 %18956  ;;  %v8402_v48 = vsel %vm8400_vm3, %v18943_v55, %v28935_v11  ;;  %v25927_v11 = vld [vmem:[%s20987_s26 + $0x178] sm:$0xff] }
 0x408   : > { %19231 = vrot.lane.b32.xlu0 %v19230_v12, %s20693_s13  ;;  %16041 = vmatpush1.bf16.msra.mxu1 %v16040_v35  ;;  %29096 = vst [vmem:[#allocation21_spill] sm:$0xff] %v25907_v25  ;;  %v18952_v57 = vpop.permute.xlu0 %18951  ;;  %v16054_v63 = vpack.c.bf16 %v8407_v18, %v8402_v48  ;;  %v25924_v18 = vld [vmem:[%s20987_s26 + $0x148] sm:$0xff] }
 0x409   : > { %16042 = vmatprep.subr.bf16.mxu1 %v29038_v8  ;;  %v18954_v12 = vunpack.i.h.bf16 %v18952_v57  ;;  %v18953_v35 = vunpack.i.l.bf16 %v18952_v57  ;;  %v5734_v15 = vpop.f32.mrb[60].mxu0  ;;  %8069 = vmatprep.mubr.f32.mxu0 %v29023_v41  ;;  %v25931_v57 = vpack.i.bf16 %v25927_v11, %v25924_v18 }
 0x40a   : > { %v25919_v1 = vadd.f32 %v5734_v15, %v25598_v49  ;;  %16055 = vmatprep.subr.bf16.mxu0 %v16054_v63  ;;  %v14843_v48 = vpop.f32.mrb[61].mxu0  ;;  %v25941_v49 = vpack.i.bf16 %v25937_v53, %v25934_v40  ;;  %v18958_v63 = vunpack.i.l.bf16 %v25903_v7  ;;  %13886 = vmatmul.mubr.msk.f32.gmra.mrb[4].mxu0 %vm665_vm1, %v25916_v3 }
 0x40b   : > { %19246 = vrot.lane.b32.xlu1 %v25656_v47, %s20694_s20  ;;  %29097 = vst [vmem:[#allocation27_spill] sm:$0xff] %v25931_v57  ;;  %v8406_v48 = vsel %vm8400_vm3, %v18954_v12, %v18948_v43  ;;  %v8401_v56 = vsel %vm8400_vm3, %v18953_v35, %v18943_v55  ;;  %v18967_v51 = vpop.permute.xlu1 %18966  ;;  %13889 = vmatmul.mubr.msk.f32.vlgmr.msra.gmra.mrb[0].mxu1 %vm665_vm1, %v25861_v0  ;;  %v25959_v35 = vld [vmem:[%s20987_s26 + $0x50] sm:$0xff]  ;;  %v25981_v47 = vld [vmem:[%s20987_s26 + $0x28] sm:$0xff] }
 0x40c   : > { %29098 = vst [vmem:[#allocation29_spill] sm:$0xff] %v25941_v49  ;;  %19241 = vrot.lane.b32.xlu0 %v25907_v25, %s20694_s20  ;;  %v18969_v31 = vunpack.i.h.bf16 %v18967_v51  ;;  %v18968_v32 = vunpack.i.l.bf16 %v18967_v51  ;;  %v25951_v20 = vpop.permute.xlu0 %18961  ;;  %v16056_v15 = vpack.c.bf16 %v8406_v48, %v8401_v56  ;;  %8158 = vmatprep.mubr.f32.mxu1 %v29023_v41  ;;  %v25966_v51 = vpack.i.bf16 %v25962_v42, %v25959_v35  ;;  %v25969_v56 = vld [vmem:[#allocation5 + $0x270] sm:$0xff]  ;;  %v25978_v25 = vld [vmem:[%s20987_s26 + $0x20] sm:$0xff] }
 0x40d   : > { %v18963_v55 = vunpack.i.l.bf16 %v25951_v20  ;;  %v5739_v12 = vpop.f32.mrb[62].mxu0  ;;  %8075 = vmatprep.mubr.f32.mxu0 %v29023_v41  ;;  %29101 = vst [vmem:[#allocation32_spill] sm:$0xff] %v25981_v47  ;;  %v25985_v42 = vpack.i.bf16 %v25981_v47, %v25978_v25 }
 0x40e   : > { %29100 = vst [vmem:[#allocation31_spill] sm:$0xff] %v25966_v51  ;;  %v8411_v48 = vsel %vm8400_vm3, %v18968_v32, %v18958_v63  ;;  %v25973_v6 = vadd.f32 %v5739_v12, %v25635_v52  ;;  %16057 = vmatpush1.bf16.msra.mxu0 %v16056_v15  ;;  %v14846_v43 = vpop.f32.mrb[63].mxu0  ;;  %v29103_v32 = vunpack.i.h.bf16 %v25903_v7 }
 0x40f   : > { %19256 = vrot.lane.b32.xlu1 %v25931_v57, %s20693_s13  ;;  %29102 = vst [vmem:[#allocation33_spill] sm:$0xff] %v25985_v42  ;;  %v8416_v39 = vsel %vm8400_vm3, %v18969_v31, %v18963_v55  ;;  %v25990_v52 = vpop.permute.xlu1 %18976  ;;  %v29104_v43 = vunpack.i.h.bf16 %v25951_v20  ;;  %13890 = vmatmul.mubr.msk.f32.gmra.mrb[2].mxu1 %vm665_vm1, %v25895_v30 }
 0x410   : > { %19251 = vrot.lane.b32.xlu0 %v25941_v49, %s20693_s13  ;;  %v8412_v15 = vsel %vm8400_vm3, %v18958_v63, %v29103_v32  ;;  %v18972_v57 = vpop.permute.xlu0 %18971  ;;  %v16060_v47 = vpack.c.bf16 %v8416_v39, %v8411_v48  ;;  %8164 = vmatprep.mubr.f32.mxu1 %v29023_v41  ;;  %v26004_v32 = vld [vmem:[#allocation5 + $0x278] sm:$0xff]  ;;  %v19275_v48 = vpack.i.bf16 %v25879_v26, %v25585_v21  ;;  %s28810_s13 = scalar_lea.hbm %s28862_s6, %s14067_s28 }
 0x411   : > { %v8417_v12 = vsel %vm8400_vm3, %v18963_v55, %v29104_v43  ;;  %13887 = vmatmul.mubr.msk.f32.gmra.mrb[6].mxu0 %vm665_vm1, %v25969_v56  ;;  %v18974_v49 = vunpack.i.h.bf16 %v18972_v57  ;;  %v18973_v44 = vunpack.i.l.bf16 %v18972_v57  ;;  %v5744_v63 = vpop.f32.mrb[64].mxu0  ;;  %v26017_v43 = vld [vmem:[%s20987_s26 + $0x88] sm:$0xff] }
 0x412   : > { %v16058_v31 = vpack.c.bf16 %v8417_v12, %v8412_v15  ;;  %8081 = vmatprep.mubr.f32.mxu0 %v29023_v41  ;;  %v26007_v55 = vadd.f32 %v5744_v63, %v25661_v16  ;;  %v14849_v39 = vpop.f32.mrb[65].mxu0  ;;  %v26014_v15 = vld [vmem:[%s20987_s26 + $0x80] sm:$0xff]  ;;  %29106 = vst [vmem:[#allocation35_spill] sm:$0xff] %v26017_v43  ;;  %v18978_v16 = vunpack.i.l.bf16 %v25990_v52  ;;  %v29108_v63 = vunpack.i.h.bf16 %v25696_v23 }
 0x413   : > { %19266 = vrot.lane.b32.xlu1 %v25966_v51, %s20694_s20  ;;  %v26021_v57 = vpack.i.bf16 %v26017_v43, %v26014_v15  ;;  %v29109_v39 = vunpack.i.h.bf16 %v25703_v14  ;;  %v18987_v51 = vpop.permute.xlu1 %18986  ;;  %13891 = vmatmul.mubr.msk.f32.gmra.mrb[4].mxu1 %vm665_vm1, %v25916_v3 }
 0x414   : > { %29105 = vst [vmem:[#allocation34_spill] sm:$0xff] %v26007_v55  ;;  %16059 = vmatprep.subr.bf16.mxu0 %v16058_v31  ;;  %v7907_v31 = vsel %vm7897_vm0, %v29108_v63, %v18974_v49  ;;  %19261 = vrot.lane.b32.xlu0 %v25985_v42, %s20694_s20  ;;  %v18989_v26 = vunpack.i.h.bf16 %v18987_v51  ;;  %v18988_v43 = vunpack.i.l.bf16 %v18987_v51  ;;  %v26033_v55 = vpop.permute.xlu0 %18981 }
 0x415   : > { %29107 = vst [vmem:[#allocation36_spill] sm:$0xff] %v26021_v57  ;;  %v7902_v21 = vsel %vm7897_vm0, %v29109_v39, %v18973_v44  ;;  %16061 = vmatpush1.bf16.msra.mxu0 %v16060_v47  ;;  %v18984_v23 = vunpack.i.h.bf16 %v26033_v55  ;;  %v18983_v14 = vunpack.i.l.bf16 %v26033_v55  ;;  %v5749_v44 = vpop.f32.mrb[66].mxu0  ;;  %v19285_v47 = vpack.i.bf16 %v25934_v40, %v25681_v17  ;;  %8170 = vmatprep.mubr.f32.mxu1 %v29023_v41  ;;  %v26054_v39 = vld [vmem:[%s20987_s26 + $0x48] sm:$0xff] }
 0x416   : > { %v16043_v12 = vpack.c.bf16 %v7907_v31, %v7902_v21  ;;  %13888 = vmatmul.mubr.msk.f32.gmra.mrb[8].mxu0 %vm665_vm1, %v26004_v32  ;;  %v8421_v49 = vsel %vm8400_vm3, %v18988_v43, %v18978_v16  ;;  %v26047_v51 = vadd.f32 %v5749_v44, %v25692_v38  ;;  %v14852_v63 = vpop.f32.mrb[67].mxu0  ;;  %v26051_v31 = vld [vmem:[%s20987_s26 + $0x18] sm:$0xff] }
 0x417   : > { %8560 = vmatprep.mubr.f32.mxu0 %v29023_v41  ;;  %19276 = vrot.lane.b32.xlu1 %v19275_v48, %s20694_s20  ;;  %v26058_v17 = vpack.i.bf16 %v26054_v39, %v26051_v31  ;;  %v8426_v40 = vsel %vm8400_vm3, %v18989_v26, %v18983_v14  ;;  %v26063_v38 = vpop.permute.xlu1 %18996  ;;  %v29111_v48 = vunpack.i.h.bf16 %v25990_v52 }
 0x418   : > { %29110 = vst [vmem:[#allocation37_spill] sm:$0xff] %v26047_v51  ;;  %16044 = vmatpush3.bf16.msra.mxu1 %v16043_v12  ;;  %19271 = vrot.lane.b32.xlu0 %v26021_v57, %s20694_s20  ;;  %v8427_v12 = vsel %vm8400_vm3, %v18983_v14, %v18984_v23  ;;  %v18992_v21 = vpop.permute.xlu0 %18991  ;;  %v16064_v63 = vpack.c.bf16 %v8426_v40, %v8421_v49 }
 0x419   : > { %v8422_v43 = vsel %vm8400_vm3, %v18978_v16, %v29111_v48  ;;  %16045 = vmatprep.subr.bf16.mxu1 %v29038_v8  ;;  %13892 = vmatmul.mubr.msk.f32.gmra.mrb[6].mxu1 %vm665_vm1, %v25969_v56  ;;  %v18994_v26 = vunpack.i.h.bf16 %v18992_v21  ;;  %v18993_v57 = vunpack.i.l.bf16 %v18992_v21  ;;  %v5754_v42 = vpop.f32.mrb[68].mxu0  ;;  %v20344_v16 = vld [vmem:[%s20987_s26 + $0xa8] sm:$0xff]  ;;  %v19290_v49 = vpack.i.bf16 %v25937_v53, %v25337_v59 }
 0x41a   : > { %v16062_v44 = vpack.c.bf16 %v8427_v12, %v8422_v43  ;;  %8176 = vmatprep.mubr.f32.mxu1 %v29023_v41  ;;  %v26076_v51 = vadd.f32 %v5754_v42, %v25740_v5  ;;  %v26081_v14 = vpack.i.bf16 %v20344_v16, %v25567_v36  ;;  %v14855_v40 = vpop.f32.mrb[69].mxu0  ;;  %v18999_v48 = vunpack.i.h.bf16 %v26063_v38 }
 0x41b   : > { %19286 = vrot.lane.b32.xlu1 %v19285_v47, %s20694_s20  ;;  %v18998_v43 = vunpack.i.l.bf16 %v26063_v38  ;;  %v29112_v12 = vunpack.i.h.bf16 %v25768_v58  ;;  %v29113_v5 = vunpack.i.h.bf16 %v25788_v10  ;;  %v19007_v21 = vpop.permute.xlu1 %19006 }
 0x41c   : > { %16063 = vmatprep.subr.bf16.mxu0 %v16062_v44  ;;  %19281 = vrot.lane.b32.xlu0 %v26058_v17, %s20694_s20  ;;  %v19009_v44 = vunpack.i.h.bf16 %v19007_v21  ;;  %v19008_v59 = vunpack.i.l.bf16 %v19007_v21  ;;  %v26095_v53 = vpop.permute.xlu0 %19001 }
 0x41d   : > { %v7912_v42 = vsel %vm7897_vm0, %v29112_v12, %v18993_v57  ;;  %v7917_v47 = vsel %vm7897_vm0, %v29113_v5, %v18994_v26  ;;  %16065 = vmatpush1.bf16.msra.mxu0 %v16064_v63  ;;  %13893 = vmatmul.mubr.msk.f32.gmra.mrb[8].mxu1 %vm665_vm1, %v26004_v32  ;;  %v19004_v58 = vunpack.i.h.bf16 %v26095_v53  ;;  %v19003_v57 = vunpack.i.l.bf16 %v26095_v53 }
 0x41e   : > { %v16046_v16 = vpack.c.bf16 %v7917_v47, %v7912_v42  ;;  %14996 = vmatprep.mubr.msk.f32.mxu1 %vm20680_vm2, %v29023_v41  ;;  %v8431_v10 = vsel %vm8400_vm3, %v19008_v59, %v18998_v43  ;;  %v19305_v63 = vpack.i.bf16 %v25927_v11, %v25358_v9  ;;  %v19300_v26 = vpack.i.bf16 %v25924_v18, %v25367_v54 }
 0x41f   : > { %19296 = vrot.lane.b32.xlu1 %v26081_v14, %s20694_s20  ;;  %v8436_v40 = vsel %vm8400_vm3, %v19009_v44, %v19003_v57  ;;  %v19017_v12 = vpop.permute.xlu1 %19016  ;;  %v8432_v42 = vsel %vm8400_vm3, %v18998_v43, %v18999_v48  ;;  %v8437_v5 = vsel %vm8400_vm3, %v19003_v57, %v19004_v58  ;;  %v29114_v43 = vunpack.i.h.bf16 %v25827_v22 }
 0x420   : > { %16047 = vmatpush3.bf16.msra.mxu1 %v16046_v16  ;;  %19291 = vrot.lane.b32.xlu0 %v19290_v49, %s20694_s20  ;;  %v19012_v47 = vpop.permute.xlu0 %19011  ;;  %v16066_v9 = vpack.c.bf16 %v8437_v5, %v8432_v42  ;;  %v16068_v11 = vpack.c.bf16 %v8436_v40, %v8431_v10  ;;  %v19019_v21 = vunpack.i.h.bf16 %v19017_v12  ;;  %v19018_v54 = vunpack.i.l.bf16 %v19017_v12 }
 0x421   : > { %16048 = vmatprep.subr.bf16.mxu1 %v29038_v8  ;;  %v19014_v18 = vunpack.i.h.bf16 %v19012_v47  ;;  %v19013_v44 = vunpack.i.l.bf16 %v19012_v47  ;;  %v26122_v49 = vpack.i.bf16 %v25712_v34, %v25727_v61  ;;  %v29115_v16 = vunpack.i.h.bf16 %v25833_v13  ;;  %v26142_v47 = vld [vmem:[#allocation5 + $0x280] sm:$0xff] }
 0x422   : > { %16067 = vmatprep.subr.bf16.mxu0 %v16066_v9  ;;  %v29116_v61 = vunpack.i.h.bf16 %v25857_v24  ;;  %v29117_v13 = vunpack.i.h.bf16 %v25850_v45 }
 0x423   : > { %19306 = vrot.lane.b32.xlu1 %v19305_v63, %s20694_s20  ;;  %v7927_v59 = vsel %vm7897_vm0, %v29114_v43, %v19014_v18  ;;  %v7922_v57 = vsel %vm7897_vm0, %v29115_v16, %v19013_v44  ;;  %16069 = vmatpush1.bf16.msra.mxu0 %v16068_v11  ;;  %v26131_v10 = vpop.permute.xlu1 %19026  ;;  %v26158_v16 = vld [vmem:[#allocation5 + $0x288] sm:$0xff] }
 0x424   : > { %19301 = vrot.lane.b32.xlu0 %v19300_v26, %s20694_s20  ;;  %v19029_v63 = vunpack.i.h.bf16 %v26131_v10  ;;  %v19028_v40 = vunpack.i.l.bf16 %v26131_v10  ;;  %v19022_v12 = vpop.permute.xlu0 %19021  ;;  %v16049_v34 = vpack.c.bf16 %v7927_v59, %v7922_v57  ;;  %16086 = vmatprep.subr.bf16.mxu0 %v29038_v8  ;;  %v7932_v22 = vsel %vm7897_vm0, %v29116_v61, %v19018_v54 }
 0x425   : > { %v7937_v42 = vsel %vm7897_vm0, %v29117_v13, %v19019_v21  ;;  %v19024_v26 = vunpack.i.h.bf16 %v19022_v12  ;;  %v19023_v5 = vunpack.i.l.bf16 %v19022_v12 }
 0x426   : > { %v8410_v9 = vsel %vm8400_vm3, %v19028_v40, %v19029_v63  ;;  %16050 = vmatpush3.bf16.msra.mxu1 %v16049_v34  ;;  %13899 = vmatmul.mubr.msk.f32.vlgmr.msra.gmra.mrb[0].mxu0 %vm665_vm1, %v26142_v47  ;;  %v16052_v18 = vpack.c.bf16 %v7937_v42, %v7932_v22 }
 0x427   : > { %19316 = vrot.lane.b32.xlu1 %v26122_v49, %s20694_s20  ;;  %v8405_v11 = vsel %vm8400_vm3, %v19023_v5, %v19024_v26  ;;  %v26150_v24 = vpop.permute.xlu1 %19036  ;;  %16051 = vmatprep.subr.bf16.mxu1 %v29038_v8  ;;  %v26176_v26 = vld [vmem:[#allocation5 + $0x290] sm:$0xff] }
 0x428   : > { %19311 = vrot.lane.b32.xlu0 %v25392_v27, %s20694_s20  ;;  %v19039_v45 = vunpack.i.h.bf16 %v26150_v24  ;;  %v19038_v21 = vunpack.i.l.bf16 %v26150_v24  ;;  %v19032_v54 = vpop.permute.xlu0 %19031  ;;  %v16087_v44 = vpack.c.bf16 %v8410_v9, %v8405_v11  ;;  %8566 = vmatprep.mubr.f32.mxu0 %v29023_v41  ;;  %v26184_v9 = vpack.i.bf16 %v25959_v35, %v26054_v39  ;;  %s13509_s20 = scalar_lea.sflag [#allocation4], %s20983_s10 }
 0x429   : > { %v19034_v43 = vunpack.i.h.bf16 %v19032_v54  ;;  %v19033_v59 = vunpack.i.l.bf16 %v19032_v54  ;;  %v26188_v11 = vpack.i.bf16 %v25978_v25, %v26051_v31 }
 0x42a   : > { %v8420_v57 = vsel %vm8400_vm3, %v19038_v21, %v19039_v45  ;;  %16053 = vmatpush3.bf16.msra.mxu1 %v16052_v18  ;;  %16088 = vmatpush3.bf16.msra.mxu0 %v16087_v44  ;;  %v29119_v45 = vunpack.i.h.bf16 %v25888_v33 }
 0x42b   : > { %19326 = vrot.lane.b32.xlu1 %v25413_v46, %s20695_s17  ;;  %v8415_v10 = vsel %vm8400_vm3, %v19033_v59, %v19034_v43  ;;  %v26166_v63 = vpop.permute.xlu1 %19046  ;;  %13900 = vmatmul.mubr.msk.f32.gmra.mrb[2].mxu0 %vm665_vm1, %v26158_v16 }
 0x42c   : > { %19321 = vrot.lane.b32.xlu0 %v25432_v37, %s20695_s17  ;;  %v19042_v12 = vpop.permute.xlu0 %19041  ;;  %16089 = vmatprep.subr.bf16.mxu0 %v29038_v8  ;;  %v16090_v34 = vpack.c.bf16 %v8420_v57, %v8415_v10  ;;  %v19049_v61 = vunpack.i.h.bf16 %v26166_v63  ;;  %v19048_v22 = vunpack.i.l.bf16 %v26166_v63  ;;  %v26213_v57 = vld [vmem:[#allocation5 + $0x298] sm:$0xff] }
 0x42d   : > { %v19044_v13 = vunpack.i.h.bf16 %v19042_v12  ;;  %v19043_v42 = vunpack.i.l.bf16 %v19042_v12  ;;  %14997 = vmatmul.mubr.msk.f32.vlgmr.msra.gmra.mrb[80].mxu1 %vm665_vm1, %v25861_v0  ;;  %8572 = vmatprep.mubr.f32.mxu0 %v29023_v41  ;;  %v29118_v0 = vunpack.i.h.bf16 %v25876_v28  ;;  %v29121_v12 = vunpack.i.h.bf16 %v25951_v20 }
 0x42e   : > { %14999 = vmatprep.mubr.msk.f32.mxu1 %vm20680_vm2, %v29023_v41  ;;  %16091 = vmatpush3.bf16.msra.mxu0 %v16090_v34 }
 0x42f   : > { %19336 = vrot.lane.b32.xlu1 %v25453_v4, %s20695_s17  ;;  %v8408_v24 = vsel %vm8400_vm3, %v29118_v0, %v19044_v13  ;;  %v8403_v54 = vsel %vm8400_vm3, %v29119_v45, %v19043_v42  ;;  %v19057_v18 = vpop.permute.xlu1 %19056  ;;  %v8404_v35 = vsel %vm8400_vm3, %v19043_v42, %v19023_v5  ;;  %13901 = vmatmul.mubr.msk.f32.gmra.mrb[4].mxu0 %vm665_vm1, %v26176_v26 }
 0x430   : > { %19331 = vrot.lane.b32.xlu0 %v25462_v29, %s20695_s17  ;;  %v19059_v39 = vunpack.i.h.bf16 %v19057_v18  ;;  %v19058_v44 = vunpack.i.l.bf16 %v19057_v18  ;;  %v26199_v43 = vpop.permute.xlu0 %19051  ;;  %v8409_v25 = vsel %vm8400_vm3, %v19044_v13, %v19028_v40  ;;  %v16072_v28 = vpack.c.bf16 %v8408_v24, %v8403_v54  ;;  %16092 = vmatprep.subr.bf16.mxu0 %v29038_v8 }
 0x431   : > { %v8425_v29 = vsel %vm8400_vm3, %v19048_v22, %v19049_v61  ;;  %v19054_v33 = vunpack.i.h.bf16 %v26199_v43  ;;  %v19053_v31 = vunpack.i.l.bf16 %v26199_v43  ;;  %15000 = vmatmul.mubr.msk.f32.gmra.mrb[82].mxu1 %vm665_vm1, %v25895_v30  ;;  %v16070_v5 = vpack.c.bf16 %v8409_v25, %v8404_v35  ;;  %8578 = vmatprep.mubr.f32.mxu0 %v29023_v41  ;;  %v26244_v35 = vld [vmem:[#allocation5 + $0x2a0] sm:$0xff] }
 0x432   : > { %v29120_v40 = vunpack.i.h.bf16 %v25903_v7  ;;  %v8418_v34 = vsel %vm8400_vm3, %v29121_v12, %v19059_v39  ;;  %15002 = vmatprep.mubr.msk.f32.mxu1 %vm20680_vm2, %v29023_v41  ;;  %v8414_v30 = vsel %vm8400_vm3, %v19058_v44, %v19033_v59  ;;  %v8419_v20 = vsel %vm8400_vm3, %v19059_v39, %v19038_v21 }
 0x433   : > { %19346 = vrot.lane.b32.xlu1 %v25801_v50, %s20695_s17  ;;  %v8430_v61 = vsel %vm8400_vm3, %v19053_v31, %v19054_v33  ;;  %16071 = vmatprep.subr.bf16.mxu1 %v16070_v5  ;;  %v26231_v7 = vpop.permute.xlu1 %19066  ;;  %v16074_v59 = vpack.c.bf16 %v8419_v20, %v8414_v30  ;;  %v26257_v5 = vpack.i.bf16 %v26014_v15, %v25567_v36 }
 0x434   : > { %v8413_v10 = vsel %vm8400_vm3, %v29120_v40, %v19058_v44  ;;  %19341 = vrot.lane.b32.xlu0 %v25484_v62, %s20695_s17  ;;  %16073 = vmatpush1.bf16.msra.mxu1 %v16072_v28  ;;  %v19069_v42 = vunpack.i.h.bf16 %v26231_v7  ;;  %v19068_v0 = vunpack.i.l.bf16 %v26231_v7  ;;  %v19062_v24 = vpop.permute.xlu0 %19061  ;;  %v16093_v45 = vpack.c.bf16 %v8430_v61, %v8425_v29 }
 0x435   : > { %v16076_v13 = vpack.c.bf16 %v8418_v34, %v8413_v10  ;;  %13902 = vmatmul.mubr.msk.f32.gmra.mrb[6].mxu0 %vm665_vm1, %v26213_v57  ;;  %v19064_v54 = vunpack.i.h.bf16 %v19062_v24  ;;  %v19063_v18 = vunpack.i.l.bf16 %v19062_v24  ;;  %15003 = vmatmul.mubr.msk.f32.gmra.mrb[84].mxu1 %vm665_vm1, %v25916_v3  ;;  %v29122_v34 = vunpack.i.h.bf16 %v25990_v52 }
 0x436   : > { %8584 = vmatprep.mubr.f32.mxu0 %v29023_v41  ;;  %v8440_v21 = vsel %vm8400_vm3, %v19068_v0, %v19069_v42  ;;  %16075 = vmatprep.subr.bf16.mxu1 %v16074_v59 }
 0x437   : > { %19356 = vrot.lane.b32.xlu1 %v26184_v9, %s20695_s17  ;;  %v8435_v39 = vsel %vm8400_vm3, %v19063_v18, %v19064_v54  ;;  %16094 = vmatpush3.bf16.msra.mxu0 %v16093_v45  ;;  %v19077_v44 = vpop.permute.xlu1 %19076 }
 0x438   : > { %19351 = vrot.lane.b32.xlu0 %v26188_v11, %s20695_s17  ;;  %16077 = vmatpush1.bf16.msra.mxu1 %v16076_v13  ;;  %v19078_v25 = vunpack.i.l.bf16 %v19077_v44  ;;  %v19072_v3 = vpop.permute.xlu0 %19071  ;;  %v16096_v28 = vpack.c.bf16 %v8440_v21, %v8435_v39  ;;  %v19079_v40 = vunpack.i.h.bf16 %v19077_v44  ;;  %v29123_v39 = vld [vmem:[#allocation26_spill] sm:$0xff] }
 0x439   : > { %15005 = vmatprep.mubr.msk.f32.mxu1 %vm20680_vm2, %v29023_v41  ;;  %v19074_v29 = vunpack.i.h.bf16 %v19072_v3  ;;  %v19073_v33 = vunpack.i.l.bf16 %v19072_v3  ;;  %13903 = vmatmul.mubr.msk.f32.gmra.mrb[8].mxu0 %vm665_vm1, %v26244_v35 }
 0x43a   : > { %15006 = vmatmul.mubr.msk.f32.gmra.mrb[86].mxu1 %vm665_vm1, %v25969_v56  ;;  %v8433_v10 = vsel %vm8400_vm3, %v18999_v48, %v19078_v25  ;;  %v6237_v12 = vpop.f32.mrb[60].mxu1  ;;  %16095 = vmatprep.subr.bf16.mxu0 %v29038_v8  ;;  %v8434_v56 = vsel %vm8400_vm3, %v19078_v25, %v19063_v18  ;;  %v8438_v24 = vsel %vm8400_vm3, %v19004_v58, %v19079_v40 }
 0x43b   : > { %19366 = vrot.lane.b32.xlu1 %v25552_v2, %s20695_s17  ;;  %v8423_v30 = vsel %vm8400_vm3, %v29122_v34, %v19073_v33  ;;  %v8428_v36 = vsel %vm8400_vm3, %v18984_v23, %v19074_v29  ;;  %v26273_v15 = vadd.f32 %v6237_v12, %v25919_v1  ;;  %16097 = vmatpush3.bf16.msra.mxu0 %v16096_v28  ;;  %v26277_v38 = vpop.permute.xlu1 %19086  ;;  %v14874_v48 = vpop.f32.mrb[61].mxu1  ;;  %v29124_v28 = vld [vmem:[#allocation34_spill] sm:$0xff] }
 0x43c   : > { %19361 = vrot.lane.b32.xlu0 %v25559_v19, %s20695_s17  ;;  %v19089_v61 = vunpack.i.h.bf16 %v26277_v38  ;;  %v19088_v52 = vunpack.i.l.bf16 %v26277_v38  ;;  %v26281_v7 = vpop.permute.xlu0 %19081  ;;  %15008 = vmatprep.mubr.msk.f32.mxu1 %vm20680_vm2, %v29023_v41  ;;  %v8424_v1 = vsel %vm8400_vm3, %v19073_v33, %v19048_v22  ;;  %v8429_v55 = vsel %vm8400_vm3, %v19074_v29, %v19053_v31  ;;  %v29125_v33 = vld [vmem:[#allocation28_spill] sm:$0xff]  ;;  %v29130_v38 = vld [vmem:[#allocation23_spill] sm:$0xff] }
 0x43d   : > { %15027 = vmatprep.mubr.msk.f32.mxu0 %vm20680_vm2, %v29023_v41  ;;  %v19084_v23 = vunpack.i.h.bf16 %v26281_v7  ;;  %v19083_v20 = vunpack.i.l.bf16 %v26281_v7  ;;  %v16078_v13 = vpack.c.bf16 %v8429_v55, %v8424_v1  ;;  %v16080_v42 = vpack.c.bf16 %v8428_v36, %v8423_v30  ;;  %v29126_v55 = vld [vmem:[#allocation22_spill] sm:$0xff] }
 0x43e   : > { %15009 = vmatmul.mubr.msk.f32.gmra.mrb[88].mxu1 %vm665_vm1, %v26004_v32  ;;  %v6242_v63 = vpop.f32.mrb[62].mxu1  ;;  %15028 = vmatmul.mubr.msk.f32.vlgmr.msra.gmra.mrb[90].mxu0 %vm665_vm1, %v26142_v47  ;;  %v8439_v22 = vsel %vm8400_vm3, %v19079_v40, %v19068_v0  ;;  %v8910_v43 = vsel %vm8903_vm4, %v19088_v52, %v19089_v61  ;;  %v16084_v44 = vpack.c.bf16 %v8438_v24, %v8433_v10 }
 0x43f   : > { %19376 = vrot.lane.b32.xlu1 %v26257_v5, %s20695_s17  ;;  %v26309_v32 = vadd.f32 %v6242_v63, %v25973_v6  ;;  %16079 = vmatprep.subr.bf16.mxu1 %v16078_v13  ;;  %v26313_v53 = vpop.permute.xlu1 %19096  ;;  %v14877_v58 = vpop.f32.mrb[63].mxu1  ;;  %v16082_v31 = vpack.c.bf16 %v8439_v22, %v8434_v56  ;;  %v8905_v59 = vsel %vm8903_vm4, %v19083_v20, %v19084_v23  ;;  %v29128_v63 = vld [vmem:[#allocation21_spill] sm:$0xff] }
 0x440   : > { %19371 = vrot.lane.b32.xlu0 %v25573_v60, %s20695_s17  ;;  %16081 = vmatpush1.bf16.msra.mxu1 %v16080_v42  ;;  %v19092_v0 = vpop.permute.xlu0 %19091  ;;  %v16098_v45 = vpack.c.bf16 %v8910_v43, %v8905_v59  ;;  %v19099_v60 = vunpack.i.h.bf16 %v26313_v53  ;;  %v19098_v18 = vunpack.i.l.bf16 %v26313_v53  ;;  %v29127_v42 = vld [vmem:[#allocation37_spill] sm:$0xff] }
 0x441   : > { %15030 = vmatprep.mubr.msk.f32.mxu0 %vm20680_vm2, %v29023_v41  ;;  %v19094_v6 = vunpack.i.h.bf16 %v19092_v0  ;;  %v19093_v54 = vunpack.i.l.bf16 %v19092_v0  ;;  %16083 = vmatprep.subr.bf16.mxu1 %v16082_v31 }
 0x442   : > { %8655 = vmatprep.mubr.f32.mxu1 %v29023_v41  ;;  %v6247_v21 = vpop.f32.mrb[64].mxu1  ;;  %15031 = vmatmul.mubr.msk.f32.gmra.mrb[92].mxu0 %vm665_vm1, %v26158_v16 }
 0x443   : > { %19386 = vrot.lane.b32.xlu1 %v29123_v39, %s20695_s17  ;;  %v8909_v25 = vsel %vm8903_vm4, %v19094_v6, %v19088_v52  ;;  %v8904_v3 = vsel %vm8903_vm4, %v19093_v54, %v19083_v20  ;;  %v26330_v29 = vadd.f32 %v6247_v21, %v29124_v28  ;;  %16099 = vmatprep.subr.bf16.mxu0 %v16098_v45  ;;  %v19107_v40 = vpop.permute.xlu1 %19106  ;;  %v14880_v12 = vpop.f32.mrb[65].mxu1 }
 0x444   : > { %19381 = vrot.lane.b32.xlu0 %v29125_v33, %s20695_s17  ;;  %16085 = vmatpush1.bf16.msra.mxu1 %v16084_v44  ;;  %v19109_v56 = vunpack.i.h.bf16 %v19107_v40  ;;  %v19108_v34 = vunpack.i.l.bf16 %v19107_v40  ;;  %v26334_v30 = vpop.permute.xlu0 %19101  ;;  %v16100_v10 = vpack.c.bf16 %v8909_v25, %v8904_v3  ;;  %v8915_v20 = vsel %vm8903_vm4, %v19098_v18, %v19099_v60  ;;  %v29129_v25 = vld [vmem:[#allocation19_spill] sm:$0xff] }
 0x445   : > { %15033 = vmatprep.mubr.msk.f32.mxu0 %vm20680_vm2, %v29023_v41  ;;  %v19104_v36 = vunpack.i.h.bf16 %v26334_v30  ;;  %v19103_v48 = vunpack.i.l.bf16 %v26334_v30 }
 0x446   : > { %v8914_v52 = vsel %vm8903_vm4, %v19108_v34, %v19098_v18  ;;  %v6252_v1 = vpop.f32.mrb[66].mxu1  ;;  %15034 = vmatmul.mubr.msk.f32.gmra.mrb[94].mxu0 %vm665_vm1, %v26176_v26 }
 0x447   : > { %19396 = vrot.lane.b32.xlu1 %v29126_v55, %s20695_s17  ;;  %v8919_v13 = vsel %vm8903_vm4, %v19109_v56, %v19103_v48  ;;  %v26350_v24 = vadd.f32 %v6252_v1, %v29127_v42  ;;  %16101 = vmatpush1.bf16.msra.mxu0 %v16100_v10  ;;  %v26354_v22 = vpop.permute.xlu1 %19116  ;;  %v14883_v43 = vpop.f32.mrb[67].mxu1  ;;  %v8920_v58 = vsel %vm8903_vm4, %v19103_v48, %v19104_v36  ;;  %v29131_v48 = vld [vmem:[#allocation24_spill] sm:$0xff] }
 0x448   : > { %19391 = vrot.lane.b32.xlu0 %v29128_v63, %s20695_s17  ;;  %v19119_v31 = vunpack.i.h.bf16 %v26354_v22  ;;  %v19118_v59 = vunpack.i.l.bf16 %v26354_v22  ;;  %v26361_v0 = vpop.permute.xlu0 %19111  ;;  %15036 = vmatprep.mubr.msk.f32.mxu0 %vm20680_vm2, %v29023_v41  ;;  %v16102_v45 = vpack.c.bf16 %v8920_v58, %v8915_v20  ;;  %v16104_v6 = vpack.c.bf16 %v8919_v13, %v8914_v52  ;;  %v29132_v52 = vld [vmem:[#allocation25_spill] sm:$0xff] }
 0x449   : > { %13904 = vmatmul.mubr.msk.f32.vlgmr.msra.gmra.mrb[0].mxu1 %vm665_vm1, %v26142_v47  ;;  %v19114_v54 = vunpack.i.h.bf16 %v26361_v0  ;;  %v19113_v18 = vunpack.i.l.bf16 %v26361_v0 }
 0x44a   : > { %8661 = vmatprep.mubr.f32.mxu1 %v29023_v41  ;;  %v8911_v21 = vsel %vm8903_vm4, %v19089_v61, %v19118_v59  ;;  %v6257_v44 = vpop.f32.mrb[68].mxu1  ;;  %15037 = vmatmul.mubr.msk.f32.gmra.mrb[96].mxu0 %vm665_vm1, %v26213_v57  ;;  %v8912_v47 = vsel %vm8903_vm4, %v19118_v59, %v19119_v31 }
 0x44b   : > { %19406 = vrot.lane.b32.xlu1 %v29129_v25, %s20695_s17  ;;  %v8906_v3 = vsel %vm8903_vm4, %v19084_v23, %v19113_v18  ;;  %v26384_v28 = vadd.f32 %v6257_v44, %v26076_v51  ;;  %16103 = vmatprep.subr.bf16.mxu0 %v16102_v45  ;;  %v8907_v61 = vsel %vm8903_vm4, %v19113_v18, %v19114_v54  ;;  %v14886_v33 = vpop.f32.mrb[69].mxu1  ;;  %v20345_v45 = vld [vmem:[%s20987_s26] sm:$0xff] }
 0x44c   : > { %19401 = vrot.lane.b32.xlu0 %v29130_v38, %s20695_s17  ;;  %16105 = vmatpush1.bf16.msra.mxu0 %v16104_v6  ;;  %v26391_v40 = vpop.permute.xlu1 %19126  ;;  %v16114_v7 = vpack.c.bf16 %v8912_v47, %v8907_v61  ;;  %v16116_v23 = vpack.c.bf16 %v8911_v21, %v8906_v3 }
 0x44d   : > { %15039 = vmatprep.mubr.msk.f32.mxu0 %vm20680_vm2, %v29023_v41  ;;  %v19129_v51 = vunpack.i.h.bf16 %v26391_v40  ;;  %v19128_v12 = vunpack.i.l.bf16 %v26391_v40  ;;  %v26397_v56 = vpop.permute.xlu0 %19121  ;;  %13905 = vmatmul.mubr.msk.f32.gmra.mrb[2].mxu1 %vm665_vm1, %v26158_v16 }
 0x44e   : > { %v19124_v34 = vunpack.i.h.bf16 %v26397_v56  ;;  %v19123_v10 = vunpack.i.l.bf16 %v26397_v56  ;;  %15040 = vmatmul.mubr.msk.f32.gmra.mrb[98].mxu0 %vm665_vm1, %v26244_v35  ;;  %16115 = vmatprep.subr.bf16.mxu1 %v16114_v7 }
 0x44f   : > { %19416 = vrot.lane.b32.xlu1 %v29131_v48, %s20695_s17  ;;  %v8930_v1 = vsel %vm8903_vm4, %v19128_v12, %v19129_v51  ;;  %16117 = vmatpush1.bf16.msra.mxu1 %v16116_v23 }
 0x450   : > { %19411 = vrot.lane.b32.xlu0 %v29132_v52, %s20695_s17  ;;  %v26412_v16 = vpop.permute.xlu1 %19136  ;;  %v8925_v55 = vsel %vm8903_vm4, %v19123_v10, %v19124_v34  ;;  %8667 = vmatprep.mubr.f32.mxu1 %v29023_v41 }
 0x451   : > { %v19132_v20 = vpop.permute.xlu0 %19131  ;;  %v16106_v13 = vpack.c.bf16 %v8930_v1, %v8925_v55  ;;  %13906 = vmatmul.mubr.msk.f32.gmra.mrb[4].mxu1 %vm665_vm1, %v26176_v26  ;;  %9063 = vmatprep.mubr.f32.mxu0 %v29023_v41  ;;  %v19139_v58 = vunpack.i.h.bf16 %v26412_v16  ;;  %v19138_v59 = vunpack.i.l.bf16 %v26412_v16  ;;  %v20346_v26 = vld [vmem:[%s20987_s26 + $0x30] sm:$0xff] }
 0x452   : > { %v19134_v42 = vunpack.i.h.bf16 %v19132_v20  ;;  %v19133_v43 = vunpack.i.l.bf16 %v19132_v20  ;;  %8673 = vmatprep.mubr.f32.mxu1 %v29023_v41  ;;  %v26430_v6 = vpack.i.bf16 %v20346_v26, %v20345_v45 }
 0x453   : > { %19426 = vrot.lane.b32.xlu1 %v25413_v46, %s20696_s29  ;;  %16107 = vmatprep.subr.bf16.mxu0 %v16106_v13  ;;  %v8916_v61 = vsel %vm8903_vm4, %v19099_v60, %v19138_v59  ;;  %v29134_v13 = vld [vmem:[#allocation30_spill] sm:$0xff] }
 0x454   : > { %19421 = vrot.lane.b32.xlu0 %v25432_v37, %s20696_s29  ;;  %v8929_v18 = vsel %vm8903_vm4, %v19134_v42, %v19128_v12  ;;  %v8924_v21 = vsel %vm8903_vm4, %v19133_v43, %v19123_v10 }
 0x455   : > { %v26434_v44 = vpop.permute.xlu1 %19146  ;;  %v16108_v47 = vpack.c.bf16 %v8929_v18, %v8924_v21  ;;  %13907 = vmatmul.mubr.msk.f32.gmra.mrb[6].mxu1 %vm665_vm1, %v26213_v57  ;;  %v8917_v57 = vsel %vm8903_vm4, %v19138_v59, %v19139_v58 }
 0x456   : > { %v26436_v25 = vpop.permute.xlu0 %19141  ;;  %8679 = vmatprep.mubr.f32.mxu1 %v29023_v41  ;;  %v19149_v33 = vunpack.i.h.bf16 %v26434_v44  ;;  %v19148_v7 = vunpack.i.l.bf16 %v26434_v44 }
 0x457   : > { %v19144_v3 = vunpack.i.h.bf16 %v26436_v25  ;;  %v19143_v38 = vunpack.i.l.bf16 %v26436_v25  ;;  %19436 = vrot.lane.b32.xlu1 %v25453_v4, %s20696_s29  ;;  %16109 = vmatpush1.bf16.msra.mxu0 %v16108_v47  ;;  %v26709_v25 = vld [vmem:[%s20987_s26 + $0x170] sm:$0xff] }
 0x458   : > { %19431 = vrot.lane.b32.xlu0 %v26430_v6, %s20696_s29 }
 0x459   : > { %v8921_v23 = vsel %vm8903_vm4, %v19104_v36, %v19143_v38  ;;  %v19157_v12 = vpop.permute.xlu1 %19156  ;;  %v8922_v53 = vsel %vm8903_vm4, %v19143_v38, %v19144_v3  ;;  %13908 = vmatmul.mubr.msk.f32.gmra.mrb[8].mxu1 %vm665_vm1, %v26244_v35  ;;  %v29133_v36 = vld [vmem:[#allocation32_spill] sm:$0xff] }
 0x45a   : > { %v19159_v60 = vunpack.i.h.bf16 %v19157_v12  ;;  %v19158_v10 = vunpack.i.l.bf16 %v19157_v12  ;;  %v19152_v48 = vpop.permute.xlu0 %19151  ;;  %v16118_v52 = vpack.c.bf16 %v8922_v53, %v8917_v57  ;;  %v16120_v1 = vpack.c.bf16 %v8921_v23, %v8916_v61  ;;  %9158 = vmatprep.mubr.f32.mxu1 %v29023_v41  ;;  %v20347_v61 = vld [vmem:[%s20987_s26 + $0xc0] sm:$0xff]  ;;  %v20348_v57 = vld [vmem:[%s20987_s26 + $0xf0] sm:$0xff] }
 0x45b   : > { %v19154_v55 = vunpack.i.h.bf16 %v19152_v48  ;;  %v19153_v20 = vunpack.i.l.bf16 %v19152_v48  ;;  %19446 = vrot.lane.b32.xlu1 %v25801_v50, %s20696_s29  ;;  %v19450_v42 = vpack.i.bf16 %v29134_v13, %v29133_v36  ;;  %v8935_v50 = vsel %vm8903_vm4, %v19148_v7, %v19149_v33  ;;  %v29135_v36 = vld [vmem:[#allocation35_spill] sm:$0xff]  ;;  %v29136_v13 = vld [vmem:[#allocation20_spill] sm:$0xff] }
 0x45c   : > { %v8934_v30 = vsel %vm8903_vm4, %v19158_v10, %v19148_v7  ;;  %19441 = vrot.lane.b32.xlu0 %v25484_v62, %s20696_s29  ;;  %16119 = vmatprep.subr.bf16.mxu1 %v16118_v52  ;;  %v26486_v7 = vpack.i.bf16 %v20348_v57, %v20347_v61  ;;  %v26534_v61 = vld [vmem:[#allocation5 + $0x2b0] sm:$0xff] }
 0x45d   : > { %v8939_v35 = vsel %vm8903_vm4, %v19159_v60, %v19153_v20  ;;  %16121 = vmatpush1.bf16.msra.mxu1 %v16120_v1  ;;  %v26472_v43 = vpop.permute.xlu1 %19166  ;;  %v8940_v59 = vsel %vm8903_vm4, %v19153_v20, %v19154_v55  ;;  %v26507_v20 = vld [vmem:[#allocation5 + $0x2a8] sm:$0xff] }
 0x45e   : > { %v28969_v45 = vunpack.i.h.bf16 %v26472_v43  ;;  %v19168_v26 = vunpack.i.l.bf16 %v26472_v43  ;;  %v26478_v18 = vpop.permute.xlu0 %19161  ;;  %v16110_v21 = vpack.c.bf16 %v8940_v59, %v8935_v50  ;;  %v16112_v44 = vpack.c.bf16 %v8939_v35, %v8934_v30 }
 0x45f   : > { %v28966_v47 = vunpack.i.h.bf16 %v26478_v18  ;;  %v19163_v38 = vunpack.i.l.bf16 %v26478_v18  ;;  %19456 = vrot.lane.b32.xlu1 %v25559_v19, %s20696_s29 }
 0x460   : > { %v8931_v23 = vsel %vm8903_vm4, %v19129_v51, %v19168_v26  ;;  %19451 = vrot.lane.b32.xlu0 %v19450_v42, %s20695_s17  ;;  %16111 = vmatprep.subr.bf16.mxu0 %v16110_v21  ;;  %v8932_v12 = vsel %vm8903_vm4, %v19168_v26, %v28969_v45  ;;  %v19470_v42 = vpack.i.bf16 %v29136_v13, %v29135_v36  ;;  %v26557_v36 = vld [vmem:[#allocation5 + $0x2b8] sm:$0xff] }
 0x461   : > { %v8926_v53 = vsel %vm8903_vm4, %v19124_v34, %v19163_v38  ;;  %16113 = vmatpush1.bf16.msra.mxu0 %v16112_v44  ;;  %v26498_v60 = vpop.permute.xlu1 %19176  ;;  %v8927_v40 = vsel %vm8903_vm4, %v19163_v38, %v28966_v47 }
 0x462   : > { %v28964_v51 = vunpack.i.h.bf16 %v26498_v60  ;;  %v19178_v10 = vunpack.i.l.bf16 %v26498_v60  ;;  %v26505_v48 = vpop.permute.xlu0 %19171  ;;  %v16122_v52 = vpack.c.bf16 %v8932_v12, %v8927_v40  ;;  %v16124_v1 = vpack.c.bf16 %v8931_v23, %v8926_v53  ;;  %v20349_v12 = vld [vmem:[%s20987_s26 + $0x120] sm:$0xff]  ;;  %v20350_v53 = vld [vmem:[%s20987_s26 + $0x150] sm:$0xff] }
 0x463   : > { %v28965_v56 = vunpack.i.h.bf16 %v26505_v48  ;;  %v19173_v34 = vunpack.i.l.bf16 %v26505_v48  ;;  %19466 = vrot.lane.b32.xlu1 %v26486_v7, %s20696_s29  ;;  %v26542_v40 = vpack.i.bf16 %v20350_v53, %v20349_v12 }
 0x464   : > { %v8941_v30 = vsel %vm8903_vm4, %v19154_v55, %v19178_v10  ;;  %19461 = vrot.lane.b32.xlu0 %v25552_v2, %s20696_s29  ;;  %16123 = vmatprep.subr.bf16.mxu1 %v16122_v52  ;;  %v8942_v35 = vsel %vm8903_vm4, %v19178_v10, %v28964_v51 }
 0x465   : > { %v8936_v50 = vsel %vm8903_vm4, %v19149_v33, %v19173_v34  ;;  %16125 = vmatpush1.bf16.msra.mxu1 %v16124_v1  ;;  %v26522_v59 = vpop.permute.xlu1 %19186  ;;  %v8937_v55 = vsel %vm8903_vm4, %v19173_v34, %v28965_v56  ;;  %13914 = vmatmul.mubr.msk.f32.vlgmr.msra.gmra.mrb[0].mxu0 %vm665_vm1, %v26507_v20 }
 0x466   : > { %v28963_v26 = vunpack.i.h.bf16 %v26522_v59  ;;  %v19188_v21 = vunpack.i.l.bf16 %v26522_v59  ;;  %v26531_v44 = vpop.permute.xlu0 %19181  ;;  %v16126_v33 = vpack.c.bf16 %v8942_v35, %v8937_v55  ;;  %v16128_v38 = vpack.c.bf16 %v8941_v30, %v8936_v50  ;;  %9069 = vmatprep.mubr.f32.mxu0 %v29023_v41 }
 0x467   : > { %v28962_v57 = vunpack.i.h.bf16 %v26531_v44  ;;  %v19183_v23 = vunpack.i.l.bf16 %v26531_v44  ;;  %19476 = vrot.lane.b32.xlu1 %v29123_v39, %s20696_s29 }
 0x468   : > { %19471 = vrot.lane.b32.xlu0 %v19470_v42, %s20695_s17  ;;  %16127 = vmatprep.subr.bf16.mxu1 %v16126_v33  ;;  %v9413_v10 = vsel %vm9406_vm5, %v19188_v21, %v28963_v26 }
 0x469   : > { %16129 = vmatpush1.bf16.msra.mxu1 %v16128_v38  ;;  %v26548_v52 = vpop.permute.xlu1 %19196  ;;  %v9408_v1 = vsel %vm9406_vm5, %v19183_v23, %v28962_v57  ;;  %13915 = vmatmul.mubr.msk.f32.gmra.mrb[2].mxu0 %vm665_vm1, %v26534_v61  ;;  %v6740_v34 = vpop.f32.mrb[70].mxu0  ;;  %v26614_v57 = vld [vmem:[%s20987_s26 + $0xb8] sm:$0xff] }
 0x46a   : > { %v19192_v39 = vpop.permute.xlu0 %19191  ;;  %v16142_v30 = vpack.c.bf16 %v9413_v10, %v9408_v1  ;;  %16130 = vmatprep.subr.bf16.mxu1 %v29038_v8  ;;  %9075 = vmatprep.mubr.f32.mxu0 %v29023_v41  ;;  %v26560_v35 = vadd.f32 %v6740_v34, %v26273_v15  ;;  %v14905_v50 = vpop.f32.mrb[71].mxu0  ;;  %v28961_v55 = vunpack.i.h.bf16 %v26548_v52  ;;  %v19198_v33 = vunpack.i.l.bf16 %v26548_v52 }
 0x46b   : > { %v19194_v13 = vunpack.i.h.bf16 %v19192_v39  ;;  %v19193_v42 = vunpack.i.l.bf16 %v19192_v39  ;;  %19486 = vrot.lane.b32.xlu1 %v26542_v40, %s20696_s29 }
 0x46c   : > { %19481 = vrot.lane.b32.xlu0 %v29128_v63, %s20696_s29  ;;  %16143 = vmatprep.subr.bf16.mxu0 %v16142_v30 }
 0x46d   : > { %v9412_v38 = vsel %vm9406_vm5, %v19194_v13, %v19188_v21  ;;  %v9407_v12 = vsel %vm9406_vm5, %v19193_v42, %v19183_v23  ;;  %v19207_v53 = vpop.permute.xlu1 %19206  ;;  %13919 = vmatmul.mubr.msk.f32.vlgmr.msra.gmra.mrb[0].mxu1 %vm665_vm1, %v26507_v20  ;;  %13916 = vmatmul.mubr.msk.f32.gmra.mrb[4].mxu0 %vm665_vm1, %v26557_v36  ;;  %v6745_v63 = vpop.f32.mrb[72].mxu0  ;;  %v26578_v21 = vld [vmem:[#allocation5 + $0x2c0] sm:$0xff] }
 0x46e   : > { %v19209_v15 = vunpack.i.h.bf16 %v19207_v53  ;;  %v19208_v10 = vunpack.i.l.bf16 %v19207_v53  ;;  %v26574_v1 = vpop.permute.xlu0 %19201  ;;  %v16144_v39 = vpack.c.bf16 %v9412_v38, %v9407_v12  ;;  %9164 = vmatprep.mubr.f32.mxu1 %v29023_v41  ;;  %9081 = vmatprep.mubr.f32.mxu0 %v29023_v41  ;;  %v26583_v30 = vadd.f32 %v6745_v63, %v26309_v32  ;;  %v29137_v13 = vld [vmem:[#allocation27_spill] sm:$0xff]  ;;  %v14908_v42 = vpop.f32.mrb[73].mxu0  ;;  %v29138_v38 = vld [vmem:[#allocation29_spill] sm:$0xff] }
 0x46f   : > { %v28960_v23 = vunpack.i.h.bf16 %v26574_v1  ;;  %v19203_v34 = vunpack.i.l.bf16 %v26574_v1  ;;  %19496 = vrot.lane.b32.xlu1 %v29137_v13, %s20695_s17  ;;  %v9418_v32 = vsel %vm9406_vm5, %v19198_v33, %v28961_v55  ;;  %v26611_v55 = vld [vmem:[%s20987_s26 + $0xb0] sm:$0xff] }
 0x470   : > { %v9417_v50 = vsel %vm9406_vm5, %v19208_v10, %v19198_v33  ;;  %19491 = vrot.lane.b32.xlu0 %v29138_v38, %s20695_s17  ;;  %16145 = vmatpush1.bf16.msra.mxu0 %v16144_v39  ;;  %s20702_s17 = smov [#allocation13]  }
 0x471   : > { %v9422_v12 = vsel %vm9406_vm5, %v19209_v15, %v19203_v34  ;;  %v26591_v53 = vpop.permute.xlu1 %19216  ;;  %v9423_v63 = vsel %vm9406_vm5, %v19203_v34, %v28960_v23  ;;  %13920 = vmatmul.mubr.msk.f32.gmra.mrb[2].mxu1 %vm665_vm1, %v26534_v61  ;;  %13917 = vmatmul.mubr.msk.f32.gmra.mrb[6].mxu0 %vm665_vm1, %v26578_v21  ;;  %v6750_v15 = vpop.f32.mrb[74].mxu0  ;;  %v29139_v34 = vld [vmem:[#allocation31_spill] sm:$0xff] }
 0x472   : > { %v19212_v10 = vpop.permute.xlu0 %19211  ;;  %v16146_v39 = vpack.c.bf16 %v9423_v63, %v9418_v32  ;;  %v16148_v13 = vpack.c.bf16 %v9422_v12, %v9417_v50  ;;  %9170 = vmatprep.mubr.f32.mxu1 %v29023_v41  ;;  %9087 = vmatprep.mubr.f32.mxu0 %v29023_v41  ;;  %v26606_v38 = vadd.f32 %v6750_v15, %v26330_v29  ;;  %v14911_v23 = vpop.f32.mrb[75].mxu0  ;;  %v26620_v12 = vld [vmem:[#allocation5 + $0x2c8] sm:$0xff]  ;;  %v28968_v29 = vunpack.i.h.bf16 %v26591_v53 }
 0x473   : > { %v19214_v33 = vunpack.i.h.bf16 %v19212_v10  ;;  %v19213_v42 = vunpack.i.l.bf16 %v19212_v10  ;;  %19506 = vrot.lane.b32.xlu1 %v29139_v34, %s20696_s29  ;;  %v26618_v50 = vpack.i.bf16 %v26614_v57, %v26611_v55  ;;  %v29141_v32 = vld [vmem:[#allocation33_spill] sm:$0xff]  ;;  %v19218_v63 = vunpack.i.l.bf16 %v26591_v53 }
 0x474   : > { %19501 = vrot.lane.b32.xlu0 %v29141_v32, %s20696_s29  ;;  %16147 = vmatprep.subr.bf16.mxu0 %v16146_v39 }
 0x475   : > { %29140 = vst [vmem:[#allocation26_spill] sm:$0xff] %v26618_v50  ;;  %v8913_v23 = vsel %vm8903_vm4, %v19119_v31, %v19214_v33  ;;  %v8908_v10 = vsel %vm8903_vm4, %v19114_v54, %v19213_v42  ;;  %16149 = vmatpush1.bf16.msra.mxu0 %v16148_v13  ;;  %v19227_v15 = vpop.permute.xlu1 %19226  ;;  %13921 = vmatmul.mubr.msk.f32.gmra.mrb[4].mxu1 %vm665_vm1, %v26557_v36  ;;  %v6755_v26 = vpop.f32.mrb[76].mxu0  ;;  %v26647_v13 = vld [vmem:[%s20987_s26 + $0xe0] sm:$0xff]  ;;  %v26650_v33 = vld [vmem:[%s20987_s26 + $0xe8] sm:$0xff] }
 0x476   : > { %v19229_v39 = vunpack.i.h.bf16 %v19227_v15  ;;  %v19228_v34 = vunpack.i.l.bf16 %v19227_v15  ;;  %v26634_v32 = vpop.permute.xlu0 %19221  ;;  %v16131_v51 = vpack.c.bf16 %v8913_v23, %v8908_v10  ;;  %9176 = vmatprep.mubr.f32.mxu1 %v29023_v41  ;;  %13918 = vmatmul.mubr.msk.f32.gmra.mrb[8].mxu0 %vm665_vm1, %v26620_v12  ;;  %v26642_v0 = vadd.f32 %v6755_v26, %v26350_v24  ;;  %v14914_v54 = vpop.f32.mrb[77].mxu0  ;;  %29142 = vst [vmem:[#allocation34_spill] sm:$0xff] %v26650_v33  ;;  %v29144_v10 = vld [vmem:[#allocation36_spill] sm:$0xff] }
 0x477   : > { %v28967_v22 = vunpack.i.h.bf16 %v26634_v32  ;;  %v19223_v31 = vunpack.i.l.bf16 %v26634_v32  ;;  %19516 = vrot.lane.b32.xlu1 %v26618_v50, %s20696_s29  ;;  %v26654_v42 = vpack.i.bf16 %v26650_v33, %v26647_v13  ;;  %9566 = vmatprep.mubr.f32.mxu0 %v29023_v41  ;;  %v9428_v15 = vsel %vm9406_vm5, %v19218_v63, %v28968_v29  ;;  %v26684_v29 = vld [vmem:[%s20987_s26 + $0x118] sm:$0xff] }
 0x478   : > { %v9427_v23 = vsel %vm9406_vm5, %v19228_v34, %v19218_v63  ;;  %19511 = vrot.lane.b32.xlu0 %v29144_v10, %s20696_s29  ;;  %16132 = vmatpush3.bf16.msra.mxu1 %v16131_v51  ;;  %29145 = vst [vmem:[#allocation22_spill] sm:$0xff] %v26684_v29 }
 0x479   : > { %29143 = vst [vmem:[#allocation28_spill] sm:$0xff] %v26654_v42  ;;  %v9432_v24 = vsel %vm9406_vm5, %v19229_v39, %v19223_v31  ;;  %v26661_v26 = vpop.permute.xlu1 %19236  ;;  %v9433_v54 = vsel %vm9406_vm5, %v19223_v31, %v28967_v22  ;;  %16133 = vmatprep.subr.bf16.mxu1 %v29038_v8  ;;  %13922 = vmatmul.mubr.msk.f32.gmra.mrb[6].mxu1 %vm665_vm1, %v26578_v21  ;;  %v6760_v34 = vpop.f32.mrb[78].mxu0  ;;  %v26681_v22 = vld [vmem:[%s20987_s26 + $0x110] sm:$0xff] }
 0x47a   : > { %v19232_v51 = vpop.permute.xlu0 %19231  ;;  %v16150_v39 = vpack.c.bf16 %v9433_v54, %v9428_v15  ;;  %v16152_v10 = vpack.c.bf16 %v9432_v24, %v9427_v23  ;;  %9182 = vmatprep.mubr.f32.mxu1 %v29023_v41  ;;  %v26674_v63 = vadd.f32 %v6760_v34, %v26384_v28  ;;  %v14917_v31 = vpop.f32.mrb[79].mxu0  ;;  %v26688_v23 = vpack.i.bf16 %v26684_v29, %v26681_v22 }
 0x47b   : > { %v19234_v56 = vunpack.i.h.bf16 %v19232_v51  ;;  %v19233_v47 = vunpack.i.l.bf16 %v19232_v51  ;;  %19526 = vrot.lane.b32.xlu1 %v26654_v42, %s20696_s29  ;;  %v19239_v28 = vunpack.i.h.bf16 %v26661_v26  ;;  %v19238_v24 = vunpack.i.l.bf16 %v26661_v26 }
 0x47c   : > { %19521 = vrot.lane.b32.xlu0 %v26058_v17, %s20696_s29  ;;  %16151 = vmatprep.subr.bf16.mxu0 %v16150_v39  ;;  %29146 = vst [vmem:[#allocation37_spill] sm:$0xff] %v26688_v23 }
 0x47d   : > { %v8918_v15 = vsel %vm8903_vm4, %v19139_v58, %v19233_v47  ;;  %v8923_v17 = vsel %vm8903_vm4, %v19144_v3, %v19234_v56  ;;  %16153 = vmatpush1.bf16.msra.mxu0 %v16152_v10  ;;  %v19247_v54 = vpop.permute.xlu1 %19246  ;;  %13923 = vmatmul.mubr.msk.f32.gmra.mrb[8].mxu1 %vm665_vm1, %v26620_v12  ;;  %v26712_v3 = vld [vmem:[%s20987_s26 + $0x178] sm:$0xff]  ;;  %v26722_v10 = vld [vmem:[%s20987_s26 + $0x140] sm:$0xff]  ;;  %v9438_v45 = vsel %vm9406_vm5, %v19238_v24, %v19239_v28 }
 0x47e   : > { %v19249_v51 = vunpack.i.h.bf16 %v19247_v54  ;;  %v19248_v34 = vunpack.i.l.bf16 %v19247_v54  ;;  %v26700_v39 = vpop.permute.xlu0 %19241  ;;  %v16134_v31 = vpack.c.bf16 %v8923_v17, %v8918_v15  ;;  %15058 = vmatprep.mubr.msk.f32.mxu1 %vm20680_vm2, %v29023_v41  ;;  %29147 = vst [vmem:[#allocation21_spill] sm:$0xff] %v26712_v3  ;;  %v26716_v47 = vpack.i.bf16 %v26712_v3, %v26709_v25  ;;  %v26725_v15 = vld [vmem:[%s20987_s26 + $0x148] sm:$0xff] }
 0x47f   : > { %v28976_v16 = vunpack.i.h.bf16 %v26700_v39  ;;  %v19243_v58 = vunpack.i.l.bf16 %v26700_v39  ;;  %19536 = vrot.lane.b32.xlu1 %v26081_v14, %s20696_s29  ;;  %v26729_v14 = vpack.i.bf16 %v26725_v15, %v26722_v10 }
 0x480   : > { %v9437_v56 = vsel %vm9406_vm5, %v19248_v34, %v19238_v24  ;;  %19531 = vrot.lane.b32.xlu0 %v26688_v23, %s20696_s29  ;;  %16135 = vmatpush3.bf16.msra.mxu1 %v16134_v31  ;;  %v29148_v24 = vunpack.i.h.bf16 %v26472_v43  ;;  %v29150_v43 = vunpack.i.h.bf16 %v26505_v48 }
 0x481   : > { %v9442_v17 = vsel %vm9406_vm5, %v19249_v51, %v19243_v58  ;;  %v19257_v54 = vpop.permute.xlu1 %19256  ;;  %v9443_v34 = vsel %vm9406_vm5, %v19243_v58, %v28976_v16  ;;  %16136 = vmatprep.subr.bf16.mxu1 %v29038_v8  ;;  %v29149_v58 = vunpack.i.h.bf16 %v26478_v18  ;;  %v26753_v16 = vld [vmem:[#allocation5 + $0x2d0] sm:$0xff]  ;;  %v29151_v18 = vunpack.i.h.bf16 %v26498_v60 }
 0x482   : > { %v19252_v31 = vpop.permute.xlu0 %19251  ;;  %v16154_v23 = vpack.c.bf16 %v9443_v34, %v9438_v45  ;;  %v16156_v42 = vpack.c.bf16 %v9442_v17, %v9437_v56  ;;  %v19259_v50 = vunpack.i.h.bf16 %v19257_v54  ;;  %v19258_v29 = vunpack.i.l.bf16 %v19257_v54 }
 0x483   : > { %v19254_v33 = vunpack.i.h.bf16 %v19252_v31  ;;  %v19253_v3 = vunpack.i.l.bf16 %v19252_v31  ;;  %19546 = vrot.lane.b32.xlu1 %v26716_v47, %s20696_s29 }
 0x484   : > { %19541 = vrot.lane.b32.xlu0 %v26729_v14, %s20696_s29  ;;  %16155 = vmatprep.subr.bf16.mxu0 %v16154_v23 }
 0x485   : > { %v8933_v51 = vsel %vm8903_vm4, %v29148_v24, %v19254_v33  ;;  %v8928_v45 = vsel %vm8903_vm4, %v29149_v58, %v19253_v3  ;;  %16157 = vmatpush1.bf16.msra.mxu0 %v16156_v42  ;;  %v26749_v56 = vpop.permute.xlu1 %19266  ;;  %v8938_v33 = vsel %vm8903_vm4, %v29150_v43, %v19258_v29  ;;  %v8943_v42 = vsel %vm8903_vm4, %v29151_v18, %v19259_v50  ;;  %v20362_v18 = vld [vmem:[%s20987_s26 + $0x90] sm:$0xff] }
 0x486   : > { %v19269_v17 = vunpack.i.h.bf16 %v26749_v56  ;;  %v19268_v54 = vunpack.i.l.bf16 %v26749_v56  ;;  %v19262_v34 = vpop.permute.xlu0 %19261  ;;  %v16137_v31 = vpack.c.bf16 %v8933_v51, %v8928_v45  ;;  %16174 = vmatprep.subr.bf16.mxu0 %v29038_v8  ;;  %v16140_v29 = vpack.c.bf16 %v8943_v42, %v8938_v33  ;;  %v26778_v56 = vld [vmem:[#allocation5 + $0x2d8] sm:$0xff]  ;;  %v20361_v33 = vld [vmem:[%s20987_s26 + $0x60] sm:$0xff] }
 0x487   : > { %v19264_v23 = vunpack.i.h.bf16 %v19262_v34  ;;  %v19263_v3 = vunpack.i.l.bf16 %v19262_v34  ;;  %19556 = vrot.lane.b32.xlu1 %v26122_v49, %s20696_s29  ;;  %v26791_v42 = vpack.i.bf16 %v20362_v18, %v20361_v33  ;;  %v26828_v18 = vld [vmem:[#allocation5 + $0x2e8] sm:$0xff] }
 0x488   : > { %v9416_v24 = vsel %vm9406_vm5, %v19268_v54, %v19269_v17  ;;  %19551 = vrot.lane.b32.xlu0 %v25392_v27, %s20696_s29  ;;  %16138 = vmatpush3.bf16.msra.mxu1 %v16137_v31  ;;  %s20588_s29 = sshll.u32 %s20702_s17, 4  ;;  %s20589_s29 = int_to_ptr.vmem [resolvable:$false] %s20588_s29 }
 0x489   : > { %v9411_v51 = vsel %vm9406_vm5, %v19263_v3, %v19264_v23  ;;  %v26768_v48 = vpop.permute.xlu1 %19276  ;;  %16139 = vmatprep.subr.bf16.mxu1 %v29038_v8  ;;  %13929 = vmatmul.mubr.msk.f32.vlgmr.msra.gmra.mrb[0].mxu0 %vm665_vm1, %v26753_v16 }
 0x48a   : > { %v19279_v60 = vunpack.i.h.bf16 %v26768_v48  ;;  %v19278_v50 = vunpack.i.l.bf16 %v26768_v48  ;;  %v19272_v49 = vpop.permute.xlu0 %19271  ;;  %v16175_v58 = vpack.c.bf16 %v9416_v24, %v9411_v51  ;;  %9572 = vmatprep.mubr.f32.mxu0 %v29023_v41  ;;  %v26799_v48 = vld [vmem:[#allocation5 + $0x2e0] sm:$0xff] }
 0x48b   : > { %v19274_v27 = vunpack.i.h.bf16 %v19272_v49  ;;  %v19273_v45 = vunpack.i.l.bf16 %v19272_v49  ;;  %19566 = vrot.lane.b32.xlu1 %v25413_v46, %s20697_s19 }
 0x48c   : > { %v9426_v17 = vsel %vm9406_vm5, %v19278_v50, %v19279_v60  ;;  %19561 = vrot.lane.b32.xlu0 %v25432_v37, %s20697_s19  ;;  %16141 = vmatpush3.bf16.msra.mxu1 %v16140_v29  ;;  %v29152_v60 = vunpack.i.h.bf16 %v26522_v59  ;;  %v29153_v29 = vunpack.i.h.bf16 %v26531_v44 }
 0x48d   : > { %v9421_v34 = vsel %vm9406_vm5, %v19273_v45, %v19274_v27  ;;  %16176 = vmatpush3.bf16.msra.mxu0 %v16175_v58  ;;  %v26784_v31 = vpop.permute.xlu1 %19286 }
 0x48e   : > { %v19282_v43 = vpop.permute.xlu0 %19281  ;;  %13930 = vmatmul.mubr.msk.f32.gmra.mrb[2].mxu0 %vm665_vm1, %v26778_v56  ;;  %16177 = vmatprep.subr.bf16.mxu0 %v29038_v8  ;;  %v16178_v46 = vpack.c.bf16 %v9426_v17, %v9421_v34  ;;  %v19289_v23 = vunpack.i.h.bf16 %v26784_v31  ;;  %v19288_v37 = vunpack.i.l.bf16 %v26784_v31 }
 0x48f   : > { %v19284_v24 = vunpack.i.h.bf16 %v19282_v43  ;;  %v19283_v51 = vunpack.i.l.bf16 %v19282_v43  ;;  %15059 = vmatmul.mubr.msk.f32.vlgmr.msra.gmra.mrb[90].mxu1 %vm665_vm1, %v26507_v20  ;;  %19576 = vrot.lane.b32.xlu1 %v25453_v4, %s20697_s19 }
 0x490   : > { %19571 = vrot.lane.b32.xlu0 %v26430_v6, %s20697_s19  ;;  %15061 = vmatprep.mubr.msk.f32.mxu1 %vm20680_vm2, %v29023_v41  ;;  %v9431_v44 = vsel %vm9406_vm5, %v19288_v37, %v19289_v23 }
 0x491   : > { %v9414_v49 = vsel %vm9406_vm5, %v29152_v60, %v19284_v24  ;;  %v9409_v58 = vsel %vm9406_vm5, %v29153_v29, %v19283_v51  ;;  %16179 = vmatpush3.bf16.msra.mxu0 %v16178_v46  ;;  %v19297_v20 = vpop.permute.xlu1 %19296  ;;  %9578 = vmatprep.mubr.f32.mxu0 %v29023_v41  ;;  %v9410_v4 = vsel %vm9406_vm5, %v19283_v51, %v19263_v3  ;;  %v29155_v51 = vunpack.i.h.bf16 %v26574_v1 }
 0x492   : > { %v19299_v27 = vunpack.i.h.bf16 %v19297_v20  ;;  %v19298_v17 = vunpack.i.l.bf16 %v19297_v20  ;;  %v26813_v34 = vpop.permute.xlu0 %19291  ;;  %13931 = vmatmul.mubr.msk.f32.gmra.mrb[4].mxu0 %vm665_vm1, %v26799_v48  ;;  %v9415_v59 = vsel %vm9406_vm5, %v19284_v24, %v19268_v54  ;;  %v16160_v43 = vpack.c.bf16 %v9414_v49, %v9409_v58  ;;  %16180 = vmatprep.subr.bf16.mxu0 %v29038_v8 }
 0x493   : > { %v19294_v46 = vunpack.i.h.bf16 %v26813_v34  ;;  %v19293_v3 = vunpack.i.l.bf16 %v26813_v34  ;;  %15062 = vmatmul.mubr.msk.f32.gmra.mrb[92].mxu1 %vm665_vm1, %v26534_v61  ;;  %19586 = vrot.lane.b32.xlu1 %v26791_v42, %s20697_s19  ;;  %v16158_v33 = vpack.c.bf16 %v9415_v59, %v9410_v4  ;;  %v29154_v54 = vunpack.i.h.bf16 %v26548_v52  ;;  %v26910_v34 = vld [vmem:[%s20987_s26 + $0xa8] sm:$0xff] }
 0x494   : > { %v9424_v23 = vsel %vm9406_vm5, %v29155_v51, %v19299_v27  ;;  %19581 = vrot.lane.b32.xlu0 %v25484_v62, %s20697_s19  ;;  %15064 = vmatprep.mubr.msk.f32.mxu1 %vm20680_vm2, %v29023_v41  ;;  %v9420_v61 = vsel %vm9406_vm5, %v19298_v17, %v19273_v45  ;;  %v9425_v1 = vsel %vm9406_vm5, %v19299_v27, %v19278_v50  ;;  %v26855_v27 = vld [vmem:[#allocation5 + $0x2f0] sm:$0xff]  ;;  %v20364_v51 = vld [vmem:[%s20987_s26 + $0x128] sm:$0xff] }
 0x495   : > { %v9419_v24 = vsel %vm9406_vm5, %v29154_v54, %v19298_v17  ;;  %v9436_v60 = vsel %vm9406_vm5, %v19293_v3, %v19294_v46  ;;  %16159 = vmatprep.subr.bf16.mxu1 %v16158_v33  ;;  %v19307_v52 = vpop.permute.xlu1 %19306  ;;  %9584 = vmatprep.mubr.f32.mxu0 %v29023_v41  ;;  %v16162_v20 = vpack.c.bf16 %v9425_v1, %v9420_v61  ;;  %v29156_v61 = vunpack.i.h.bf16 %v26591_v53 }
 0x496   : > { %v16164_v49 = vpack.c.bf16 %v9424_v23, %v9419_v24  ;;  %16161 = vmatpush1.bf16.msra.mxu1 %v16160_v43  ;;  %v19309_v29 = vunpack.i.h.bf16 %v19307_v52  ;;  %v19308_v58 = vunpack.i.l.bf16 %v19307_v52  ;;  %v19302_v62 = vpop.permute.xlu0 %19301  ;;  %13932 = vmatmul.mubr.msk.f32.gmra.mrb[6].mxu0 %vm665_vm1, %v26828_v18  ;;  %v16181_v45 = vpack.c.bf16 %v9436_v60, %v9431_v44  ;;  %v20363_v24 = vld [vmem:[%s20987_s26 + $0x130] sm:$0xff] }
 0x497   : > { %v19304_v4 = vunpack.i.h.bf16 %v19302_v62  ;;  %v19303_v17 = vunpack.i.l.bf16 %v19302_v62  ;;  %15065 = vmatmul.mubr.msk.f32.gmra.mrb[94].mxu1 %vm665_vm1, %v26557_v36  ;;  %19596 = vrot.lane.b32.xlu1 %v26184_v9, %s20697_s19  ;;  %v26871_v23 = vpack.i.bf16 %v20363_v24, %v20364_v51 }
 0x498   : > { %v9446_v50 = vsel %vm9406_vm5, %v19308_v58, %v19309_v29  ;;  %19591 = vrot.lane.b32.xlu0 %v26188_v11, %s20697_s19  ;;  %16163 = vmatprep.subr.bf16.mxu1 %v16162_v20 }
 0x499   : > { %v9441_v59 = vsel %vm9406_vm5, %v19303_v17, %v19304_v4  ;;  %16182 = vmatpush3.bf16.msra.mxu0 %v16181_v45  ;;  %v19317_v43 = vpop.permute.xlu1 %19316  ;;  %15067 = vmatprep.mubr.msk.f32.mxu1 %vm20680_vm2, %v29023_v41 }
 0x49a   : > { %16165 = vmatpush1.bf16.msra.mxu1 %v16164_v49  ;;  %v19318_v36 = vunpack.i.l.bf16 %v19317_v43  ;;  %v19312_v9 = vpop.permute.xlu0 %19311  ;;  %9590 = vmatprep.mubr.f32.mxu0 %v29023_v41  ;;  %v16184_v44 = vpack.c.bf16 %v9446_v50, %v9441_v59  ;;  %v19319_v46 = vunpack.i.h.bf16 %v19317_v43 }
 0x49b   : > { %v19314_v11 = vunpack.i.h.bf16 %v19312_v9  ;;  %v19313_v33 = vunpack.i.l.bf16 %v19312_v9  ;;  %15068 = vmatmul.mubr.msk.f32.gmra.mrb[96].mxu1 %vm665_vm1, %v26578_v21  ;;  %13933 = vmatmul.mubr.msk.f32.gmra.mrb[8].mxu0 %vm665_vm1, %v26855_v27  ;;  %v29157_v21 = vunpack.i.h.bf16 %v26634_v32 }
 0x49c   : > { %16183 = vmatprep.subr.bf16.mxu0 %v29038_v8  ;;  %19606 = vrot.lane.b32.xlu1 %v25552_v2, %s20697_s19  ;;  %v9440_v54 = vsel %vm9406_vm5, %v19318_v36, %v19303_v17  ;;  %v9445_v20 = vsel %vm9406_vm5, %v19319_v46, %v19308_v58  ;;  %v9439_v45 = vsel %vm9406_vm5, %v19239_v28, %v19318_v36  ;;  %v29158_v58 = vunpack.i.h.bf16 %v26700_v39 }
 0x49d   : > { %v9429_v60 = vsel %vm9406_vm5, %v29156_v61, %v19313_v33  ;;  %v9434_v52 = vsel %vm9406_vm5, %v29157_v21, %v19314_v11  ;;  %19601 = vrot.lane.b32.xlu0 %v25559_v19, %s20697_s19  ;;  %16185 = vmatpush3.bf16.msra.mxu0 %v16184_v44  ;;  %v26881_v1 = vpop.permute.xlu1 %19326  ;;  %v9430_v2 = vsel %vm9406_vm5, %v19313_v33, %v19288_v37  ;;  %v20366_v44 = vld [vmem:[%s20987_s26 + $0x158] sm:$0xff] }
 0x49e   : > { %v19329_v53 = vunpack.i.h.bf16 %v26881_v1  ;;  %v19328_v49 = vunpack.i.l.bf16 %v26881_v1  ;;  %v26888_v29 = vpop.permute.xlu0 %19321  ;;  %15070 = vmatprep.mubr.msk.f32.mxu1 %vm20680_vm2, %v29023_v41  ;;  %15089 = vmatprep.mubr.msk.f32.mxu0 %vm20680_vm2, %v29023_v41  ;;  %v9435_v19 = vsel %vm9406_vm5, %v19314_v11, %v19293_v3  ;;  %v16168_v32 = vpack.c.bf16 %v9434_v52, %v9429_v60 }
 0x49f   : > { %v19324_v31 = vunpack.i.h.bf16 %v26888_v29  ;;  %v19323_v37 = vunpack.i.l.bf16 %v26888_v29  ;;  %15071 = vmatmul.mubr.msk.f32.gmra.mrb[98].mxu1 %vm665_vm1, %v26620_v12  ;;  %v16166_v62 = vpack.c.bf16 %v9435_v19, %v9430_v2  ;;  %v19620_v3 = vpack.i.bf16 %v26611_v55, %v26910_v34 }
 0x4a0   : > { %15090 = vmatmul.mubr.msk.f32.vlgmr.msra.gmra.mrb[100].mxu0 %vm665_vm1, %v26753_v16  ;;  %19616 = vrot.lane.b32.xlu1 %v26257_v5, %s20697_s19  ;;  %v9916_v12 = vsel %vm9909_vm6, %v19328_v49, %v19329_v53  ;;  %v9444_v26 = vsel %vm9406_vm5, %v29158_v58, %v19319_v46  ;;  %v7243_v5 = vpop.f32.mrb[70].mxu1  ;;  %v16170_v4 = vpack.c.bf16 %v9445_v20, %v9440_v54  ;;  %v26961_v20 = vld [vmem:[%s20987_s26 + $0x108] sm:$0xff] }
 0x4a1   : > { %19611 = vrot.lane.b32.xlu0 %v26486_v7, %s20697_s19  ;;  %16167 = vmatprep.subr.bf16.mxu1 %v16166_v62  ;;  %v26922_v28 = vpop.permute.xlu1 %19336  ;;  %v9911_v55 = vsel %vm9909_vm6, %v19323_v37, %v19324_v31  ;;  %v26928_v39 = vadd.f32 %v7243_v5, %v26560_v35  ;;  %v14936_v59 = vpop.f32.mrb[71].mxu1  ;;  %v16172_v9 = vpack.c.bf16 %v9444_v26, %v9439_v45  ;;  %v20367_v35 = vld [vmem:[%s20987_s26 + $0x160] sm:$0xff]  ;;  %v26966_v45 = vld [vmem:[%s20987_s26 + $0xd8] sm:$0xff] }
 0x4a2   : > { %16169 = vmatpush1.bf16.msra.mxu1 %v16168_v32  ;;  %v19332_v17 = vpop.permute.xlu0 %19331  ;;  %15092 = vmatprep.mubr.msk.f32.mxu0 %vm20680_vm2, %v29023_v41  ;;  %v16186_v50 = vpack.c.bf16 %v9916_v12, %v9911_v55  ;;  %v26939_v46 = vpack.i.bf16 %v20367_v35, %v20366_v44  ;;  %v19339_v11 = vunpack.i.h.bf16 %v26922_v28  ;;  %v19338_v33 = vunpack.i.l.bf16 %v26922_v28 }
 0x4a3   : > { %v19334_v43 = vunpack.i.h.bf16 %v19332_v17  ;;  %v19333_v36 = vunpack.i.l.bf16 %v19332_v17  ;;  %16171 = vmatprep.subr.bf16.mxu1 %v16170_v4  ;;  %9661 = vmatprep.mubr.f32.mxu1 %v29023_v41 }
 0x4a4   : > { %15093 = vmatmul.mubr.msk.f32.gmra.mrb[102].mxu0 %vm665_vm1, %v26778_v56  ;;  %19626 = vrot.lane.b32.xlu1 %v26871_v23, %s20697_s19  ;;  %v7248_v61 = vpop.f32.mrb[72].mxu1 }
 0x4a5   : > { %v9915_v54 = vsel %vm9909_vm6, %v19334_v43, %v19328_v49  ;;  %v9910_v24 = vsel %vm9909_vm6, %v19333_v36, %v19323_v37  ;;  %19621 = vrot.lane.b32.xlu0 %v19620_v3, %s20697_s19  ;;  %16187 = vmatprep.subr.bf16.mxu0 %v16186_v50  ;;  %v19347_v51 = vpop.permute.xlu1 %19346  ;;  %v26949_v2 = vadd.f32 %v7248_v61, %v26583_v30  ;;  %v14939_v19 = vpop.f32.mrb[73].mxu1 }
 0x4a6   : > { %16173 = vmatpush1.bf16.msra.mxu1 %v16172_v9  ;;  %v19349_v60 = vunpack.i.h.bf16 %v19347_v51  ;;  %v19348_v21 = vunpack.i.l.bf16 %v19347_v51  ;;  %v26946_v52 = vpop.permute.xlu0 %19341  ;;  %15095 = vmatprep.mubr.msk.f32.mxu0 %vm20680_vm2, %v29023_v41  ;;  %v16188_v49 = vpack.c.bf16 %v9915_v54, %v9910_v24  ;;  %v19645_v30 = vpack.i.bf16 %v26681_v22, %v26961_v20  ;;  %v27002_v9 = vld [vmem:[%s20987_s26 + $0x168] sm:$0xff]  ;;  %v20373_v19 = vld [vmem:[%s20987_s26 + $0x40] sm:$0xff] }
 0x4a7   : > { %v19344_v32 = vunpack.i.h.bf16 %v26946_v52  ;;  %v19343_v37 = vunpack.i.l.bf16 %v26946_v52  ;;  %v19640_v3 = vpack.i.bf16 %v26647_v13, %v26966_v45 }
 0x4a8   : > { %v9920_v62 = vsel %vm9909_vm6, %v19348_v21, %v19338_v33  ;;  %15096 = vmatmul.mubr.msk.f32.gmra.mrb[104].mxu0 %vm665_vm1, %v26799_v48  ;;  %19636 = vrot.lane.b32.xlu1 %v26542_v40, %s20697_s19  ;;  %v7253_v26 = vpop.f32.mrb[74].mxu1  ;;  %v9921_v40 = vsel %vm9909_vm6, %v19338_v33, %v19339_v11  ;;  %v27016_v33 = vld [vmem:[%s20987_s26 + $0x138] sm:$0xff] }
 0x4a9   : > { %v9925_v12 = vsel %vm9909_vm6, %v19349_v60, %v19343_v37  ;;  %19631 = vrot.lane.b32.xlu0 %v26939_v46, %s20697_s19  ;;  %16189 = vmatpush1.bf16.msra.mxu0 %v16188_v49  ;;  %v26973_v58 = vpop.permute.xlu1 %19356  ;;  %v9926_v22 = vsel %vm9909_vm6, %v19343_v37, %v19344_v32  ;;  %v26986_v55 = vadd.f32 %v7253_v26, %v26606_v38  ;;  %v14942_v50 = vpop.f32.mrb[75].mxu1 }
 0x4aa   : > { %v19359_v13 = vunpack.i.h.bf16 %v26973_v58  ;;  %v19358_v5 = vunpack.i.l.bf16 %v26973_v58  ;;  %v26983_v4 = vpop.permute.xlu0 %19351  ;;  %15098 = vmatprep.mubr.msk.f32.mxu0 %vm20680_vm2, %v29023_v41  ;;  %v16190_v17 = vpack.c.bf16 %v9926_v22, %v9921_v40  ;;  %13934 = vmatmul.mubr.msk.f32.vlgmr.msra.gmra.mrb[0].mxu1 %vm665_vm1, %v26753_v16  ;;  %v16192_v36 = vpack.c.bf16 %v9925_v12, %v9920_v62  ;;  %v20375_v12 = vld [vmem:[%s20987_s26 + $0x10] sm:$0xff] }
 0x4ab   : > { %v19354_v59 = vunpack.i.h.bf16 %v26983_v4  ;;  %v19353_v43 = vunpack.i.l.bf16 %v26983_v4  ;;  %9667 = vmatprep.mubr.f32.mxu1 %v29023_v41  ;;  %v19655_v16 = vpack.i.bf16 %v26709_v25, %v27002_v9  ;;  %v19650_v54 = vpack.i.bf16 %v26722_v10, %v27016_v33 }
 0x4ac   : > { %v9917_v38 = vsel %vm9909_vm6, %v19329_v53, %v19358_v5  ;;  %15099 = vmatmul.mubr.msk.f32.gmra.mrb[106].mxu0 %vm665_vm1, %v26828_v18  ;;  %19646 = vrot.lane.b32.xlu1 %v19645_v30, %s20697_s19  ;;  %v9918_v44 = vsel %vm9909_vm6, %v19358_v5, %v19359_v13  ;;  %v7258_v35 = vpop.f32.mrb[76].mxu1 }
 0x4ad   : > { %v9912_v1 = vsel %vm9909_vm6, %v19324_v31, %v19353_v43  ;;  %19641 = vrot.lane.b32.xlu0 %v19640_v3, %s20697_s19  ;;  %16191 = vmatprep.subr.bf16.mxu0 %v16190_v17  ;;  %v27013_v53 = vpop.permute.xlu1 %19366  ;;  %v9913_v25 = vsel %vm9909_vm6, %v19353_v43, %v19354_v59  ;;  %v27028_v51 = vadd.f32 %v7258_v35, %v26642_v0  ;;  %v14945_v61 = vpop.f32.mrb[77].mxu1  ;;  %v20372_v0 = vld [vmem:[%s20987_s26 + $0x38] sm:$0xff]  ;;  %v20376_v35 = vld [vmem:[%s20987_s26 + $0x70] sm:$0xff] }
 0x4ae   : > { %16193 = vmatpush1.bf16.msra.mxu0 %v16192_v36  ;;  %v19369_v29 = vunpack.i.h.bf16 %v27013_v53  ;;  %v19368_v31 = vunpack.i.l.bf16 %v27013_v53  ;;  %v27025_v24 = vpop.permute.xlu0 %19361  ;;  %15101 = vmatprep.mubr.msk.f32.mxu0 %vm20680_vm2, %v29023_v41  ;;  %v16202_v10 = vpack.c.bf16 %v9918_v44, %v9913_v25  ;;  %v16204_v49 = vpack.c.bf16 %v9917_v38, %v9912_v1  ;;  %v20384_v53 = vld [vmem:[%s20987_s26 + $0xf8] sm:$0xff] }
 0x4af   : > { %v19364_v60 = vunpack.i.h.bf16 %v27025_v24  ;;  %v19363_v21 = vunpack.i.l.bf16 %v27025_v24  ;;  %13935 = vmatmul.mubr.msk.f32.gmra.mrb[2].mxu1 %vm665_vm1, %v26778_v56  ;;  %v27041_v37 = vpack.i.bf16 %v20373_v19, %v20372_v0  ;;  %v20374_v56 = vld [vmem:[%s20987_s26 + $0x8] sm:$0xff] }
 0x4b0   : > { %15102 = vmatmul.mubr.msk.f32.gmra.mrb[108].mxu0 %vm665_vm1, %v26855_v27  ;;  %19656 = vrot.lane.b32.xlu1 %v19655_v16, %s20697_s19  ;;  %v9936_v62 = vsel %vm9909_vm6, %v19368_v31, %v19369_v29  ;;  %v7263_v3 = vpop.f32.mrb[78].mxu1  ;;  %v27051_v26 = vpack.i.bf16 %v20375_v12, %v20374_v56  ;;  %v20378_v56 = vld [vmem:[%s20987_s26 + $0x98] sm:$0xff]  ;;  %v20379_v12 = vld [vmem:[%s20987_s26 + $0xa0] sm:$0xff] }
 0x4b1   : > { %19651 = vrot.lane.b32.xlu0 %v19650_v54, %s20697_s19  ;;  %16203 = vmatprep.subr.bf16.mxu1 %v16202_v10  ;;  %v27047_v30 = vpop.permute.xlu1 %19376  ;;  %v9931_v40 = vsel %vm9909_vm6, %v19363_v21, %v19364_v60  ;;  %v27057_v5 = vadd.f32 %v7263_v3, %v26674_v63  ;;  %v7746_v17 = vpop.f32.mrb[80].mxu0  ;;  %v20377_v54 = vld [vmem:[%s20987_s26 + $0x68] sm:$0xff] }
 0x4b2   : > { %16205 = vmatpush1.bf16.msra.mxu1 %v16204_v49  ;;  %v19372_v22 = vpop.permute.xlu0 %19371  ;;  %v16194_v50 = vpack.c.bf16 %v9936_v62, %v9931_v40  ;;  %9673 = vmatprep.mubr.f32.mxu1 %v29023_v41  ;;  %v27061_v38 = vadd.f32 %v7746_v17, %v26928_v39  ;;  %v14967_v16 = vpop.f32.mrb[81].mxu0  ;;  %v28986_v63 = vunpack.i.h.bf16 %v27047_v30  ;;  %v19378_v1 = vunpack.i.l.bf16 %v27047_v30 }
 0x4b3   : > { %v19374_v43 = vunpack.i.h.bf16 %v19372_v22  ;;  %v19373_v36 = vunpack.i.l.bf16 %v19372_v22  ;;  %13936 = vmatmul.mubr.msk.f32.gmra.mrb[4].mxu1 %vm665_vm1, %v26799_v48  ;;  %10069 = vmatprep.mubr.f32.mxu0 %v29023_v41  ;;  %v14948_v44 = vpop.f32.mrb[79].mxu1  ;;  %v27072_v39 = vpack.i.bf16 %v20376_v35, %v20377_v54  ;;  %v27097_v40 = vpack.i.bf16 %v20379_v12, %v20378_v56 }
 0x4b4   : > { %19666 = vrot.lane.b32.xlu1 %v27041_v37, %s20698_s30  ;;  %16195 = vmatprep.subr.bf16.mxu0 %v16194_v50  ;;  %v9922_v3 = vsel %vm9909_vm6, %v19339_v11, %v19378_v1 }
 0x4b5   : > { %v9935_v25 = vsel %vm9909_vm6, %v19374_v43, %v19368_v31  ;;  %v9930_v48 = vsel %vm9909_vm6, %v19373_v36, %v19363_v21  ;;  %19661 = vrot.lane.b32.xlu0 %v27051_v26, %s20698_s30  ;;  %v27078_v10 = vpop.permute.xlu1 %19386  ;;  %9679 = vmatprep.mubr.f32.mxu1 %v29023_v41  ;;  %v7751_v49 = vpop.f32.mrb[82].mxu0 }
 0x4b6   : > { %v27081_v61 = vpop.permute.xlu0 %19381  ;;  %v16196_v0 = vpack.c.bf16 %v9935_v25, %v9930_v48  ;;  %v27086_v31 = vadd.f32 %v7751_v49, %v26949_v2  ;;  %v14970_v21 = vpop.f32.mrb[83].mxu0  ;;  %v9923_v2 = vsel %vm9909_vm6, %v19378_v1, %v28986_v63  ;;  %v19389_v22 = vunpack.i.h.bf16 %v27078_v10  ;;  %v20380_v25 = vld [vmem:[%s20987_s26 + $0xd0] sm:$0xff]  ;;  %v20381_v48 = vld [vmem:[%s20987_s26 + $0xc8] sm:$0xff] }
 0x4b7   : > { %v28985_v19 = vunpack.i.h.bf16 %v27081_v61  ;;  %v19383_v62 = vunpack.i.l.bf16 %v27081_v61  ;;  %13937 = vmatmul.mubr.msk.f32.gmra.mrb[6].mxu1 %vm665_vm1, %v26828_v18  ;;  %v19388_v18 = vunpack.i.l.bf16 %v27078_v10  ;;  %v27123_v49 = vpack.i.bf16 %v20380_v25, %v20381_v48  ;;  %v29165_v63 = vld [vmem:[#allocation28_spill] sm:$0xff] }
 0x4b8   : > { %19676 = vrot.lane.b32.xlu1 %v27072_v39, %s20698_s30  ;;  %16197 = vmatpush1.bf16.msra.mxu0 %v16196_v0  ;;  %v27126_v0 = vld [vmem:[%s20987_s26 + $0x28] sm:$0xff] }
 0x4b9   : > { %v9927_v28 = vsel %vm9909_vm6, %v19344_v32, %v19383_v62  ;;  %19671 = vrot.lane.b32.xlu0 %v26430_v6, %s20698_s30  ;;  %v19397_v11 = vpop.permute.xlu1 %19396  ;;  %v9928_v17 = vsel %vm9909_vm6, %v19383_v62, %v28985_v19  ;;  %9685 = vmatprep.mubr.f32.mxu1 %v29023_v41  ;;  %v7756_v52 = vpop.f32.mrb[84].mxu0  ;;  %v27129_v62 = vld [vmem:[%s20987_s26 + $0x58] sm:$0xff] }
 0x4ba   : > { %v19399_v50 = vunpack.i.h.bf16 %v19397_v11  ;;  %v19398_v43 = vunpack.i.l.bf16 %v19397_v11  ;;  %v19392_v36 = vpop.permute.xlu0 %19391  ;;  %v16206_v16 = vpack.c.bf16 %v9928_v17, %v9923_v2  ;;  %v16208_v32 = vpack.c.bf16 %v9927_v28, %v9922_v3  ;;  %v14973_v35 = vpop.f32.mrb[85].mxu0 }
 0x4bb   : > { %v19394_v44 = vunpack.i.h.bf16 %v19392_v36  ;;  %v19393_v1 = vunpack.i.l.bf16 %v19392_v36  ;;  %v27114_v6 = vadd.f32 %v7756_v52, %v26986_v55  ;;  %13938 = vmatmul.mubr.msk.f32.gmra.mrb[8].mxu1 %vm665_vm1, %v26855_v27  ;;  %v27133_v55 = vpack.i.bf16 %v27129_v62, %v27126_v0 }
 0x4bc   : > { %v9940_v54 = vsel %vm9909_vm6, %v19398_v43, %v19388_v18  ;;  %19686 = vrot.lane.b32.xlu1 %v26791_v42, %s20698_s30  ;;  %16207 = vmatprep.subr.bf16.mxu1 %v16206_v16  ;;  %v9941_v3 = vsel %vm9909_vm6, %v19388_v18, %v19389_v22 }
 0x4bd   : > { %29159 = vst [vmem:[#allocation19_spill] sm:$0xff] %v27133_v55  ;;  %v9945_v27 = vsel %vm9909_vm6, %v19399_v50, %v19393_v1  ;;  %19681 = vrot.lane.b32.xlu0 %v27097_v40, %s20698_s30  ;;  %16209 = vmatpush1.bf16.msra.mxu1 %v16208_v32  ;;  %v27138_v21 = vpop.permute.xlu1 %19406  ;;  %v9946_v56 = vsel %vm9909_vm6, %v19393_v1, %v19394_v44  ;;  %v7761_v11 = vpop.f32.mrb[86].mxu0 }
 0x4be   : > { %v28982_v12 = vunpack.i.h.bf16 %v27138_v21  ;;  %v19408_v2 = vunpack.i.l.bf16 %v27138_v21  ;;  %v27146_v28 = vpop.permute.xlu0 %19401  ;;  %v16198_v17 = vpack.c.bf16 %v9946_v56, %v9941_v3  ;;  %v16200_v50 = vpack.c.bf16 %v9945_v27, %v9940_v54  ;;  %10164 = vmatprep.mubr.f32.mxu1 %v29023_v41  ;;  %v14976_v52 = vpop.f32.mrb[87].mxu0 }
 0x4bf   : > { %v28981_v43 = vunpack.i.h.bf16 %v27146_v28  ;;  %v19403_v36 = vunpack.i.l.bf16 %v27146_v28  ;;  %v27152_v18 = vadd.f32 %v7761_v11, %v27028_v51 }
 0x4c0   : > { %v9937_v16 = vsel %vm9909_vm6, %v19369_v29, %v19408_v2  ;;  %19696 = vrot.lane.b32.xlu1 %v27123_v49, %s20698_s30  ;;  %16199 = vmatprep.subr.bf16.mxu0 %v16198_v17  ;;  %v9938_v32 = vsel %vm9909_vm6, %v19408_v2, %v28982_v12  ;;  %v20385_v29 = vld [vmem:[%s20987_s26 + $0x100] sm:$0xff]  ;;  %v27185_v17 = vld [vmem:[#allocation5 + $0x2f8] sm:$0xff] }
 0x4c1   : > { %v9932_v1 = vsel %vm9909_vm6, %v19364_v60, %v19403_v36  ;;  %19691 = vrot.lane.b32.xlu0 %v27133_v55, %s20697_s19  ;;  %16201 = vmatpush1.bf16.msra.mxu0 %v16200_v50  ;;  %v27167_v51 = vpop.permute.xlu1 %19416  ;;  %v27171_v35 = vpack.i.bf16 %v20385_v29, %v20384_v53  ;;  %v9933_v54 = vsel %vm9909_vm6, %v19403_v36, %v28981_v43  ;;  %v7766_v60 = vpop.f32.mrb[88].mxu0 }
 0x4c2   : > { %v28979_v25 = vunpack.i.h.bf16 %v27167_v51  ;;  %v19418_v24 = vunpack.i.l.bf16 %v27167_v51  ;;  %v27178_v48 = vpop.permute.xlu0 %19411  ;;  %v16210_v27 = vpack.c.bf16 %v9938_v32, %v9933_v54  ;;  %v16212_v3 = vpack.c.bf16 %v9937_v16, %v9932_v1  ;;  %v14979_v50 = vpop.f32.mrb[89].mxu0  ;;  %v27201_v32 = vld [vmem:[%s20987_s26 + $0x88] sm:$0xff] }
 0x4c3   : > { %v28980_v56 = vunpack.i.h.bf16 %v27178_v48  ;;  %v19413_v2 = vunpack.i.l.bf16 %v27178_v48  ;;  %v27183_v11 = vadd.f32 %v7766_v60, %v27057_v5  ;;  %29160 = vst [vmem:[#allocation23_spill] sm:$0xff] %v27201_v32  ;;  %v20387_v60 = vld [vmem:[%s20987_s26 + $0x120] sm:$0xff] }
 0x4c4   : > { %v9947_v36 = vsel %vm9909_vm6, %v19394_v44, %v19418_v24  ;;  %19706 = vrot.lane.b32.xlu1 %v26486_v7, %s20698_s30  ;;  %16211 = vmatprep.subr.bf16.mxu1 %v16210_v27  ;;  %v9948_v52 = vsel %vm9909_vm6, %v19418_v24, %v28979_v25  ;;  %v19710_v7 = vpack.i.bf16 %v26614_v57, %v27201_v32  ;;  %v27217_v24 = vld [vmem:[#allocation5 + $0x300] sm:$0xff]  ;;  %v20388_v27 = vld [vmem:[%s20987_s26 + $0x150] sm:$0xff] }
 0x4c5   : > { %v9942_v16 = vsel %vm9909_vm6, %v19389_v22, %v19413_v2  ;;  %19701 = vrot.lane.b32.xlu0 %v27171_v35, %s20698_s30  ;;  %16213 = vmatpush1.bf16.msra.mxu1 %v16212_v3  ;;  %v27198_v5 = vpop.permute.xlu1 %19426  ;;  %v9943_v44 = vsel %vm9909_vm6, %v19413_v2, %v28980_v56  ;;  %v27223_v3 = vpack.i.bf16 %v20388_v27, %v20387_v60  ;;  %v27238_v60 = vld [vmem:[#allocation5 + $0x308] sm:$0xff]  ;;  %v29162_v27 = vld [vmem:[#allocation34_spill] sm:$0xff] }
 0x4c6   : > { %v28978_v10 = vunpack.i.h.bf16 %v27198_v5  ;;  %v19428_v22 = vunpack.i.l.bf16 %v27198_v5  ;;  %v27210_v1 = vpop.permute.xlu0 %19421  ;;  %v16214_v53 = vpack.c.bf16 %v9948_v52, %v9943_v44  ;;  %v16216_v29 = vpack.c.bf16 %v9947_v36, %v9942_v16  ;;  %13944 = vmatmul.mubr.msk.f32.vlgmr.msra.gmra.mrb[0].mxu0 %vm665_vm1, %v27185_v17 }
 0x4c7   : > { %v28977_v54 = vunpack.i.h.bf16 %v27210_v1  ;;  %v19423_v57 = vunpack.i.l.bf16 %v27210_v1  ;;  %10075 = vmatprep.mubr.f32.mxu0 %v29023_v41 }
 0x4c8   : > { %19716 = vrot.lane.b32.xlu1 %v26871_v23, %s20698_s30  ;;  %16215 = vmatprep.subr.bf16.mxu1 %v16214_v53  ;;  %v10419_v2 = vsel %vm10412_vm7, %v19428_v22, %v28978_v10 }
 0x4c9   : > { %19711 = vrot.lane.b32.xlu0 %v19710_v7, %s20697_s19  ;;  %16217 = vmatpush1.bf16.msra.mxu1 %v16216_v29  ;;  %v27229_v50 = vpop.permute.xlu1 %19436  ;;  %v10414_v36 = vsel %vm10412_vm7, %v19423_v57, %v28977_v54  ;;  %v29161_v7 = vld [vmem:[#allocation21_spill] sm:$0xff] }
 0x4ca   : > { %v19432_v52 = vpop.permute.xlu0 %19431  ;;  %v16230_v16 = vpack.c.bf16 %v10419_v2, %v10414_v36  ;;  %16218 = vmatprep.subr.bf16.mxu1 %v29038_v8  ;;  %13945 = vmatmul.mubr.msk.f32.gmra.mrb[2].mxu0 %vm665_vm1, %v27217_v24  ;;  %v19735_v29 = vpack.i.bf16 %v29161_v7, %v26725_v15  ;;  %v29163_v2 = vld [vmem:[#allocation22_spill] sm:$0xff]  ;;  %v28984_v54 = vunpack.i.h.bf16 %v27229_v50  ;;  %v19438_v10 = vunpack.i.l.bf16 %v27229_v50 }
 0x4cb   : > { %v19434_v44 = vunpack.i.h.bf16 %v19432_v52  ;;  %v19433_v53 = vunpack.i.l.bf16 %v19432_v52  ;;  %10081 = vmatprep.mubr.f32.mxu0 %v29023_v41  ;;  %v19730_v36 = vpack.i.bf16 %v29163_v2, %v29162_v27  ;;  %v27272_v2 = vld [vmem:[%s20987_s26 + $0x20] sm:$0xff] }
 0x4cc   : > { %19726 = vrot.lane.b32.xlu1 %v27223_v3, %s20698_s30  ;;  %16231 = vmatprep.subr.bf16.mxu0 %v16230_v16 }
 0x4cd   : > { %v10418_v52 = vsel %vm10412_vm7, %v19434_v44, %v19428_v22  ;;  %v10413_v25 = vsel %vm10412_vm7, %v19433_v53, %v19423_v57  ;;  %19721 = vrot.lane.b32.xlu0 %v26939_v46, %s20698_s30  ;;  %v19447_v56 = vpop.permute.xlu1 %19446  ;;  %13949 = vmatmul.mubr.msk.f32.vlgmr.msra.gmra.mrb[0].mxu1 %vm665_vm1, %v27185_v17  ;;  %v27262_v44 = vld [vmem:[#allocation5 + $0x310] sm:$0xff] }
 0x4ce   : > { %v19449_v15 = vunpack.i.h.bf16 %v19447_v56  ;;  %v19448_v16 = vunpack.i.l.bf16 %v19447_v56  ;;  %v27254_v7 = vpop.permute.xlu0 %19441  ;;  %v16232_v27 = vpack.c.bf16 %v10418_v52, %v10413_v25  ;;  %10170 = vmatprep.mubr.f32.mxu1 %v29023_v41  ;;  %13946 = vmatmul.mubr.msk.f32.gmra.mrb[4].mxu0 %vm665_vm1, %v27238_v60  ;;  %v27267_v56 = vld [vmem:[%s20987_s26 + $0x50] sm:$0xff]  ;;  %v19740_v52 = vpack.i.bf16 %v27126_v0, %v27272_v2 }
 0x4cf   : > { %v28983_v22 = vunpack.i.h.bf16 %v27254_v7  ;;  %v19443_v57 = vunpack.i.l.bf16 %v27254_v7  ;;  %10087 = vmatprep.mubr.f32.mxu0 %v29023_v41  ;;  %v19745_v25 = vpack.i.bf16 %v27129_v62, %v27267_v56 }
 0x4d0   : > { %v10423_v53 = vsel %vm10412_vm7, %v19448_v16, %v19438_v10  ;;  %19736 = vrot.lane.b32.xlu1 %v19735_v29, %s20697_s19  ;;  %16233 = vmatpush1.bf16.msra.mxu0 %v16232_v27  ;;  %v10424_v29 = vsel %vm10412_vm7, %v19438_v10, %v28984_v54  ;;  %v27292_v10 = vld [vmem:[#allocation5 + $0x318] sm:$0xff] }
 0x4d1   : > { %v10428_v43 = vsel %vm10412_vm7, %v19449_v15, %v19443_v57  ;;  %19731 = vrot.lane.b32.xlu0 %v19730_v36, %s20697_s19  ;;  %v27278_v12 = vpop.permute.xlu1 %19456  ;;  %v10429_v62 = vsel %vm10412_vm7, %v19443_v57, %v28983_v22  ;;  %13950 = vmatmul.mubr.msk.f32.gmra.mrb[2].mxu1 %vm665_vm1, %v27217_v24  ;;  %v27296_v57 = vld [vmem:[%s20987_s26 + $0x80] sm:$0xff]  ;;  %s20590_s19 = scalar_lea.vmem %s20589_s29, 512 }
 0x4d2   : > { %v19452_v16 = vpop.permute.xlu0 %19451  ;;  %v16234_v0 = vpack.c.bf16 %v10429_v62, %v10424_v29  ;;  %v16236_v27 = vpack.c.bf16 %v10428_v43, %v10423_v53  ;;  %10176 = vmatprep.mubr.f32.mxu1 %v29023_v41  ;;  %13947 = vmatmul.mubr.msk.f32.gmra.mrb[6].mxu0 %vm665_vm1, %v27262_v44  ;;  %v19750_v29 = vpack.i.bf16 %v27201_v32, %v27296_v57  ;;  %v28988_v43 = vunpack.i.h.bf16 %v27278_v12 }
 0x4d3   : > { %v19454_v36 = vunpack.i.h.bf16 %v19452_v16  ;;  %v19453_v15 = vunpack.i.l.bf16 %v19452_v16  ;;  %10093 = vmatprep.mubr.f32.mxu0 %v29023_v41  ;;  %v19458_v53 = vunpack.i.l.bf16 %v27278_v12 }
 0x4d4   : > { %19746 = vrot.lane.b32.xlu1 %v19745_v25, %s20698_s30  ;;  %16235 = vmatprep.subr.bf16.mxu0 %v16234_v0 }
 0x4d5   : > { %v9919_v62 = vsel %vm9909_vm6, %v19359_v13, %v19454_v36  ;;  %v9914_v16 = vsel %vm9909_vm6, %v19354_v59, %v19453_v15  ;;  %19741 = vrot.lane.b32.xlu0 %v19740_v52, %s20698_s30  ;;  %16237 = vmatpush1.bf16.msra.mxu0 %v16236_v27  ;;  %v19467_v25 = vpop.permute.xlu1 %19466  ;;  %v29164_v59 = vld [vmem:[#allocation26_spill] sm:$0xff]  ;;  %v27326_v27 = vld [vmem:[%s20987_s26 + $0x48] sm:$0xff] }
 0x4d6   : > { %v19469_v0 = vunpack.i.h.bf16 %v19467_v25  ;;  %v19468_v22 = vunpack.i.l.bf16 %v19467_v25  ;;  %v27309_v54 = vpop.permute.xlu0 %19461  ;;  %v16219_v19 = vpack.c.bf16 %v9919_v62, %v9914_v16  ;;  %13951 = vmatmul.mubr.msk.f32.gmra.mrb[4].mxu1 %vm665_vm1, %v27238_v60  ;;  %13948 = vmatmul.mubr.msk.f32.gmra.mrb[8].mxu0 %vm665_vm1, %v27292_v10  ;;  %v27323_v52 = vld [vmem:[%s20987_s26 + $0x18] sm:$0xff] }
 0x4d7   : > { %v28987_v58 = vunpack.i.h.bf16 %v27309_v54  ;;  %v19463_v13 = vunpack.i.l.bf16 %v27309_v54  ;;  %10182 = vmatprep.mubr.f32.mxu1 %v29023_v41  ;;  %10572 = vmatprep.mubr.f32.mxu0 %v29023_v41  ;;  %v19760_v36 = vpack.i.bf16 %v27326_v27, %v27323_v52 }
 0x4d8   : > { %v10433_v4 = vsel %vm10412_vm7, %v19468_v22, %v19458_v53  ;;  %19756 = vrot.lane.b32.xlu1 %v29164_v59, %s20698_s30  ;;  %16220 = vmatpush3.bf16.msra.mxu1 %v16219_v19  ;;  %v10434_v22 = vsel %vm10412_vm7, %v19458_v53, %v28988_v43  ;;  %v27347_v53 = vld [vmem:[%s20987_s26 + $0x78] sm:$0xff] }
 0x4d9   : > { %v10438_v15 = vsel %vm10412_vm7, %v19469_v0, %v19463_v13  ;;  %19751 = vrot.lane.b32.xlu0 %v19750_v29, %s20698_s30  ;;  %v27332_v62 = vpop.permute.xlu1 %19476  ;;  %v10439_v19 = vsel %vm10412_vm7, %v19463_v13, %v28987_v58  ;;  %16221 = vmatprep.subr.bf16.mxu1 %v29038_v8  ;;  %v19775_v13 = vpack.i.bf16 %v26910_v34, %v27347_v53 }
 0x4da   : > { %v19472_v16 = vpop.permute.xlu0 %19471  ;;  %v16238_v25 = vpack.c.bf16 %v10439_v19, %v10434_v22  ;;  %v16240_v59 = vpack.c.bf16 %v10438_v15, %v10433_v4  ;;  %13952 = vmatmul.mubr.msk.f32.gmra.mrb[6].mxu1 %vm665_vm1, %v27262_v44  ;;  %v28992_v58 = vunpack.i.h.bf16 %v27332_v62  ;;  %v19478_v4 = vunpack.i.l.bf16 %v27332_v62 }
 0x4db   : > { %v19474_v0 = vunpack.i.h.bf16 %v19472_v16  ;;  %v19473_v29 = vunpack.i.l.bf16 %v19472_v16  ;;  %10188 = vmatprep.mubr.f32.mxu1 %v29023_v41  ;;  %v29166_v15 = vunpack.i.h.bf16 %v27047_v30  ;;  %v29167_v19 = vunpack.i.h.bf16 %v27081_v61 }
 0x4dc   : > { %19766 = vrot.lane.b32.xlu1 %v29165_v63, %s20698_s30  ;;  %16239 = vmatprep.subr.bf16.mxu0 %v16238_v25 }
 0x4dd   : > { %v9924_v22 = vsel %vm9909_vm6, %v29166_v15, %v19473_v29  ;;  %v9929_v16 = vsel %vm9909_vm6, %v29167_v19, %v19474_v0  ;;  %19761 = vrot.lane.b32.xlu0 %v19760_v36, %s20698_s30  ;;  %16241 = vmatpush1.bf16.msra.mxu0 %v16240_v59  ;;  %v19487_v63 = vpop.permute.xlu1 %19486  ;;  %v29168_v59 = vld [vmem:[#allocation37_spill] sm:$0xff]  ;;  %v10444_v15 = vsel %vm10412_vm7, %v19478_v4, %v28992_v58 }
 0x4de   : > { %v19489_v25 = vunpack.i.h.bf16 %v19487_v63  ;;  %v19488_v43 = vunpack.i.l.bf16 %v19487_v63  ;;  %v27360_v32 = vpop.permute.xlu0 %19481  ;;  %v16222_v55 = vpack.c.bf16 %v9929_v16, %v9924_v22  ;;  %13953 = vmatmul.mubr.msk.f32.gmra.mrb[8].mxu1 %vm665_vm1, %v27292_v10 }
 0x4df   : > { %v28991_v30 = vunpack.i.h.bf16 %v27360_v32  ;;  %v19483_v29 = vunpack.i.l.bf16 %v27360_v32  ;;  %15120 = vmatprep.mubr.msk.f32.mxu1 %vm20680_vm2, %v29023_v41 }
 0x4e0   : > { %v10443_v61 = vsel %vm10412_vm7, %v19488_v43, %v19478_v4  ;;  %19776 = vrot.lane.b32.xlu1 %v19775_v13, %s20698_s30  ;;  %16223 = vmatpush3.bf16.msra.mxu1 %v16222_v55  ;;  %v19795_v4 = vpack.i.bf16 %v27002_v9, %v27016_v33 }
 0x4e1   : > { %v10448_v36 = vsel %vm10412_vm7, %v19489_v25, %v19483_v29  ;;  %19771 = vrot.lane.b32.xlu0 %v29168_v59, %s20698_s30  ;;  %v19497_v0 = vpop.permute.xlu1 %19496  ;;  %v10449_v22 = vsel %vm10412_vm7, %v19483_v29, %v28991_v30  ;;  %16224 = vmatprep.subr.bf16.mxu1 %v29038_v8  ;;  %v29169_v59 = vunpack.i.h.bf16 %v27138_v21  ;;  %v29170_v30 = vunpack.i.h.bf16 %v27146_v28 }
 0x4e2   : > { %v19492_v43 = vpop.permute.xlu0 %19491  ;;  %v16242_v19 = vpack.c.bf16 %v10449_v22, %v10444_v15  ;;  %v16244_v13 = vpack.c.bf16 %v10448_v36, %v10443_v61  ;;  %v19499_v55 = vunpack.i.h.bf16 %v19497_v0  ;;  %v19498_v16 = vunpack.i.l.bf16 %v19497_v0 }
 0x4e3   : > { %v19494_v63 = vunpack.i.h.bf16 %v19492_v43  ;;  %v19493_v25 = vunpack.i.l.bf16 %v19492_v43  ;;  %v29171_v28 = vunpack.i.h.bf16 %v27178_v48 }
 0x4e4   : > { %19786 = vrot.lane.b32.xlu1 %v26716_v47, %s20698_s30  ;;  %16243 = vmatprep.subr.bf16.mxu0 %v16242_v19  ;;  %v19790_v47 = vpack.i.bf16 %v26961_v20, %v26966_v45 }
 0x4e5   : > { %v9939_v29 = vsel %vm9909_vm6, %v29169_v59, %v19494_v63  ;;  %v9934_v15 = vsel %vm9909_vm6, %v29170_v30, %v19493_v25  ;;  %19781 = vrot.lane.b32.xlu0 %v26729_v14, %s20698_s30  ;;  %16245 = vmatpush1.bf16.msra.mxu0 %v16244_v13  ;;  %v27392_v61 = vpop.permute.xlu1 %19506  ;;  %v9944_v30 = vsel %vm9909_vm6, %v29171_v28, %v19498_v16  ;;  %v29172_v14 = vunpack.i.h.bf16 %v27167_v51  ;;  %v27405_v63 = vld [vmem:[#allocation5 + $0x320] sm:$0xff] }
 0x4e6   : > { %v19509_v36 = vunpack.i.h.bf16 %v27392_v61  ;;  %v19508_v0 = vunpack.i.l.bf16 %v27392_v61  ;;  %v19502_v21 = vpop.permute.xlu0 %19501  ;;  %v16225_v22 = vpack.c.bf16 %v9939_v29, %v9934_v15  ;;  %16262 = vmatprep.subr.bf16.mxu0 %v29038_v8  ;;  %v27484_v61 = vld [vmem:[#allocation5 + $0x338] sm:$0xff] }
 0x4e7   : > { %v9949_v43 = vsel %vm9909_vm6, %v29172_v14, %v19499_v55  ;;  %v19504_v19 = vunpack.i.h.bf16 %v19502_v21  ;;  %v19503_v13 = vunpack.i.l.bf16 %v19502_v21  ;;  %v20396_v14 = vld [vmem:[%s20987_s26 + $0x30] sm:$0xff] }
 0x4e8   : > { %v10422_v25 = vsel %vm10412_vm7, %v19508_v0, %v19509_v36  ;;  %19796 = vrot.lane.b32.xlu1 %v19795_v4, %s20698_s30  ;;  %16226 = vmatpush3.bf16.msra.mxu1 %v16225_v22  ;;  %v16228_v4 = vpack.c.bf16 %v9949_v43, %v9944_v30  ;;  %v20395_v30 = vld [vmem:[%s20987_s26] sm:$0xff] }
 0x4e9   : > { %v10417_v59 = vsel %vm10412_vm7, %v19503_v13, %v19504_v19  ;;  %19791 = vrot.lane.b32.xlu0 %v19790_v47, %s20698_s30  ;;  %v27413_v48 = vpop.permute.xlu1 %19516  ;;  %16227 = vmatprep.subr.bf16.mxu1 %v29038_v8  ;;  %v27421_v47 = vld [vmem:[#allocation5 + $0x328] sm:$0xff]  ;;  %v27435_v43 = vpack.i.bf16 %v20396_v14, %v20395_v30  ;;  %v29174_v30 = vunpack.i.h.bf16 %v27210_v1 }
 0x4ea   : > { %v19519_v51 = vunpack.i.h.bf16 %v27413_v48  ;;  %v28993_v55 = vunpack.i.l.bf16 %v27413_v48  ;;  %v19512_v16 = vpop.permute.xlu0 %19511  ;;  %13959 = vmatmul.mubr.msk.f32.vlgmr.msra.gmra.mrb[0].mxu0 %vm665_vm1, %v27405_v63  ;;  %v16263_v29 = vpack.c.bf16 %v10422_v25, %v10417_v59 }
 0x4eb   : > { %v19514_v15 = vunpack.i.h.bf16 %v19512_v16  ;;  %v19513_v36 = vunpack.i.l.bf16 %v19512_v16  ;;  %10578 = vmatprep.mubr.f32.mxu0 %v29023_v41 }
 0x4ec   : > { %v10432_v21 = vsel %vm10412_vm7, %v28993_v55, %v19519_v51  ;;  %19806 = vrot.lane.b32.xlu1 %v27041_v37, %s20699_s15  ;;  %16229 = vmatpush3.bf16.msra.mxu1 %v16228_v4 }
 0x4ed   : > { %v10427_v22 = vsel %vm10412_vm7, %v19513_v36, %v19514_v15  ;;  %19801 = vrot.lane.b32.xlu0 %v27051_v26, %s20699_s15  ;;  %16264 = vmatpush3.bf16.msra.mxu0 %v16263_v29  ;;  %v27431_v28 = vpop.permute.xlu1 %19526  ;;  %v27445_v29 = vld [vmem:[#allocation5 + $0x330] sm:$0xff]  ;;  %v27453_v15 = vpack.i.bf16 %v27267_v56, %v27326_v27 }
 0x4ee   : > { %v19522_v19 = vpop.permute.xlu0 %19521  ;;  %13960 = vmatmul.mubr.msk.f32.gmra.mrb[2].mxu0 %vm665_vm1, %v27421_v47  ;;  %16265 = vmatprep.subr.bf16.mxu0 %v29038_v8  ;;  %v16266_v25 = vpack.c.bf16 %v10432_v21, %v10427_v22  ;;  %v19529_v59 = vunpack.i.h.bf16 %v27431_v28  ;;  %v19528_v51 = vunpack.i.l.bf16 %v27431_v28  ;;  %v27457_v21 = vpack.i.bf16 %v27272_v2, %v27323_v52 }
 0x4ef   : > { %v19524_v16 = vunpack.i.h.bf16 %v19522_v19  ;;  %v19523_v4 = vunpack.i.l.bf16 %v19522_v19  ;;  %15121 = vmatmul.mubr.msk.f32.vlgmr.msra.gmra.mrb[100].mxu1 %vm665_vm1, %v27185_v17  ;;  %10584 = vmatprep.mubr.f32.mxu0 %v29023_v41  ;;  %v29173_v17 = vunpack.i.h.bf16 %v27198_v5 }
 0x4f0   : > { %19816 = vrot.lane.b32.xlu1 %v27072_v39, %s20699_s15  ;;  %15123 = vmatprep.mubr.msk.f32.mxu1 %vm20680_vm2, %v29023_v41  ;;  %v10437_v2 = vsel %vm10412_vm7, %v19528_v51, %v19529_v59 }
 0x4f1   : > { %v10420_v22 = vsel %vm10412_vm7, %v29173_v17, %v19524_v16  ;;  %v10415_v14 = vsel %vm10412_vm7, %v29174_v30, %v19523_v4  ;;  %19811 = vrot.lane.b32.xlu0 %v27435_v43, %s20699_s15  ;;  %16267 = vmatpush3.bf16.msra.mxu0 %v16266_v25  ;;  %v19537_v19 = vpop.permute.xlu1 %19536  ;;  %v10416_v56 = vsel %vm10412_vm7, %v19523_v4, %v19503_v13  ;;  %v29176_v4 = vunpack.i.h.bf16 %v27254_v7 }
 0x4f2   : > { %v19539_v27 = vunpack.i.h.bf16 %v19537_v19  ;;  %v19538_v58 = vunpack.i.l.bf16 %v19537_v19  ;;  %v27468_v55 = vpop.permute.xlu0 %19531  ;;  %13961 = vmatmul.mubr.msk.f32.gmra.mrb[4].mxu0 %vm665_vm1, %v27445_v29  ;;  %v10421_v5 = vsel %vm10412_vm7, %v19524_v16, %v19508_v0  ;;  %v16248_v1 = vpack.c.bf16 %v10420_v22, %v10415_v14  ;;  %16268 = vmatprep.subr.bf16.mxu0 %v29038_v8 }
 0x4f3   : > { %v19534_v52 = vunpack.i.h.bf16 %v27468_v55  ;;  %v19533_v13 = vunpack.i.l.bf16 %v27468_v55  ;;  %15124 = vmatmul.mubr.msk.f32.gmra.mrb[102].mxu1 %vm665_vm1, %v27217_v24  ;;  %v16246_v25 = vpack.c.bf16 %v10421_v5, %v10416_v56  ;;  %10590 = vmatprep.mubr.f32.mxu0 %v29023_v41  ;;  %v29175_v0 = vunpack.i.h.bf16 %v27229_v50  ;;  %v20399_v55 = vld [vmem:[%s20987_s26 + $0xb0] sm:$0xff] }
 0x4f4   : > { %v10430_v59 = vsel %vm10412_vm7, %v29176_v4, %v19539_v27  ;;  %19826 = vrot.lane.b32.xlu1 %v26791_v42, %s20699_s15  ;;  %15126 = vmatprep.mubr.msk.f32.mxu1 %vm20680_vm2, %v29023_v41  ;;  %v10426_v24 = vsel %vm10412_vm7, %v19538_v58, %v19513_v36  ;;  %v29177_v7 = vunpack.i.l.bf16 %v27413_v48 }
 0x4f5   : > { %v10425_v16 = vsel %vm10412_vm7, %v29175_v0, %v19538_v58  ;;  %v10442_v17 = vsel %vm10412_vm7, %v19533_v13, %v19534_v52  ;;  %19821 = vrot.lane.b32.xlu0 %v27097_v40, %s20699_s15  ;;  %16247 = vmatprep.subr.bf16.mxu1 %v16246_v25  ;;  %v19547_v50 = vpop.permute.xlu1 %19546 }
 0x4f6   : > { %v10431_v22 = vsel %vm10412_vm7, %v19539_v27, %v29177_v7  ;;  %v16252_v30 = vpack.c.bf16 %v10430_v59, %v10425_v16  ;;  %16249 = vmatpush1.bf16.msra.mxu1 %v16248_v1  ;;  %v19549_v42 = vunpack.i.h.bf16 %v19547_v50  ;;  %v19548_v14 = vunpack.i.l.bf16 %v19547_v50  ;;  %v19542_v19 = vpop.permute.xlu0 %19541  ;;  %13962 = vmatmul.mubr.msk.f32.gmra.mrb[6].mxu0 %vm665_vm1, %v27484_v61  ;;  %v27513_v27 = vld [vmem:[#allocation5 + $0x340] sm:$0xff] }
 0x4f7   : > { %v16250_v58 = vpack.c.bf16 %v10431_v22, %v10426_v24  ;;  %v16269_v36 = vpack.c.bf16 %v10442_v17, %v10437_v2  ;;  %v19544_v56 = vunpack.i.h.bf16 %v19542_v19  ;;  %v19543_v5 = vunpack.i.l.bf16 %v19542_v19  ;;  %15127 = vmatmul.mubr.msk.f32.gmra.mrb[104].mxu1 %vm665_vm1, %v27238_v60  ;;  %10596 = vmatprep.mubr.f32.mxu0 %v29023_v41  ;;  %v20397_v24 = vld [vmem:[%s20987_s26 + $0xc0] sm:$0xff]  ;;  %v20398_v17 = vld [vmem:[%s20987_s26 + $0xf0] sm:$0xff] }
 0x4f8   : > { %v10452_v48 = vsel %vm10412_vm7, %v19548_v14, %v19549_v42  ;;  %19836 = vrot.lane.b32.xlu1 %v27453_v15, %s20699_s15  ;;  %15129 = vmatprep.mubr.msk.f32.mxu1 %vm20680_vm2, %v29023_v41  ;;  %v27526_v59 = vpack.i.bf16 %v27296_v57, %v27347_v53  ;;  %v27533_v50 = vpack.i.bf16 %v20398_v17, %v20397_v24 }
 0x4f9   : > { %16251 = vmatprep.subr.bf16.mxu1 %v16250_v58  ;;  %v10447_v1 = vsel %vm10412_vm7, %v19543_v5, %v19544_v56  ;;  %19831 = vrot.lane.b32.xlu0 %v27457_v21, %s20699_s15  ;;  %v19557_v2 = vpop.permute.xlu1 %19556 }
 0x4fa   : > { %16270 = vmatpush3.bf16.msra.mxu0 %v16269_v36  ;;  %16253 = vmatpush1.bf16.msra.mxu1 %v16252_v30  ;;  %v19558_v60 = vunpack.i.l.bf16 %v19557_v2  ;;  %v19552_v52 = vpop.permute.xlu0 %19551  ;;  %v16272_v25 = vpack.c.bf16 %v10452_v48, %v10447_v1  ;;  %v19559_v0 = vunpack.i.h.bf16 %v19557_v2  ;;  %v29179_v30 = vunpack.i.h.bf16 %v27309_v54 }
 0x4fb   : > { %v19554_v16 = vunpack.i.h.bf16 %v19552_v52  ;;  %v19553_v4 = vunpack.i.l.bf16 %v19552_v52  ;;  %15130 = vmatmul.mubr.msk.f32.gmra.mrb[106].mxu1 %vm665_vm1, %v27262_v44  ;;  %13963 = vmatmul.mubr.msk.f32.gmra.mrb[8].mxu0 %vm665_vm1, %v27513_v27  ;;  %v29178_v44 = vunpack.i.h.bf16 %v27278_v12  ;;  %v29180_v48 = vunpack.i.h.bf16 %v27332_v62 }
 0x4fc   : > { %16271 = vmatprep.subr.bf16.mxu0 %v29038_v8  ;;  %19846 = vrot.lane.b32.xlu1 %v27171_v35, %s20699_s15  ;;  %v10446_v7 = vsel %vm10412_vm7, %v19558_v60, %v19543_v5  ;;  %v10451_v5 = vsel %vm10412_vm7, %v19559_v0, %v19548_v14  ;;  %v29181_v14 = vunpack.i.h.bf16 %v27360_v32 }
 0x4fd   : > { %v10435_v22 = vsel %vm10412_vm7, %v29178_v44, %v19553_v4  ;;  %v10440_v57 = vsel %vm10412_vm7, %v29179_v30, %v19554_v16  ;;  %19841 = vrot.lane.b32.xlu0 %v27123_v49, %s20699_s15  ;;  %v27544_v53 = vpop.permute.xlu1 %19566  ;;  %v10436_v42 = vsel %vm10412_vm7, %v19553_v4, %v19528_v51  ;;  %15132 = vmatprep.mubr.msk.f32.mxu1 %vm20680_vm2, %v29023_v41 }
 0x4fe   : > { %16273 = vmatpush3.bf16.msra.mxu0 %v16272_v25  ;;  %v19569_v12 = vunpack.i.h.bf16 %v27544_v53  ;;  %v19568_v19 = vunpack.i.l.bf16 %v27544_v53  ;;  %v27551_v58 = vpop.permute.xlu0 %19561  ;;  %15151 = vmatprep.mubr.msk.f32.mxu0 %vm20680_vm2, %v29023_v41  ;;  %v10441_v54 = vsel %vm10412_vm7, %v19554_v16, %v19533_v13  ;;  %v16256_v28 = vpack.c.bf16 %v10440_v57, %v10435_v22 }
 0x4ff   : > { %v19564_v51 = vunpack.i.h.bf16 %v27551_v58  ;;  %v19563_v36 = vunpack.i.l.bf16 %v27551_v58  ;;  %15133 = vmatmul.mubr.msk.f32.gmra.mrb[108].mxu1 %vm665_vm1, %v27292_v10  ;;  %v16254_v56 = vpack.c.bf16 %v10441_v54, %v10436_v42  ;;  %v10445_v1 = vsel %vm10412_vm7, %v29180_v48, %v19558_v60 }
 0x500   : > { %19856 = vrot.lane.b32.xlu1 %v27526_v59, %s20699_s15  ;;  %v27574_v13 = vpack.i.bf16 %v20399_v55, %v26910_v34  ;;  %v10922_v10 = vsel %vm10915_vm8, %v19568_v19, %v19569_v12  ;;  %v10450_v62 = vsel %vm10412_vm7, %v29181_v14, %v19559_v0  ;;  %v8249_v60 = vpop.f32.mrb[80].mxu1  ;;  %v16258_v52 = vpack.c.bf16 %v10451_v5, %v10446_v7  ;;  %v20400_v55 = vld [vmem:[%s20987_s26 + $0x110] sm:$0xff] }
 0x501   : > { %15152 = vmatmul.mubr.msk.f32.vlgmr.msra.gmra.mrb[110].mxu0 %vm665_vm1, %v27405_v63  ;;  %19851 = vrot.lane.b32.xlu0 %v27533_v50, %s20699_s15  ;;  %v27584_v2 = vpop.permute.xlu1 %19576  ;;  %v10917_v34 = vsel %vm10915_vm8, %v19563_v36, %v19564_v51  ;;  %v27590_v16 = vadd.f32 %v8249_v60, %v27061_v38  ;;  %v14998_v0 = vpop.f32.mrb[81].mxu1  ;;  %v16260_v17 = vpack.c.bf16 %v10450_v62, %v10445_v1 }
 0x502   : > { %16255 = vmatprep.subr.bf16.mxu1 %v16254_v56  ;;  %v19572_v25 = vpop.permute.xlu0 %19571  ;;  %15154 = vmatprep.mubr.msk.f32.mxu0 %vm20680_vm2, %v29023_v41  ;;  %v16274_v32 = vpack.c.bf16 %v10922_v10, %v10917_v34  ;;  %v19579_v38 = vunpack.i.h.bf16 %v27584_v2  ;;  %v19578_v7 = vunpack.i.l.bf16 %v27584_v2  ;;  %v20401_v10 = vld [vmem:[%s20987_s26 + $0xe0] sm:$0xff] }
 0x503   : > { %16257 = vmatpush1.bf16.msra.mxu1 %v16256_v28  ;;  %v19574_v4 = vunpack.i.h.bf16 %v19572_v25  ;;  %v19573_v24 = vunpack.i.l.bf16 %v19572_v25  ;;  %10667 = vmatprep.mubr.f32.mxu1 %v29023_v41  ;;  %v27625_v14 = vpack.i.bf16 %v20401_v10, %v26966_v45 }
 0x504   : > { %16259 = vmatprep.subr.bf16.mxu1 %v16258_v52  ;;  %19866 = vrot.lane.b32.xlu1 %v26871_v23, %s20699_s15  ;;  %v8254_v57 = vpop.f32.mrb[82].mxu1  ;;  %v10927_v34 = vsel %vm10915_vm8, %v19578_v7, %v19579_v38 }
 0x505   : > { %15155 = vmatmul.mubr.msk.f32.gmra.mrb[112].mxu0 %vm665_vm1, %v27421_v47  ;;  %v10921_v44 = vsel %vm10915_vm8, %v19574_v4, %v19568_v19  ;;  %v10916_v22 = vsel %vm10915_vm8, %v19573_v24, %v19563_v36  ;;  %19861 = vrot.lane.b32.xlu0 %v27574_v13, %s20699_s15  ;;  %v19587_v30 = vpop.permute.xlu1 %19586  ;;  %v27608_v5 = vadd.f32 %v8254_v57, %v27086_v31  ;;  %v15001_v19 = vpop.f32.mrb[83].mxu1  ;;  %v20403_v57 = vld [vmem:[%s20987_s26 + $0x140] sm:$0xff] }
 0x506   : > { %16275 = vmatprep.subr.bf16.mxu0 %v16274_v32  ;;  %v16276_v42 = vpack.c.bf16 %v10921_v44, %v10916_v22  ;;  %v19589_v54 = vunpack.i.h.bf16 %v19587_v30  ;;  %v19588_v28 = vunpack.i.l.bf16 %v19587_v30  ;;  %v27605_v56 = vpop.permute.xlu0 %19581  ;;  %15157 = vmatprep.mubr.msk.f32.mxu0 %vm20680_vm2, %v29023_v41  ;;  %v27621_v31 = vpack.i.bf16 %v20400_v55, %v26961_v20  ;;  %v20402_v22 = vld [vmem:[%s20987_s26 + $0x170] sm:$0xff] }
 0x507   : > { %16261 = vmatpush1.bf16.msra.mxu1 %v16260_v17  ;;  %v19584_v36 = vunpack.i.h.bf16 %v27605_v56  ;;  %v19583_v48 = vunpack.i.l.bf16 %v27605_v56 }
 0x508   : > { %v10926_v1 = vsel %vm10915_vm8, %v19588_v28, %v19578_v7  ;;  %19876 = vrot.lane.b32.xlu1 %v27223_v3, %s20699_s15  ;;  %16277 = vmatpush1.bf16.msra.mxu0 %v16276_v42  ;;  %v8259_v52 = vpop.f32.mrb[84].mxu1  ;;  %v27673_v42 = vpack.i.bf16 %v20403_v57, %v27016_v33 }
 0x509   : > { %15158 = vmatmul.mubr.msk.f32.gmra.mrb[114].mxu0 %vm665_vm1, %v27445_v29  ;;  %v10931_v62 = vsel %vm10915_vm8, %v19589_v54, %v19583_v48  ;;  %19871 = vrot.lane.b32.xlu0 %v26939_v46, %s20699_s15  ;;  %v27630_v60 = vpop.permute.xlu1 %19596  ;;  %v10932_v20 = vsel %vm10915_vm8, %v19583_v48, %v19584_v36  ;;  %v27643_v0 = vadd.f32 %v8259_v52, %v27114_v6  ;;  %v15004_v24 = vpop.f32.mrb[85].mxu1 }
 0x50a   : > { %v19599_v45 = vunpack.i.h.bf16 %v27630_v60  ;;  %v19598_v25 = vunpack.i.l.bf16 %v27630_v60  ;;  %v27640_v32 = vpop.permute.xlu0 %19591  ;;  %15160 = vmatprep.mubr.msk.f32.mxu0 %vm20680_vm2, %v29023_v41  ;;  %v16278_v4 = vpack.c.bf16 %v10932_v20, %v10927_v34  ;;  %13964 = vmatmul.mubr.msk.f32.vlgmr.msra.gmra.mrb[0].mxu1 %vm665_vm1, %v27405_v63  ;;  %v16280_v44 = vpack.c.bf16 %v10931_v62, %v10926_v1 }
 0x50b   : > { %v19594_v17 = vunpack.i.h.bf16 %v27640_v32  ;;  %v19593_v7 = vunpack.i.l.bf16 %v27640_v32  ;;  %10673 = vmatprep.mubr.f32.mxu1 %v29023_v41  ;;  %v27661_v63 = vpack.i.bf16 %v20402_v22, %v27002_v9 }
 0x50c   : > { %v10923_v6 = vsel %vm10915_vm8, %v19569_v12, %v19598_v25  ;;  %19886 = vrot.lane.b32.xlu1 %v27621_v31, %s20699_s15  ;;  %v10924_v30 = vsel %vm10915_vm8, %v19598_v25, %v19599_v45  ;;  %16279 = vmatprep.subr.bf16.mxu0 %v16278_v4 }
 0x50d   : > { %15161 = vmatmul.mubr.msk.f32.gmra.mrb[116].mxu0 %vm665_vm1, %v27484_v61  ;;  %v10918_v53 = vsel %vm10915_vm8, %v19564_v51, %v19593_v7  ;;  %19881 = vrot.lane.b32.xlu0 %v27625_v14, %s20699_s15  ;;  %v8264_v12 = vpop.f32.mrb[86].mxu1  ;;  %v10919_v9 = vsel %vm10915_vm8, %v19593_v7, %v19594_v17 }
 0x50e   : > { %v16292_v54 = vpack.c.bf16 %v10923_v6, %v10918_v53  ;;  %16281 = vmatpush1.bf16.msra.mxu0 %v16280_v44  ;;  %v27678_v28 = vpop.permute.xlu1 %19606  ;;  %v27681_v58 = vadd.f32 %v8264_v12, %v27152_v18  ;;  %15163 = vmatprep.mubr.msk.f32.mxu0 %vm20680_vm2, %v29023_v41  ;;  %v16290_v51 = vpack.c.bf16 %v10924_v30, %v10919_v9  ;;  %v15007_v19 = vpop.f32.mrb[87].mxu1 }
 0x50f   : > { %v19609_v48 = vunpack.i.h.bf16 %v27678_v28  ;;  %v19608_v33 = vunpack.i.l.bf16 %v27678_v28  ;;  %v27687_v1 = vpop.permute.xlu0 %19601  ;;  %13965 = vmatmul.mubr.msk.f32.gmra.mrb[2].mxu1 %vm665_vm1, %v27421_v47  ;;  %v20404_v19 = vld [vmem:[%s20987_s26 + $0x60] sm:$0xff] }
 0x510   : > { %v19604_v55 = vunpack.i.h.bf16 %v27687_v1  ;;  %v19603_v10 = vunpack.i.l.bf16 %v27687_v1  ;;  %19896 = vrot.lane.b32.xlu1 %v27661_v63, %s20699_s15  ;;  %16291 = vmatprep.subr.bf16.mxu1 %v16290_v51 }
 0x511   : > { %15164 = vmatmul.mubr.msk.f32.gmra.mrb[118].mxu0 %vm665_vm1, %v27513_v27  ;;  %19891 = vrot.lane.b32.xlu0 %v27673_v42, %s20699_s15  ;;  %v8269_v18 = vpop.f32.mrb[88].mxu1  ;;  %v10942_v62 = vsel %vm10915_vm8, %v19608_v33, %v19609_v48  ;;  %v8752_v34 = vpop.f32.mrb[90].mxu0 }
 0x512   : > { %16293 = vmatpush1.bf16.msra.mxu1 %v16292_v54  ;;  %v27702_v47 = vpop.permute.xlu1 %19616  ;;  %v27705_v52 = vadd.f32 %v8269_v18, %v27183_v11  ;;  %v10937_v20 = vsel %vm10915_vm8, %v19603_v10, %v19604_v55  ;;  %10679 = vmatprep.mubr.f32.mxu1 %v29023_v41  ;;  %v27712_v4 = vadd.f32 %v8752_v34, %v27590_v16  ;;  %v15029_v7 = vpop.f32.mrb[91].mxu0 }
 0x513   : > { %v19612_v25 = vpop.permute.xlu0 %19611  ;;  %v16282_v24 = vpack.c.bf16 %v10942_v62, %v10937_v20  ;;  %13966 = vmatmul.mubr.msk.f32.gmra.mrb[4].mxu1 %vm665_vm1, %v27445_v29  ;;  %11075 = vmatprep.mubr.f32.mxu0 %v29023_v41  ;;  %v15010_v6 = vpop.f32.mrb[89].mxu1  ;;  %v19619_v22 = vunpack.i.h.bf16 %v27702_v47  ;;  %v19618_v16 = vunpack.i.l.bf16 %v27702_v47 }
 0x514   : > { %v19614_v11 = vunpack.i.h.bf16 %v19612_v25  ;;  %v19613_v44 = vunpack.i.l.bf16 %v19612_v25  ;;  %19906 = vrot.lane.b32.xlu1 %v27041_v37, %s20700_s9  ;;  %10685 = vmatprep.mubr.f32.mxu1 %v29023_v41 }
 0x515   : > { %19901 = vrot.lane.b32.xlu0 %v27051_v26, %s20700_s9  ;;  %16283 = vmatprep.subr.bf16.mxu0 %v16282_v24  ;;  %v8757_v37 = vpop.f32.mrb[92].mxu0 }
 0x516   : > { %v10941_v29 = vsel %vm10915_vm8, %v19614_v11, %v19608_v33  ;;  %v10936_v30 = vsel %vm10915_vm8, %v19613_v44, %v19603_v10  ;;  %v27726_v53 = vpop.permute.xlu1 %19626  ;;  %v27731_v9 = vadd.f32 %v8757_v37, %v27608_v5  ;;  %v15032_v54 = vpop.f32.mrb[93].mxu0  ;;  %v20405_v33 = vld [vmem:[%s20987_s26 + $0x90] sm:$0xff]  ;;  %v10928_v5 = vsel %vm10915_vm8, %v19579_v38, %v19618_v16 }
 0x517   : > { %v16284_v12 = vpack.c.bf16 %v10941_v29, %v10936_v30  ;;  %v27728_v57 = vpop.permute.xlu0 %19621  ;;  %13967 = vmatmul.mubr.msk.f32.gmra.mrb[6].mxu1 %vm665_vm1, %v27484_v61  ;;  %v19925_v10 = vpack.i.bf16 %v20405_v33, %v20404_v19  ;;  %v10929_v61 = vsel %vm10915_vm8, %v19618_v16, %v19619_v22  ;;  %v19629_v18 = vunpack.i.h.bf16 %v27726_v53 }
 0x518   : > { %v19624_v26 = vunpack.i.h.bf16 %v27728_v57  ;;  %v19623_v51 = vunpack.i.l.bf16 %v27728_v57  ;;  %19916 = vrot.lane.b32.xlu1 %v27072_v39, %s20700_s9  ;;  %10691 = vmatprep.mubr.f32.mxu1 %v29023_v41  ;;  %v19628_v39 = vunpack.i.l.bf16 %v27726_v53 }
 0x519   : > { %19911 = vrot.lane.b32.xlu0 %v27435_v43, %s20700_s9  ;;  %16285 = vmatpush1.bf16.msra.mxu0 %v16284_v12  ;;  %v8762_v2 = vpop.f32.mrb[94].mxu0 }
 0x51a   : > { %v10933_v62 = vsel %vm10915_vm8, %v19584_v36, %v19623_v51  ;;  %v19637_v34 = vpop.permute.xlu1 %19636  ;;  %v10934_v38 = vsel %vm10915_vm8, %v19623_v51, %v19624_v26  ;;  %v27759_v7 = vadd.f32 %v8762_v2, %v27643_v0  ;;  %v15035_v11 = vpop.f32.mrb[95].mxu0 }
 0x51b   : > { %v16296_v43 = vpack.c.bf16 %v10933_v62, %v10928_v5  ;;  %v19639_v20 = vunpack.i.h.bf16 %v19637_v34  ;;  %v19638_v25 = vunpack.i.l.bf16 %v19637_v34  ;;  %v19632_v24 = vpop.permute.xlu0 %19631  ;;  %13968 = vmatmul.mubr.msk.f32.gmra.mrb[8].mxu1 %vm665_vm1, %v27513_v27  ;;  %v16294_v36 = vpack.c.bf16 %v10934_v38, %v10929_v61 }
 0x51c   : > { %v19634_v56 = vunpack.i.h.bf16 %v19632_v24  ;;  %v19633_v44 = vunpack.i.l.bf16 %v19632_v24  ;;  %19926 = vrot.lane.b32.xlu1 %v19925_v10, %s20700_s9  ;;  %11170 = vmatprep.mubr.f32.mxu1 %v29023_v41  ;;  %v10947_v27 = vsel %vm10915_vm8, %v19628_v39, %v19629_v18 }
 0x51d   : > { %v10946_v6 = vsel %vm10915_vm8, %v19638_v25, %v19628_v39  ;;  %19921 = vrot.lane.b32.xlu0 %v27097_v40, %s20700_s9  ;;  %16295 = vmatprep.subr.bf16.mxu1 %v16294_v36  ;;  %v8767_v29 = vpop.f32.mrb[96].mxu0  ;;  %v29182_v39 = vld [vmem:[#allocation19_spill] sm:$0xff] }
 0x51e   : > { %v10951_v16 = vsel %vm10915_vm8, %v19639_v20, %v19633_v44  ;;  %v27769_v0 = vpop.permute.xlu1 %19646  ;;  %v10952_v30 = vsel %vm10915_vm8, %v19633_v44, %v19634_v56  ;;  %16297 = vmatpush1.bf16.msra.mxu1 %v16296_v43  ;;  %v27780_v40 = vadd.f32 %v8767_v29, %v27681_v58  ;;  %v15038_v19 = vpop.f32.mrb[97].mxu0  ;;  %v27819_v36 = vld [vmem:[%s20987_s26 + $0xb8] sm:$0xff] }
 0x51f   : > { %v16288_v37 = vpack.c.bf16 %v10951_v16, %v10946_v6  ;;  %v19649_v12 = vunpack.i.h.bf16 %v27769_v0  ;;  %v19648_v54 = vunpack.i.l.bf16 %v27769_v0  ;;  %v27777_v51 = vpop.permute.xlu0 %19641  ;;  %v16286_v5 = vpack.c.bf16 %v10952_v30, %v10947_v27 }
 0x520   : > { %v19644_v33 = vunpack.i.h.bf16 %v27777_v51  ;;  %v19643_v10 = vunpack.i.l.bf16 %v27777_v51  ;;  %19936 = vrot.lane.b32.xlu1 %v27123_v49, %s20700_s9 }
 0x521   : > { %v10943_v61 = vsel %vm10915_vm8, %v19609_v48, %v19648_v54  ;;  %19931 = vrot.lane.b32.xlu0 %v29182_v39, %s20699_s15  ;;  %v10944_v58 = vsel %vm10915_vm8, %v19648_v54, %v19649_v12  ;;  %16287 = vmatprep.subr.bf16.mxu0 %v16286_v5  ;;  %v8772_v49 = vpop.f32.mrb[98].mxu0 }
 0x522   : > { %v10938_v62 = vsel %vm10915_vm8, %v19604_v55, %v19643_v10  ;;  %v27797_v34 = vpop.permute.xlu1 %19656  ;;  %v10939_v28 = vsel %vm10915_vm8, %v19643_v10, %v19644_v33  ;;  %16289 = vmatpush1.bf16.msra.mxu0 %v16288_v37  ;;  %v27807_v1 = vadd.f32 %v8772_v49, %v27705_v52  ;;  %v27809_v55 = vld [vmem:[#allocation5 + $0x348] sm:$0xff]  ;;  %v15041_v20 = vpop.f32.mrb[99].mxu0  ;;  %v29183_v52 = vld [vmem:[#allocation23_spill] sm:$0xff]  ;;  %v27841_v37 = vld [vmem:[#allocation5 + $0x350] sm:$0xff] }
 0x523   : > { %v16300_v48 = vpack.c.bf16 %v10943_v61, %v10938_v62  ;;  %v19659_v2 = vunpack.i.h.bf16 %v27797_v34  ;;  %v19658_v38 = vunpack.i.l.bf16 %v27797_v34  ;;  %v27804_v43 = vpop.permute.xlu0 %19651  ;;  %v16298_v11 = vpack.c.bf16 %v10944_v58, %v10939_v28  ;;  %v27859_v58 = vld [vmem:[#allocation5 + $0x358] sm:$0xff]  ;;  %v20407_v28 = vld [vmem:[%s20987_s26 + $0x148] sm:$0xff] }
 0x524   : > { %v19654_v25 = vunpack.i.h.bf16 %v27804_v43  ;;  %v19653_v24 = vunpack.i.l.bf16 %v27804_v43  ;;  %19946 = vrot.lane.b32.xlu1 %v27533_v50, %s20700_s9  ;;  %v19950_v6 = vpack.i.bf16 %v27819_v36, %v29183_v52  ;;  %v20409_v20 = vld [vmem:[%s20987_s26 + $0xe8] sm:$0xff] }
 0x525   : > { %v10953_v44 = vsel %vm10915_vm8, %v19634_v56, %v19658_v38  ;;  %19941 = vrot.lane.b32.xlu0 %v27171_v35, %s20700_s9  ;;  %v10954_v16 = vsel %vm10915_vm8, %v19658_v38, %v19659_v2  ;;  %16299 = vmatprep.subr.bf16.mxu1 %v16298_v11 }
 0x526   : > { %v10948_v29 = vsel %vm10915_vm8, %v19629_v18, %v19653_v24  ;;  %v27829_v50 = vpop.permute.xlu1 %19666  ;;  %v10949_v35 = vsel %vm10915_vm8, %v19653_v24, %v19654_v25  ;;  %13974 = vmatmul.mubr.msk.f32.vlgmr.msra.gmra.mrb[0].mxu0 %vm665_vm1, %v27809_v55  ;;  %16301 = vmatpush1.bf16.msra.mxu1 %v16300_v48  ;;  %v20408_v48 = vld [vmem:[%s20987_s26 + $0x178] sm:$0xff] }
 0x527   : > { %v16304_v56 = vpack.c.bf16 %v10953_v44, %v10948_v29  ;;  %v19669_v27 = vunpack.i.h.bf16 %v27829_v50  ;;  %v19668_v30 = vunpack.i.l.bf16 %v27829_v50  ;;  %v27838_v53 = vpop.permute.xlu0 %19661  ;;  %v16302_v18 = vpack.c.bf16 %v10954_v16, %v10949_v35  ;;  %11081 = vmatprep.mubr.f32.mxu0 %v29023_v41  ;;  %v20410_v24 = vld [vmem:[%s20987_s26 + $0x118] sm:$0xff]  ;;  %v28045_v50 = vld [vmem:[#allocation5 + $0x388] sm:$0xff] }
 0x528   : > { %v19664_v54 = vunpack.i.h.bf16 %v27838_v53  ;;  %v19663_v19 = vunpack.i.l.bf16 %v27838_v53  ;;  %19956 = vrot.lane.b32.xlu1 %v26871_v23, %s20700_s9  ;;  %v27865_v38 = vpack.i.bf16 %v20408_v48, %v20407_v28  ;;  %v27872_v11 = vpack.i.bf16 %v20410_v24, %v20409_v20 }
 0x529   : > { %19951 = vrot.lane.b32.xlu0 %v19950_v6, %s20699_s15  ;;  %16303 = vmatprep.subr.bf16.mxu1 %v16302_v18  ;;  %v11425_v10 = vsel %vm11418_vm9, %v19668_v30, %v19669_v27  ;;  %v27886_v18 = vld [vmem:[#allocation5 + $0x360] sm:$0xff] }
 0x52a   : > { %v27851_v5 = vpop.permute.xlu1 %19676  ;;  %v11420_v61 = vsel %vm11418_vm9, %v19663_v19, %v19664_v54  ;;  %13975 = vmatmul.mubr.msk.f32.gmra.mrb[2].mxu0 %vm665_vm1, %v27841_v37  ;;  %16305 = vmatpush1.bf16.msra.mxu1 %v16304_v56 }
 0x52b   : > { %v19672_v23 = vpop.permute.xlu0 %19671  ;;  %v16318_v39 = vpack.c.bf16 %v11425_v10, %v11420_v61  ;;  %11087 = vmatprep.mubr.f32.mxu0 %v29023_v41  ;;  %16306 = vmatprep.subr.bf16.mxu1 %v29038_v8  ;;  %v19679_v44 = vunpack.i.h.bf16 %v27851_v5  ;;  %v19678_v52 = vunpack.i.l.bf16 %v27851_v5 }
 0x52c   : > { %v19674_v62 = vunpack.i.h.bf16 %v19672_v23  ;;  %v19673_v49 = vunpack.i.l.bf16 %v19672_v23  ;;  %19966 = vrot.lane.b32.xlu1 %v27223_v3, %s20700_s9 }
 0x52d   : > { %19961 = vrot.lane.b32.xlu0 %v26939_v46, %s20700_s9  ;;  %16319 = vmatprep.subr.bf16.mxu0 %v16318_v39  ;;  %v11430_v39 = vsel %vm11418_vm9, %v19678_v52, %v19679_v44 }
 0x52e   : > { %v11424_v3 = vsel %vm11418_vm9, %v19674_v62, %v19668_v30  ;;  %v11419_v6 = vsel %vm11418_vm9, %v19673_v49, %v19663_v19  ;;  %v19687_v16 = vpop.permute.xlu1 %19686  ;;  %13979 = vmatmul.mubr.msk.f32.vlgmr.msra.gmra.mrb[0].mxu1 %vm665_vm1, %v27809_v55  ;;  %13976 = vmatmul.mubr.msk.f32.gmra.mrb[4].mxu0 %vm665_vm1, %v27859_v58 }
 0x52f   : > { %v16320_v46 = vpack.c.bf16 %v11424_v3, %v11419_v6  ;;  %v19689_v29 = vunpack.i.h.bf16 %v19687_v16  ;;  %v19688_v35 = vunpack.i.l.bf16 %v19687_v16  ;;  %v27882_v56 = vpop.permute.xlu0 %19681  ;;  %11176 = vmatprep.mubr.f32.mxu1 %v29023_v41  ;;  %11093 = vmatprep.mubr.f32.mxu0 %v29023_v41 }
 0x530   : > { %v19684_v30 = vunpack.i.h.bf16 %v27882_v56  ;;  %v19683_v19 = vunpack.i.l.bf16 %v27882_v56  ;;  %19976 = vrot.lane.b32.xlu1 %v27865_v38, %s20699_s15 }
 0x531   : > { %v11429_v10 = vsel %vm11418_vm9, %v19688_v35, %v19678_v52  ;;  %19971 = vrot.lane.b32.xlu0 %v27872_v11, %s20699_s15  ;;  %16321 = vmatpush1.bf16.msra.mxu0 %v16320_v46  ;;  %v27912_v52 = vld [vmem:[#allocation5 + $0x368] sm:$0xff] }
 0x532   : > { %v11434_v61 = vsel %vm11418_vm9, %v19689_v29, %v19683_v19  ;;  %v27896_v23 = vpop.permute.xlu1 %19696  ;;  %v11435_v62 = vsel %vm11418_vm9, %v19683_v19, %v19684_v30  ;;  %13980 = vmatmul.mubr.msk.f32.gmra.mrb[2].mxu1 %vm665_vm1, %v27841_v37  ;;  %13977 = vmatmul.mubr.msk.f32.gmra.mrb[6].mxu0 %vm665_vm1, %v27886_v18 }
 0x533   : > { %v16324_v49 = vpack.c.bf16 %v11434_v61, %v11429_v10  ;;  %v19692_v28 = vpop.permute.xlu0 %19691  ;;  %v16322_v48 = vpack.c.bf16 %v11435_v62, %v11430_v39  ;;  %11182 = vmatprep.mubr.f32.mxu1 %v29023_v41  ;;  %11099 = vmatprep.mubr.f32.mxu0 %v29023_v41  ;;  %v19699_v3 = vunpack.i.h.bf16 %v27896_v23  ;;  %v19698_v6 = vunpack.i.l.bf16 %v27896_v23  ;;  %v20412_v10 = vld [vmem:[%s20987_s26 + $0x58] sm:$0xff] }
 0x534   : > { %v19694_v20 = vunpack.i.h.bf16 %v19692_v28  ;;  %v19693_v24 = vunpack.i.l.bf16 %v19692_v28  ;;  %19986 = vrot.lane.b32.xlu1 %v27453_v15, %s20700_s9 }
 0x535   : > { %19981 = vrot.lane.b32.xlu0 %v27457_v21, %s20700_s9  ;;  %16323 = vmatprep.subr.bf16.mxu0 %v16322_v48 }
 0x536   : > { %v10925_v16 = vsel %vm10915_vm8, %v19599_v45, %v19694_v20  ;;  %v10920_v46 = vsel %vm10915_vm8, %v19594_v17, %v19693_v24  ;;  %16325 = vmatpush1.bf16.msra.mxu0 %v16324_v49  ;;  %v19707_v15 = vpop.permute.xlu1 %19706  ;;  %13981 = vmatmul.mubr.msk.f32.gmra.mrb[4].mxu1 %vm665_vm1, %v27859_v58  ;;  %v20411_v17 = vld [vmem:[%s20987_s26 + $0x28] sm:$0xff] }
 0x537   : > { %v16307_v21 = vpack.c.bf16 %v10925_v16, %v10920_v46  ;;  %v19709_v29 = vunpack.i.h.bf16 %v19707_v15  ;;  %v19708_v35 = vunpack.i.l.bf16 %v19707_v15  ;;  %v27926_v19 = vpop.permute.xlu0 %19701  ;;  %11188 = vmatprep.mubr.f32.mxu1 %v29023_v41  ;;  %13978 = vmatmul.mubr.msk.f32.gmra.mrb[8].mxu0 %vm665_vm1, %v27912_v52  ;;  %v20000_v61 = vpack.i.bf16 %v20412_v10, %v20411_v17 }
 0x538   : > { %v19704_v60 = vunpack.i.h.bf16 %v27926_v19  ;;  %v19703_v45 = vunpack.i.l.bf16 %v27926_v19  ;;  %19996 = vrot.lane.b32.xlu1 %v27574_v13, %s20700_s9  ;;  %11578 = vmatprep.mubr.f32.mxu0 %v29023_v41  ;;  %v11440_v13 = vsel %vm11418_vm9, %v19698_v6, %v19699_v3 }
 0x539   : > { %v11439_v32 = vsel %vm11418_vm9, %v19708_v35, %v19698_v6  ;;  %19991 = vrot.lane.b32.xlu0 %v27526_v59, %s20700_s9  ;;  %16308 = vmatpush3.bf16.msra.mxu1 %v16307_v21  ;;  %v20413_v6 = vld [vmem:[%s20987_s26 + $0x88] sm:$0xff]  ;;  %s13658_s26 = sshll.u32 %s20983_s10, 4 }
 0x53a   : > { %v11444_v39 = vsel %vm11418_vm9, %v19709_v29, %v19703_v45  ;;  %v27942_v62 = vpop.permute.xlu1 %19716  ;;  %v11445_v49 = vsel %vm11418_vm9, %v19703_v45, %v19704_v60  ;;  %16309 = vmatprep.subr.bf16.mxu1 %v29038_v8  ;;  %13982 = vmatmul.mubr.msk.f32.gmra.mrb[6].mxu1 %vm665_vm1, %v27886_v18  ;;  %v20015_v16 = vpack.i.bf16 %v27819_v36, %v20413_v6  ;;  %s340_s11 = scalar_lea.vmem [#allocation13], %s13658_s26 }
 0x53b   : > { %v16328_v59 = vpack.c.bf16 %v11444_v39, %v11439_v32  ;;  %v19712_v28 = vpop.permute.xlu0 %19711  ;;  %v16326_v48 = vpack.c.bf16 %v11445_v49, %v11440_v13  ;;  %11194 = vmatprep.mubr.f32.mxu1 %v29023_v41  ;;  %v19719_v46 = vunpack.i.h.bf16 %v27942_v62  ;;  %v19718_v15 = vunpack.i.l.bf16 %v27942_v62  ;;  %s13522_s12 = sshll.u32 %s340_s11, 4  ;;  %s28805_s12 = int_to_ptr.vmem [resolvable:$true] %s13522_s12 }
 0x53c   : > { %v19714_v20 = vunpack.i.h.bf16 %v19712_v28  ;;  %v19713_v24 = vunpack.i.l.bf16 %v19712_v28  ;;  %20006 = vrot.lane.b32.xlu1 %v27625_v14, %s20700_s9  ;;  %s20584_s27 = scalar_lea.vmem %s28805_s12, 256  ;;  %p20591_p13 = scmp.lt.s32.totalorder %s28805_s12, %s20589_s29 }
 0x53d   : > { %20001 = vrot.lane.b32.xlu0 %v20000_v61, %s20700_s9  ;;  %16327 = vmatprep.subr.bf16.mxu0 %v16326_v48  ;;  %v11450_v10 = vsel %vm11418_vm9, %v19718_v15, %v19719_v46  ;;  %p20585_p7 = scmp.ne.s32.totalorder %s28805_s12, %s20584_s27  ;;  %p20592_p0 = scmp.lt.s32.totalorder %s20590_s19, %s20584_s27 }
 0x53e   : > { %v10930_v21 = vsel %vm10915_vm8, %v19619_v22, %v19713_v24  ;;  %v10935_v29 = vsel %vm10915_vm8, %v19624_v26, %v19714_v20  ;;  %16329 = vmatpush1.bf16.msra.mxu0 %v16328_v59  ;;  %v19727_v14 = vpop.permute.xlu1 %19726  ;;  %13983 = vmatmul.mubr.msk.f32.gmra.mrb[8].mxu1 %vm665_vm1, %v27912_v52 }
 0x53f   : > { %v16310_v36 = vpack.c.bf16 %v10935_v29, %v10930_v21  ;;  %v19729_v35 = vunpack.i.h.bf16 %v19727_v14  ;;  %v19728_v45 = vunpack.i.l.bf16 %v19727_v14  ;;  %v27969_v32 = vpop.permute.xlu0 %19721  ;;  %15182 = vmatprep.mubr.msk.f32.mxu1 %vm20680_vm2, %v29023_v41  ;;  %v27997_v14 = vld [vmem:[#allocation5 + $0x370] sm:$0xff]  ;;  %p20586_p12 = pnand %p20585_p7, %p29184_p4  ;;  %p20593_p2 = por %p20592_p0, %p20591_p13 }
 0x540   : > { %v19724_v47 = vunpack.i.h.bf16 %v27969_v32  ;;  %v19723_v22 = vunpack.i.l.bf16 %v27969_v32  ;;  %20016 = vrot.lane.b32.xlu1 %v20015_v16, %s20700_s9 }
 0x541   : > { %v11449_v57 = vsel %vm11418_vm9, %v19728_v45, %v19718_v15  ;;  %20011 = vrot.lane.b32.xlu0 %v27621_v31, %s20700_s9  ;;  %16311 = vmatpush3.bf16.msra.mxu1 %v16310_v36  ;;  %p20587_p1 = pneg %p20586_p12 }
 0x542   : > { %v11454_v26 = vsel %vm11418_vm9, %v19729_v35, %v19723_v22  ;;  %v19737_v17 = vpop.permute.xlu1 %19736  ;;  %v11455_v61 = vsel %vm11418_vm9, %v19723_v22, %v19724_v47  ;;  %16312 = vmatprep.subr.bf16.mxu1 %v29038_v8 }
 0x543   : > { %v16332_v39 = vpack.c.bf16 %v11454_v26, %v11449_v57  ;;  %v19732_v13 = vpop.permute.xlu0 %19731  ;;  %v16330_v49 = vpack.c.bf16 %v11455_v61, %v11450_v10  ;;  %v19739_v59 = vunpack.i.h.bf16 %v19737_v17  ;;  %v19738_v28 = vunpack.i.l.bf16 %v19737_v17  ;;  %v28026_v61 = vld [vmem:[#allocation5 + $0x380] sm:$0xff]  ;;  %p20594_p8 = pnand %p20593_p2, %p20587_p1 }
 0x544   : > { %v19734_v31 = vunpack.i.h.bf16 %v19732_v13  ;;  %v19733_v48 = vunpack.i.l.bf16 %v19732_v13  ;;  %20026 = vrot.lane.b32.xlu1 %v27661_v63, %s20700_s9 }
 0x545   : > { %20021 = vrot.lane.b32.xlu0 %v27673_v42, %s20700_s9  ;;  %16331 = vmatprep.subr.bf16.mxu0 %v16330_v49  ;;  %v10950_v63 = vsel %vm10915_vm8, %v19654_v25, %v19738_v28  ;;  %v10955_v42 = vsel %vm10915_vm8, %v19659_v2, %v19739_v59 }
 0x546   : > { %v10945_v20 = vsel %vm10915_vm8, %v19649_v12, %v19734_v31  ;;  %v10940_v24 = vsel %vm10915_vm8, %v19644_v33, %v19733_v48  ;;  %16333 = vmatpush1.bf16.msra.mxu0 %v16332_v39  ;;  %v19747_v6 = vpop.permute.xlu1 %19746  ;;  %v16316_v34 = vpack.c.bf16 %v10955_v42, %v10950_v63 }
 0x547   : > { %v16313_v16 = vpack.c.bf16 %v10945_v20, %v10940_v24  ;;  %v19749_v15 = vunpack.i.h.bf16 %v19747_v6  ;;  %v19748_v21 = vunpack.i.l.bf16 %v19747_v6  ;;  %v19742_v29 = vpop.permute.xlu0 %19741  ;;  %16350 = vmatprep.subr.bf16.mxu0 %v29038_v8 }
 0x548   : > { %v19744_v0 = vunpack.i.h.bf16 %v19742_v29  ;;  %v19743_v12 = vunpack.i.l.bf16 %v19742_v29  ;;  %20036 = vrot.lane.b32.xlu1 %v27865_v38, %s20700_s9  ;;  %v28016_v38 = vld [vmem:[#allocation5 + $0x378] sm:$0xff] }
 0x549   : > { %v11428_v51 = vsel %vm11418_vm9, %v19748_v21, %v19749_v15  ;;  %20031 = vrot.lane.b32.xlu0 %v27872_v11, %s20700_s9  ;;  %16314 = vmatpush3.bf16.msra.mxu1 %v16313_v16 }
 0x54a   : > { %v11423_v33 = vsel %vm11418_vm9, %v19743_v12, %v19744_v0  ;;  %v19757_v43 = vpop.permute.xlu1 %19756  ;;  %16315 = vmatprep.subr.bf16.mxu1 %v29038_v8  ;;  %13989 = vmatmul.mubr.msk.f32.vlgmr.msra.gmra.mrb[0].mxu0 %vm665_vm1, %v27997_v14 }
 0x54b   : > { %v16351_v2 = vpack.c.bf16 %v11428_v51, %v11423_v33  ;;  %v19759_v25 = vunpack.i.h.bf16 %v19757_v43  ;;  %v19758_v36 = vunpack.i.l.bf16 %v19757_v43  ;;  %v19752_v35 = vpop.permute.xlu0 %19751  ;;  %11584 = vmatprep.mubr.f32.mxu0 %v29023_v41 }
 0x54c   : > { %v19754_v45 = vunpack.i.h.bf16 %v19752_v35  ;;  %v19753_v11 = vunpack.i.l.bf16 %v19752_v35 }
 0x54d   : > { %v11438_v22 = vsel %vm11418_vm9, %v19758_v36, %v19759_v25  ;;  %16317 = vmatpush3.bf16.msra.mxu1 %v16316_v34  ;;  %16352 = vmatpush3.bf16.msra.mxu0 %v16351_v2  ;;  %v28069_v2 = vld [vmem:[#allocation5 + $0x390] sm:$0xff] }
 0x54e   : > { %v11433_v57 = vsel %vm11418_vm9, %v19753_v11, %v19754_v45  ;;  %v28020_v26 = vpop.permute.xlu1 %19766  ;;  %13990 = vmatmul.mubr.msk.f32.gmra.mrb[2].mxu0 %vm665_vm1, %v28016_v38  ;;  %16353 = vmatprep.subr.bf16.mxu0 %v29038_v8 }
 0x54f   : > { %v16354_v17 = vpack.c.bf16 %v11438_v22, %v11433_v57  ;;  %v19762_v10 = vpop.permute.xlu0 %19761  ;;  %11590 = vmatprep.mubr.f32.mxu0 %v29023_v41  ;;  %v19769_v39 = vunpack.i.h.bf16 %v28020_v26  ;;  %v19768_v13 = vunpack.i.l.bf16 %v28020_v26 }
 0x550   : > { %v19764_v49 = vunpack.i.h.bf16 %v19762_v10  ;;  %v19763_v59 = vunpack.i.l.bf16 %v19762_v10  ;;  %15183 = vmatmul.mubr.msk.f32.vlgmr.msra.gmra.mrb[110].mxu1 %vm665_vm1, %v27809_v55 }
 0x551   : > { %16355 = vmatpush3.bf16.msra.mxu0 %v16354_v17  ;;  %15185 = vmatprep.mubr.msk.f32.mxu1 %vm20680_vm2, %v29023_v41 }
 0x552   : > { %v11426_v28 = vsel %vm11418_vm9, %v19669_v27, %v19764_v49  ;;  %v11421_v31 = vsel %vm11418_vm9, %v19664_v54, %v19763_v59  ;;  %v19777_v48 = vpop.permute.xlu1 %19776  ;;  %13991 = vmatmul.mubr.msk.f32.gmra.mrb[4].mxu0 %vm665_vm1, %v28026_v61  ;;  %v11422_v20 = vsel %vm11418_vm9, %v19763_v59, %v19743_v12  ;;  %v11427_v55 = vsel %vm11418_vm9, %v19764_v49, %v19748_v21 }
 0x553   : > { %v16336_v24 = vpack.c.bf16 %v11426_v28, %v11421_v31  ;;  %v19779_v6 = vunpack.i.h.bf16 %v19777_v48  ;;  %v19778_v16 = vunpack.i.l.bf16 %v19777_v48  ;;  %v19772_v15 = vpop.permute.xlu0 %19771  ;;  %v16334_v29 = vpack.c.bf16 %v11427_v55, %v11422_v20  ;;  %11596 = vmatprep.mubr.f32.mxu0 %v29023_v41  ;;  %16356 = vmatprep.subr.bf16.mxu0 %v29038_v8 }
 0x554   : > { %v11443_v27 = vsel %vm11418_vm9, %v19768_v13, %v19769_v39  ;;  %v19774_v53 = vunpack.i.h.bf16 %v19772_v15  ;;  %v19773_v54 = vunpack.i.l.bf16 %v19772_v15  ;;  %15186 = vmatmul.mubr.msk.f32.gmra.mrb[112].mxu1 %vm665_vm1, %v27841_v37 }
 0x555   : > { %v11431_v21 = vsel %vm11418_vm9, %v19679_v44, %v19778_v16  ;;  %v11436_v63 = vsel %vm11418_vm9, %v19684_v30, %v19779_v6  ;;  %16335 = vmatprep.subr.bf16.mxu1 %v16334_v29  ;;  %15188 = vmatprep.mubr.msk.f32.mxu1 %vm20680_vm2, %v29023_v41  ;;  %v11432_v42 = vsel %vm11418_vm9, %v19778_v16, %v19753_v11 }
 0x556   : > { %v16340_v0 = vpack.c.bf16 %v11436_v63, %v11431_v21  ;;  %v11448_v12 = vsel %vm11418_vm9, %v19773_v54, %v19774_v53  ;;  %16337 = vmatpush1.bf16.msra.mxu1 %v16336_v24  ;;  %v19787_v51 = vpop.permute.xlu1 %19786  ;;  %13992 = vmatmul.mubr.msk.f32.gmra.mrb[6].mxu0 %vm665_vm1, %v28045_v50  ;;  %v11437_v37 = vsel %vm11418_vm9, %v19779_v6, %v19758_v36  ;;  %v12826_v21 = vld [vmem:[#allocation7 + $0x8] sm:$0xff] }
 0x557   : > { %v16357_v5 = vpack.c.bf16 %v11448_v12, %v11443_v27  ;;  %v19789_v44 = vunpack.i.h.bf16 %v19787_v51  ;;  %v19788_v56 = vunpack.i.l.bf16 %v19787_v51  ;;  %v19782_v30 = vpop.permute.xlu0 %19781  ;;  %v16338_v33 = vpack.c.bf16 %v11437_v37, %v11432_v42  ;;  %11602 = vmatprep.mubr.f32.mxu0 %v29023_v41 }
 0x558   : > { %v19784_v43 = vunpack.i.h.bf16 %v19782_v30  ;;  %v19783_v34 = vunpack.i.l.bf16 %v19782_v30  ;;  %15189 = vmatmul.mubr.msk.f32.gmra.mrb[114].mxu1 %vm665_vm1, %v27859_v58  ;;  %v20701_v37 = vmov 0  }
 0x559   : > { %v11458_v25 = vsel %vm11418_vm9, %v19788_v56, %v19789_v44  ;;  %16339 = vmatprep.subr.bf16.mxu1 %v16338_v33  ;;  %16358 = vmatpush3.bf16.msra.mxu0 %v16357_v5 }
 0x55a   : > { %v11453_v36 = vsel %vm11418_vm9, %v19783_v34, %v19784_v43  ;;  %16341 = vmatpush1.bf16.msra.mxu1 %v16340_v0  ;;  %v19797_v35 = vpop.permute.xlu1 %19796  ;;  %15191 = vmatprep.mubr.msk.f32.mxu1 %vm20680_vm2, %v29023_v41 }
 0x55b   : > { %v16360_v45 = vpack.c.bf16 %v11458_v25, %v11453_v36  ;;  %v19798_v11 = vunpack.i.l.bf16 %v19797_v35  ;;  %v19792_v22 = vpop.permute.xlu0 %19791  ;;  %13993 = vmatmul.mubr.msk.f32.gmra.mrb[8].mxu0 %vm665_vm1, %v28069_v2  ;;  %16359 = vmatprep.subr.bf16.mxu0 %v29038_v8  ;;  %v19799_v58 = vunpack.i.h.bf16 %v19797_v35  ;;  %v12828_v36 = vld [vmem:[#allocation7 + $0x18] sm:$0xff] }
 0x55c   : > { %v19794_v57 = vunpack.i.h.bf16 %v19792_v22  ;;  %v19793_v17 = vunpack.i.l.bf16 %v19792_v22  ;;  %15192 = vmatmul.mubr.msk.f32.gmra.mrb[116].mxu1 %vm665_vm1, %v27886_v18  ;;  %15213 = vmatprep.mubr.msk.f32.mxu0 %vm20680_vm2, %v29023_v41 }
 0x55d   : > { %16361 = vmatpush3.bf16.msra.mxu0 %v16360_v45  ;;  %15194 = vmatprep.mubr.msk.f32.mxu1 %vm20680_vm2, %v29023_v41  ;;  %v11452_v59 = vsel %vm11418_vm9, %v19798_v11, %v19783_v34  ;;  %v11451_v55 = vsel %vm11418_vm9, %v19719_v46, %v19798_v11  ;;  %v12827_v45 = vld [vmem:[#allocation7 + $0x10] sm:$0xff] }
 0x55e   : > { %v11441_v10 = vsel %vm11418_vm9, %v19699_v3, %v19793_v17  ;;  %v11446_v39 = vsel %vm11418_vm9, %v19704_v60, %v19794_v57  ;;  %v28090_v49 = vpop.permute.xlu1 %19806  ;;  %v11442_v18 = vsel %vm11418_vm9, %v19793_v17, %v19768_v13  ;;  %v11447_v3 = vsel %vm11418_vm9, %v19794_v57, %v19773_v54  ;;  %20040 = vset.pattern.permute.xlu0 %v20701_v37 }
 0x55f   : > { %v16344_v28 = vpack.c.bf16 %v11446_v39, %v11441_v10  ;;  %v19809_v31 = vunpack.i.h.bf16 %v28090_v49  ;;  %v19808_v48 = vunpack.i.l.bf16 %v28090_v49  ;;  %v28098_v23 = vpop.permute.xlu0 %19801  ;;  %v16342_v26 = vpack.c.bf16 %v11447_v3, %v11442_v18  ;;  %20041 = vset.pattern.permute.xlu1 %v20701_v37 }
 0x560   : > { %v19804_v19 = vunpack.i.h.bf16 %v28098_v23  ;;  %v19803_v60 = vunpack.i.l.bf16 %v28098_v23  ;;  %15195 = vmatmul.mubr.msk.f32.gmra.mrb[118].mxu1 %vm665_vm1, %v27912_v52  ;;  %15214 = vmatmul.mubr.msk.f32.vlgmr.msra.gmra.mrb[120].mxu0 %vm665_vm1, %v27997_v14  ;;  %v11457_v13 = vsel %vm11418_vm9, %v19799_v58, %v19788_v56  ;;  %v11456_v52 = vsel %vm11418_vm9, %v19724_v47, %v19799_v58  ;;  %v12825_v47 = vld [vmem:[#allocation7] sm:$0xff] }
 0x561   : > { %15216 = vmatprep.mubr.msk.f32.mxu0 %vm20680_vm2, %v29023_v41  ;;  %v11928_v20 = vsel %vm11921_vm10, %v19808_v48, %v19809_v31  ;;  %11673 = vmatprep.mubr.f32.mxu1 %v29023_v41  ;;  %v16346_v16 = vpack.c.bf16 %v11457_v13, %v11452_v59  ;;  %v16348_v54 = vpack.c.bf16 %v11456_v52, %v11451_v55 }
 0x562   : > { %16343 = vmatprep.subr.bf16.mxu1 %v16342_v26  ;;  %v28120_v24 = vpop.permute.xlu1 %19816  ;;  %v9255_v6 = vpop.f32.mrb[90].mxu1  ;;  %v11923_v15 = vsel %vm11921_vm10, %v19803_v60, %v19804_v19  ;;  %12832 = vperm.xlu0 %20040, %v12825_v47   ;;  %v12829_v26 = vld [vmem:[#allocation7 + $0x20] sm:$0xff] }
 0x563   : > { %16345 = vmatpush1.bf16.msra.mxu1 %v16344_v28  ;;  %v19812_v29 = vpop.permute.xlu0 %19811  ;;  %v28126_v27 = vadd.f32 %v9255_v6, %v27712_v4  ;;  %v16362_v62 = vpack.c.bf16 %v11928_v20, %v11923_v15  ;;  %v15060_v46 = vpop.f32.mrb[91].mxu1  ;;  %v19819_v63 = vunpack.i.h.bf16 %v28120_v24  ;;  %v19818_v4 = vunpack.i.l.bf16 %v28120_v24  ;;  %12837 = vperm.xlu1 %20041, %v12826_v21  }
 0x564   : > { %v19814_v53 = vunpack.i.h.bf16 %v19812_v29  ;;  %v19813_v32 = vunpack.i.l.bf16 %v19812_v29  ;;  %16347 = vmatprep.subr.bf16.mxu1 %v16346_v16  ;;  %15217 = vmatmul.mubr.msk.f32.gmra.mrb[122].mxu0 %vm665_vm1, %v28016_v38 }
 0x565   : > { %16363 = vmatprep.subr.bf16.mxu0 %v16362_v62  ;;  %15219 = vmatprep.mubr.msk.f32.mxu0 %vm20680_vm2, %v29023_v41  ;;  %v11933_v58 = vsel %vm11921_vm10, %v19818_v4, %v19819_v63 }
 0x566   : > { %v11927_v42 = vsel %vm11921_vm10, %v19814_v53, %v19808_v48  ;;  %v11922_v0 = vsel %vm11921_vm10, %v19813_v32, %v19803_v60  ;;  %v19827_v12 = vpop.permute.xlu1 %19826  ;;  %v9260_v51 = vpop.f32.mrb[92].mxu1  ;;  %12847 = vperm.xlu0 %20040, %v12828_v36  }
 0x567   : > { %v16364_v5 = vpack.c.bf16 %v11927_v42, %v11922_v0  ;;  %16349 = vmatpush1.bf16.msra.mxu1 %v16348_v54  ;;  %v19829_v44 = vunpack.i.h.bf16 %v19827_v12  ;;  %v19828_v56 = vunpack.i.l.bf16 %v19827_v12  ;;  %v28136_v30 = vpop.permute.xlu0 %19821  ;;  %v28139_v33 = vadd.f32 %v9260_v51, %v27731_v9  ;;  %v15063_v43 = vpop.f32.mrb[93].mxu1  ;;  %12842 = vperm.xlu1 %20041, %v12827_v45  }
 0x568   : > { %v19824_v34 = vunpack.i.h.bf16 %v28136_v30  ;;  %v19823_v25 = vunpack.i.l.bf16 %v28136_v30  ;;  %15220 = vmatmul.mubr.msk.f32.gmra.mrb[124].mxu0 %vm665_vm1, %v28026_v61 }
 0x569   : > { %v11932_v35 = vsel %vm11921_vm10, %v19828_v56, %v19818_v4  ;;  %16365 = vmatpush1.bf16.msra.mxu0 %v16364_v5  ;;  %15222 = vmatprep.mubr.msk.f32.mxu0 %vm20680_vm2, %v29023_v41 }
 0x56a   : > { %v11937_v9 = vsel %vm11921_vm10, %v19829_v44, %v19823_v25  ;;  %v28149_v11 = vpop.permute.xlu1 %19836  ;;  %v9265_v22 = vpop.f32.mrb[94].mxu1  ;;  %v11938_v57 = vsel %vm11921_vm10, %v19823_v25, %v19824_v34  ;;  %13994 = vmatmul.mubr.msk.f32.vlgmr.msra.gmra.mrb[0].mxu1 %vm665_vm1, %v27997_v14 }
 0x56b   : > { %v16368_v17 = vpack.c.bf16 %v11937_v9, %v11932_v35  ;;  %v19839_v10 = vunpack.i.h.bf16 %v28149_v11  ;;  %v19838_v39 = vunpack.i.l.bf16 %v28149_v11  ;;  %v28161_v18 = vpop.permute.xlu0 %19831  ;;  %v28164_v59 = vadd.f32 %v9265_v22, %v27759_v7  ;;  %v15066_v28 = vpop.f32.mrb[95].mxu1  ;;  %11679 = vmatprep.mubr.f32.mxu1 %v29023_v41  ;;  %12852 = vperm.xlu1 %20041, %v12829_v26  }
 0x56c   : > { %v19834_v48 = vunpack.i.h.bf16 %v28161_v18  ;;  %v19833_v3 = vunpack.i.l.bf16 %v28161_v18  ;;  %15223 = vmatmul.mubr.msk.f32.gmra.mrb[126].mxu0 %vm665_vm1, %v28045_v50  ;;  %v16366_v14 = vpack.c.bf16 %v11938_v57, %v11933_v58 }
 0x56d   : > { %v11929_v60 = vsel %vm11921_vm10, %v19809_v31, %v19838_v39  ;;  %15225 = vmatprep.mubr.msk.f32.mxu0 %vm20680_vm2, %v29023_v41  ;;  %v11930_v7 = vsel %vm11921_vm10, %v19838_v39, %v19839_v10 }
 0x56e   : > { %v11924_v13 = vsel %vm11921_vm10, %v19804_v19, %v19833_v3  ;;  %16367 = vmatprep.subr.bf16.mxu0 %v16366_v14  ;;  %v28182_v20 = vpop.permute.xlu1 %19846  ;;  %v9270_v55 = vpop.f32.mrb[96].mxu1  ;;  %v11925_v49 = vsel %vm11921_vm10, %v19833_v3, %v19834_v48  ;;  %13995 = vmatmul.mubr.msk.f32.gmra.mrb[2].mxu1 %vm665_vm1, %v28016_v38 }
 0x56f   : > { %v16380_v31 = vpack.c.bf16 %v11929_v60, %v11924_v13  ;;  %16369 = vmatpush1.bf16.msra.mxu0 %v16368_v17  ;;  %v19849_v52 = vunpack.i.h.bf16 %v28182_v20  ;;  %v19848_v6 = vunpack.i.l.bf16 %v28182_v20  ;;  %v28191_v23 = vpop.permute.xlu0 %19841  ;;  %v28194_v19 = vadd.f32 %v9270_v55, %v27780_v40  ;;  %v15069_v16 = vpop.f32.mrb[97].mxu1  ;;  %11685 = vmatprep.mubr.f32.mxu1 %v29023_v41 }
 0x570   : > { %v19844_v15 = vunpack.i.h.bf16 %v28191_v23  ;;  %v19843_v29 = vunpack.i.l.bf16 %v28191_v23  ;;  %15226 = vmatmul.mubr.msk.f32.gmra.mrb[128].mxu0 %vm665_vm1, %v28069_v2  ;;  %v16378_v38 = vpack.c.bf16 %v11930_v7, %v11925_v49 }
 0x571   : > { %v11948_v62 = vsel %vm11921_vm10, %v19848_v6, %v19849_v52  ;;  %12081 = vmatprep.mubr.f32.mxu0 %v29023_v41 }
 0x572   : > { %16379 = vmatprep.subr.bf16.mxu1 %v16378_v38  ;;  %v28205_v40 = vpop.permute.xlu1 %19856  ;;  %v9275_v46 = vpop.f32.mrb[98].mxu1  ;;  %v11943_v53 = vsel %vm11921_vm10, %v19843_v29, %v19844_v15  ;;  %13996 = vmatmul.mubr.msk.f32.gmra.mrb[4].mxu1 %vm665_vm1, %v28026_v61 }
 0x573   : > { %16381 = vmatpush1.bf16.msra.mxu1 %v16380_v31  ;;  %v19852_v32 = vpop.permute.xlu0 %19851  ;;  %v28213_v47 = vadd.f32 %v9275_v46, %v27807_v1  ;;  %v9758_v54 = vpop.f32.mrb[100].mxu0  ;;  %v16370_v21 = vpack.c.bf16 %v11948_v62, %v11943_v53  ;;  %11691 = vmatprep.mubr.f32.mxu1 %v29023_v41  ;;  %v19859_v37 = vunpack.i.h.bf16 %v28205_v40  ;;  %v19858_v61 = vunpack.i.l.bf16 %v28205_v40 }
 0x574   : > { %v19854_v4 = vunpack.i.h.bf16 %v19852_v32  ;;  %v19853_v42 = vunpack.i.l.bf16 %v19852_v32  ;;  %v28217_v0 = vadd.f32 %v9758_v54, %v28126_v27  ;;  %v15091_v12 = vpop.f32.mrb[101].mxu0  ;;  %v15072_v51 = vpop.f32.mrb[99].mxu1 }
 0x575   : > { %16371 = vmatprep.subr.bf16.mxu0 %v16370_v21  ;;  %v11934_v9 = vsel %vm11921_vm10, %v19819_v63, %v19858_v61  ;;  %v28284_v12 = vld [vmem:[#allocation5 + $0x398] sm:$0xff] }
 0x576   : > { %v11947_v5 = vsel %vm11921_vm10, %v19854_v4, %v19848_v6  ;;  %v11942_v1 = vsel %vm11921_vm10, %v19853_v42, %v19843_v29  ;;  %v28223_v44 = vpop.permute.xlu1 %19866  ;;  %13997 = vmatmul.mubr.msk.f32.gmra.mrb[6].mxu1 %vm665_vm1, %v28045_v50  ;;  %v11935_v50 = vsel %vm11921_vm10, %v19858_v61, %v19859_v37 }
 0x577   : > { %v16372_v56 = vpack.c.bf16 %v11947_v5, %v11942_v1  ;;  %v28227_v43 = vpop.permute.xlu0 %19861  ;;  %v9763_v27 = vpop.f32.mrb[102].mxu0  ;;  %11697 = vmatprep.mubr.f32.mxu1 %v29023_v41  ;;  %v19869_v22 = vunpack.i.h.bf16 %v28223_v44  ;;  %v19868_v58 = vunpack.i.l.bf16 %v28223_v44 }
 0x578   : > { %v19864_v25 = vunpack.i.h.bf16 %v28227_v43  ;;  %v19863_v36 = vunpack.i.l.bf16 %v28227_v43  ;;  %v28233_v35 = vadd.f32 %v9763_v27, %v28139_v33  ;;  %v15094_v45 = vpop.f32.mrb[103].mxu0 }
 0x579   : > { %16373 = vmatpush1.bf16.msra.mxu0 %v16372_v56  ;;  %v11953_v55 = vsel %vm11921_vm10, %v19868_v58, %v19869_v22 }
 0x57a   : > { %v11939_v57 = vsel %vm11921_vm10, %v19824_v34, %v19863_v36  ;;  %v19877_v33 = vpop.permute.xlu1 %19876  ;;  %v11940_v24 = vsel %vm11921_vm10, %v19863_v36, %v19864_v25  ;;  %13998 = vmatmul.mubr.msk.f32.gmra.mrb[8].mxu1 %vm665_vm1, %v28069_v2 }
 0x57b   : > { %v16384_v63 = vpack.c.bf16 %v11939_v57, %v11934_v9  ;;  %v19879_v17 = vunpack.i.h.bf16 %v19877_v33  ;;  %v19878_v39 = vunpack.i.l.bf16 %v19877_v33  ;;  %v19872_v28 = vpop.permute.xlu0 %19871  ;;  %v9768_v3 = vpop.f32.mrb[104].mxu0  ;;  %v16382_v14 = vpack.c.bf16 %v11940_v24, %v11935_v50  ;;  %12176 = vmatprep.mubr.f32.mxu1 %v29023_v41  ;;  %v28308_v50 = vld [vmem:[#allocation5 + $0x3a0] sm:$0xff] }
 0x57c   : > { %v19874_v60 = vunpack.i.h.bf16 %v19872_v28  ;;  %v19873_v30 = vunpack.i.l.bf16 %v19872_v28  ;;  %v28253_v34 = vadd.f32 %v9768_v3, %v28164_v59  ;;  %v15097_v7 = vpop.f32.mrb[105].mxu0 }
 0x57d   : > { %v11952_v26 = vsel %vm11921_vm10, %v19878_v39, %v19868_v58  ;;  %16383 = vmatprep.subr.bf16.mxu1 %v16382_v14 }
 0x57e   : > { %v11957_v13 = vsel %vm11921_vm10, %v19879_v17, %v19873_v30  ;;  %16385 = vmatpush1.bf16.msra.mxu1 %v16384_v63  ;;  %v28257_v2 = vpop.permute.xlu1 %19886  ;;  %v11958_v49 = vsel %vm11921_vm10, %v19873_v30, %v19874_v60  ;;  %v28328_v30 = vld [vmem:[#allocation5 + $0x3a8] sm:$0xff] }
 0x57f   : > { %v16376_v31 = vpack.c.bf16 %v11957_v13, %v11952_v26  ;;  %v19889_v6 = vunpack.i.h.bf16 %v28257_v2  ;;  %v19888_v16 = vunpack.i.l.bf16 %v28257_v2  ;;  %v28263_v59 = vpop.permute.xlu0 %19881  ;;  %v9773_v29 = vpop.f32.mrb[106].mxu0  ;;  %v16374_v38 = vpack.c.bf16 %v11958_v49, %v11953_v55 }
 0x580   : > { %v19884_v62 = vunpack.i.h.bf16 %v28263_v59  ;;  %v19883_v46 = vunpack.i.l.bf16 %v28263_v59  ;;  %v28268_v53 = vadd.f32 %v9773_v29, %v28194_v19  ;;  %v15100_v32 = vpop.f32.mrb[107].mxu0 }
 0x581   : > { %v11949_v54 = vsel %vm11921_vm10, %v19849_v52, %v19888_v16  ;;  %16375 = vmatprep.subr.bf16.mxu0 %v16374_v38  ;;  %v11950_v21 = vsel %vm11921_vm10, %v19888_v16, %v19889_v6 }
 0x582   : > { %v11944_v4 = vsel %vm11921_vm10, %v19844_v15, %v19883_v46  ;;  %16377 = vmatpush1.bf16.msra.mxu0 %v16376_v31  ;;  %v28279_v42 = vpop.permute.xlu1 %19896  ;;  %v11945_v19 = vsel %vm11921_vm10, %v19883_v46, %v19884_v62 }
 0x583   : > { %v16388_v20 = vpack.c.bf16 %v11949_v54, %v11944_v4  ;;  %v19899_v52 = vunpack.i.h.bf16 %v28279_v42  ;;  %v19898_v51 = vunpack.i.l.bf16 %v28279_v42  ;;  %v28288_v61 = vpop.permute.xlu0 %19891  ;;  %v9778_v5 = vpop.f32.mrb[108].mxu0  ;;  %v16386_v23 = vpack.c.bf16 %v11950_v21, %v11945_v19  ;;  %v28342_v54 = vld [vmem:[#allocation5 + $0x3b0] sm:$0xff] }
 0x584   : > { %v19894_v15 = vunpack.i.h.bf16 %v28288_v61  ;;  %v19893_v1 = vunpack.i.l.bf16 %v28288_v61  ;;  %v28293_v44 = vadd.f32 %v9778_v5, %v28213_v47  ;;  %v15103_v56 = vpop.f32.mrb[109].mxu0  ;;  %v28441_v61 = vld [vmem:[#allocation5 + $0x3c8] sm:$0xff] }
 0x585   : > { %v11959_v27 = vsel %vm11921_vm10, %v19874_v60, %v19898_v51  ;;  %16387 = vmatprep.subr.bf16.mxu1 %v16386_v23  ;;  %v11960_v36 = vsel %vm11921_vm10, %v19898_v51, %v19899_v52  ;;  %14004 = vmatmul.mubr.msk.f32.vlgmr.msra.gmra.mrb[0].mxu0 %vm665_vm1, %v28284_v12 }
 0x586   : > { %v11954_v45 = vsel %vm11921_vm10, %v19869_v22, %v19893_v1  ;;  %16389 = vmatpush1.bf16.msra.mxu1 %v16388_v20  ;;  %v28302_v9 = vpop.permute.xlu1 %19906  ;;  %v11955_v47 = vsel %vm11921_vm10, %v19893_v1, %v19894_v15  ;;  %12087 = vmatprep.mubr.f32.mxu0 %v29023_v41 }
 0x587   : > { %v16392_v58 = vpack.c.bf16 %v11959_v27, %v11954_v45  ;;  %v19909_v57 = vunpack.i.h.bf16 %v28302_v9  ;;  %v19908_v33 = vunpack.i.l.bf16 %v28302_v9  ;;  %v28312_v24 = vpop.permute.xlu0 %19901  ;;  %v16390_v22 = vpack.c.bf16 %v11960_v36, %v11955_v47  ;;  %v28362_v47 = vld [vmem:[#allocation5 + $0x3b8] sm:$0xff]  ;;  %v28456_v9 = vld [vmem:[#allocation5 + $0x3d0] sm:$0xff] }
 0x588   : > { %v19904_v63 = vunpack.i.h.bf16 %v28312_v24  ;;  %v19903_v17 = vunpack.i.l.bf16 %v28312_v24 }
 0x589   : > { %16391 = vmatprep.subr.bf16.mxu1 %v16390_v22  ;;  %v12431_v39 = vsel %vm12424_vm11, %v19908_v33, %v19909_v57  ;;  %14005 = vmatmul.mubr.msk.f32.gmra.mrb[2].mxu0 %vm665_vm1, %v28308_v50 }
 0x58a   : > { %16393 = vmatpush1.bf16.msra.mxu1 %v16392_v58  ;;  %v28321_v28 = vpop.permute.xlu1 %19916  ;;  %v12426_v3 = vsel %vm12424_vm11, %v19903_v17, %v19904_v63  ;;  %12093 = vmatprep.mubr.f32.mxu0 %v29023_v41 }
 0x58b   : > { %v19912_v14 = vpop.permute.xlu0 %19911  ;;  %v16406_v60 = vpack.c.bf16 %v12431_v39, %v12426_v3  ;;  %16394 = vmatprep.subr.bf16.mxu1 %v29038_v8  ;;  %v19919_v13 = vunpack.i.h.bf16 %v28321_v28  ;;  %v19918_v55 = vunpack.i.l.bf16 %v28321_v28 }
 0x58c   : > { %v19914_v7 = vunpack.i.h.bf16 %v19912_v14  ;;  %v19913_v26 = vunpack.i.l.bf16 %v19912_v14 }
 0x58d   : > { %16407 = vmatprep.subr.bf16.mxu0 %v16406_v60  ;;  %14009 = vmatmul.mubr.msk.f32.vlgmr.msra.gmra.mrb[0].mxu1 %vm665_vm1, %v28284_v12  ;;  %v12436_v5 = vsel %vm12424_vm11, %v19918_v55, %v19919_v13 }
 0x58e   : > { %v12430_v49 = vsel %vm12424_vm11, %v19914_v7, %v19908_v33  ;;  %v12425_v31 = vsel %vm12424_vm11, %v19913_v26, %v19903_v17  ;;  %v19927_v16 = vpop.permute.xlu1 %19926  ;;  %14006 = vmatmul.mubr.msk.f32.gmra.mrb[4].mxu0 %vm665_vm1, %v28328_v30  ;;  %12182 = vmatprep.mubr.f32.mxu1 %v29023_v41 }
 0x58f   : > { %v16408_v29 = vpack.c.bf16 %v12430_v49, %v12425_v31  ;;  %v19929_v38 = vunpack.i.h.bf16 %v19927_v16  ;;  %v19928_v46 = vunpack.i.l.bf16 %v19927_v16  ;;  %v28339_v32 = vpop.permute.xlu0 %19921  ;;  %12099 = vmatprep.mubr.f32.mxu0 %v29023_v41 }
 0x590   : > { %v19924_v21 = vunpack.i.h.bf16 %v28339_v32  ;;  %v19923_v4 = vunpack.i.l.bf16 %v28339_v32 }
 0x591   : > { %v12435_v19 = vsel %vm12424_vm11, %v19928_v46, %v19918_v55  ;;  %16409 = vmatpush1.bf16.msra.mxu0 %v16408_v29  ;;  %14010 = vmatmul.mubr.msk.f32.gmra.mrb[2].mxu1 %vm665_vm1, %v28308_v50 }
 0x592   : > { %v12440_v20 = vsel %vm12424_vm11, %v19929_v38, %v19923_v4  ;;  %v28350_v51 = vpop.permute.xlu1 %19936  ;;  %v12441_v23 = vsel %vm12424_vm11, %v19923_v4, %v19924_v21  ;;  %14007 = vmatmul.mubr.msk.f32.gmra.mrb[6].mxu0 %vm665_vm1, %v28342_v54  ;;  %12188 = vmatprep.mubr.f32.mxu1 %v29023_v41 }
 0x593   : > { %v16412_v1 = vpack.c.bf16 %v12440_v20, %v12435_v19  ;;  %v19932_v56 = vpop.permute.xlu0 %19931  ;;  %v16410_v27 = vpack.c.bf16 %v12441_v23, %v12436_v5  ;;  %12105 = vmatprep.mubr.f32.mxu0 %v29023_v41  ;;  %v19939_v58 = vunpack.i.h.bf16 %v28350_v51  ;;  %v19938_v33 = vunpack.i.l.bf16 %v28350_v51  ;;  %v28495_v51 = vld [vmem:[#allocation5 + $0x3e0] sm:$0xff] }
 0x594   : > { %v19934_v36 = vunpack.i.h.bf16 %v19932_v56  ;;  %v19933_v45 = vunpack.i.l.bf16 %v19932_v56 }
 0x595   : > { %16411 = vmatprep.subr.bf16.mxu0 %v16410_v27  ;;  %14011 = vmatmul.mubr.msk.f32.gmra.mrb[4].mxu1 %vm665_vm1, %v28328_v30  ;;  %v12446_v55 = vsel %vm12424_vm11, %v19938_v33, %v19939_v58 }
 0x596   : > { %v11931_v22 = vsel %vm11921_vm10, %v19839_v10, %v19934_v36  ;;  %v11926_v17 = vsel %vm11921_vm10, %v19834_v48, %v19933_v45  ;;  %16413 = vmatpush1.bf16.msra.mxu0 %v16412_v1  ;;  %v19947_v39 = vpop.permute.xlu1 %19946  ;;  %12194 = vmatprep.mubr.f32.mxu1 %v29023_v41 }
 0x597   : > { %v16395_v3 = vpack.c.bf16 %v11931_v22, %v11926_v17  ;;  %v19949_v14 = vunpack.i.h.bf16 %v19947_v39  ;;  %v19948_v60 = vunpack.i.l.bf16 %v19947_v39  ;;  %v28375_v7 = vpop.permute.xlu0 %19941  ;;  %14008 = vmatmul.mubr.msk.f32.gmra.mrb[8].mxu0 %vm665_vm1, %v28362_v47 }
 0x598   : > { %v19944_v11 = vunpack.i.h.bf16 %v28375_v7  ;;  %v19943_v10 = vunpack.i.l.bf16 %v28375_v7  ;;  %12584 = vmatprep.mubr.f32.mxu0 %v29023_v41 }
 0x599   : > { %v12445_v18 = vsel %vm12424_vm11, %v19948_v60, %v19938_v33  ;;  %16396 = vmatpush3.bf16.msra.mxu1 %v16395_v3 }
 0x59a   : > { %v12450_v48 = vsel %vm12424_vm11, %v19949_v14, %v19943_v10  ;;  %v28384_v26 = vpop.permute.xlu1 %19956  ;;  %v12451_v49 = vsel %vm12424_vm11, %v19943_v10, %v19944_v11  ;;  %16397 = vmatprep.subr.bf16.mxu1 %v29038_v8  ;;  %14012 = vmatmul.mubr.msk.f32.gmra.mrb[6].mxu1 %vm665_vm1, %v28342_v54 }
 0x59b   : > { %v16416_v31 = vpack.c.bf16 %v12450_v48, %v12445_v18  ;;  %v19952_v16 = vpop.permute.xlu0 %19951  ;;  %v16414_v29 = vpack.c.bf16 %v12451_v49, %v12446_v55  ;;  %12200 = vmatprep.mubr.f32.mxu1 %v29023_v41  ;;  %v19959_v4 = vunpack.i.h.bf16 %v28384_v26  ;;  %v19958_v19 = vunpack.i.l.bf16 %v28384_v26 }
 0x59c   : > { %v19954_v38 = vunpack.i.h.bf16 %v19952_v16  ;;  %v19953_v46 = vunpack.i.l.bf16 %v19952_v16 }
 0x59d   : > { %16415 = vmatprep.subr.bf16.mxu0 %v16414_v29  ;;  %v12456_v33 = vsel %vm12424_vm11, %v19958_v19, %v19959_v4 }
 0x59e   : > { %v11936_v20 = vsel %vm11921_vm10, %v19859_v37, %v19953_v46  ;;  %v11941_v5 = vsel %vm11921_vm10, %v19864_v25, %v19954_v38  ;;  %16417 = vmatpush1.bf16.msra.mxu0 %v16416_v31  ;;  %v19967_v23 = vpop.permute.xlu1 %19966  ;;  %14013 = vmatmul.mubr.msk.f32.gmra.mrb[8].mxu1 %vm665_vm1, %v28362_v47  ;;  %v28427_v31 = vld [vmem:[#allocation5 + $0x3c0] sm:$0xff] }
 0x59f   : > { %v16398_v1 = vpack.c.bf16 %v11941_v5, %v11936_v20  ;;  %v19969_v56 = vunpack.i.h.bf16 %v19967_v23  ;;  %v19968_v27 = vunpack.i.l.bf16 %v19967_v23  ;;  %v28406_v36 = vpop.permute.xlu0 %19961  ;;  %15244 = vmatprep.mubr.msk.f32.mxu1 %vm20680_vm2, %v29023_v41 }
 0x5a0   : > { %v19964_v40 = vunpack.i.h.bf16 %v28406_v36  ;;  %v19963_v37 = vunpack.i.l.bf16 %v28406_v36 }
 0x5a1   : > { %v12455_v43 = vsel %vm12424_vm11, %v19968_v27, %v19958_v19  ;;  %16399 = vmatpush3.bf16.msra.mxu1 %v16398_v1 }
 0x5a2   : > { %v12460_v25 = vsel %vm12424_vm11, %v19969_v56, %v19963_v37  ;;  %v19977_v45 = vpop.permute.xlu1 %19976  ;;  %v12461_v22 = vsel %vm12424_vm11, %v19963_v37, %v19964_v40  ;;  %16400 = vmatprep.subr.bf16.mxu1 %v29038_v8 }
 0x5a3   : > { %v16420_v17 = vpack.c.bf16 %v12460_v25, %v12455_v43  ;;  %v19972_v39 = vpop.permute.xlu0 %19971  ;;  %v16418_v3 = vpack.c.bf16 %v12461_v22, %v12456_v33  ;;  %v19979_v14 = vunpack.i.h.bf16 %v19977_v45  ;;  %v19978_v60 = vunpack.i.l.bf16 %v19977_v45 }
 0x5a4   : > { %v19974_v10 = vunpack.i.h.bf16 %v19972_v39  ;;  %v19973_v18 = vunpack.i.l.bf16 %v19972_v39 }
 0x5a5   : > { %16419 = vmatprep.subr.bf16.mxu0 %v16418_v3  ;;  %v11956_v2 = vsel %vm11921_vm10, %v19894_v15, %v19978_v60 }
 0x5a6   : > { %v11951_v48 = vsel %vm11921_vm10, %v19889_v6, %v19974_v10  ;;  %v11946_v55 = vsel %vm11921_vm10, %v19884_v62, %v19973_v18  ;;  %16421 = vmatpush1.bf16.msra.mxu0 %v16420_v17  ;;  %v19987_v49 = vpop.permute.xlu1 %19986  ;;  %v11961_v6 = vsel %vm11921_vm10, %v19899_v52, %v19979_v14 }
 0x5a7   : > { %v16401_v16 = vpack.c.bf16 %v11951_v48, %v11946_v55  ;;  %v19989_v29 = vunpack.i.h.bf16 %v19987_v49  ;;  %v19988_v38 = vunpack.i.l.bf16 %v19987_v49  ;;  %v19982_v46 = vpop.permute.xlu0 %19981  ;;  %16438 = vmatprep.subr.bf16.mxu0 %v29038_v8  ;;  %v16404_v42 = vpack.c.bf16 %v11961_v6, %v11956_v2 }
 0x5a8   : > { %v19984_v59 = vunpack.i.h.bf16 %v19982_v46  ;;  %v19983_v62 = vunpack.i.l.bf16 %v19982_v46 }
 0x5a9   : > { %16402 = vmatpush3.bf16.msra.mxu1 %v16401_v16  ;;  %14019 = vmatmul.mubr.msk.f32.vlgmr.msra.gmra.mrb[0].mxu0 %vm665_vm1, %v28427_v31  ;;  %v12433_v19 = vsel %vm12424_vm11, %v19988_v38, %v19989_v29  ;;  %v12432_v56 = vsel %vm12424_vm11, %v19909_v57, %v19988_v38 }
 0x5aa   : > { %v19997_v20 = vpop.permute.xlu1 %19996  ;;  %16403 = vmatprep.subr.bf16.mxu1 %v29038_v8  ;;  %12590 = vmatprep.mubr.f32.mxu0 %v29023_v41  ;;  %v12428_v15 = vsel %vm12424_vm11, %v19983_v62, %v19984_v59  ;;  %v12427_v27 = vsel %vm12424_vm11, %v19904_v63, %v19983_v62 }
 0x5ab   : > { %v19999_v5 = vunpack.i.h.bf16 %v19997_v20  ;;  %v19998_v52 = vunpack.i.l.bf16 %v19997_v20  ;;  %v19992_v23 = vpop.permute.xlu0 %19991  ;;  %v16422_v1 = vpack.c.bf16 %v12433_v19, %v12428_v15  ;;  %v16424_v24 = vpack.c.bf16 %v12432_v56, %v12427_v27 }
 0x5ac   : > { %v19994_v37 = vunpack.i.h.bf16 %v19992_v23  ;;  %v19993_v43 = vunpack.i.l.bf16 %v19992_v23 }
 0x5ad   : > { %16405 = vmatpush3.bf16.msra.mxu1 %v16404_v42  ;;  %14020 = vmatmul.mubr.msk.f32.gmra.mrb[2].mxu0 %vm665_vm1, %v28441_v61  ;;  %v12443_v25 = vsel %vm12424_vm11, %v19998_v52, %v19999_v5  ;;  %v12442_v63 = vsel %vm12424_vm11, %v19924_v21, %v19998_v52 }
 0x5ae   : > { %16423 = vmatprep.subr.bf16.mxu1 %v16422_v1  ;;  %v28453_v45 = vpop.permute.xlu1 %20006  ;;  %12596 = vmatprep.mubr.f32.mxu0 %v29023_v41  ;;  %v12438_v57 = vsel %vm12424_vm11, %v19993_v43, %v19994_v37  ;;  %v12437_v17 = vsel %vm12424_vm11, %v19919_v13, %v19993_v43  ;;  %v28475_v13 = vld [vmem:[#allocation5 + $0x3d8] sm:$0xff] }
 0x5af   : > { %v20002_v33 = vpop.permute.xlu0 %20001  ;;  %v16426_v22 = vpack.c.bf16 %v12443_v25, %v12438_v57  ;;  %v20009_v39 = vunpack.i.h.bf16 %v28453_v45  ;;  %v20008_v60 = vunpack.i.l.bf16 %v28453_v45  ;;  %v16428_v10 = vpack.c.bf16 %v12442_v63, %v12437_v17  ;;  %v13046_v17 = vld [vmem:[#allocation8 + $0x80] sm:$0xff] }
 0x5b0   : > { %v20004_v3 = vunpack.i.h.bf16 %v20002_v33  ;;  %v20003_v14 = vunpack.i.l.bf16 %v20002_v33  ;;  %15245 = vmatmul.mubr.msk.f32.vlgmr.msra.gmra.mrb[120].mxu1 %vm665_vm1, %v28284_v12 }
 0x5b1   : > { %14021 = vmatmul.mubr.msk.f32.gmra.mrb[4].mxu0 %vm665_vm1, %v28456_v9  ;;  %16425 = vmatpush1.bf16.msra.mxu1 %v16424_v24  ;;  %v12447_v38 = vsel %vm12424_vm11, %v19939_v58, %v20008_v60 }
 0x5b2   : > { %v12434_v32 = vsel %vm12424_vm11, %v19989_v29, %v20004_v3  ;;  %v12429_v21 = vsel %vm12424_vm11, %v19984_v59, %v20003_v14  ;;  %16427 = vmatprep.subr.bf16.mxu1 %v16426_v22  ;;  %v20017_v28 = vpop.permute.xlu1 %20016  ;;  %15247 = vmatprep.mubr.msk.f32.mxu1 %vm20680_vm2, %v29023_v41  ;;  %v12448_v29 = vsel %vm12424_vm11, %v20008_v60, %v20009_v39  ;;  %v13030_v3 = vld [vmem:[#allocation8] sm:$0xff]  ;;  %v13031_v14 = vld [vmem:[#allocation8 + $0x8] sm:$0xff]  ;;  %v13048_v60 = vld [vmem:[#allocation8 + $0x90] sm:$0xff] }
 0x5b3   : > { %v16439_v18 = vpack.c.bf16 %v12434_v32, %v12429_v21  ;;  %v20019_v12 = vunpack.i.h.bf16 %v20017_v28  ;;  %v20018_v48 = vunpack.i.l.bf16 %v20017_v28  ;;  %v20012_v55 = vpop.permute.xlu0 %20011  ;;  %12602 = vmatprep.mubr.f32.mxu0 %v29023_v41  ;;  %v13049_v32 = vld [vmem:[#allocation8 + $0x98] sm:$0xff]  ;;  %v16452_v28 = vpack.c.bf16 %v13031_v14, %v13030_v3  ;;  %v13059_v3 = vld [vmem:[#allocation8 + $0xe8] sm:$0xff]  ;;  %v13042_v14 = vld [vmem:[#allocation8 + $0x60] sm:$0xff] }
 0x5b4   : > { %v20014_v49 = vunpack.i.h.bf16 %v20012_v55  ;;  %v20013_v16 = vunpack.i.l.bf16 %v20012_v55  ;;  %15248 = vmatmul.mubr.msk.f32.gmra.mrb[122].mxu1 %vm665_vm1, %v28308_v50  ;;  %v13050_v55 = vld [vmem:[#allocation8 + $0xa0] sm:$0xff] }
 0x5b5   : > { %v12439_v46 = vsel %vm12424_vm11, %v19994_v37, %v20018_v48  ;;  %v12444_v2 = vsel %vm12424_vm11, %v19999_v5, %v20019_v12  ;;  %14022 = vmatmul.mubr.msk.f32.gmra.mrb[6].mxu0 %vm665_vm1, %v28475_v13  ;;  %16429 = vmatpush1.bf16.msra.mxu1 %v16428_v10  ;;  %v13032_v12 = vld [vmem:[#allocation8 + $0x10] sm:$0xff]  ;;  %v13033_v48 = vld [vmem:[#allocation8 + $0x18] sm:$0xff] }
 0x5b6   : > { %v16442_v6 = vpack.c.bf16 %v12444_v2, %v12439_v46  ;;  %v12452_v50 = vsel %vm12424_vm11, %v19944_v11, %v20013_v16  ;;  %16440 = vmatpush3.bf16.msra.mxu0 %v16439_v18  ;;  %v20027_v59 = vpop.permute.xlu1 %20026  ;;  %15250 = vmatprep.mubr.msk.f32.mxu1 %vm20680_vm2, %v29023_v41  ;;  %v12453_v58 = vsel %vm12424_vm11, %v20013_v16, %v20014_v49  ;;  %v13034_v2 = vld [vmem:[#allocation8 + $0x20] sm:$0xff] }
 0x5b7   : > { %v16432_v62 = vpack.c.bf16 %v12452_v50, %v12447_v38  ;;  %v20029_v19 = vunpack.i.h.bf16 %v20027_v59  ;;  %v20028_v20 = vunpack.i.l.bf16 %v20027_v59  ;;  %v20022_v15 = vpop.permute.xlu0 %20021  ;;  %12608 = vmatprep.mubr.f32.mxu0 %v29023_v41  ;;  %16441 = vmatprep.subr.bf16.mxu0 %v29038_v8  ;;  %v16430_v7 = vpack.c.bf16 %v12453_v58, %v12448_v29 }
 0x5b8   : > { %v20024_v42 = vunpack.i.h.bf16 %v20022_v15  ;;  %v20023_v11 = vunpack.i.l.bf16 %v20022_v15  ;;  %15251 = vmatmul.mubr.msk.f32.gmra.mrb[124].mxu1 %vm665_vm1, %v28328_v30 }
 0x5b9   : > { %v12462_v5 = vsel %vm12424_vm11, %v19964_v40, %v20028_v20  ;;  %14023 = vmatmul.mubr.msk.f32.gmra.mrb[8].mxu0 %vm665_vm1, %v28495_v51  ;;  %16431 = vmatprep.subr.bf16.mxu1 %v16430_v7  ;;  %v12463_v52 = vsel %vm12424_vm11, %v20028_v20, %v20029_v19 }
 0x5ba   : > { %v12457_v23 = vsel %vm12424_vm11, %v19959_v4, %v20023_v11  ;;  %16443 = vmatpush3.bf16.msra.mxu0 %v16442_v6  ;;  %16433 = vmatpush1.bf16.msra.mxu1 %v16432_v62  ;;  %v20037_v1 = vpop.permute.xlu1 %20036  ;;  %v12458_v56 = vsel %vm12424_vm11, %v20023_v11, %v20024_v42  ;;  %v13035_v6 = vld [vmem:[#allocation8 + $0x28] sm:$0xff] }
 0x5bb   : > { %v16436_v30 = vpack.c.bf16 %v12462_v5, %v12457_v23  ;;  %v20032_v27 = vpop.permute.xlu0 %20031  ;;  %15253 = vmatprep.mubr.msk.f32.mxu1 %vm20680_vm2, %v29023_v41  ;;  %v16434_v36 = vpack.c.bf16 %v12463_v52, %v12458_v56  ;;  %16444 = vmatprep.subr.bf16.mxu0 %v29038_v8  ;;  %v20039_v40 = vunpack.i.h.bf16 %v20037_v1  ;;  %v20038_v37 = vunpack.i.l.bf16 %v20037_v1 }
 0x5bc   : > { %v20034_v43 = vunpack.i.h.bf16 %v20032_v27  ;;  %v20033_v25 = vunpack.i.l.bf16 %v20032_v27  ;;  %15254 = vmatmul.mubr.msk.f32.gmra.mrb[126].mxu1 %vm665_vm1, %v28342_v54  ;;  %15275 = vmatprep.mubr.msk.f32.mxu0 %vm20680_vm2, %v29023_v41  ;;  %v16460_v50 = vpack.c.bf16 %v13035_v6, %v13034_v2  ;;  %v13053_v27 = vld [vmem:[#allocation8 + $0xb8] sm:$0xff]  ;;  %v13064_v6 = vld [vmem:[#allocation8 + $0x110] sm:$0xff] }
 0x5bd   : > { %16435 = vmatprep.subr.bf16.mxu1 %v16434_v36  ;;  %15256 = vmatprep.mubr.msk.f32.mxu1 %vm20680_vm2, %v29023_v41  ;;  %v12459_v24 = vsel %vm12424_vm11, %v20024_v42, %v20038_v37  ;;  %v12464_v63 = vsel %vm12424_vm11, %v20029_v19, %v20039_v40  ;;  %v13036_v40 = vld [vmem:[#allocation8 + $0x30] sm:$0xff]  ;;  %v13037_v37 = vld [vmem:[#allocation8 + $0x38] sm:$0xff] }
 0x5be   : > { %v12449_v26 = vsel %vm12424_vm11, %v20009_v39, %v20033_v25  ;;  %v12454_v4 = vsel %vm12424_vm11, %v20014_v49, %v20034_v43  ;;  %16437 = vmatpush1.bf16.msra.mxu1 %v16436_v30  ;;  %v16448_v45 = vpack.c.bf16 %v12464_v63, %v12459_v24  ;;  %v13047_v39 = vld [vmem:[#allocation8 + $0x88] sm:$0xff]  ;;  %v13052_v30 = vld [vmem:[#allocation8 + $0xb0] sm:$0xff]  ;;  %v16464_v43 = vpack.c.bf16 %v13037_v37, %v13036_v40  ;;  %v13089_v37 = vld [vmem:[#allocation8 + $0x1d8] sm:$0xff] }
 0x5bf   : > { %v16445_v57 = vpack.c.bf16 %v12454_v4, %v12449_v26  ;;  %v13051_v49 = vld [vmem:[#allocation8 + $0xa8] sm:$0xff]  ;;  %v16462_v36 = vpack.c.bf16 %v13053_v27, %v13052_v30  ;;  %v13038_v4 = vld [vmem:[#allocation8 + $0x40] sm:$0xff]  ;;  %v13056_v63 = vld [vmem:[#allocation8 + $0xd0] sm:$0xff] }
 0x5c0   : > { %15257 = vmatmul.mubr.msk.f32.gmra.mrb[128].mxu1 %vm665_vm1, %v28362_v47  ;;  %v16450_v47 = vpack.c.bf16 %v13047_v39, %v13046_v17  ;;  %v16458_v46 = vpack.c.bf16 %v13051_v49, %v13050_v55  ;;  %v13055_v25 = vld [vmem:[#allocation8 + $0xc8] sm:$0xff]  ;;  %v13058_v39 = vld [vmem:[#allocation8 + $0xe0] sm:$0xff]  ;;  %v13088_v40 = vld [vmem:[#allocation8 + $0x1d0] sm:$0xff] }
 0x5c1   : > { %16446 = vmatpush3.bf16.msra.mxu0 %v16445_v57  ;;  %12679 = vmatprep.mubr.f32.mxu1 %v29023_v41  ;;  %v13039_v57 = vld [vmem:[#allocation8 + $0x48] sm:$0xff]  ;;  %v13070_v30 = vld [vmem:[#allocation8 + $0x140] sm:$0xff] }
 0x5c2   : > { %v10261_v54 = vpop.f32.mrb[100].mxu1  ;;  %16447 = vmatprep.subr.bf16.mxu0 %v29038_v8  ;;  %16451 = vmatprep.subr.bf16.mxu1 %v16450_v47  ;;  %v16468_v24 = vpack.c.bf16 %v13039_v57, %v13038_v4  ;;  %v16474_v47 = vpack.c.bf16 %v13059_v3, %v13058_v39  ;;  %v13071_v27 = vld [vmem:[#allocation8 + $0x148] sm:$0xff] }
 0x5c3   : > { %v10289_v33 = vadd.f32 %v10261_v54, %v28217_v0  ;;  %v15122_v22 = vpop.f32.mrb[101].mxu1  ;;  %v16454_v0 = vpack.c.bf16 %v13049_v32, %v13048_v60  ;;  %v13057_v54 = vld [vmem:[#allocation8 + $0xd8] sm:$0xff]  ;;  %v13043_v60 = vld [vmem:[#allocation8 + $0x68] sm:$0xff] }
 0x5c4   : > { %14024 = vmatmul.mubr.msk.f32.vlgmr.msra.gmra.mrb[0].mxu1 %vm665_vm1, %v28427_v31  ;;  %v13041_v22 = vld [vmem:[#allocation8 + $0x58] sm:$0xff]  ;;  %v16476_v32 = vpack.c.bf16 %v13043_v60, %v13042_v14  ;;  %v13092_v14 = vld [vmem:[#allocation8 + $0x1f0] sm:$0xff] }
 0x5c5   : > { %16449 = vmatpush3.bf16.msra.mxu0 %v16448_v45  ;;  %12685 = vmatprep.mubr.f32.mxu1 %v29023_v41  ;;  %v16470_v45 = vpack.c.bf16 %v13057_v54, %v13056_v63  ;;  %v13090_v63 = vld [vmem:[#allocation8 + $0x1e0] sm:$0xff]  ;;  %v13091_v54 = vld [vmem:[#allocation8 + $0x1e8] sm:$0xff]  ;;  %v13093_v60 = vld [vmem:[#allocation8 + $0x1f8] sm:$0xff] }
 0x5c6   : > { %v10266_v21 = vpop.f32.mrb[102].mxu1  ;;  %16453 = vmatpush3.bf16.msra.mxu1 %v16452_v28  ;;  %v13061_v28 = vld [vmem:[#allocation8 + $0xf8] sm:$0xff] }
 0x5c7   : > { %v10294_v10 = vadd.f32 %v10266_v21, %v28233_v35  ;;  %v15125_v18 = vpop.f32.mrb[103].mxu1  ;;  %v16456_v35 = vpack.c.bf16 %v13033_v48, %v13032_v12  ;;  %16455 = vmatprep.subr.bf16.mxu1 %v16454_v0  ;;  %v13060_v21 = vld [vmem:[#allocation8 + $0xf0] sm:$0xff]  ;;  %v13079_v0 = vld [vmem:[#allocation8 + $0x188] sm:$0xff]  ;;  %v13045_v48 = vld [vmem:[#allocation8 + $0x78] sm:$0xff] }
 0x5c8   : > { %14025 = vmatmul.mubr.msk.f32.gmra.mrb[2].mxu1 %vm665_vm1, %v28441_v61  ;;  %15276 = vmatmul.mubr.msk.f32.vlgmr.msra.gmra.mrb[130].mxu0 %vm665_vm1, %v28427_v31  ;;  %v16478_v18 = vpack.c.bf16 %v13061_v28, %v13060_v21  ;;  %v13044_v12 = vld [vmem:[#allocation8 + $0x70] sm:$0xff] }
 0x5c9   : > { %12691 = vmatprep.mubr.f32.mxu1 %v29023_v41  ;;  %15278 = vmatprep.mubr.msk.f32.mxu0 %vm20680_vm2, %v29023_v41  ;;  %v16480_v49 = vpack.c.bf16 %v13045_v48, %v13044_v12  ;;  %v13076_v21 = vld [vmem:[#allocation8 + $0x170] sm:$0xff] }
 0x5ca   : > { %v10271_v16 = vpop.f32.mrb[104].mxu1  ;;  %16457 = vmatpush3.bf16.msra.mxu1 %v16456_v35  ;;  %v13063_v35 = vld [vmem:[#allocation8 + $0x108] sm:$0xff] }
 0x5cb   : > { %v10299_v29 = vadd.f32 %v10271_v16, %v28253_v34  ;;  %v15128_v38 = vpop.f32.mrb[105].mxu1  ;;  %16459 = vmatprep.subr.bf16.mxu1 %v16458_v46  ;;  %v13062_v16 = vld [vmem:[#allocation8 + $0x100] sm:$0xff]  ;;  %v13081_v46 = vld [vmem:[#allocation8 + $0x198] sm:$0xff] }
 0x5cc   : > { %14026 = vmatmul.mubr.msk.f32.gmra.mrb[4].mxu1 %vm665_vm1, %v28456_v9  ;;  %15279 = vmatmul.mubr.msk.f32.gmra.mrb[132].mxu0 %vm665_vm1, %v28441_v61  ;;  %v13080_v38 = vld [vmem:[#allocation8 + $0x190] sm:$0xff] }
 0x5cd   : > { %12697 = vmatprep.mubr.f32.mxu1 %v29023_v41  ;;  %15281 = vmatprep.mubr.msk.f32.mxu0 %vm20680_vm2, %v29023_v41  ;;  %v16486_v2 = vpack.c.bf16 %v13081_v46, %v13080_v38 }
 0x5ce   : > { %v10276_v31 = vpop.f32.mrb[106].mxu1  ;;  %16461 = vmatpush3.bf16.msra.mxu1 %v16460_v50 }
 0x5cf   : > { %v10304_v34 = vadd.f32 %v10276_v31, %v28268_v53  ;;  %v15131_v59 = vpop.f32.mrb[107].mxu1  ;;  %16463 = vmatprep.subr.bf16.mxu1 %v16462_v36  ;;  %v13065_v31 = vld [vmem:[#allocation8 + $0x118] sm:$0xff]  ;;  %v16500_v36 = vpack.c.bf16 %v13071_v27, %v13070_v30 }
 0x5d0   : > { %14027 = vmatmul.mubr.msk.f32.gmra.mrb[6].mxu1 %vm665_vm1, %v28475_v13  ;;  %15282 = vmatmul.mubr.msk.f32.gmra.mrb[134].mxu0 %vm665_vm1, %v28456_v9  ;;  %v16488_v50 = vpack.c.bf16 %v13065_v31, %v13064_v6  ;;  %v13083_v59 = vld [vmem:[#allocation8 + $0x1a8] sm:$0xff] }
 0x5d1   : > { %12703 = vmatprep.mubr.f32.mxu1 %v29023_v41  ;;  %15284 = vmatprep.mubr.msk.f32.mxu0 %vm20680_vm2, %v29023_v41 }
 0x5d2   : > { %v10281_v61 = vpop.f32.mrb[108].mxu1  ;;  %16465 = vmatpush3.bf16.msra.mxu1 %v16464_v43  ;;  %v16502_v43 = vpack.c.bf16 %v13089_v37, %v13088_v40 }
 0x5d3   : > { %v10309_v58 = vadd.f32 %v10281_v61, %v28293_v44  ;;  %v15134_v19 = vpop.f32.mrb[109].mxu1 }
 0x5d4   : > { %v10764_v62 = vpop.f32.mrb[110].mxu0  ;;  %14028 = vmatmul.mubr.msk.f32.gmra.mrb[8].mxu1 %vm665_vm1, %v28495_v51  ;;  %15285 = vmatmul.mubr.msk.f32.gmra.mrb[136].mxu0 %vm665_vm1, %v28475_v13 }
 0x5d5   : > { %v28560_v53 = vadd.f32 %v10764_v62, %v10289_v33  ;;  %v15153_v9 = vpop.f32.mrb[111].mxu0  ;;  %15287 = vmatprep.mubr.msk.f32.mxu0 %vm20680_vm2, %v29023_v41  ;;  %v13040_v33 = vld [vmem:[#allocation8 + $0x50] sm:$0xff]  ;;  %v13067_v62 = vld [vmem:[#allocation8 + $0x128] sm:$0xff] }
 0x5d6   : > { %v16472_v17 = vpack.c.bf16 %v13041_v22, %v13040_v33  ;;  %v13084_v9 = vld [vmem:[#allocation8 + $0x1b0] sm:$0xff]  ;;  %v13074_v33 = vld [vmem:[#allocation8 + $0x160] sm:$0xff]  ;;  %v13075_v22 = vld [vmem:[#allocation8 + $0x168] sm:$0xff] }
 0x5d7   : > { %v16508_v39 = vpack.c.bf16 %v13075_v22, %v13074_v33 }
 0x5d8   : > { %v10769_v20 = vpop.f32.mrb[112].mxu0  ;;  %15288 = vmatmul.mubr.msk.f32.gmra.mrb[138].mxu0 %vm665_vm1, %v28495_v51  ;;  %v13054_v51 = vld [vmem:[#allocation8 + $0xc0] sm:$0xff] }
 0x5d9   : > { %v28568_v15 = vadd.f32 %v10769_v20, %v10294_v10  ;;  %v15156_v44 = vpop.f32.mrb[113].mxu0  ;;  %v16466_v26 = vpack.c.bf16 %v13055_v25, %v13054_v51  ;;  %v13078_v10 = vld [vmem:[#allocation8 + $0x180] sm:$0xff]  ;;  %v13085_v20 = vld [vmem:[#allocation8 + $0x1b8] sm:$0xff]  ;;  %v13072_v51 = vld [vmem:[#allocation8 + $0x150] sm:$0xff] }
 0x5da   : > { %v16482_v55 = vpack.c.bf16 %v13079_v0, %v13078_v10  ;;  %v16494_v44 = vpack.c.bf16 %v13085_v20, %v13084_v9  ;;  %v13073_v25 = vld [vmem:[#allocation8 + $0x158] sm:$0xff] }
 0x5db   : > { %16467 = vmatprep.subr.bf16.mxu1 %v16466_v26  ;;  %v16504_v4 = vpack.c.bf16 %v13073_v25, %v13072_v51 }
 0x5dc   : > { %v10774_v7 = vpop.f32.mrb[114].mxu0  ;;  %16469 = vmatpush3.bf16.msra.mxu1 %v16468_v24  ;;  %16483 = vmatprep.subr.bf16.mxu0 %v16482_v55 }
 0x5dd   : > { %v28572_v42 = vadd.f32 %v10774_v7, %v10299_v29  ;;  %v15159_v11 = vpop.f32.mrb[115].mxu0  ;;  %16471 = vmatprep.subr.bf16.mxu1 %v16470_v45  ;;  %v16484_v29 = vpack.c.bf16 %v13063_v35, %v13062_v16  ;;  %v13068_v7 = vld [vmem:[#allocation8 + $0x130] sm:$0xff]  ;;  %v16506_v45 = vpack.c.bf16 %v13091_v54, %v13090_v63 }
 0x5de   : > { %v13069_v11 = vld [vmem:[#allocation8 + $0x138] sm:$0xff] }
 0x5df   : > { %16485 = vmatpush3.bf16.msra.mxu0 %v16484_v29 }
 0x5e0   : > { %v10779_v5 = vpop.f32.mrb[116].mxu0  ;;  %16473 = vmatpush3.bf16.msra.mxu1 %v16472_v17  ;;  %16487 = vmatprep.subr.bf16.mxu0 %v16486_v2 }
 0x5e1   : > { %v28574_v52 = vadd.f32 %v10779_v5, %v10304_v34  ;;  %v15162_v23 = vpop.f32.mrb[117].mxu0  ;;  %16475 = vmatprep.subr.bf16.mxu1 %v16474_v47  ;;  %v13082_v34 = vld [vmem:[#allocation8 + $0x1a0] sm:$0xff]  ;;  %v16496_v5 = vpack.c.bf16 %v13069_v11, %v13068_v7 }
 0x5e2   : > { %v16490_v61 = vpack.c.bf16 %v13083_v59, %v13082_v34  ;;  %v13086_v23 = vld [vmem:[#allocation8 + $0x1c0] sm:$0xff]  ;;  %v28590_v9 = vpop.permute.xlu1 %12837 }
 0x5e3   : > { %16489 = vmatpush3.bf16.msra.mxu0 %v16488_v50 }
 0x5e4   : > { %v10784_v13 = vpop.f32.mrb[118].mxu0  ;;  %16477 = vmatpush3.bf16.msra.mxu1 %v16476_v32  ;;  %16491 = vmatprep.subr.bf16.mxu0 %v16490_v61  ;;  %v16510_v32 = vpack.c.bf16 %v13093_v60, %v13092_v14 }
 0x5e5   : > { %v28576_v1 = vadd.f32 %v10784_v13, %v10309_v58  ;;  %v15165_v56 = vpop.f32.mrb[119].mxu0  ;;  %16479 = vmatprep.subr.bf16.mxu1 %v16478_v18  ;;  %v13066_v58 = vld [vmem:[#allocation8 + $0x120] sm:$0xff]  ;;  %v13087_v13 = vld [vmem:[#allocation8 + $0x1c8] sm:$0xff] }
 0x5e6   : > { %v16492_v19 = vpack.c.bf16 %v13067_v62, %v13066_v58  ;;  %v16498_v56 = vpack.c.bf16 %v13087_v13, %v13086_v23  ;;  %v28606_v40 = vpop.permute.xlu1 %12842 }
 0x5e8   : > { %16481 = vmatpush3.bf16.msra.mxu1 %v16480_v49  ;;  %16493 = vmatpush3.bf16.msra.mxu0 %v16492_v19  ;;  %v28588_v19 = vpop.permute.xlu0 %12832 }
 0x5e9   : > { %16514 = vmatprep.subr.bf16.mxu1 %v29038_v8  ;;  %16495 = vmatprep.subr.bf16.mxu0 %v16494_v44 }
 0x5ec   : > { %16497 = vmatpush3.bf16.msra.mxu0 %v16496_v5  ;;  %v28618_v33 = vpop.permute.xlu0 %12847 }
 0x5ed   : > { %16499 = vmatprep.subr.bf16.mxu0 %v16498_v56 }
 0x5f0   : > { %16501 = vmatpush3.bf16.msra.mxu0 %v16500_v36 }
 0x5f1   : > { %16503 = vmatprep.subr.bf16.mxu0 %v16502_v43 }
 0x5f4   : > { %16505 = vmatpush3.bf16.msra.mxu0 %v16504_v4 }
 0x5f5   : > { %16507 = vmatprep.subr.bf16.mxu0 %v16506_v45 }
 0x5f8   : > { %16509 = vmatpush3.bf16.msra.mxu0 %v16508_v39 }
 0x5f9   : > { %16511 = vmatprep.subr.bf16.mxu0 %v16510_v32 }
 0x623   : > { %v11267_v26 = vpop.f32.mrb[110].mxu1 }
 0x624   : > { %v11295_v57 = vadd.f32 %v11267_v26, %v28560_v53  ;;  %v15184_v24 = vpop.f32.mrb[111].mxu1  ;;  %v13077_v53 = vld [vmem:[#allocation8 + $0x178] sm:$0xff] }
 0x625   : > { %v16512_v10 = vpack.c.bf16 %v13077_v53, %v13076_v21 }
 0x627   : > { %v11272_v17 = vpop.f32.mrb[112].mxu1  ;;  %16513 = vmatpush3.bf16.msra.mxu0 %v16512_v10  ;;  %v28630_v10 = vpop.permute.xlu1 %12852 }
 0x628   : > { %v11300_v3 = vadd.f32 %v11272_v17, %v28568_v15  ;;  %v15187_v47 = vpop.f32.mrb[113].mxu1 }
 0x62b   : > { %v11277_v28 = vpop.f32.mrb[114].mxu1 }
 0x62c   : > { %v11305_v18 = vadd.f32 %v11277_v28, %v28572_v42  ;;  %v15190_v0 = vpop.f32.mrb[115].mxu1 }
 0x62f   : > { %v11282_v12 = vpop.f32.mrb[116].mxu1 }
 0x630   : > { %v11310_v48 = vadd.f32 %v11282_v12, %v28574_v52  ;;  %v15193_v55 = vpop.f32.mrb[117].mxu1 }
 0x633   : > { %v11287_v15 = vpop.f32.mrb[118].mxu1  ;;  %v11770_v49 = vpop.f32.mrb[120].mxu0 }
 0x634   : > { %v11315_v16 = vadd.f32 %v11287_v15, %v28576_v1  ;;  %v11798_v35 = vadd.f32 %v11770_v49, %v11295_v57  ;;  %v15215_v29 = vpop.f32.mrb[121].mxu0  ;;  %v15196_v38 = vpop.f32.mrb[119].mxu1  ;;  %v13094_v49 = vld [vmem:[#allocation8 + $0x200] sm:$0xff] }
 0x637   : > { %v11775_v46 = vpop.f32.mrb[122].mxu0 }
 0x638   : > { %v11803_v2 = vadd.f32 %v11775_v46, %v11300_v3  ;;  %v15218_v6 = vpop.f32.mrb[123].mxu0 }
 0x63b   : > { %v11780_v31 = vpop.f32.mrb[124].mxu0 }
 0x63c   : > { %v11808_v50 = vadd.f32 %v11780_v31, %v11305_v18  ;;  %v15221_v42 = vpop.f32.mrb[125].mxu0 }
 0x63f   : > { %v11785_v34 = vpop.f32.mrb[126].mxu0 }
 0x640   : > { %v28584_v59 = vadd.f32 %v11785_v34, %v11310_v48  ;;  %v15224_v61 = vpop.f32.mrb[127].mxu0 }
 0x643   : > { %v11790_v58 = vpop.f32.mrb[128].mxu0 }
 0x644   : > { %v28586_v52 = vadd.f32 %v11790_v58, %v11315_v16  ;;  %v15227_v62 = vpop.f32.mrb[129].mxu0  ;;  %v13095_v16 = vld [vmem:[#allocation8 + $0x208] sm:$0xff] }
 0x645   : > { %v16515_v58 = vpack.c.bf16 %v13095_v16, %v13094_v49 }
 0x67c   : > { %v12586_v1 = vpop.f32.mrb[0].mxu0 }
 0x67d   : > { %v28593_v20 = vadd.f32 %v28588_v19, %v12586_v1  ;;  %v12588_v44 = vpop.f32.mrb[1].mxu0 }
 0x67e   : > { %v28596_v7 = vadd.f32 %v28588_v19, %v12588_v44 }
 0x67f   : > { %v12905_v11 = vmin.f32 %v28593_v20, 0.0  ;;  %vm12880_vm12 = vcmp.gt.f32.partialorder %v28593_v20, 0.0 }
 0x680   : > { %v12906_v5 = vmin.f32 %v28596_v7, 0.0  ;;  %v12592_v23 = vpop.f32.mrb[2].mxu0  ;;  %vm12881_vm1 = vcmp.gt.f32.partialorder %v28596_v7, 0.0 }
 0x681   : > { %v12930_v13 = vmul.f32 1.442695, %v12905_v11  ;;  %v28601_v56 = vadd.f32 %v28590_v9, %v12592_v23  ;;  %v12594_v30 = vpop.f32.mrb[3].mxu0 }
 0x682   : > { %v12932_v27 = vmul.f32 1.442695, %v12906_v5  ;;  %v28604_v36 = vadd.f32 %v28590_v9, %v12594_v30  ;;  %v13097_v30 = vld [vmem:[#allocation8 + $0x218] sm:$0xff] }
 0x683   : > { %20042 = vpow2.f32 %v12930_v13  ;;  %v12910_v37 = vmin.f32 %v28601_v56, 0.0  ;;  %v12273_v43 = vpop.f32.mrb[120].mxu1  ;;  %v13096_v13 = vld [vmem:[#allocation8 + $0x210] sm:$0xff]  ;;  %vm12885_vm14 = vcmp.gt.f32.partialorder %v28601_v56, 0.0 }
 0x684   : > { %20044 = vpow2.f32 %v12932_v27  ;;  %v12911_v51 = vmin.f32 %v28604_v36, 0.0  ;;  %v28610_v25 = vadd.f32 %v12273_v43, %v11798_v35  ;;  %v12598_v26 = vpop.f32.mrb[4].mxu0  ;;  %v15246_v4 = vpop.f32.mrb[121].mxu1  ;;  %vm12886_vm13 = vcmp.gt.f32.partialorder %v28604_v36, 0.0 }
 0x685   : > { %v12940_v57 = vmul.f32 1.442695, %v12910_v37  ;;  %v28613_v24 = vadd.f32 %v28606_v40, %v12598_v26  ;;  %v12600_v63 = vpop.f32.mrb[5].mxu0 }
 0x686   : > { %v12942_v54 = vmul.f32 1.442695, %v12911_v51  ;;  %v28616_v45 = vadd.f32 %v28606_v40, %v12600_v63 }
 0x687   : > { %20046 = vpow2.f32 %v12940_v57  ;;  %v12915_v22 = vmin.f32 %v28613_v24, 0.0  ;;  %v12278_v17 = vpop.f32.mrb[122].mxu1  ;;  %vm12890_vm0 = vcmp.gt.f32.partialorder %v28613_v24, 0.0 }
 0x688   : > { %20048 = vpow2.f32 %v12942_v54  ;;  %v12916_v39 = vmin.f32 %v28616_v45, 0.0  ;;  %v28622_v3 = vadd.f32 %v12278_v17, %v11803_v2  ;;  %v12604_v47 = vpop.f32.mrb[6].mxu0  ;;  %v15249_v14 = vpop.f32.mrb[123].mxu1  ;;  %vm12891_vm15 = vcmp.gt.f32.partialorder %v28616_v45, 0.0 }
 0x689   : > { %v12950_v60 = vmul.f32 1.442695, %v12915_v22  ;;  %v28625_v32 = vadd.f32 %v28618_v33, %v12604_v47  ;;  %v12606_v21 = vpop.f32.mrb[7].mxu0  ;;  %v13099_v22 = vld [vmem:[#allocation8 + $0x228] sm:$0xff] }
 0x68a   : > { %v12952_v53 = vmul.f32 1.442695, %v12916_v39  ;;  %v28628_v28 = vadd.f32 %v28618_v33, %v12606_v21  ;;  %v13101_v21 = vld [vmem:[#allocation8 + $0x238] sm:$0xff] }
 0x68b   : > { %20050 = vpow2.f32 %v12950_v60  ;;  %v12920_v18 = vmin.f32 %v28625_v32, 0.0  ;;  %v12283_v0 = vpop.f32.mrb[124].mxu1  ;;  %v13100_v60 = vld [vmem:[#allocation8 + $0x230] sm:$0xff]  ;;  %vm12895_vm3 = vcmp.gt.f32.partialorder %v28625_v32, 0.0 }
 0x68c   : > { %20052 = vpow2.f32 %v12952_v53  ;;  %v12921_v12 = vmin.f32 %v28628_v28, 0.0  ;;  %v28634_v48 = vadd.f32 %v12283_v0, %v11808_v50  ;;  %v12610_v55 = vpop.f32.mrb[8].mxu0  ;;  %v15252_v15 = vpop.f32.mrb[125].mxu1  ;;  %v28663_v0 = vld [vmem:[#allocation8 + $0x240] sm:$0xff]  ;;  %vm12896_vm4 = vcmp.gt.f32.partialorder %v28628_v28, 0.0 }
 0x68d   : > { %v20043_v35 = vpop.eup %20042  ;;  %v12960_v29 = vmul.f32 1.442695, %v12920_v18  ;;  %v28637_v38 = vadd.f32 %v28630_v10, %v12610_v55  ;;  %v12612_v46 = vpop.f32.mrb[9].mxu0 }
 0x68e   : > { %v20045_v2 = vpop.eup %20044  ;;  %v14034_v6 = vadd.f32 -1.0, %v20043_v35  ;;  %v12962_v31 = vmul.f32 1.442695, %v12921_v12  ;;  %v28640_v42 = vadd.f32 %v28630_v10, %v12612_v46  ;;  %v28665_v12 = vld [vmem:[#allocation8 + $0x248] sm:$0xff]  ;;  %v16524_v46 = vpack.c.bf16 %v13101_v21, %v13100_v60  ;;  %v13106_v60 = vld [vmem:[#allocation8 + $0x260] sm:$0xff] }
 0x68f   : > { %20054 = vpow2.f32 %v12960_v29  ;;  %v12925_v50 = vmin.f32 %v28637_v38, 0.0  ;;  %v12288_v34 = vpop.f32.mrb[126].mxu1  ;;  %v14035_v61 = vadd.f32 -1.0, %v20045_v2  ;;  %vm12900_vm5 = vcmp.gt.f32.partialorder %v28637_v38, 0.0  ;;  %v13107_v21 = vld [vmem:[#allocation8 + $0x268] sm:$0xff] }
 0x690   : > { %20056 = vpow2.f32 %v12962_v31  ;;  %v12926_v62 = vmin.f32 %v28640_v42, 0.0  ;;  %v28645_v1 = vadd.f32 %v12288_v34, %v28584_v59  ;;  %v15255_v44 = vpop.f32.mrb[127].mxu1  ;;  %v13005_v37 = vsel %vm12880_vm12, %v28593_v20, %v14034_v6  ;;  %v13098_v20 = vld [vmem:[#allocation8 + $0x220] sm:$0xff] }
 0x691   : > { %v20047_v11 = vpop.eup %20046  ;;  %v12970_v5 = vmul.f32 1.442695, %v12925_v50  ;;  %v13006_v23 = vsel %vm12881_vm1, %v28596_v7, %v14035_v61  ;;  %v16518_v7 = vpack.c.bf16 %v13097_v30, %v13096_v13  ;;  %v16521_v18 = vpack.c.bf16 %v13099_v22, %v13098_v20 }
 0x692   : > { %v20049_v27 = vpop.eup %20048  ;;  %v12972_v43 = vmul.f32 1.442695, %v12926_v62  ;;  %13174 = vmatprep.mubr.f32.mxu1 %v13006_v23  ;;  %v14039_v51 = vadd.f32 -1.0, %v20047_v11  ;;  %vm12901_vm6 = vcmp.gt.f32.partialorder %v28640_v42, 0.0 }
 0x693   : > { %20058 = vpow2.f32 %v12970_v5  ;;  %v12293_v59 = vpop.f32.mrb[128].mxu1  ;;  %13175 = vmatmul.mubr.f32.vlgmr.msra.gmra.mrb[130].mxu1 %v13005_v37  ;;  %v14040_v26 = vadd.f32 -1.0, %v20049_v27 }
 0x694   : > { %20060 = vpow2.f32 %v12972_v43  ;;  %v28652_v4 = vadd.f32 %v12293_v59, %v28586_v52  ;;  %16516 = vmatpush3.bf16.msra.mxu1 %v16515_v58  ;;  %v15258_v57 = vpop.f32.mrb[129].mxu1  ;;  %v13010_v39 = vsel %vm12885_vm14, %v28601_v56, %v14039_v51  ;;  %v28694_v43 = vld [vmem:[#allocation8 + $0x250] sm:$0xff] }
 0x695   : > { %v20051_v63 = vpop.eup %20050  ;;  %v13011_v54 = vsel %vm12886_vm13, %v28604_v36, %v14040_v26  ;;  %16517 = vmatprep.subr.bf16.mxu1 %v29038_v8 }
 0x696   : > { %v20053_v17 = vpop.eup %20052  ;;  %13179 = vmatprep.mubr.f32.mxu1 %v13011_v54  ;;  %v14044_v52 = vadd.f32 -1.0, %v20051_v63 }
 0x697   : > { %v12681_v47 = vpop.f32.mrb[0].mxu1  ;;  %13180 = vmatmul.mubr.f32.gmra.mrb[132].mxu1 %v13010_v39  ;;  %v14045_v14 = vadd.f32 -1.0, %v20053_v17 }
 0x698   : > { %v28660_v53 = vadd.f32 %v28588_v19, %v12681_v47  ;;  %16519 = vmatpush3.bf16.msra.mxu1 %v16518_v7  ;;  %v12683_v36 = vpop.f32.mrb[1].mxu1  ;;  %v13015_v35 = vsel %vm12890_vm0, %v28613_v24, %v14044_v52 }
 0x699   : > { %v20055_v55 = vpop.eup %20054  ;;  %v28668_v56 = vadd.f32 %v28588_v19, %v12683_v36  ;;  %v13016_v15 = vsel %vm12891_vm15, %v28616_v45, %v14045_v14  ;;  %16520 = vmatprep.subr.bf16.mxu1 %v29038_v8  ;;  %v16527_v45 = vpack.c.bf16 %v28665_v12, %v28663_v0  ;;  %v28718_v12 = vld [vmem:[#allocation8 + $0x270] sm:$0xff] }
 0x69a   : > { %v20057_v49 = vpop.eup %20056  ;;  %v12907_v16 = vmin.f32 %v28660_v53, 0.0  ;;  %13184 = vmatprep.mubr.f32.mxu1 %v13016_v15  ;;  %v14049_v29 = vadd.f32 -1.0, %v20055_v55  ;;  %v28720_v55 = vld [vmem:[#allocation8 + $0x278] sm:$0xff]  ;;  %vm12882_vm7 = vcmp.gt.f32.partialorder %v28660_v53, 0.0 }
 0x69b   : > { %v12908_v2 = vmin.f32 %v28668_v56, 0.0  ;;  %v12687_v6 = vpop.f32.mrb[2].mxu1  ;;  %v12776_v31 = vpop.f32.mrb[130].mxu0  ;;  %13185 = vmatmul.mubr.f32.gmra.mrb[134].mxu1 %v13015_v35  ;;  %v14050_v50 = vadd.f32 -1.0, %v20057_v49  ;;  %vm12883_vm8 = vcmp.gt.f32.partialorder %v28668_v56, 0.0 }
 0x69c   : > { %v12934_v34 = vmul.f32 1.442695, %v12907_v16  ;;  %v28680_v61 = vadd.f32 %v28590_v9, %v12687_v6  ;;  %v12804_v58 = vadd.f32 %v12776_v31, %v28610_v25  ;;  %16522 = vmatpush3.bf16.msra.mxu1 %v16521_v18  ;;  %v12689_v24 = vpop.f32.mrb[3].mxu1  ;;  %v15277_v62 = vpop.f32.mrb[131].mxu0  ;;  %v13020_v13 = vsel %vm12895_vm3, %v28625_v32, %v14049_v29  ;;  %v13105_v32 = vld [vmem:[#allocation8 + $0x258] sm:$0xff] }
 0x69d   : > { %v20059_v44 = vpop.eup %20058  ;;  %v12936_v11 = vmul.f32 1.442695, %v12908_v2  ;;  %v28685_v5 = vadd.f32 %v28590_v9, %v12689_v24  ;;  %v13021_v23 = vsel %vm12896_vm4, %v28628_v28, %v14050_v50  ;;  %16523 = vmatprep.subr.bf16.mxu1 %v29038_v8  ;;  %v16530_v0 = vpack.c.bf16 %v13105_v32, %v28694_v43 }
 0x69e   : > { %v20061_v30 = vpop.eup %20060  ;;  %20062 = vpow2.f32 %v12934_v34  ;;  %v12912_v25 = vmin.f32 %v28680_v61, 0.0  ;;  %v28692_v27 = vadd.f32 %v28588_v19, %v12804_v58  ;;  %13189 = vmatprep.mubr.f32.mxu1 %v13021_v23  ;;  %v14054_v37 = vadd.f32 -1.0, %v20059_v44 }
 0x69f   : > { %20064 = vpow2.f32 %v12936_v11  ;;  %v12913_v51 = vmin.f32 %v28685_v5, 0.0  ;;  %v12693_v59 = vpop.f32.mrb[4].mxu1  ;;  %v12781_v28 = vpop.f32.mrb[132].mxu0  ;;  %13190 = vmatmul.mubr.f32.gmra.mrb[136].mxu1 %v13020_v13  ;;  %v14055_v26 = vadd.f32 -1.0, %v20061_v30  ;;  %v16533_v2 = vpack.c.bf16 %v13107_v21, %v13106_v60 }
 0x6a0   : > { %v12944_v57 = vmul.f32 1.442695, %v12912_v25  ;;  %v12909_v7 = vmin.f32 %v28692_v27, 0.0  ;;  %v28700_v19 = vadd.f32 %v28606_v40, %v12693_v59  ;;  %16525 = vmatpush3.bf16.msra.mxu1 %v16524_v46  ;;  %v12695_v63 = vpop.f32.mrb[5].mxu1  ;;  %v15280_v54 = vpop.f32.mrb[133].mxu0  ;;  %v12809_v22 = vadd.f32 %v12781_v28, %v28622_v3 }
 0x6a1   : > { %v12946_v20 = vmul.f32 1.442695, %v12913_v51  ;;  %v28705_v17 = vadd.f32 %v28606_v40, %v12695_v63  ;;  %v13026_v39 = vsel %vm12901_vm6, %v28640_v42, %v14055_v26  ;;  %16526 = vmatprep.subr.bf16.mxu1 %v29038_v8  ;;  %v13025_v14 = vsel %vm12900_vm5, %v28637_v38, %v14054_v37 }
 0x6a2   : > { %20066 = vpow2.f32 %v12944_v57  ;;  %v12938_v52 = vmul.f32 1.442695, %v12909_v7  ;;  %v12917_v47 = vmin.f32 %v28700_v19, 0.0  ;;  %13194 = vmatprep.mubr.f32.mxu1 %v13026_v39  ;;  %v28714_v3 = vadd.f32 %v28590_v9, %v12809_v22 }
 0x6a3   : > { %20068 = vpow2.f32 %v12946_v20  ;;  %v12918_v36 = vmin.f32 %v28705_v17, 0.0  ;;  %v12699_v42 = vpop.f32.mrb[6].mxu1  ;;  %v12786_v18 = vpop.f32.mrb[134].mxu0  ;;  %13195 = vmatmul.mubr.f32.gmra.mrb[138].mxu1 %v13025_v14  ;;  %v16536_v31 = vpack.c.bf16 %v28720_v55, %v28718_v12  ;;  %vm12888_vm9 = vcmp.gt.f32.partialorder %v28685_v5, 0.0 }
 0x6a4   : > { %20070 = vpow2.f32 %v12938_v52  ;;  %v12954_v15 = vmul.f32 1.442695, %v12917_v47  ;;  %v28723_v38 = vadd.f32 %v28618_v33, %v12699_v42  ;;  %v12814_v49 = vadd.f32 %v12786_v18, %v28634_v48  ;;  %16528 = vmatpush3.bf16.msra.mxu1 %v16527_v45  ;;  %v12701_v9 = vpop.f32.mrb[7].mxu1  ;;  %v15283_v16 = vpop.f32.mrb[135].mxu0  ;;  %15322 = vmatprep.mubr.msk.f32.mxu1 %vm20680_vm2, %v29023_v41 }
 0x6a5   : > { %v12914_v35 = vmin.f32 %v28714_v3, 0.0  ;;  %v12956_v29 = vmul.f32 1.442695, %v12918_v36  ;;  %v28730_v46 = vadd.f32 %v28618_v33, %v12701_v9  ;;  %16529 = vmatprep.subr.bf16.mxu1 %v29038_v8  ;;  %vm12884_vm10 = vcmp.gt.f32.partialorder %v28692_v27, 0.0 }
 0x6a6   : > { %20072 = vpow2.f32 %v12954_v15  ;;  %v12922_v6 = vmin.f32 %v28723_v38, 0.0  ;;  %v28735_v48 = vadd.f32 %v28606_v40, %v12814_v49  ;;  %vm12887_vm11 = vcmp.gt.f32.partialorder %v28680_v61, 0.0 }
 0x6a7   : > { %v12948_v50 = vmul.f32 1.442695, %v12914_v35  ;;  %20074 = vpow2.f32 %v12956_v29  ;;  %v12923_v45 = vmin.f32 %v28730_v46, 0.0  ;;  %v12705_v34 = vpop.f32.mrb[8].mxu1  ;;  %v12791_v58 = vpop.f32.mrb[136].mxu0  ;;  %vm12893_vm1 = vcmp.gt.f32.partialorder %v28705_v17, 0.0 }
 0x6a8   : > { %v20063_v24 = vpop.eup %20062  ;;  %v12964_v62 = vmul.f32 1.442695, %v12922_v6  ;;  %v12919_v44 = vmin.f32 %v28735_v48, 0.0  ;;  %v28743_v11 = vadd.f32 %v28630_v10, %v12705_v34  ;;  %v12819_v40 = vadd.f32 %v12791_v58, %v28645_v1  ;;  %16531 = vmatpush3.bf16.msra.mxu1 %v16530_v0  ;;  %v12707_v23 = vpop.f32.mrb[9].mxu1 }
 0x6a9   : > { %v15286_v13 = vpop.f32.mrb[137].mxu0  ;;  %v20065_v30 = vpop.eup %20064  ;;  %v14036_v25 = vadd.f32 -1.0, %v20063_v24  ;;  %20076 = vpow2.f32 %v12948_v50  ;;  %v12966_v37 = vmul.f32 1.442695, %v12923_v45  ;;  %v28747_v43 = vadd.f32 %v28630_v10, %v12707_v23  ;;  %16532 = vmatprep.subr.bf16.mxu1 %v29038_v8  ;;  %v13380_v23 = vld [vmem:[#allocation10] sm:$0xff] }
 0x6aa   : > { %20078 = vpow2.f32 %v12964_v62  ;;  %v12958_v51 = vmul.f32 1.442695, %v12919_v44  ;;  %v12927_v59 = vmin.f32 %v28743_v11, 0.0  ;;  %v28752_v28 = vadd.f32 %v28618_v33, %v12819_v40  ;;  %v13381_v13 = vld [vmem:[#allocation10 + $0x8] sm:$0xff] }
 0x6ab   : > { %20080 = vpow2.f32 %v12966_v37  ;;  %v12928_v1 = vmin.f32 %v28747_v43, 0.0  ;;  %v12796_v26 = vpop.f32.mrb[138].mxu0  ;;  %v14037_v32 = vadd.f32 -1.0, %v20065_v30  ;;  %v13007_v33 = vsel %vm12882_vm7, %v28660_v53, %v14036_v25  ;;  %v13382_v30 = vld [vmem:[#allocation10 + $0x10] sm:$0xff]  ;;  %v13383_v37 = vld [vmem:[#allocation10 + $0x18] sm:$0xff] }
 0x6ac   : > { %v20067_v57 = vpop.eup %20066  ;;  %20082 = vpow2.f32 %v12958_v51  ;;  %v12974_v7 = vmul.f32 1.442695, %v12927_v59  ;;  %v12924_v63 = vmin.f32 %v28752_v28, 0.0  ;;  %v12824_v54 = vadd.f32 %v12796_v26, %v28652_v4  ;;  %16534 = vmatpush3.bf16.msra.mxu1 %v16533_v2  ;;  %v15289_v20 = vpop.f32.mrb[139].mxu0 }
 0x6ad   : > { %v20069_v22 = vpop.eup %20068  ;;  %v12976_v39 = vmul.f32 1.442695, %v12928_v1  ;;  %v13008_v52 = vsel %vm12883_vm8, %v28668_v56, %v14037_v32  ;;  %16535 = vmatprep.subr.bf16.mxu1 %v29038_v8  ;;  %v14041_v47 = vadd.f32 -1.0, %v20067_v57  ;;  %vm12892_vm12 = vcmp.gt.f32.partialorder %v28700_v19, 0.0 }
 0x6ae   : > { %v20071_v14 = vpop.eup %20070  ;;  %20084 = vpow2.f32 %v12974_v7  ;;  %v12968_v60 = vmul.f32 1.442695, %v12924_v63  ;;  %v28764_v21 = vadd.f32 %v28630_v10, %v12824_v54  ;;  %13264 = vmatprep.mubr.f32.mxu0 %v13008_v52  ;;  %v14042_v4 = vadd.f32 -1.0, %v20069_v22 }
 0x6af   : > { %20086 = vpow2.f32 %v12976_v39  ;;  %13265 = vmatmul.mubr.f32.vlgmr.msra.gmra.mrb[140].mxu0 %v13007_v33  ;;  %v14038_v36 = vadd.f32 -1.0, %v20071_v14  ;;  %v13012_v0 = vsel %vm12887_vm11, %v28680_v61, %v14041_v47  ;;  %vm12889_vm13 = vcmp.gt.f32.partialorder %v28714_v3, 0.0 }
 0x6b0   : > { %v20073_v53 = vpop.eup %20072  ;;  %20088 = vpow2.f32 %v12968_v60  ;;  %v12929_v8 = vmin.f32 %v28764_v21, 0.0  ;;  %16537 = vmatpush3.bf16.msra.mxu1 %v16536_v31  ;;  %v13013_v56 = vsel %vm12888_vm9, %v28685_v5, %v14042_v4  ;;  %vm12898_vm14 = vcmp.gt.f32.partialorder %v28730_v46, 0.0 }
 0x6b1   : > { %v20075_v42 = vpop.eup %20074  ;;  %13269 = vmatprep.mubr.f32.mxu0 %v13013_v56  ;;  %v13009_v10 = vsel %vm12884_vm10, %v28692_v27, %v14038_v36  ;;  %v14046_v55 = vadd.f32 -1.0, %v20073_v53  ;;  %vm12894_vm15 = vcmp.gt.f32.partialorder %v28735_v48, 0.0  ;;  %vm12897_vm0 = vcmp.gt.f32.partialorder %v28723_v38, 0.0 }
 0x6b2   : > { %v12978_v18 = vmul.f32 1.442695, %v12929_v8  ;;  %v14047_v12 = vadd.f32 -1.0, %v20075_v42  ;;  %vm12903_vm3 = vcmp.gt.f32.partialorder %v28747_v43, 0.0  ;;  %vm12899_vm4 = vcmp.gt.f32.partialorder %v28752_v28, 0.0 }
 0x6b3   : > { %v20077_v15 = vpop.eup %20076  ;;  %13270 = vmatmul.mubr.f32.gmra.mrb[142].mxu0 %v13012_v0  ;;  %15323 = vmatmul.mubr.f32.vlgmr.msra.gmra.mrb[140].mxu1 %v13009_v10  ;;  %v13017_v27 = vsel %vm12892_vm12, %v28700_v19, %v14046_v55  ;;  %vm12902_vm5 = vcmp.gt.f32.partialorder %v28743_v11, 0.0  ;;  %vm12904_vm6 = vcmp.gt.f32.partialorder %v28764_v21, 0.0  ;;  %v16538_v25 = vpack.c.bf16 %v13381_v13, %v13380_v23 }
 0x6b4   : > { %v20079_v49 = vpop.eup %20078  ;;  %20090 = vpow2.f32 %v12978_v18  ;;  %v13018_v5 = vsel %vm12893_vm1, %v28705_v17, %v14047_v12  ;;  %15325 = vmatprep.mubr.msk.f32.mxu1 %vm20680_vm2, %v29023_v41  ;;  %v14043_v9 = vadd.f32 -1.0, %v20077_v15 }
 0x6b5   : > { %v20081_v16 = vpop.eup %20080  ;;  %13274 = vmatprep.mubr.f32.mxu0 %v13018_v5  ;;  %v14051_v2 = vadd.f32 -1.0, %v20079_v49  ;;  %16539 = vmatprep.subr.bf16.mxu0 %v16538_v25 }
 0x6b6   : > { %v20083_v61 = vpop.eup %20082  ;;  %v13014_v35 = vsel %vm12889_vm13, %v28714_v3, %v14043_v9  ;;  %v14052_v29 = vadd.f32 -1.0, %v20081_v16  ;;  %16541 = vmatpush3.bf16.msra.mxu0 %v16538_v25 }
 0x6b7   : > { %13275 = vmatmul.mubr.f32.gmra.mrb[144].mxu0 %v13017_v27  ;;  %15326 = vmatmul.mubr.f32.gmra.mrb[142].mxu1 %v13014_v35  ;;  %v14048_v17 = vadd.f32 -1.0, %v20083_v61  ;;  %v13022_v45 = vsel %vm12897_vm0, %v28723_v38, %v14051_v2 }
 0x6b8   : > { %v20085_v6 = vpop.eup %20084  ;;  %v13023_v31 = vsel %vm12898_vm14, %v28730_v46, %v14052_v29  ;;  %15328 = vmatprep.mubr.msk.f32.mxu1 %vm20680_vm2, %v29023_v41 }
 0x6b9   : > { %v20087_v50 = vpop.eup %20086  ;;  %13279 = vmatprep.mubr.f32.mxu0 %v13023_v31  ;;  %v13019_v19 = vsel %vm12894_vm15, %v28735_v48, %v14048_v17  ;;  %v14056_v58 = vadd.f32 -1.0, %v20085_v6 }
 0x6ba   : > { %v20089_v3 = vpop.eup %20088  ;;  %v14057_v34 = vadd.f32 -1.0, %v20087_v50 }
 0x6bb   : > { %13280 = vmatmul.mubr.f32.gmra.mrb[146].mxu0 %v13022_v45  ;;  %15329 = vmatmul.mubr.f32.gmra.mrb[144].mxu1 %v13019_v19  ;;  %v14053_v46 = vadd.f32 -1.0, %v20089_v3  ;;  %v13027_v62 = vsel %vm12902_vm5, %v28743_v11, %v14056_v58  ;;  %v13384_v11 = vld [vmem:[#allocation10 + $0x20] sm:$0xff] }
 0x6bc   : > { %v13028_v24 = vsel %vm12903_vm3, %v28747_v43, %v14057_v34  ;;  %15331 = vmatprep.mubr.msk.f32.mxu1 %vm20680_vm2, %v29023_v41  ;;  %v16542_v43 = vpack.c.bf16 %v13383_v37, %v13382_v30 }
 0x6bd   : > { %13284 = vmatprep.mubr.f32.mxu0 %v13028_v24  ;;  %v13024_v48 = vsel %vm12899_vm4, %v28752_v28, %v14053_v46 }
 0x6be   : > { %v20091_v38 = vpop.eup %20090  ;;  %16543 = vmatprep.subr.bf16.mxu0 %v16542_v43 }
 0x6bf   : > { %13285 = vmatmul.mubr.f32.gmra.mrb[148].mxu0 %v13027_v62  ;;  %15332 = vmatmul.mubr.f32.gmra.mrb[146].mxu1 %v13024_v48  ;;  %v14058_v44 = vadd.f32 -1.0, %v20091_v38  ;;  %v14059_v48 = vld [vmem:[#allocation11] ss:$0 sm:$0xff] }
 0x6c0   : > { %15334 = vmatprep.mubr.msk.f32.mxu1 %vm20680_vm2, %v29023_v41  ;;  %16545 = vmatpush3.bf16.msra.mxu0 %v16542_v43  ;;  %vm13424_vm2 = vcmask 326656  }
 0x6c1   : > { %v13029_v40 = vsel %vm12904_vm6, %v28764_v21, %v14058_v44  ;;  %15345 = vmatprep.subr.mxu0 %v13384_v11 }
 0x6c3   : > { %15335 = vmatmul.mubr.f32.gmra.mrb[148].mxu1 %v13029_v40 }
 0x6c4   : > { %15346 = vmatpush3.msra.mxu0 %v13384_v11 }
 0x766   : > { %v14425_v51 = vpop.f32.mrb[130].mxu1 }
 0x767   : > { %v14426_v41 = vpop.f32.mrb[131].mxu1 }
 0x768   : > { %v14427_v59 = vadd.f32 %v14426_v41, %v14425_v51 }
 0x76a   : > { %v14428_v28 = vpop.f32.mrb[132].mxu1 }
 0x76b   : > { %v14429_v1 = vpop.f32.mrb[133].mxu1 }
 0x76c   : > { %v14430_v26 = vadd.f32 %v14429_v1, %v14428_v28 }
 0x76e   : > { %v14431_v32 = vpop.f32.mrb[134].mxu1 }
 0x76f   : > { %v14432_v57 = vpop.f32.mrb[135].mxu1 }
 0x770   : > { %v14433_v7 = vadd.f32 %v14432_v57, %v14431_v32 }
 0x772   : > { %v14434_v63 = vpop.f32.mrb[136].mxu1 }
 0x773   : > { %v14435_v54 = vpop.f32.mrb[137].mxu1 }
 0x774   : > { %v14436_v20 = vadd.f32 %v14435_v54, %v14434_v63 }
 0x776   : > { %v14437_v22 = vpop.f32.mrb[138].mxu1 }
 0x777   : > { %v14438_v33 = vpop.f32.mrb[139].mxu1 }
 0x778   : > { %v14439_v39 = vadd.f32 %v14438_v33, %v14437_v22 }
 0x782   : > { %v14472_v52 = vpop.f32.mrb[140].mxu0 }
 0x783   : > { %v14473_v47 = vpop.f32.mrb[141].mxu0 }
 0x784   : > { %v14474_v14 = vadd.f32 %v14473_v47, %v14472_v52 }
 0x786   : > { %v14475_v60 = vpop.f32.mrb[142].mxu0  ;;  %v13267_v21 = vadd.f32 %v14474_v14, %v14427_v59  ;;  %v13356_v4 = vpop.f32.mrb[140].mxu1 }
 0x787   : > { %v14476_v36 = vpop.f32.mrb[143].mxu0  ;;  %v15324_v53 = vpop.f32.mrb[141].mxu1 }
 0x788   : > { %v13357_v8 = vadd.f32 %v13356_v4, %v13267_v21  ;;  %v14477_v56 = vadd.f32 %v14476_v36, %v14475_v60 }
 0x78a   : > { %v14478_v42 = vpop.f32.mrb[144].mxu0  ;;  %v13272_v10 = vadd.f32 %v14477_v56, %v14430_v26  ;;  %v13361_v18 = vpop.f32.mrb[142].mxu1  ;;  %13392 = vxpose.xlu0.b32.start [1/5] (short) (narrow) %v13357_v8, 16 }
 0x78b   : > { %v14479_v0 = vpop.f32.mrb[145].mxu0  ;;  %v15327_v12 = vpop.f32.mrb[143].mxu1 }
 0x78c   : > { %v13362_v55 = vadd.f32 %v13361_v18, %v13272_v10  ;;  %v14480_v15 = vadd.f32 %v14479_v0, %v14478_v42 }
 0x78e   : > { %v14481_v49 = vpop.f32.mrb[146].mxu0  ;;  %v13277_v5 = vadd.f32 %v14480_v15, %v14433_v7  ;;  %v13366_v9 = vpop.f32.mrb[144].mxu1  ;;  %13393 = vxpose.xlu0.b32.cont [2/5] (short) (narrow) %v13362_v55, 16 }
 0x78f   : > { %v14482_v16 = vpop.f32.mrb[147].mxu0  ;;  %v15330_v61 = vpop.f32.mrb[145].mxu1 }
 0x790   : > { %v13367_v27 = vadd.f32 %v13366_v9, %v13277_v5  ;;  %v14483_v35 = vadd.f32 %v14482_v16, %v14481_v49 }
 0x792   : > { %v14484_v29 = vpop.f32.mrb[148].mxu0  ;;  %v13282_v2 = vadd.f32 %v14483_v35, %v14436_v20  ;;  %v13371_v17 = vpop.f32.mrb[146].mxu1  ;;  %13394 = vxpose.xlu0.b32.cont [3/5] (short) (narrow) %v13367_v27, 16 }
 0x793   : > { %v14485_v6 = vpop.f32.mrb[149].mxu0  ;;  %v15333_v31 = vpop.f32.mrb[147].mxu1 }
 0x794   : > { %v13372_v50 = vadd.f32 %v13371_v17, %v13282_v2  ;;  %v14486_v19 = vadd.f32 %v14485_v6, %v14484_v29 }
 0x796   : > { %v13287_v3 = vadd.f32 %v14486_v19, %v14439_v39  ;;  %v13376_v45 = vpop.f32.mrb[148].mxu1  ;;  %13395 = vxpose.xlu0.b32.cont [4/5] (short) (narrow) %v13372_v50, 16 }
 0x797   : > { %v15336_v34 = vpop.f32.mrb[149].mxu1 }
 0x798   : > { %v13377_v58 = vadd.f32 %v13376_v45, %v13287_v3 }
 0x79a   : > { %13396 = vxpose.xlu0.b32.end [5/5] (short) (narrow) %v13377_v58, 16 }
 0x80a   : > { %v13408_v46 = vpop.trf.xlu0 }
 0x80b   : > { %15347 = vmatprep.mubr.msk.f32.mxu0 %vm13424_vm2, %v13408_v46 }
 0x80e   : > { %v13409_v24 = vpop.trf.xlu0 }
 0x80f   : > { %15348 = vmatmul.mubr.msk.f32.vlgmr.msra.gmra.mrb[150].mxu0 %vm13424_vm2, %v13409_v24 }
 0x8e2   : > { %v15349_v38 = vpop.f32.mrb[150].mxu0 }
 0x8e3   : > { %v13503_v62 = vadd.f32 %v15349_v38, %v14059_v48  ;;  %v13497_v44 = vpop.f32.mrb[151].mxu0 }
 0x8e4   : > { %v13498_v40 = vadd.f32 %v14059_v48, %v13497_v44 }
 0x8e5   : > { %13507 = vst.msk [vmem:[%s340_s11 + $0x8] sm:$0xff] %vm13424_vm2, %v13503_v62 }
 0x8e6   : > { %13506 = vst.msk [vmem:[%s340_s11] sm:$0xff] %vm13424_vm2, %v13498_v40 }
 0x8e7   : > { %20597 = shalt.err (!%p20594_p8)
}
 0x8e8   : > { %s20598_s30 = scalar_lea.hbm %s28810_s13, 256  ;;  %s20602_s26 = scalar_lea.hbm %s28862_s6, 512 }
 0x8e9   : > { %p20599_p6 = scmp.ne.s32.totalorder %s28810_s13, %s20598_s30  ;;  %p20603_p3 = scmp.lt.u32.totalorder %s28810_s13, %s28862_s6 }
 0x8ea   : > { %p20604_p5 = scmp.lt.u32.totalorder %s20602_s26, %s20598_s30  ;;  %p20606_p7 = scmp.lt.u32.totalorder %s20598_s30, %s28810_s13 }
 0x8eb   : > { %p20600_p10 = pnand %p20599_p6, %p29184_p4 }
 0x8ec   : > { %p20605_p9 = por %p20604_p5, %p20603_p3 }
 0x8ed   : > { %p20601_p11 = pneg %p20600_p10 }
 0x8ee   : > { %p20607_p12 = por %p20606_p7, %p20605_p9 }
 0x8f0   : > { %p20608_p1 = pnand %p20607_p12, %p20601_p11 }
 0x8f2   : > { %20611 = shalt.err (!%p20608_p1)
}
 0x8f3   : > { %s20703_s16 = smov 128   ;;  %s20704_s8 = smov 8  }
 0x8f4   : > { %17051 = dma.vmem_to_hbm [thread:$0]  (%p29184_p4), %s28805_s12, 256, %s28810_s13, %s13509_s20, %s20703_s16, %s20703_s16, %s20704_s8  }
 0x8f5 PF: > { %s13537_s27 = sand.u32 1, %s20650_s21   ;;  %p29185_p13 = scmp.ne.s32.totalorder %s29000_s18, 0 }
 0x8f6   : > { %p29186_p0 = scmp.ge.s32.totalorder %s20662_s24, 2  ;;  %s13538_s17 = scalar_lea.sflag [#allocation4], %s13537_s27 }
 0x8f8   : > { %p17074_p2 = pnand %p29186_p0, %p29185_p13 }
 0x8fa   : > { %20645 = dma.done.wait (!%p17074_p2), %s13538_s17, 256  }
 0x8fb   : > { %20647 = vsyncadd (!%p17074_p2), %s13538_s17, 4294967040  ;;  %p22_p8 = scmp.ge.s32.totalorder %s20910_s7, 4   ;;  %s29187_s21 = smov %s20654_s22 }
 0x8fc   : > { %s29188_s22 = smov %s20658_s23  ;;  %s29189_s23 = smov %s20922_s14 }
 0x8fd   : > { %s29190_s24 = smov %s20910_s7  ;;  %24 = sbr.rel (!%p22_p8) target bundleno = 8 (0x8), region = 133 }
 0x904   :  { %13543 = vsyncpa [#allocation3], 1 }
 0x905   :  { %13545 = vsyncpa [#allocation3 + $0x1], 1 }
 0x906   :  { %13546 = vsyncpa [#allocation6], 1 }
 0x907   :  { %13547 = vsyncpa [#allocation9], 1 }
 0x908   :  { %13548 = vsyncpa [#allocation12], 1 }
 0x909   :  { %13549 = vsyncpa [#allocation4], 1 }
 0x90a   :  { %13551 = vsyncpa [#allocation4 + $0x1], 1 }

</bundles_post_ra>
